<compile_context>
chip_gen: v5e
topology: v5e:2x2
jax: 0.10.0
libtpu: 0.0.40
codegen_flags: <defaults>
</compile_context>

<pallas_src>
import functools

import jax
import jax.numpy as jnp
from jax import lax
from jax.experimental import pallas as pl
from jax.experimental.pallas import tpu as pltpu


def _round_up(x, m):
    return (x + m - 1) // m * m


def _vmem_capacity_bytes():
    """Generation-aware physical VMEM capacity (fallback: v7x's 64 MiB per TC)."""
    try:
        info = pltpu.get_tpu_info()
        cap = getattr(info, "vmem_capacity_bytes", None)
        if cap:
            return int(cap)
    except Exception:
        pass
    return 64 << 20


# -----------------------------------------------------------------------------
# Kernel 1: encoder LSTM + teacher-forced decoder LSTM (the recurrent part).
# Emits ReLU(decoder hidden states) as a lane-dense bf16 (Sy*Bp, Hp) slab.
# -----------------------------------------------------------------------------
def lstm_seq2seq_kernel(
    x_ref,      # (Sx*Bp, Ip)  bf16  encoder inputs, time-major rows flattened (t, b)
    y_ref,      # (Sy*Bp, Hp)  bf16  decoder inputs (teacher forcing)
    ewih_ref,   # (Ip, 4Hp)    bf16  encoder W_ih^T (gate order i,f,g,o; per-gate padded)
    ewhh_ref,   # (Hp, 4Hp)    f32   encoder W_hh^T
    eb_ref,     # (1, 4Hp)     f32   encoder bias_ih + bias_hh
    dwih_ref,   # (Hp, 4Hp)    bf16  decoder W_ih^T
    dwhh_ref,   # (Hp, 4Hp)    f32   decoder W_hh^T
    db_ref,     # (1, 4Hp)     f32   decoder bias_ih + bias_hh
    h_out_ref,  # (Sy*Bp, Hp)  bf16  ReLU(decoder hidden states), time-major flattened
    gx_ref,     # scratch (Sx*Bp, 4Hp) bf16  precomputed encoder input gates
    gy_ref,     # scratch (Sy*Bp, 4Hp) bf16  precomputed decoder input gates
    *,
    Bp: int,
):
    Hp = ewhh_ref.shape[0]
    Sx = x_ref.shape[0] // Bp
    Sy = y_ref.shape[0] // Bp

    # --- Hoisted non-recurrent input projections: two big bf16 MXU matmuls, bias folded,
    # --- stored as bf16 gate slabs (halves the dominant VMEM scratch).
    gx_ref[...] = (
        jnp.dot(x_ref[...], ewih_ref[...], preferred_element_type=jnp.float32)
        + eb_ref[...]
    ).astype(jnp.bfloat16)
    gy_ref[...] = (
        jnp.dot(y_ref[...], dwih_ref[...], preferred_element_type=jnp.float32)
        + db_ref[...]
    ).astype(jnp.bfloat16)

    ewhh = ewhh_ref[...]
    dwhh = dwhh_ref[...]

    def cell(g_in, h, c, whh):
        # PyTorch-convention LSTM cell; input projection already in g_in (f32 math).
        gates = g_in + jnp.dot(h, whh, preferred_element_type=jnp.float32)
        i = jax.nn.sigmoid(gates[:, 0 * Hp:1 * Hp])   # lane-aligned gate slices
        f = jax.nn.sigmoid(gates[:, 1 * Hp:2 * Hp])
        g = jnp.tanh(gates[:, 2 * Hp:3 * Hp])
        o = jax.nn.sigmoid(gates[:, 3 * Hp:4 * Hp])
        c_new = f * c + i * g
        h_new = o * jnp.tanh(c_new)
        return h_new, c_new

    h0 = jnp.zeros((Bp, Hp), jnp.float32)
    c0 = jnp.zeros((Bp, Hp), jnp.float32)

    # --- encoder recurrence (only the serial h @ W_hh matmul remains inside) ---
    def enc_body(t, carry):
        h, c = carry
        off = pl.multiple_of(t * Bp, Bp)
        g_t = gx_ref[pl.ds(off, Bp), :].astype(jnp.float32)
        return cell(g_t, h, c, ewhh)

    h, c = lax.fori_loop(0, Sx, enc_body, (h0, c0), unroll=min(Sx, 8))

    # --- decoder recurrence; ReLU(h_t) stored (bf16), Linear projection deferred ---
    def dec_body(t, carry):
        h, c = carry
        off = pl.multiple_of(t * Bp, Bp)
        g_t = gy_ref[pl.ds(off, Bp), :].astype(jnp.float32)
        h_new, c_new = cell(g_t, h, c, dwhh)
        h_out_ref[pl.ds(off, Bp), :] = jnp.maximum(h_new, 0.0).astype(jnp.bfloat16)
        return h_new, c_new

    lax.fori_loop(0, Sy, dec_body, (h, c), unroll=min(Sy, 8))


# -----------------------------------------------------------------------------
# Kernel 2: big batched projection relu_h @ W_lin + b, M and D tiled on a parallel grid.
# -----------------------------------------------------------------------------
def proj_kernel(a_ref, w_ref, b_ref, o_ref):
    o_ref[...] = (
        jnp.dot(a_ref[...], w_ref[...], preferred_element_type=jnp.float32)
        + b_ref[...]
    )


# -----------------------------------------------------------------------------
# Padding helpers (per-gate lane padding for LSTM weights).
# -----------------------------------------------------------------------------
def _pad_lstm_w(w, H, Hp, in_pad):
    """(in, 4H) -> (in_pad, 4Hp) with each gate block zero-padded from H to Hp."""
    gates = jnp.split(w, 4, axis=1)
    gates = [jnp.pad(g, ((0, 0), (0, Hp - H))) for g in gates]
    w4 = jnp.concatenate(gates, axis=1)
    return jnp.pad(w4, ((0, in_pad - w.shape[0]), (0, 0)))


def _pad_lstm_b(b, H, Hp):
    """(1, 4H) -> (1, 4Hp) with per-gate zero padding."""
    gates = jnp.split(b, 4, axis=1)
    gates = [jnp.pad(g, ((0, 0), (0, Hp - H))) for g in gates]
    return jnp.concatenate(gates, axis=1)


# -----------------------------------------------------------------------------
# Wrapper: embedding glue + padding + two pallas_calls.
# -----------------------------------------------------------------------------
def seq2seq_forward(params, x_tok, y_tok):
    """Teacher-forcing forward. Returns (B, Sy, dictLen) logits (PyTorch `out`)."""
    EN, ZH = params["EN"], params["ZH"]
    B, Sx = x_tok.shape
    Sy = y_tok.shape[1]
    I = EN.shape[1]
    H = params["enc_whh"].shape[0]
    D = params["lin_w"].shape[1]

    # Batch padded to 16 so dynamic sublane slices of the bf16 slabs stay tile-aligned;
    # feature dims padded to the 128 lane width.
    Bp = _round_up(B, 16)
    Ip = _round_up(I, 128)
    Hp = _round_up(H, 128)
    Dp = _round_up(D, 128)

    # Embedding lookups (plain-JAX glue), time-major, padded, flattened to (S*Bp, feat),
    # cast to bf16 (MXU operands only; accumulation and recurrence stay f32).
    x_emb = jnp.transpose(jnp.take(EN, x_tok, axis=0).astype(jnp.float32), (1, 0, 2))
    y_emb = jnp.transpose(jnp.take(ZH, y_tok, axis=0).astype(jnp.float32), (1, 0, 2))
    x2 = jnp.pad(x_emb, ((0, 0), (0, Bp - B), (0, Ip - I))
                 ).reshape(Sx * Bp, Ip).astype(jnp.bfloat16)
    y2 = jnp.pad(y_emb, ((0, 0), (0, Bp - B), (0, Hp - H))
                 ).reshape(Sy * Bp, Hp).astype(jnp.bfloat16)

    ewih = _pad_lstm_w(params["enc_wih"], H, Hp, Ip).astype(jnp.bfloat16)
    ewhh = _pad_lstm_w(params["enc_whh"], H, Hp, Hp)           # f32 (serial recurrence)
    eb = _pad_lstm_b(params["enc_b"], H, Hp)
    dwih = _pad_lstm_w(params["dec_wih"], H, Hp, Hp).astype(jnp.bfloat16)
    dwhh = _pad_lstm_w(params["dec_whh"], H, Hp, Hp)           # f32 (serial recurrence)
    db = _pad_lstm_b(params["dec_b"], H, Hp)
    lw = jnp.pad(params["lin_w"], ((0, Hp - H), (0, Dp - D))).astype(jnp.bfloat16)
    lb = jnp.pad(params["lin_b"], ((0, 0), (0, Dp - D)))

    cap = _vmem_capacity_bytes()

    # --- Kernel 1: recurrent LSTMs -> bf16 ReLU(decoder hidden states) slab ---
    bf, f4 = 2, 4
    vmem_need = (
        bf * (x2.size + y2.size + ewih.size + dwih.size)     # bf16 inputs
        + f4 * (ewhh.size + dwhh.size + eb.size + db.size)    # f32 recurrent weights
        + bf * (Sy * Bp * Hp)                                 # bf16 output slab
        + bf * ((Sx + Sy) * Bp * 4 * Hp)                      # bf16 gate-slab scratch
    )
    # Grid-less kernel -> nothing double-buffered; cap at physical capacity minus headroom.
    vmem_limit1 = int(min(max(vmem_need + (8 << 20), 16 << 20), cap - (8 << 20)))

    vmem = pl.BlockSpec(memory_space=pltpu.MemorySpace.VMEM)
    h_relu = pl.pallas_call(
        functools.partial(lstm_seq2seq_kernel, Bp=Bp),
        out_shape=jax.ShapeDtypeStruct((Sy * Bp, Hp), jnp.bfloat16),
        in_specs=[vmem] * 8,
        out_specs=vmem,
        scratch_shapes=[
            pltpu.VMEM((Sx * Bp, 4 * Hp), jnp.bfloat16),
            pltpu.VMEM((Sy * Bp, 4 * Hp), jnp.bfloat16),
        ],
        compiler_params=pltpu.CompilerParams(vmem_limit_bytes=vmem_limit1),
    )(x2, y2, ewih, ewhh, eb, dwih, dwhh, db)

    # --- Kernel 2: lane-dense bulk projection, (M, D) tiled on a 2-D "parallel" grid ---
    M = Sy * Bp
    if M <= 512:
        tm = M
    else:
        tm = next(c for c in (512, 256, 128, 64, 32, 16) if M % c == 0)

    budget2 = max(cap - (16 << 20), cap // 2)
    tn = 128
    for cand in (1024, 512, 256, 128):
        if Dp % cand == 0:
            est = (2 * tm * Hp * 2 + 3 * Hp * cand * 2
                   + 2 * cand * 4 + 2 * tm * cand * 4)
            if est <= budget2 or cand == 128:
                tn = cand
                break

    n_i, n_j = M // tm, Dp // tn
    w_buffers = 3 if n_j >= 3 else 2
    if w_buffers == 3:
        # Deeper buffering on the streamed W_lin blocks hides weight-DMA latency.
        w_spec = pl.BlockSpec((Hp, tn), lambda i, j: (0, j),
                              pipeline_mode=pl.Buffered(3))
    else:
        w_spec = pl.BlockSpec((Hp, tn), lambda i, j: (0, j))

    k2_bytes = (2 * tm * Hp * 2 + w_buffers * Hp * tn * 2
                + 2 * tn * 4 + 2 * tm * tn * 4)
    vmem_limit2 = int(min(max(k2_bytes + (8 << 20), 16 << 20), cap - (8 << 20)))

    logits2 = pl.pallas_call(
        proj_kernel,
        out_shape=jax.ShapeDtypeStruct((M, Dp), jnp.float32),
        grid_spec=pltpu.PrefetchScalarGridSpec(
            num_scalar_prefetch=0,
            grid=(n_i, n_j),
            in_specs=[
                pl.BlockSpec((tm, Hp), lambda i, j: (i, 0)),
                w_spec,
                pl.BlockSpec((1, tn), lambda i, j: (0, j)),
            ],
            out_specs=pl.BlockSpec((tm, tn), lambda i, j: (i, j)),
        ),
        compiler_params=pltpu.CompilerParams(
            dimension_semantics=("parallel", "parallel"),
            vmem_limit_bytes=vmem_limit2,
        ),
    )(h_relu, lw, lb)

    # Back to PyTorch's (batch, tgt_len, dictLen), dropping padding.
    out = logits2.reshape(Sy, Bp, Dp)[:, :B, :D]
    return jnp.transpose(out, (1, 0, 2))


# -----------------------------------------------------------------------------
# Pure-JAX f32 reference (unpadded) for correctness checking.
# -----------------------------------------------------------------------------
def _lstm_step_ref(x_t, h, c, w_ih, w_hh, b, H):
    gates = x_t @ w_ih + h @ w_hh + b
    i = jax.nn.sigmoid(gates[:, 0 * H:1 * H])
    f = jax.nn.sigmoid(gates[:, 1 * H:2 * H])
    g = jnp.tanh(gates[:, 2 * H:3 * H])
    o = jax.nn.sigmoid(gates[:, 3 * H:4 * H])
    c_new = f * c + i * g
    return o * jnp.tanh(c_new), c_new


def seq2seq_reference(params, x_tok, y_tok):
    EN, ZH = params["EN"], params["ZH"]
    H = params["enc_whh"].shape[0]
    x_emb = jnp.transpose(jnp.take(EN, x_tok, axis=0).astype(jnp.float32), (1, 0, 2))
    y_emb = jnp.transpose(jnp.take(ZH, y_tok, axis=0).astype(jnp.float32), (1, 0, 2))
    B = x_emb.shape[1]

    h = jnp.zeros((B, H), jnp.float32)
    c = jnp.zeros((B, H), jnp.float32)

    def enc_step(cr, xt):
        h, c = _lstm_step_ref(xt, cr[0], cr[1],
                              params["enc_wih"], params["enc_whh"], params["enc_b"], H)
        return (h, c), h

    (h, c), _ = lax.scan(enc_step, (h, c), x_emb)

    def dec_step(cr, yt):
        h, c = _lstm_step_ref(yt, cr[0], cr[1],
                              params["dec_wih"], params["dec_whh"], params["dec_b"], H)
        logits = jnp.maximum(h, 0.0) @ params["lin_w"] + params["lin_b"]
        return (h, c), logits

    _, logits_tm = lax.scan(dec_step, (h, c), y_emb)   # (Sy, B, D)
    return jnp.transpose(logits_tm, (1, 0, 2))


# -----------------------------------------------------------------------------
# Deterministic synthetic parameters (shapes match the PyTorch module).
# -----------------------------------------------------------------------------
def init_params(key, vocab_en, vocab_zh, input_size, hidden_size, dict_len):
    ks = jax.random.split(key, 12)
    s = 1.0 / jnp.sqrt(hidden_size)
    u = lambda k, shape, sc: jax.random.uniform(k, shape, jnp.float32, -sc, sc)
    enc_wih = u(ks[0], (input_size, 4 * hidden_size), s)
    enc_whh = u(ks[1], (hidden_size, 4 * hidden_size), s)
    enc_b = u(ks[2], (1, 4 * hidden_size), s) + u(ks[3], (1, 4 * hidden_size), s)
    dec_wih = u(ks[4], (hidden_size, 4 * hidden_size), s)
    dec_whh = u(ks[5], (hidden_size, 4 * hidden_size), s)
    dec_b = u(ks[6], (1, 4 * hidden_size), s) + u(ks[7], (1, 4 * hidden_size), s)
    std = jnp.sqrt(2.0 / (hidden_size + dict_len))          # xavier_normal_
    lin_w = jax.random.normal(ks[8], (hidden_size, dict_len), jnp.float32) * std
    lin_b = u(ks[9], (1, dict_len), 1.0 / jnp.sqrt(hidden_size))
    EN = jax.random.normal(ks[10], (vocab_en, input_size), jnp.float32) * 0.1
    ZH = jax.random.normal(ks[11], (vocab_zh, hidden_size), jnp.float32) * 0.1
    return dict(enc_wih=enc_wih, enc_whh=enc_whh, enc_b=enc_b,
                dec_wih=dec_wih, dec_whh=dec_whh, dec_b=dec_b,
                lin_w=lin_w, lin_b=lin_b, EN=EN, ZH=ZH)


if __name__ == "__main__":
    # numLayers=1 (required for the decoder to accept the encoder state), B=2
    B, Sx, Sy = 2, 8, 6
    input_size, hidden_size, dict_len = 16, 32, 64
    vocab_en, vocab_zh = 50, 40

    key = jax.random.PRNGKey(0)
    kp, kx, ky = jax.random.split(key, 3)
    params = init_params(kp, vocab_en, vocab_zh, input_size, hidden_size, dict_len)

    x_tok = jax.random.randint(kx, (B, Sx), 0, vocab_en, dtype=jnp.int32)
    y_tok = jax.random.randint(ky, (B, Sy), 0, vocab_zh, dtype=jnp.int32)

    out = jax.jit(functools.partial(seq2seq_forward, params))(x_tok, y_tok)
    out = jax.block_until_ready(out)
    assert out.shape == (B, Sy, dict_len), out.shape

    ref = jax.block_until_ready(seq2seq_reference(params, x_tok, y_tok))
    # Tolerance relaxed vs the all-f32 version: bf16 MXU operands / bf16 gate & hidden slabs.
    assert jnp.allclose(out, ref, atol=6e-2, rtol=6e-2), "kernel/reference mismatch"

    print("KERNEL_OK")
</pallas_src>

<mosaic_0001>
module attributes {stable_mosaic.version = 11 : i64} {
  func.func @proj_kernel(%arg0: i32, %arg1: i32, %arg2: memref<96x128xbf16, #tpu.memory_space<vmem>>, %arg3: memref<128x128xbf16, #tpu.memory_space<vmem>>, %arg4: memref<1x128xf32, #tpu.memory_space<vmem>>, %arg5: memref<96x128xf32, #tpu.memory_space<vmem>>) attributes {dimension_semantics = [#tpu.dimension_semantics<parallel>, #tpu.dimension_semantics<parallel>], iteration_bounds = array<i64: 1, 1>, scalar_prefetch = 0 : i64, scratch_operands = 0 : i64, tpu.core_type = #tpu.core_type<tc>, window_params = [{transform_indices = @transform_0, window_bounds = array<i64: 96, 128>}, {transform_indices = @transform_1, window_bounds = array<i64: 128, 128>}, {transform_indices = @transform_2, window_bounds = array<i64: 1, 128>}, {transform_indices = @transform_3, window_bounds = array<i64: 96, 128>}]} {
    %c0 = arith.constant 0 : index
    %c0_0 = arith.constant 0 : index
    %0 = vector.load %arg2[%c0, %c0_0] : memref<96x128xbf16, #tpu.memory_space<vmem>>, vector<96x128xbf16>
    %c0_1 = arith.constant 0 : index
    %c0_2 = arith.constant 0 : index
    %1 = vector.load %arg3[%c0_1, %c0_2] : memref<128x128xbf16, #tpu.memory_space<vmem>>, vector<128x128xbf16>
    %cst = arith.constant dense<0.000000e+00> : vector<96x128xf32>
    %2 = tpu.matmul %0, %1, %cst {dimension_numbers = #tpu.dot_dimension_numbers<[1], [0], [0], [1], [0, 0, 1, 1], [], []>} : vector<96x128xbf16>, vector<128x128xbf16>, vector<96x128xf32> -> vector<96x128xf32>
    %c0_3 = arith.constant 0 : index
    %c0_4 = arith.constant 0 : index
    %3 = vector.load %arg4[%c0_3, %c0_4] : memref<1x128xf32, #tpu.memory_space<vmem>>, vector<1x128xf32>
    %4 = vector.broadcast %3 : vector<1x128xf32> to vector<96x128xf32>
    %5 = arith.addf %2, %4 : vector<96x128xf32>
    %c0_5 = arith.constant 0 : index
    %c0_6 = arith.constant 0 : index
    %6 = vector.load %arg5[%c0_5, %c0_6] : memref<96x128xf32, #tpu.memory_space<vmem>>, vector<96x128xf32>
    tpu.vector_store %arg5[%c0_5, %c0_6], %5 {strides = array<i32>} : memref<96x128xf32, #tpu.memory_space<vmem>>, vector<96x128xf32>,
    return
  }
  func.func @transform_0(%arg0: i32, %arg1: i32) -> (i32, i32) {
    %c0_i32 = arith.constant 0 : i32
    %c0_i32_0 = arith.constant 0 : i32
    return %arg0, %c0_i32 : i32, i32
  }
  func.func @transform_1(%arg0: i32, %arg1: i32) -> (i32, i32) {
    %c0_i32 = arith.constant 0 : i32
    %c0_i32_0 = arith.constant 0 : i32
    return %c0_i32, %arg1 : i32, i32
  }
  func.func @transform_2(%arg0: i32, %arg1: i32) -> (i32, i32) {
    %c0_i32 = arith.constant 0 : i32
    %c0_i32_0 = arith.constant 0 : i32
    return %c0_i32, %arg1 : i32, i32
  }
  func.func @transform_3(%arg0: i32, %arg1: i32) -> (i32, i32) {
    %c0_i32 = arith.constant 0 : i32
    return %arg0, %arg1 : i32, i32
  }
}

module attributes {stable_mosaic.version = 11 : i64} {
  func.func @lstm_seq2seq_kernel(%arg0: memref<128x128xbf16, #tpu.memory_space<vmem>>, %arg1: memref<96x128xbf16, #tpu.memory_space<vmem>>, %arg2: memref<128x512xbf16, #tpu.memory_space<vmem>>, %arg3: memref<128x512xf32, #tpu.memory_space<vmem>>, %arg4: memref<1x512xf32, #tpu.memory_space<vmem>>, %arg5: memref<128x512xbf16, #tpu.memory_space<vmem>>, %arg6: memref<128x512xf32, #tpu.memory_space<vmem>>, %arg7: memref<1x512xf32, #tpu.memory_space<vmem>>, %arg8: memref<96x128xbf16, #tpu.memory_space<vmem>>, %arg9: memref<128x512xbf16, #tpu.memory_space<vmem>>, %arg10: memref<96x512xbf16, #tpu.memory_space<vmem>>) attributes {dimension_semantics = [], scalar_prefetch = 0 : i64, scratch_operands = 2 : i64, tpu.core_type = #tpu.core_type<tc>} {
    %c0 = arith.constant 0 : index
    %c0_0 = arith.constant 0 : index
    %0 = vector.load %arg0[%c0, %c0_0] : memref<128x128xbf16, #tpu.memory_space<vmem>>, vector<128x128xbf16>
    %c0_1 = arith.constant 0 : index
    %c0_2 = arith.constant 0 : index
    %1 = vector.load %arg2[%c0_1, %c0_2] : memref<128x512xbf16, #tpu.memory_space<vmem>>, vector<128x512xbf16>
    %cst = arith.constant dense<0.000000e+00> : vector<128x512xf32>
    %2 = tpu.matmul %0, %1, %cst {dimension_numbers = #tpu.dot_dimension_numbers<[1], [0], [0], [1], [0, 0, 1, 1], [], []>} : vector<128x128xbf16>, vector<128x512xbf16>, vector<128x512xf32> -> vector<128x512xf32>
    %c0_3 = arith.constant 0 : index
    %c0_4 = arith.constant 0 : index
    %3 = vector.load %arg4[%c0_3, %c0_4] : memref<1x512xf32, #tpu.memory_space<vmem>>, vector<1x512xf32>
    %4 = vector.broadcast %3 : vector<1x512xf32> to vector<128x512xf32>
    %5 = arith.addf %2, %4 : vector<128x512xf32>
    %6 = arith.truncf %5 : vector<128x512xf32> to vector<128x512xbf16>
    %c0_5 = arith.constant 0 : index
    %c0_6 = arith.constant 0 : index
    %7 = vector.load %arg9[%c0_5, %c0_6] : memref<128x512xbf16, #tpu.memory_space<vmem>>, vector<128x512xbf16>
    tpu.vector_store %arg9[%c0_5, %c0_6], %6 {strides = array<i32>} : memref<128x512xbf16, #tpu.memory_space<vmem>>, vector<128x512xbf16>,
    %c0_7 = arith.constant 0 : index
    %c0_8 = arith.constant 0 : index
    %8 = vector.load %arg1[%c0_7, %c0_8] : memref<96x128xbf16, #tpu.memory_space<vmem>>, vector<96x128xbf16>
    %c0_9 = arith.constant 0 : index
    %c0_10 = arith.constant 0 : index
    %9 = vector.load %arg5[%c0_9, %c0_10] : memref<128x512xbf16, #tpu.memory_space<vmem>>, vector<128x512xbf16>
    %cst_11 = arith.constant dense<0.000000e+00> : vector<96x512xf32>
    %10 = tpu.matmul %8, %9, %cst_11 {dimension_numbers = #tpu.dot_dimension_numbers<[1], [0], [0], [1], [0, 0, 1, 1], [], []>} : vector<96x128xbf16>, vector<128x512xbf16>, vector<96x512xf32> -> vector<96x512xf32>
    %c0_12 = arith.constant 0 : index
    %c0_13 = arith.constant 0 : index
    %11 = vector.load %arg7[%c0_12, %c0_13] : memref<1x512xf32, #tpu.memory_space<vmem>>, vector<1x512xf32>
    %12 = vector.broadcast %11 : vector<1x512xf32> to vector<96x512xf32>
    %13 = arith.addf %10, %12 : vector<96x512xf32>
    %14 = arith.truncf %13 : vector<96x512xf32> to vector<96x512xbf16>
    %c0_14 = arith.constant 0 : index
    %c0_15 = arith.constant 0 : index
    %15 = vector.load %arg10[%c0_14, %c0_15] : memref<96x512xbf16, #tpu.memory_space<vmem>>, vector<96x512xbf16>
    tpu.vector_store %arg10[%c0_14, %c0_15], %14 {strides = array<i32>} : memref<96x512xbf16, #tpu.memory_space<vmem>>, vector<96x512xbf16>,
    %c0_16 = arith.constant 0 : index
    %c0_17 = arith.constant 0 : index
    %16 = vector.load %arg3[%c0_16, %c0_17] : memref<128x512xf32, #tpu.memory_space<vmem>>, vector<128x512xf32>
    %c0_18 = arith.constant 0 : index
    %c0_19 = arith.constant 0 : index
    %17 = vector.load %arg6[%c0_18, %c0_19] : memref<128x512xf32, #tpu.memory_space<vmem>>, vector<128x512xf32>
    %cst_20 = arith.constant 0.000000e+00 : f32
    %18 = vector.broadcast %cst_20 : f32 to vector<16x128xf32>
    %cst_21 = arith.constant 0.000000e+00 : f32
    %19 = vector.broadcast %cst_21 : f32 to vector<16x128xf32>
    %c0_i32 = arith.constant 0 : i32
    %c16_i32 = arith.constant 16 : i32
    %20 = arith.muli %c0_i32, %c16_i32 : i32
    %21 = tpu.assume_multiple %20, 16 : i32
    %22 = arith.index_cast %21 : i32 to index
    %c0_22 = arith.constant 0 : index
    %23 = vector.load %arg9[%22, %c0_22] : memref<128x512xbf16, #tpu.memory_space<vmem>>, vector<16x512xbf16>
    %24 = arith.extf %23 : vector<16x512xbf16> to vector<16x512xf32>
    %cst_23 = arith.constant dense<0.000000e+00> : vector<16x512xf32>
    %25 = tpu.matmul %18, %16, %cst_23 {dimension_numbers = #tpu.dot_dimension_numbers<[1], [0], [0], [1], [0, 0, 1, 1], [], []>} : vector<16x128xf32>, vector<128x512xf32>, vector<16x512xf32> -> vector<16x512xf32>
    %26 = arith.addf %24, %25 : vector<16x512xf32>
    %27 = vector.extract_strided_slice %26 {offsets = [0, 0], sizes = [16, 128], strides = [1, 1]} : vector<16x512xf32> to vector<16x128xf32>
    %28 = arith.negf %27 : vector<16x128xf32>
    %29 = math.exp %28 : vector<16x128xf32>
    %cst_24 = arith.constant 1.000000e+00 : f32
    %30 = vector.broadcast %cst_24 : f32 to vector<16x128xf32>
    %31 = arith.addf %30, %29 : vector<16x128xf32>
    %32 = arith.divf %30, %31 : vector<16x128xf32>
    %33 = vector.extract_strided_slice %26 {offsets = [0, 128], sizes = [16, 128], strides = [1, 1]} : vector<16x512xf32> to vector<16x128xf32>
    %34 = arith.negf %33 : vector<16x128xf32>
    %35 = math.exp %34 : vector<16x128xf32>
    %cst_25 = arith.constant 1.000000e+00 : f32
    %36 = vector.broadcast %cst_25 : f32 to vector<16x128xf32>
    %37 = arith.addf %36, %35 : vector<16x128xf32>
    %38 = arith.divf %36, %37 : vector<16x128xf32>
    %39 = vector.extract_strided_slice %26 {offsets = [0, 256], sizes = [16, 128], strides = [1, 1]} : vector<16x512xf32> to vector<16x128xf32>
    %40 = math.tanh %39 : vector<16x128xf32>
    %41 = vector.extract_strided_slice %26 {offsets = [0, 384], sizes = [16, 128], strides = [1, 1]} : vector<16x512xf32> to vector<16x128xf32>
    %42 = arith.negf %41 : vector<16x128xf32>
    %43 = math.exp %42 : vector<16x128xf32>
    %cst_26 = arith.constant 1.000000e+00 : f32
    %44 = vector.broadcast %cst_26 : f32 to vector<16x128xf32>
    %45 = arith.addf %44, %43 : vector<16x128xf32>
    %46 = arith.divf %44, %45 : vector<16x128xf32>
    %47 = arith.mulf %38, %19 : vector<16x128xf32>
    %48 = arith.mulf %32, %40 : vector<16x128xf32>
    %49 = arith.addf %47, %48 : vector<16x128xf32>
    %50 = math.tanh %49 : vector<16x128xf32>
    %51 = arith.mulf %46, %50 : vector<16x128xf32>
    %c1_i32 = arith.constant 1 : i32
    %c16_i32_27 = arith.constant 16 : i32
    %52 = arith.muli %c1_i32, %c16_i32_27 : i32
    %53 = tpu.assume_multiple %52, 16 : i32
    %54 = arith.index_cast %53 : i32 to index
    %c0_28 = arith.constant 0 : index
    %55 = vector.load %arg9[%54, %c0_28] : memref<128x512xbf16, #tpu.memory_space<vmem>>, vector<16x512xbf16>
    %56 = arith.extf %55 : vector<16x512xbf16> to vector<16x512xf32>
    %cst_29 = arith.constant dense<0.000000e+00> : vector<16x512xf32>
    %57 = tpu.matmul %51, %16, %cst_29 {dimension_numbers = #tpu.dot_dimension_numbers<[1], [0], [0], [1], [0, 0, 1, 1], [], []>} : vector<16x128xf32>, vector<128x512xf32>, vector<16x512xf32> -> vector<16x512xf32>
    %58 = arith.addf %56, %57 : vector<16x512xf32>
    %59 = vector.extract_strided_slice %58 {offsets = [0, 0], sizes = [16, 128], strides = [1, 1]} : vector<16x512xf32> to vector<16x128xf32>
    %60 = arith.negf %59 : vector<16x128xf32>
    %61 = math.exp %60 : vector<16x128xf32>
    %cst_30 = arith.constant 1.000000e+00 : f32
    %62 = vector.broadcast %cst_30 : f32 to vector<16x128xf32>
    %63 = arith.addf %62, %61 : vector<16x128xf32>
    %64 = arith.divf %62, %63 : vector<16x128xf32>
    %65 = vector.extract_strided_slice %58 {offsets = [0, 128], sizes = [16, 128], strides = [1, 1]} : vector<16x512xf32> to vector<16x128xf32>
    %66 = arith.negf %65 : vector<16x128xf32>
    %67 = math.exp %66 : vector<16x128xf32>
    %cst_31 = arith.constant 1.000000e+00 : f32
    %68 = vector.broadcast %cst_31 : f32 to vector<16x128xf32>
    %69 = arith.addf %68, %67 : vector<16x128xf32>
    %70 = arith.divf %68, %69 : vector<16x128xf32>
    %71 = vector.extract_strided_slice %58 {offsets = [0, 256], sizes = [16, 128], strides = [1, 1]} : vector<16x512xf32> to vector<16x128xf32>
    %72 = math.tanh %71 : vector<16x128xf32>
    %73 = vector.extract_strided_slice %58 {offsets = [0, 384], sizes = [16, 128], strides = [1, 1]} : vector<16x512xf32> to vector<16x128xf32>
    %74 = arith.negf %73 : vector<16x128xf32>
    %75 = math.exp %74 : vector<16x128xf32>
    %cst_32 = arith.constant 1.000000e+00 : f32
    %76 = vector.broadcast %cst_32 : f32 to vector<16x128xf32>
    %77 = arith.addf %76, %75 : vector<16x128xf32>
    %78 = arith.divf %76, %77 : vector<16x128xf32>
    %79 = arith.mulf %70, %49 : vector<16x128xf32>
    %80 = arith.mulf %64, %72 : vector<16x128xf32>
    %81 = arith.addf %79, %80 : vector<16x128xf32>
    %82 = math.tanh %81 : vector<16x128xf32>
    %83 = arith.mulf %78, %82 : vector<16x128xf32>
    %c2_i32 = arith.constant 2 : i32
    %c16_i32_33 = arith.constant 16 : i32
    %84 = arith.muli %c2_i32, %c16_i32_33 : i32
    %85 = tpu.assume_multiple %84, 16 : i32
    %86 = arith.index_cast %85 : i32 to index
    %c0_34 = arith.constant 0 : index
    %87 = vector.load %arg9[%86, %c0_34] : memref<128x512xbf16, #tpu.memory_space<vmem>>, vector<16x512xbf16>
    %88 = arith.extf %87 : vector<16x512xbf16> to vector<16x512xf32>
    %cst_35 = arith.constant dense<0.000000e+00> : vector<16x512xf32>
    %89 = tpu.matmul %83, %16, %cst_35 {dimension_numbers = #tpu.dot_dimension_numbers<[1], [0], [0], [1], [0, 0, 1, 1], [], []>} : vector<16x128xf32>, vector<128x512xf32>, vector<16x512xf32> -> vector<16x512xf32>
    %90 = arith.addf %88, %89 : vector<16x512xf32>
    %91 = vector.extract_strided_slice %90 {offsets = [0, 0], sizes = [16, 128], strides = [1, 1]} : vector<16x512xf32> to vector<16x128xf32>
    %92 = arith.negf %91 : vector<16x128xf32>
    %93 = math.exp %92 : vector<16x128xf32>
    %cst_36 = arith.constant 1.000000e+00 : f32
    %94 = vector.broadcast %cst_36 : f32 to vector<16x128xf32>
    %95 = arith.addf %94, %93 : vector<16x128xf32>
    %96 = arith.divf %94, %95 : vector<16x128xf32>
    %97 = vector.extract_strided_slice %90 {offsets = [0, 128], sizes = [16, 128], strides = [1, 1]} : vector<16x512xf32> to vector<16x128xf32>
    %98 = arith.negf %97 : vector<16x128xf32>
    %99 = math.exp %98 : vector<16x128xf32>
    %cst_37 = arith.constant 1.000000e+00 : f32
    %100 = vector.broadcast %cst_37 : f32 to vector<16x128xf32>
    %101 = arith.addf %100, %99 : vector<16x128xf32>
    %102 = arith.divf %100, %101 : vector<16x128xf32>
    %103 = vector.extract_strided_slice %90 {offsets = [0, 256], sizes = [16, 128], strides = [1, 1]} : vector<16x512xf32> to vector<16x128xf32>
    %104 = math.tanh %103 : vector<16x128xf32>
    %105 = vector.extract_strided_slice %90 {offsets = [0, 384], sizes = [16, 128], strides = [1, 1]} : vector<16x512xf32> to vector<16x128xf32>
    %106 = arith.negf %105 : vector<16x128xf32>
    %107 = math.exp %106 : vector<16x128xf32>
    %cst_38 = arith.constant 1.000000e+00 : f32
    %108 = vector.broadcast %cst_38 : f32 to vector<16x128xf32>
    %109 = arith.addf %108, %107 : vector<16x128xf32>
    %110 = arith.divf %108, %109 : vector<16x128xf32>
    %111 = arith.mulf %102, %81 : vector<16x128xf32>
    %112 = arith.mulf %96, %104 : vector<16x128xf32>
    %113 = arith.addf %111, %112 : vector<16x128xf32>
    %114 = math.tanh %113 : vector<16x128xf32>
    %115 = arith.mulf %110, %114 : vector<16x128xf32>
    %c3_i32 = arith.constant 3 : i32
    %c16_i32_39 = arith.constant 16 : i32
    %116 = arith.muli %c3_i32, %c16_i32_39 : i32
    %117 = tpu.assume_multiple %116, 16 : i32
    %118 = arith.index_cast %117 : i32 to index
    %c0_40 = arith.constant 0 : index
    %119 = vector.load %arg9[%118, %c0_40] : memref<128x512xbf16, #tpu.memory_space<vmem>>, vector<16x512xbf16>
    %120 = arith.extf %119 : vector<16x512xbf16> to vector<16x512xf32>
    %cst_41 = arith.constant dense<0.000000e+00> : vector<16x512xf32>
    %121 = tpu.matmul %115, %16, %cst_41 {dimension_numbers = #tpu.dot_dimension_numbers<[1], [0], [0], [1], [0, 0, 1, 1], [], []>} : vector<16x128xf32>, vector<128x512xf32>, vector<16x512xf32> -> vector<16x512xf32>
    %122 = arith.addf %120, %121 : vector<16x512xf32>
    %123 = vector.extract_strided_slice %122 {offsets = [0, 0], sizes = [16, 128], strides = [1, 1]} : vector<16x512xf32> to vector<16x128xf32>
    %124 = arith.negf %123 : vector<16x128xf32>
    %125 = math.exp %124 : vector<16x128xf32>
    %cst_42 = arith.constant 1.000000e+00 : f32
    %126 = vector.broadcast %cst_42 : f32 to vector<16x128xf32>
    %127 = arith.addf %126, %125 : vector<16x128xf32>
    %128 = arith.divf %126, %127 : vector<16x128xf32>
    %129 = vector.extract_strided_slice %122 {offsets = [0, 128], sizes = [16, 128], strides = [1, 1]} : vector<16x512xf32> to vector<16x128xf32>
    %130 = arith.negf %129 : vector<16x128xf32>
    %131 = math.exp %130 : vector<16x128xf32>
    %cst_43 = arith.constant 1.000000e+00 : f32
    %132 = vector.broadcast %cst_43 : f32 to vector<16x128xf32>
    %133 = arith.addf %132, %131 : vector<16x128xf32>
    %134 = arith.divf %132, %133 : vector<16x128xf32>
    %135 = vector.extract_strided_slice %122 {offsets = [0, 256], sizes = [16, 128], strides = [1, 1]} : vector<16x512xf32> to vector<16x128xf32>
    %136 = math.tanh %135 : vector<16x128xf32>
    %137 = vector.extract_strided_slice %122 {offsets = [0, 384], sizes = [16, 128], strides = [1, 1]} : vector<16x512xf32> to vector<16x128xf32>
    %138 = arith.negf %137 : vector<16x128xf32>
    %139 = math.exp %138 : vector<16x128xf32>
    %cst_44 = arith.constant 1.000000e+00 : f32
    %140 = vector.broadcast %cst_44 : f32 to vector<16x128xf32>
    %141 = arith.addf %140, %139 : vector<16x128xf32>
    %142 = arith.divf %140, %141 : vector<16x128xf32>
    %143 = arith.mulf %134, %113 : vector<16x128xf32>
    %144 = arith.mulf %128, %136 : vector<16x128xf32>
    %145 = arith.addf %143, %144 : vector<16x128xf32>
    %146 = math.tanh %145 : vector<16x128xf32>
    %147 = arith.mulf %142, %146 : vector<16x128xf32>
    %c4_i32 = arith.constant 4 : i32
    %c16_i32_45 = arith.constant 16 : i32
    %148 = arith.muli %c4_i32, %c16_i32_45 : i32
    %149 = tpu.assume_multiple %148, 16 : i32
    %150 = arith.index_cast %149 : i32 to index
    %c0_46 = arith.constant 0 : index
    %151 = vector.load %arg9[%150, %c0_46] : memref<128x512xbf16, #tpu.memory_space<vmem>>, vector<16x512xbf16>
    %152 = arith.extf %151 : vector<16x512xbf16> to vector<16x512xf32>
    %cst_47 = arith.constant dense<0.000000e+00> : vector<16x512xf32>
    %153 = tpu.matmul %147, %16, %cst_47 {dimension_numbers = #tpu.dot_dimension_numbers<[1], [0], [0], [1], [0, 0, 1, 1], [], []>} : vector<16x128xf32>, vector<128x512xf32>, vector<16x512xf32> -> vector<16x512xf32>
    %154 = arith.addf %152, %153 : vector<16x512xf32>
    %155 = vector.extract_strided_slice %154 {offsets = [0, 0], sizes = [16, 128], strides = [1, 1]} : vector<16x512xf32> to vector<16x128xf32>
    %156 = arith.negf %155 : vector<16x128xf32>
    %157 = math.exp %156 : vector<16x128xf32>
    %cst_48 = arith.constant 1.000000e+00 : f32
    %158 = vector.broadcast %cst_48 : f32 to vector<16x128xf32>
    %159 = arith.addf %158, %157 : vector<16x128xf32>
    %160 = arith.divf %158, %159 : vector<16x128xf32>
    %161 = vector.extract_strided_slice %154 {offsets = [0, 128], sizes = [16, 128], strides = [1, 1]} : vector<16x512xf32> to vector<16x128xf32>
    %162 = arith.negf %161 : vector<16x128xf32>
    %163 = math.exp %162 : vector<16x128xf32>
    %cst_49 = arith.constant 1.000000e+00 : f32
    %164 = vector.broadcast %cst_49 : f32 to vector<16x128xf32>
    %165 = arith.addf %164, %163 : vector<16x128xf32>
    %166 = arith.divf %164, %165 : vector<16x128xf32>
    %167 = vector.extract_strided_slice %154 {offsets = [0, 256], sizes = [16, 128], strides = [1, 1]} : vector<16x512xf32> to vector<16x128xf32>
    %168 = math.tanh %167 : vector<16x128xf32>
    %169 = vector.extract_strided_slice %154 {offsets = [0, 384], sizes = [16, 128], strides = [1, 1]} : vector<16x512xf32> to vector<16x128xf32>
    %170 = arith.negf %169 : vector<16x128xf32>
    %171 = math.exp %170 : vector<16x128xf32>
    %cst_50 = arith.constant 1.000000e+00 : f32
    %172 = vector.broadcast %cst_50 : f32 to vector<16x128xf32>
    %173 = arith.addf %172, %171 : vector<16x128xf32>
    %174 = arith.divf %172, %173 : vector<16x128xf32>
    %175 = arith.mulf %166, %145 : vector<16x128xf32>
    %176 = arith.mulf %160, %168 : vector<16x128xf32>
    %177 = arith.addf %175, %176 : vector<16x128xf32>
    %178 = math.tanh %177 : vector<16x128xf32>
    %179 = arith.mulf %174, %178 : vector<16x128xf32>
    %c5_i32 = arith.constant 5 : i32
    %c16_i32_51 = arith.constant 16 : i32
    %180 = arith.muli %c5_i32, %c16_i32_51 : i32
    %181 = tpu.assume_multiple %180, 16 : i32
    %182 = arith.index_cast %181 : i32 to index
    %c0_52 = arith.constant 0 : index
    %183 = vector.load %arg9[%182, %c0_52] : memref<128x512xbf16, #tpu.memory_space<vmem>>, vector<16x512xbf16>
    %184 = arith.extf %183 : vector<16x512xbf16> to vector<16x512xf32>
    %cst_53 = arith.constant dense<0.000000e+00> : vector<16x512xf32>
    %185 = tpu.matmul %179, %16, %cst_53 {dimension_numbers = #tpu.dot_dimension_numbers<[1], [0], [0], [1], [0, 0, 1, 1], [], []>} : vector<16x128xf32>, vector<128x512xf32>, vector<16x512xf32> -> vector<16x512xf32>
    %186 = arith.addf %184, %185 : vector<16x512xf32>
    %187 = vector.extract_strided_slice %186 {offsets = [0, 0], sizes = [16, 128], strides = [1, 1]} : vector<16x512xf32> to vector<16x128xf32>
    %188 = arith.negf %187 : vector<16x128xf32>
    %189 = math.exp %188 : vector<16x128xf32>
    %cst_54 = arith.constant 1.000000e+00 : f32
    %190 = vector.broadcast %cst_54 : f32 to vector<16x128xf32>
    %191 = arith.addf %190, %189 : vector<16x128xf32>
    %192 = arith.divf %190, %191 : vector<16x128xf32>
    %193 = vector.extract_strided_slice %186 {offsets = [0, 128], sizes = [16, 128], strides = [1, 1]} : vector<16x512xf32> to vector<16x128xf32>
    %194 = arith.negf %193 : vector<16x128xf32>
    %195 = math.exp %194 : vector<16x128xf32>
    %cst_55 = arith.constant 1.000000e+00 : f32
    %196 = vector.broadcast %cst_55 : f32 to vector<16x128xf32>
    %197 = arith.addf %196, %195 : vector<16x128xf32>
    %198 = arith.divf %196, %197 : vector<16x128xf32>
    %199 = vector.extract_strided_slice %186 {offsets = [0, 256], sizes = [16, 128], strides = [1, 1]} : vector<16x512xf32> to vector<16x128xf32>
    %200 = math.tanh %199 : vector<16x128xf32>
    %201 = vector.extract_strided_slice %186 {offsets = [0, 384], sizes = [16, 128], strides = [1, 1]} : vector<16x512xf32> to vector<16x128xf32>
    %202 = arith.negf %201 : vector<16x128xf32>
    %203 = math.exp %202 : vector<16x128xf32>
    %cst_56 = arith.constant 1.000000e+00 : f32
    %204 = vector.broadcast %cst_56 : f32 to vector<16x128xf32>
    %205 = arith.addf %204, %203 : vector<16x128xf32>
    %206 = arith.divf %204, %205 : vector<16x128xf32>
    %207 = arith.mulf %198, %177 : vector<16x128xf32>
    %208 = arith.mulf %192, %200 : vector<16x128xf32>
    %209 = arith.addf %207, %208 : vector<16x128xf32>
    %210 = math.tanh %209 : vector<16x128xf32>
    %211 = arith.mulf %206, %210 : vector<16x128xf32>
    %c6_i32 = arith.constant 6 : i32
    %c16_i32_57 = arith.constant 16 : i32
    %212 = arith.muli %c6_i32, %c16_i32_57 : i32
    %213 = tpu.assume_multiple %212, 16 : i32
    %214 = arith.index_cast %213 : i32 to index
    %c0_58 = arith.constant 0 : index
    %215 = vector.load %arg9[%214, %c0_58] : memref<128x512xbf16, #tpu.memory_space<vmem>>, vector<16x512xbf16>
    %216 = arith.extf %215 : vector<16x512xbf16> to vector<16x512xf32>
    %cst_59 = arith.constant dense<0.000000e+00> : vector<16x512xf32>
    %217 = tpu.matmul %211, %16, %cst_59 {dimension_numbers = #tpu.dot_dimension_numbers<[1], [0], [0], [1], [0, 0, 1, 1], [], []>} : vector<16x128xf32>, vector<128x512xf32>, vector<16x512xf32> -> vector<16x512xf32>
    %218 = arith.addf %216, %217 : vector<16x512xf32>
    %219 = vector.extract_strided_slice %218 {offsets = [0, 0], sizes = [16, 128], strides = [1, 1]} : vector<16x512xf32> to vector<16x128xf32>
    %220 = arith.negf %219 : vector<16x128xf32>
    %221 = math.exp %220 : vector<16x128xf32>
    %cst_60 = arith.constant 1.000000e+00 : f32
    %222 = vector.broadcast %cst_60 : f32 to vector<16x128xf32>
    %223 = arith.addf %222, %221 : vector<16x128xf32>
    %224 = arith.divf %222, %223 : vector<16x128xf32>
    %225 = vector.extract_strided_slice %218 {offsets = [0, 128], sizes = [16, 128], strides = [1, 1]} : vector<16x512xf32> to vector<16x128xf32>
    %226 = arith.negf %225 : vector<16x128xf32>
    %227 = math.exp %226 : vector<16x128xf32>
    %cst_61 = arith.constant 1.000000e+00 : f32
    %228 = vector.broadcast %cst_61 : f32 to vector<16x128xf32>
    %229 = arith.addf %228, %227 : vector<16x128xf32>
    %230 = arith.divf %228, %229 : vector<16x128xf32>
    %231 = vector.extract_strided_slice %218 {offsets = [0, 256], sizes = [16, 128], strides = [1, 1]} : vector<16x512xf32> to vector<16x128xf32>
    %232 = math.tanh %231 : vector<16x128xf32>
    %233 = vector.extract_strided_slice %218 {offsets = [0, 384], sizes = [16, 128], strides = [1, 1]} : vector<16x512xf32> to vector<16x128xf32>
    %234 = arith.negf %233 : vector<16x128xf32>
    %235 = math.exp %234 : vector<16x128xf32>
    %cst_62 = arith.constant 1.000000e+00 : f32
    %236 = vector.broadcast %cst_62 : f32 to vector<16x128xf32>
    %237 = arith.addf %236, %235 : vector<16x128xf32>
    %238 = arith.divf %236, %237 : vector<16x128xf32>
    %239 = arith.mulf %230, %209 : vector<16x128xf32>
    %240 = arith.mulf %224, %232 : vector<16x128xf32>
    %241 = arith.addf %239, %240 : vector<16x128xf32>
    %242 = math.tanh %241 : vector<16x128xf32>
    %243 = arith.mulf %238, %242 : vector<16x128xf32>
    %c7_i32 = arith.constant 7 : i32
    %c16_i32_63 = arith.constant 16 : i32
    %244 = arith.muli %c7_i32, %c16_i32_63 : i32
    %245 = tpu.assume_multiple %244, 16 : i32
    %246 = arith.index_cast %245 : i32 to index
    %c0_64 = arith.constant 0 : index
    %247 = vector.load %arg9[%246, %c0_64] : memref<128x512xbf16, #tpu.memory_space<vmem>>, vector<16x512xbf16>
    %248 = arith.extf %247 : vector<16x512xbf16> to vector<16x512xf32>
    %cst_65 = arith.constant dense<0.000000e+00> : vector<16x512xf32>
    %249 = tpu.matmul %243, %16, %cst_65 {dimension_numbers = #tpu.dot_dimension_numbers<[1], [0], [0], [1], [0, 0, 1, 1], [], []>} : vector<16x128xf32>, vector<128x512xf32>, vector<16x512xf32> -> vector<16x512xf32>
    %250 = arith.addf %248, %249 : vector<16x512xf32>
    %251 = vector.extract_strided_slice %250 {offsets = [0, 0], sizes = [16, 128], strides = [1, 1]} : vector<16x512xf32> to vector<16x128xf32>
    %252 = arith.negf %251 : vector<16x128xf32>
    %253 = math.exp %252 : vector<16x128xf32>
    %cst_66 = arith.constant 1.000000e+00 : f32
    %254 = vector.broadcast %cst_66 : f32 to vector<16x128xf32>
    %255 = arith.addf %254, %253 : vector<16x128xf32>
    %256 = arith.divf %254, %255 : vector<16x128xf32>
    %257 = vector.extract_strided_slice %250 {offsets = [0, 128], sizes = [16, 128], strides = [1, 1]} : vector<16x512xf32> to vector<16x128xf32>
    %258 = arith.negf %257 : vector<16x128xf32>
    %259 = math.exp %258 : vector<16x128xf32>
    %cst_67 = arith.constant 1.000000e+00 : f32
    %260 = vector.broadcast %cst_67 : f32 to vector<16x128xf32>
    %261 = arith.addf %260, %259 : vector<16x128xf32>
    %262 = arith.divf %260, %261 : vector<16x128xf32>
    %263 = vector.extract_strided_slice %250 {offsets = [0, 256], sizes = [16, 128], strides = [1, 1]} : vector<16x512xf32> to vector<16x128xf32>
    %264 = math.tanh %263 : vector<16x128xf32>
    %265 = vector.extract_strided_slice %250 {offsets = [0, 384], sizes = [16, 128], strides = [1, 1]} : vector<16x512xf32> to vector<16x128xf32>
    %266 = arith.negf %265 : vector<16x128xf32>
    %267 = math.exp %266 : vector<16x128xf32>
    %cst_68 = arith.constant 1.000000e+00 : f32
    %268 = vector.broadcast %cst_68 : f32 to vector<16x128xf32>
    %269 = arith.addf %268, %267 : vector<16x128xf32>
    %270 = arith.divf %268, %269 : vector<16x128xf32>
    %271 = arith.mulf %262, %241 : vector<16x128xf32>
    %272 = arith.mulf %256, %264 : vector<16x128xf32>
    %273 = arith.addf %271, %272 : vector<16x128xf32>
    %274 = math.tanh %273 : vector<16x128xf32>
    %275 = arith.mulf %270, %274 : vector<16x128xf32>
    %c8_i32 = arith.constant 8 : i32
    %c0_i32_69 = arith.constant 0 : i32
    %c16_i32_70 = arith.constant 16 : i32
    %276 = arith.muli %c0_i32_69, %c16_i32_70 : i32
    %277 = tpu.assume_multiple %276, 16 : i32
    %278 = arith.index_cast %277 : i32 to index
    %c0_71 = arith.constant 0 : index
    %279 = vector.load %arg10[%278, %c0_71] : memref<96x512xbf16, #tpu.memory_space<vmem>>, vector<16x512xbf16>
    %280 = arith.extf %279 : vector<16x512xbf16> to vector<16x512xf32>
    %cst_72 = arith.constant dense<0.000000e+00> : vector<16x512xf32>
    %281 = tpu.matmul %275, %17, %cst_72 {dimension_numbers = #tpu.dot_dimension_numbers<[1], [0], [0], [1], [0, 0, 1, 1], [], []>} : vector<16x128xf32>, vector<128x512xf32>, vector<16x512xf32> -> vector<16x512xf32>
    %282 = arith.addf %280, %281 : vector<16x512xf32>
    %283 = vector.extract_strided_slice %282 {offsets = [0, 0], sizes = [16, 128], strides = [1, 1]} : vector<16x512xf32> to vector<16x128xf32>
    %284 = arith.negf %283 : vector<16x128xf32>
    %285 = math.exp %284 : vector<16x128xf32>
    %cst_73 = arith.constant 1.000000e+00 : f32
    %286 = vector.broadcast %cst_73 : f32 to vector<16x128xf32>
    %287 = arith.addf %286, %285 : vector<16x128xf32>
    %288 = arith.divf %286, %287 : vector<16x128xf32>
    %289 = vector.extract_strided_slice %282 {offsets = [0, 128], sizes = [16, 128], strides = [1, 1]} : vector<16x512xf32> to vector<16x128xf32>
    %290 = arith.negf %289 : vector<16x128xf32>
    %291 = math.exp %290 : vector<16x128xf32>
    %cst_74 = arith.constant 1.000000e+00 : f32
    %292 = vector.broadcast %cst_74 : f32 to vector<16x128xf32>
    %293 = arith.addf %292, %291 : vector<16x128xf32>
    %294 = arith.divf %292, %293 : vector<16x128xf32>
    %295 = vector.extract_strided_slice %282 {offsets = [0, 256], sizes = [16, 128], strides = [1, 1]} : vector<16x512xf32> to vector<16x128xf32>
    %296 = math.tanh %295 : vector<16x128xf32>
    %297 = vector.extract_strided_slice %282 {offsets = [0, 384], sizes = [16, 128], strides = [1, 1]} : vector<16x512xf32> to vector<16x128xf32>
    %298 = arith.negf %297 : vector<16x128xf32>
    %299 = math.exp %298 : vector<16x128xf32>
    %cst_75 = arith.constant 1.000000e+00 : f32
    %300 = vector.broadcast %cst_75 : f32 to vector<16x128xf32>
    %301 = arith.addf %300, %299 : vector<16x128xf32>
    %302 = arith.divf %300, %301 : vector<16x128xf32>
    %303 = arith.mulf %294, %273 : vector<16x128xf32>
    %304 = arith.mulf %288, %296 : vector<16x128xf32>
    %305 = arith.addf %303, %304 : vector<16x128xf32>
    %306 = math.tanh %305 : vector<16x128xf32>
    %307 = arith.mulf %302, %306 : vector<16x128xf32>
    %cst_76 = arith.constant 0.000000e+00 : f32
    %308 = vector.broadcast %cst_76 : f32 to vector<16x128xf32>
    %309 = arith.maximumf %307, %308 : vector<16x128xf32>
    %310 = arith.truncf %309 : vector<16x128xf32> to vector<16x128xbf16>
    %311 = arith.index_cast %277 : i32 to index
    %c0_77 = arith.constant 0 : index
    %312 = vector.load %arg8[%311, %c0_77] : memref<96x128xbf16, #tpu.memory_space<vmem>>, vector<16x128xbf16>
    tpu.vector_store %arg8[%311, %c0_77], %310 {strides = array<i32>} : memref<96x128xbf16, #tpu.memory_space<vmem>>, vector<16x128xbf16>,
    %c1_i32_78 = arith.constant 1 : i32
    %c16_i32_79 = arith.constant 16 : i32
    %313 = arith.muli %c1_i32_78, %c16_i32_79 : i32
    %314 = tpu.assume_multiple %313, 16 : i32
    %315 = arith.index_cast %314 : i32 to index
    %c0_80 = arith.constant 0 : index
    %316 = vector.load %arg10[%315, %c0_80] : memref<96x512xbf16, #tpu.memory_space<vmem>>, vector<16x512xbf16>
    %317 = arith.extf %316 : vector<16x512xbf16> to vector<16x512xf32>
    %cst_81 = arith.constant dense<0.000000e+00> : vector<16x512xf32>
    %318 = tpu.matmul %307, %17, %cst_81 {dimension_numbers = #tpu.dot_dimension_numbers<[1], [0], [0], [1], [0, 0, 1, 1], [], []>} : vector<16x128xf32>, vector<128x512xf32>, vector<16x512xf32> -> vector<16x512xf32>
    %319 = arith.addf %317, %318 : vector<16x512xf32>
    %320 = vector.extract_strided_slice %319 {offsets = [0, 0], sizes = [16, 128], strides = [1, 1]} : vector<16x512xf32> to vector<16x128xf32>
    %321 = arith.negf %320 : vector<16x128xf32>
    %322 = math.exp %321 : vector<16x128xf32>
    %cst_82 = arith.constant 1.000000e+00 : f32
    %323 = vector.broadcast %cst_82 : f32 to vector<16x128xf32>
    %324 = arith.addf %323, %322 : vector<16x128xf32>
    %325 = arith.divf %323, %324 : vector<16x128xf32>
    %326 = vector.extract_strided_slice %319 {offsets = [0, 128], sizes = [16, 128], strides = [1, 1]} : vector<16x512xf32> to vector<16x128xf32>
    %327 = arith.negf %326 : vector<16x128xf32>
    %328 = math.exp %327 : vector<16x128xf32>
    %cst_83 = arith.constant 1.000000e+00 : f32
    %329 = vector.broadcast %cst_83 : f32 to vector<16x128xf32>
    %330 = arith.addf %329, %328 : vector<16x128xf32>
    %331 = arith.divf %329, %330 : vector<16x128xf32>
    %332 = vector.extract_strided_slice %319 {offsets = [0, 256], sizes = [16, 128], strides = [1, 1]} : vector<16x512xf32> to vector<16x128xf32>
    %333 = math.tanh %332 : vector<16x128xf32>
    %334 = vector.extract_strided_slice %319 {offsets = [0, 384], sizes = [16, 128], strides = [1, 1]} : vector<16x512xf32> to vector<16x128xf32>
    %335 = arith.negf %334 : vector<16x128xf32>
    %336 = math.exp %335 : vector<16x128xf32>
    %cst_84 = arith.constant 1.000000e+00 : f32
    %337 = vector.broadcast %cst_84 : f32 to vector<16x128xf32>
    %338 = arith.addf %337, %336 : vector<16x128xf32>
    %339 = arith.divf %337, %338 : vector<16x128xf32>
    %340 = arith.mulf %331, %305 : vector<16x128xf32>
    %341 = arith.mulf %325, %333 : vector<16x128xf32>
    %342 = arith.addf %340, %341 : vector<16x128xf32>
    %343 = math.tanh %342 : vector<16x128xf32>
    %344 = arith.mulf %339, %343 : vector<16x128xf32>
    %cst_85 = arith.constant 0.000000e+00 : f32
    %345 = vector.broadcast %cst_85 : f32 to vector<16x128xf32>
    %346 = arith.maximumf %344, %345 : vector<16x128xf32>
    %347 = arith.truncf %346 : vector<16x128xf32> to vector<16x128xbf16>
    %348 = arith.index_cast %314 : i32 to index
    %c0_86 = arith.constant 0 : index
    %349 = vector.load %arg8[%348, %c0_86] : memref<96x128xbf16, #tpu.memory_space<vmem>>, vector<16x128xbf16>
    tpu.vector_store %arg8[%348, %c0_86], %347 {strides = array<i32>} : memref<96x128xbf16, #tpu.memory_space<vmem>>, vector<16x128xbf16>,
    %c2_i32_87 = arith.constant 2 : i32
    %c16_i32_88 = arith.constant 16 : i32
    %350 = arith.muli %c2_i32_87, %c16_i32_88 : i32
    %351 = tpu.assume_multiple %350, 16 : i32
    %352 = arith.index_cast %351 : i32 to index
    %c0_89 = arith.constant 0 : index
    %353 = vector.load %arg10[%352, %c0_89] : memref<96x512xbf16, #tpu.memory_space<vmem>>, vector<16x512xbf16>
    %354 = arith.extf %353 : vector<16x512xbf16> to vector<16x512xf32>
    %cst_90 = arith.constant dense<0.000000e+00> : vector<16x512xf32>
    %355 = tpu.matmul %344, %17, %cst_90 {dimension_numbers = #tpu.dot_dimension_numbers<[1], [0], [0], [1], [0, 0, 1, 1], [], []>} : vector<16x128xf32>, vector<128x512xf32>, vector<16x512xf32> -> vector<16x512xf32>
    %356 = arith.addf %354, %355 : vector<16x512xf32>
    %357 = vector.extract_strided_slice %356 {offsets = [0, 0], sizes = [16, 128], strides = [1, 1]} : vector<16x512xf32> to vector<16x128xf32>
    %358 = arith.negf %357 : vector<16x128xf32>
    %359 = math.exp %358 : vector<16x128xf32>
    %cst_91 = arith.constant 1.000000e+00 : f32
    %360 = vector.broadcast %cst_91 : f32 to vector<16x128xf32>
    %361 = arith.addf %360, %359 : vector<16x128xf32>
    %362 = arith.divf %360, %361 : vector<16x128xf32>
    %363 = vector.extract_strided_slice %356 {offsets = [0, 128], sizes = [16, 128], strides = [1, 1]} : vector<16x512xf32> to vector<16x128xf32>
    %364 = arith.negf %363 : vector<16x128xf32>
    %365 = math.exp %364 : vector<16x128xf32>
    %cst_92 = arith.constant 1.000000e+00 : f32
    %366 = vector.broadcast %cst_92 : f32 to vector<16x128xf32>
    %367 = arith.addf %366, %365 : vector<16x128xf32>
    %368 = arith.divf %366, %367 : vector<16x128xf32>
    %369 = vector.extract_strided_slice %356 {offsets = [0, 256], sizes = [16, 128], strides = [1, 1]} : vector<16x512xf32> to vector<16x128xf32>
    %370 = math.tanh %369 : vector<16x128xf32>
    %371 = vector.extract_strided_slice %356 {offsets = [0, 384], sizes = [16, 128], strides = [1, 1]} : vector<16x512xf32> to vector<16x128xf32>
    %372 = arith.negf %371 : vector<16x128xf32>
    %373 = math.exp %372 : vector<16x128xf32>
    %cst_93 = arith.constant 1.000000e+00 : f32
    %374 = vector.broadcast %cst_93 : f32 to vector<16x128xf32>
    %375 = arith.addf %374, %373 : vector<16x128xf32>
    %376 = arith.divf %374, %375 : vector<16x128xf32>
    %377 = arith.mulf %368, %342 : vector<16x128xf32>
    %378 = arith.mulf %362, %370 : vector<16x128xf32>
    %379 = arith.addf %377, %378 : vector<16x128xf32>
    %380 = math.tanh %379 : vector<16x128xf32>
    %381 = arith.mulf %376, %380 : vector<16x128xf32>
    %cst_94 = arith.constant 0.000000e+00 : f32
    %382 = vector.broadcast %cst_94 : f32 to vector<16x128xf32>
    %383 = arith.maximumf %381, %382 : vector<16x128xf32>
    %384 = arith.truncf %383 : vector<16x128xf32> to vector<16x128xbf16>
    %385 = arith.index_cast %351 : i32 to index
    %c0_95 = arith.constant 0 : index
    %386 = vector.load %arg8[%385, %c0_95] : memref<96x128xbf16, #tpu.memory_space<vmem>>, vector<16x128xbf16>
    tpu.vector_store %arg8[%385, %c0_95], %384 {strides = array<i32>} : memref<96x128xbf16, #tpu.memory_space<vmem>>, vector<16x128xbf16>,
    %c3_i32_96 = arith.constant 3 : i32
    %c16_i32_97 = arith.constant 16 : i32
    %387 = arith.muli %c3_i32_96, %c16_i32_97 : i32
    %388 = tpu.assume_multiple %387, 16 : i32
    %389 = arith.index_cast %388 : i32 to index
    %c0_98 = arith.constant 0 : index
    %390 = vector.load %arg10[%389, %c0_98] : memref<96x512xbf16, #tpu.memory_space<vmem>>, vector<16x512xbf16>
    %391 = arith.extf %390 : vector<16x512xbf16> to vector<16x512xf32>
    %cst_99 = arith.constant dense<0.000000e+00> : vector<16x512xf32>
    %392 = tpu.matmul %381, %17, %cst_99 {dimension_numbers = #tpu.dot_dimension_numbers<[1], [0], [0], [1], [0, 0, 1, 1], [], []>} : vector<16x128xf32>, vector<128x512xf32>, vector<16x512xf32> -> vector<16x512xf32>
    %393 = arith.addf %391, %392 : vector<16x512xf32>
    %394 = vector.extract_strided_slice %393 {offsets = [0, 0], sizes = [16, 128], strides = [1, 1]} : vector<16x512xf32> to vector<16x128xf32>
    %395 = arith.negf %394 : vector<16x128xf32>
    %396 = math.exp %395 : vector<16x128xf32>
    %cst_100 = arith.constant 1.000000e+00 : f32
    %397 = vector.broadcast %cst_100 : f32 to vector<16x128xf32>
    %398 = arith.addf %397, %396 : vector<16x128xf32>
    %399 = arith.divf %397, %398 : vector<16x128xf32>
    %400 = vector.extract_strided_slice %393 {offsets = [0, 128], sizes = [16, 128], strides = [1, 1]} : vector<16x512xf32> to vector<16x128xf32>
    %401 = arith.negf %400 : vector<16x128xf32>
    %402 = math.exp %401 : vector<16x128xf32>
    %cst_101 = arith.constant 1.000000e+00 : f32
    %403 = vector.broadcast %cst_101 : f32 to vector<16x128xf32>
    %404 = arith.addf %403, %402 : vector<16x128xf32>
    %405 = arith.divf %403, %404 : vector<16x128xf32>
    %406 = vector.extract_strided_slice %393 {offsets = [0, 256], sizes = [16, 128], strides = [1, 1]} : vector<16x512xf32> to vector<16x128xf32>
    %407 = math.tanh %406 : vector<16x128xf32>
    %408 = vector.extract_strided_slice %393 {offsets = [0, 384], sizes = [16, 128], strides = [1, 1]} : vector<16x512xf32> to vector<16x128xf32>
    %409 = arith.negf %408 : vector<16x128xf32>
    %410 = math.exp %409 : vector<16x128xf32>
    %cst_102 = arith.constant 1.000000e+00 : f32
    %411 = vector.broadcast %cst_102 : f32 to vector<16x128xf32>
    %412 = arith.addf %411, %410 : vector<16x128xf32>
    %413 = arith.divf %411, %412 : vector<16x128xf32>
    %414 = arith.mulf %405, %379 : vector<16x128xf32>
    %415 = arith.mulf %399, %407 : vector<16x128xf32>
    %416 = arith.addf %414, %415 : vector<16x128xf32>
    %417 = math.tanh %416 : vector<16x128xf32>
    %418 = arith.mulf %413, %417 : vector<16x128xf32>
    %cst_103 = arith.constant 0.000000e+00 : f32
    %419 = vector.broadcast %cst_103 : f32 to vector<16x128xf32>
    %420 = arith.maximumf %418, %419 : vector<16x128xf32>
    %421 = arith.truncf %420 : vector<16x128xf32> to vector<16x128xbf16>
    %422 = arith.index_cast %388 : i32 to index
    %c0_104 = arith.constant 0 : index
    %423 = vector.load %arg8[%422, %c0_104] : memref<96x128xbf16, #tpu.memory_space<vmem>>, vector<16x128xbf16>
    tpu.vector_store %arg8[%422, %c0_104], %421 {strides = array<i32>} : memref<96x128xbf16, #tpu.memory_space<vmem>>, vector<16x128xbf16>,
    %c4_i32_105 = arith.constant 4 : i32
    %c16_i32_106 = arith.constant 16 : i32
    %424 = arith.muli %c4_i32_105, %c16_i32_106 : i32
    %425 = tpu.assume_multiple %424, 16 : i32
    %426 = arith.index_cast %425 : i32 to index
    %c0_107 = arith.constant 0 : index
    %427 = vector.load %arg10[%426, %c0_107] : memref<96x512xbf16, #tpu.memory_space<vmem>>, vector<16x512xbf16>
    %428 = arith.extf %427 : vector<16x512xbf16> to vector<16x512xf32>
    %cst_108 = arith.constant dense<0.000000e+00> : vector<16x512xf32>
    %429 = tpu.matmul %418, %17, %cst_108 {dimension_numbers = #tpu.dot_dimension_numbers<[1], [0], [0], [1], [0, 0, 1, 1], [], []>} : vector<16x128xf32>, vector<128x512xf32>, vector<16x512xf32> -> vector<16x512xf32>
    %430 = arith.addf %428, %429 : vector<16x512xf32>
    %431 = vector.extract_strided_slice %430 {offsets = [0, 0], sizes = [16, 128], strides = [1, 1]} : vector<16x512xf32> to vector<16x128xf32>
    %432 = arith.negf %431 : vector<16x128xf32>
    %433 = math.exp %432 : vector<16x128xf32>
    %cst_109 = arith.constant 1.000000e+00 : f32
    %434 = vector.broadcast %cst_109 : f32 to vector<16x128xf32>
    %435 = arith.addf %434, %433 : vector<16x128xf32>
    %436 = arith.divf %434, %435 : vector<16x128xf32>
    %437 = vector.extract_strided_slice %430 {offsets = [0, 128], sizes = [16, 128], strides = [1, 1]} : vector<16x512xf32> to vector<16x128xf32>
    %438 = arith.negf %437 : vector<16x128xf32>
    %439 = math.exp %438 : vector<16x128xf32>
    %cst_110 = arith.constant 1.000000e+00 : f32
    %440 = vector.broadcast %cst_110 : f32 to vector<16x128xf32>
    %441 = arith.addf %440, %439 : vector<16x128xf32>
    %442 = arith.divf %440, %441 : vector<16x128xf32>
    %443 = vector.extract_strided_slice %430 {offsets = [0, 256], sizes = [16, 128], strides = [1, 1]} : vector<16x512xf32> to vector<16x128xf32>
    %444 = math.tanh %443 : vector<16x128xf32>
    %445 = vector.extract_strided_slice %430 {offsets = [0, 384], sizes = [16, 128], strides = [1, 1]} : vector<16x512xf32> to vector<16x128xf32>
    %446 = arith.negf %445 : vector<16x128xf32>
    %447 = math.exp %446 : vector<16x128xf32>
    %cst_111 = arith.constant 1.000000e+00 : f32
    %448 = vector.broadcast %cst_111 : f32 to vector<16x128xf32>
    %449 = arith.addf %448, %447 : vector<16x128xf32>
    %450 = arith.divf %448, %449 : vector<16x128xf32>
    %451 = arith.mulf %442, %416 : vector<16x128xf32>
    %452 = arith.mulf %436, %444 : vector<16x128xf32>
    %453 = arith.addf %451, %452 : vector<16x128xf32>
    %454 = math.tanh %453 : vector<16x128xf32>
    %455 = arith.mulf %450, %454 : vector<16x128xf32>
    %cst_112 = arith.constant 0.000000e+00 : f32
    %456 = vector.broadcast %cst_112 : f32 to vector<16x128xf32>
    %457 = arith.maximumf %455, %456 : vector<16x128xf32>
    %458 = arith.truncf %457 : vector<16x128xf32> to vector<16x128xbf16>
    %459 = arith.index_cast %425 : i32 to index
    %c0_113 = arith.constant 0 : index
    %460 = vector.load %arg8[%459, %c0_113] : memref<96x128xbf16, #tpu.memory_space<vmem>>, vector<16x128xbf16>
    tpu.vector_store %arg8[%459, %c0_113], %458 {strides = array<i32>} : memref<96x128xbf16, #tpu.memory_space<vmem>>, vector<16x128xbf16>,
    %c5_i32_114 = arith.constant 5 : i32
    %c16_i32_115 = arith.constant 16 : i32
    %461 = arith.muli %c5_i32_114, %c16_i32_115 : i32
    %462 = tpu.assume_multiple %461, 16 : i32
    %463 = arith.index_cast %462 : i32 to index
    %c0_116 = arith.constant 0 : index
    %464 = vector.load %arg10[%463, %c0_116] : memref<96x512xbf16, #tpu.memory_space<vmem>>, vector<16x512xbf16>
    %465 = arith.extf %464 : vector<16x512xbf16> to vector<16x512xf32>
    %cst_117 = arith.constant dense<0.000000e+00> : vector<16x512xf32>
    %466 = tpu.matmul %455, %17, %cst_117 {dimension_numbers = #tpu.dot_dimension_numbers<[1], [0], [0], [1], [0, 0, 1, 1], [], []>} : vector<16x128xf32>, vector<128x512xf32>, vector<16x512xf32> -> vector<16x512xf32>
    %467 = arith.addf %465, %466 : vector<16x512xf32>
    %468 = vector.extract_strided_slice %467 {offsets = [0, 0], sizes = [16, 128], strides = [1, 1]} : vector<16x512xf32> to vector<16x128xf32>
    %469 = arith.negf %468 : vector<16x128xf32>
    %470 = math.exp %469 : vector<16x128xf32>
    %cst_118 = arith.constant 1.000000e+00 : f32
    %471 = vector.broadcast %cst_118 : f32 to vector<16x128xf32>
    %472 = arith.addf %471, %470 : vector<16x128xf32>
    %473 = arith.divf %471, %472 : vector<16x128xf32>
    %474 = vector.extract_strided_slice %467 {offsets = [0, 128], sizes = [16, 128], strides = [1, 1]} : vector<16x512xf32> to vector<16x128xf32>
    %475 = arith.negf %474 : vector<16x128xf32>
    %476 = math.exp %475 : vector<16x128xf32>
    %cst_119 = arith.constant 1.000000e+00 : f32
    %477 = vector.broadcast %cst_119 : f32 to vector<16x128xf32>
    %478 = arith.addf %477, %476 : vector<16x128xf32>
    %479 = arith.divf %477, %478 : vector<16x128xf32>
    %480 = vector.extract_strided_slice %467 {offsets = [0, 256], sizes = [16, 128], strides = [1, 1]} : vector<16x512xf32> to vector<16x128xf32>
    %481 = math.tanh %480 : vector<16x128xf32>
    %482 = vector.extract_strided_slice %467 {offsets = [0, 384], sizes = [16, 128], strides = [1, 1]} : vector<16x512xf32> to vector<16x128xf32>
    %483 = arith.negf %482 : vector<16x128xf32>
    %484 = math.exp %483 : vector<16x128xf32>
    %cst_120 = arith.constant 1.000000e+00 : f32
    %485 = vector.broadcast %cst_120 : f32 to vector<16x128xf32>
    %486 = arith.addf %485, %484 : vector<16x128xf32>
    %487 = arith.divf %485, %486 : vector<16x128xf32>
    %488 = arith.mulf %479, %453 : vector<16x128xf32>
    %489 = arith.mulf %473, %481 : vector<16x128xf32>
    %490 = arith.addf %488, %489 : vector<16x128xf32>
    %491 = math.tanh %490 : vector<16x128xf32>
    %492 = arith.mulf %487, %491 : vector<16x128xf32>
    %cst_121 = arith.constant 0.000000e+00 : f32
    %493 = vector.broadcast %cst_121 : f32 to vector<16x128xf32>
    %494 = arith.maximumf %492, %493 : vector<16x128xf32>
    %495 = arith.truncf %494 : vector<16x128xf32> to vector<16x128xbf16>
    %496 = arith.index_cast %462 : i32 to index
    %c0_122 = arith.constant 0 : index
    %497 = vector.load %arg8[%496, %c0_122] : memref<96x128xbf16, #tpu.memory_space<vmem>>, vector<16x128xbf16>
    tpu.vector_store %arg8[%496, %c0_122], %495 {strides = array<i32>} : memref<96x128xbf16, #tpu.memory_space<vmem>>, vector<16x128xbf16>,
    %c6_i32_123 = arith.constant 6 : i32
    return
  }
}

</mosaic_0001>

<bundles_post_ra>
// kernel: seq2seq_forward.3
= control target key start
LH: loop header
LB: loop body
LE: loop exit
PB: predicated region body
PF: predicated region fallthrough
CT: control target
= control target key end

     0   :  { %s381_s1 = inlined_call_operand.vmem [shape: bf16[128,128], index: 1, kind: input, shape index: {}]   ;;  %s382_s2 = inlined_call_operand.vmem [shape: f32[1,128], index: 2, kind: input, shape index: {}]   ;;  %s383_s0 = inlined_call_operand.vmem [shape: bf16[96,128], index: 0, kind: input, shape index: {}]   ;;  %s384_s3 = inlined_call_operand.vmem [shape: f32[96,128], index: 3, kind: output, shape index: {}]  }
   0x1   :  { %v254_v0 = vld [vmem:[%s381_s1 + $0x38] sm:$0xff]  ;;  %v253_v1 = vld [vmem:[%s381_s1 + $0x30] sm:$0xff]  ;;  %v252_v2 = vld [vmem:[%s381_s1 + $0x28] sm:$0xff] }
   0x2   :  { %256 = vmatpush.bf16.msra.mxu2 %v254_v0  ;;  %257 = vmatpush.bf16.msra.mxu3 %v254_v0  ;;  %v251_v3 = vld [vmem:[%s381_s1 + $0x20] sm:$0xff]  ;;  %v250_v4 = vld [vmem:[%s381_s1 + $0x18] sm:$0xff]  ;;  %v249_v5 = vld [vmem:[%s381_s1 + $0x10] sm:$0xff] }
   0x3   :  { %130 = vmatpush.bf16.msra.mxu0 %v254_v0  ;;  %255 = vmatpush.bf16.msra.mxu1 %v254_v0  ;;  %v248_v6 = vld [vmem:[%s381_s1 + $0x8] sm:$0xff]  ;;  %v247_v7 = vld [vmem:[%s381_s1] sm:$0xff]  ;;  %v243_v8 = vld [vmem:[%s383_s0 + $0x10] sm:$0xff] }
   0x4   :  { %v245_v9 = vld [vmem:[%s383_s0 + $0x20] sm:$0xff]  ;;  %v242_v11 = vld [vmem:[%s383_s0 + $0x8] sm:$0xff]  ;;  %v244_v12 = vld [vmem:[%s383_s0 + $0x18] sm:$0xff] }
   0x5   :  { %v241_v10 = vld [vmem:[%s383_s0] sm:$0xff]  ;;  %v246_v13 = vld [vmem:[%s383_s0 + $0x28] sm:$0xff] }
   0x6   :  { %259 = vmatpush.bf16.msra.mxu2 %v253_v1  ;;  %260 = vmatpush.bf16.msra.mxu3 %v253_v1  ;;  %v279_v14 = vld [vmem:[%s382_s2] ss:$0 sm:$0xff] }
   0x7   :  { %131 = vmatpush.bf16.msra.mxu0 %v253_v1  ;;  %258 = vmatpush.bf16.msra.mxu1 %v253_v1 }
   0xa   :  { %262 = vmatpush.bf16.msra.mxu2 %v252_v2  ;;  %263 = vmatpush.bf16.msra.mxu3 %v252_v2 }
   0xb   :  { %132 = vmatpush.bf16.msra.mxu0 %v252_v2  ;;  %261 = vmatpush.bf16.msra.mxu1 %v252_v2 }
   0xe   :  { %265 = vmatpush.bf16.msra.mxu2 %v251_v3  ;;  %266 = vmatpush.bf16.msra.mxu3 %v251_v3 }
   0xf   :  { %133 = vmatpush.bf16.msra.mxu0 %v251_v3  ;;  %264 = vmatpush.bf16.msra.mxu1 %v251_v3 }
  0x12   :  { %268 = vmatpush.bf16.msra.mxu2 %v250_v4  ;;  %269 = vmatpush.bf16.msra.mxu3 %v250_v4 }
  0x13   :  { %134 = vmatpush.bf16.msra.mxu0 %v250_v4  ;;  %267 = vmatpush.bf16.msra.mxu1 %v250_v4 }
  0x16   :  { %271 = vmatpush.bf16.msra.mxu2 %v249_v5  ;;  %272 = vmatpush.bf16.msra.mxu3 %v249_v5 }
  0x17   :  { %135 = vmatpush.bf16.msra.mxu0 %v249_v5  ;;  %270 = vmatpush.bf16.msra.mxu1 %v249_v5 }
  0x1a   :  { %274 = vmatpush.bf16.msra.mxu2 %v248_v6  ;;  %275 = vmatpush.bf16.msra.mxu3 %v248_v6 }
  0x1b   :  { %136 = vmatpush.bf16.msra.mxu0 %v248_v6  ;;  %273 = vmatpush.bf16.msra.mxu1 %v248_v6 }
  0x1e   :  { %277 = vmatpush.bf16.msra.mxu2 %v247_v7  ;;  %278 = vmatpush.bf16.msra.mxu3 %v247_v7 }
  0x1f   :  { %137 = vmatpush.bf16.msra.mxu0 %v247_v7  ;;  %276 = vmatpush.bf16.msra.mxu1 %v247_v7 }
  0x21   :  { %148 = vmatmul.bf16.vlgmr.msra.gmra.mxu2 %v243_v8  ;;  %158 = vmatmul.bf16.vlgmr.msra.gmra.mxu3 %v245_v9 }
  0x22   :  { %138 = vmatmul.bf16.vlgmr.msra.gmra.mxu0 %v241_v10  ;;  %143 = vmatmul.bf16.vlgmr.msra.gmra.mxu1 %v242_v11 }
  0x31   :  { %153 = vmatmul.bf16.gmra.mxu2 %v244_v12  ;;  %163 = vmatmul.bf16.gmra.mxu3 %v246_v13 }
  0x9f   :  { %v139_v15 = vpop.f32.mrf.mxu0  ;;  %v144_v16 = vpop.f32.mrf.mxu1 }
  0xa0   :  { %v140_v17 = vadd.f32 %v279_v14, %v139_v15  ;;  %v145_v18 = vadd.f32 %v279_v14, %v144_v16 }
  0xa2   :  { %169 = vst [vmem:[%s384_s3] sm:$0xff] %v140_v17 }
  0xa3   :  { %171 = vst [vmem:[%s384_s3 + $0x10] sm:$0xff] %v145_v18 }
  0xa4   :  { %v149_v19 = vpop.f32.mrf.mxu2  ;;  %v159_v20 = vpop.f32.mrf.mxu3 }
  0xa5   :  { %v150_v21 = vadd.f32 %v279_v14, %v149_v19  ;;  %v160_v22 = vadd.f32 %v279_v14, %v159_v20 }
  0xa7   :  { %173 = vst [vmem:[%s384_s3 + $0x20] sm:$0xff] %v150_v21  ;;  %v141_v23 = vpop.f32.mrf.mxu0  ;;  %v146_v24 = vpop.f32.mrf.mxu1 }
  0xa8   :  { %177 = vst [vmem:[%s384_s3 + $0x40] sm:$0xff] %v160_v22  ;;  %v142_v25 = vadd.f32 %v279_v14, %v141_v23  ;;  %v147_v26 = vadd.f32 %v279_v14, %v146_v24 }
  0xaa   :  { %170 = vst [vmem:[%s384_s3 + $0x8] sm:$0xff] %v142_v25 }
  0xab   :  { %172 = vst [vmem:[%s384_s3 + $0x18] sm:$0xff] %v147_v26 }
  0xac   :  { %v151_v27 = vpop.f32.mrf.mxu2  ;;  %v161_v28 = vpop.f32.mrf.mxu3 }
  0xad   :  { %v152_v29 = vadd.f32 %v279_v14, %v151_v27  ;;  %v162_v30 = vadd.f32 %v279_v14, %v161_v28 }
  0xaf   :  { %174 = vst [vmem:[%s384_s3 + $0x28] sm:$0xff] %v152_v29 }
  0xb0   :  { %178 = vst [vmem:[%s384_s3 + $0x48] sm:$0xff] %v162_v30 }
  0xb4   :  { %v154_v31 = vpop.f32.mrf.mxu2  ;;  %v164_v32 = vpop.f32.mrf.mxu3 }
  0xb5   :  { %v155_v33 = vadd.f32 %v279_v14, %v154_v31  ;;  %v165_v34 = vadd.f32 %v279_v14, %v164_v32 }
  0xb7   :  { %175 = vst [vmem:[%s384_s3 + $0x30] sm:$0xff] %v155_v33 }
  0xb8   :  { %179 = vst [vmem:[%s384_s3 + $0x50] sm:$0xff] %v165_v34 }
  0xbc   :  { %v156_v35 = vpop.f32.mrf.mxu2  ;;  %v166_v36 = vpop.f32.mrf.mxu3 }
  0xbd   :  { %v157_v37 = vadd.f32 %v279_v14, %v156_v35  ;;  %v167_v38 = vadd.f32 %v279_v14, %v166_v36 }
  0xbf   :  { %176 = vst [vmem:[%s384_s3 + $0x38] sm:$0xff] %v157_v37 }
  0xc0   :  { %180 = vst [vmem:[%s384_s3 + $0x58] sm:$0xff] %v167_v38 }

// kernel: seq2seq_forward.2
= control target key start
LH: loop header
LB: loop body
LE: loop exit
PB: predicated region body
PF: predicated region fallthrough
CT: control target
= control target key end

     0   :  { %13 = vsyncpa [#allocation5], 0  ;;  %s8612_s0 = inlined_call_operand.vmem [shape: bf16[128,128], index: 0, kind: input, shape index: {}]   ;;  %s8613_s1 = inlined_call_operand.vmem [shape: bf16[96,128], index: 1, kind: input, shape index: {}]   ;;  %s8614_s2 = inlined_call_operand.hbm [shape: bf16[128,512], index: 2, kind: input, shape index: {}]   ;;  %s8615_s3 = inlined_call_operand.hbm [shape: f32[128,512], index: 3, kind: input, shape index: {}]   ;;  %s8616_s4 = inlined_call_operand.vmem [shape: f32[1,512], index: 4, kind: input, shape index: {}]   ;;  %s8617_s5 = inlined_call_operand.hbm [shape: bf16[128,512], index: 5, kind: input, shape index: {}]   ;;  %s8618_s6 = inlined_call_operand.hbm [shape: f32[128,512], index: 6, kind: input, shape index: {}]   ;;  %s8619_s7 = inlined_call_operand.vmem [shape: f32[1,512], index: 7, kind: input, shape index: {}]   ;;  %s8620_s8 = inlined_call_operand.vmem [shape: bf16[96,128], index: 8, kind: output, shape index: {}]  }
   0x1   :  { %14 = vsyncpa [#allocation7], 0  ;;  %s37_s29 = sshll.u32 %s8615_s3, 4  ;;  %s38_s29 = int_to_ptr.hbm [resolvable:$true] %s37_s29 }
   0x2   :  { %15 = vsyncpa [#allocation10], 0  ;;  %s5898_s30 = smov [#allocation6]   ;;  %s24_s12 = sshll.u32 %s8614_s2, 4  ;;  %s25_s12 = int_to_ptr.hbm [resolvable:$true] %s24_s12 }
   0x3   :  { %s39_s9 = sshll.u32 %s5898_s30, 4  ;;  %s5899_s13 = smov 512   ;;  %s40_s9 = int_to_ptr.vmem [resolvable:$true] %s39_s9 }
   0x4   :  { %s5900_s14 = smov 32   ;;  %s5901_s15 = smov [#allocation4]  }
   0x5   :  { %45 = dma.hbm_to_vmem [thread:$0]  %s38_s29, 8192, %s40_s9, [#allocation7], %s5899_s13, %s5899_s13, %s5900_s14  }
   0x6   :  { %s26_s16 = sshll.u32 %s5901_s15, 4  ;;  %s5902_s17 = smov 256   ;;  %s27_s16 = int_to_ptr.vmem [resolvable:$true] %s26_s16 }
   0x7   :  { %s5903_s18 = smov 16   ;;  %s52_s20 = sshll.u32 %s8617_s5, 4  ;;  %s53_s20 = int_to_ptr.hbm [resolvable:$true] %s52_s20 }
   0x8   :  { %32 = dma.hbm_to_vmem [thread:$0]  %s25_s12, 4096, %s27_s16, [#allocation5], %s5902_s17, %s5902_s17, %s5903_s18  }
   0x9   :  { %s5904_s21 = smov [#allocation8]   ;;  %s65_s24 = sshll.u32 %s8618_s6, 4  ;;  %s66_s24 = int_to_ptr.hbm [resolvable:$true] %s65_s24 }
   0xa   :  { %s54_s22 = sshll.u32 %s5904_s21, 4  ;;  %s5905_s25 = smov [#allocation9]   ;;  %s55_s22 = int_to_ptr.vmem [resolvable:$true] %s54_s22 }
   0xb   :  { %60 = dma.hbm_to_vmem [thread:$0]  %s53_s20, 4096, %s55_s22, [#allocation7], %s5902_s17, %s5902_s17, %s5903_s18  }
   0xc   :  { %s67_s26 = sshll.u32 %s5905_s25, 4  ;;  %s68_s26 = int_to_ptr.vmem [resolvable:$true] %s67_s26 }
   0xd   :  { %73 = dma.hbm_to_vmem [thread:$0]  %s66_s24, 8192, %s68_s26, [#allocation10], %s5899_s13, %s5899_s13, %s5900_s14  }
   0xe   :  { %5892 = dma.done.wait [#allocation5], 4096  }
   0xf   :  { %5893 = vsyncadd [#allocation5], 4294963200 }
  0x10   :  { %5894 = dma.done.wait [#allocation7], 12288  }
  0x11   :  { %5895 = vsyncadd [#allocation7], 4294955008 }
  0x12   :  { %5896 = dma.done.wait [#allocation10], 8192  }
  0x13   :  { %5897 = vsyncadd [#allocation10], 4294959104  ;;  %v4774_v0 = vld [vmem:[#allocation4 + $0xe0] sm:$0xf]  ;;  %v5072_v1 = vld [vmem:[#allocation4 + $0xec] sm:$0xf0] }
  0x14   :  { %v5070_v2 = vld [vmem:[#allocation4 + $0xe4] sm:$0xf]  ;;  %v4775_v3 = vor.u32 %v5072_v1, %v4774_v0  ;;  %v4776_v4 = vld [vmem:[#allocation4 + $0xf0] sm:$0xf0]  ;;  %v4782_v5 = vld [vmem:[#allocation4 + $0xe8] sm:$0xf] }
  0x15   :  { %v5073_v6 = vld [vmem:[#allocation4 + $0xf4] sm:$0xf0]  ;;  %v4779_v7 = vor.u32 %v5070_v2, %v4776_v4  ;;  %v5071_v9 = vld [vmem:[#allocation4 + $0xec] sm:$0xf]  ;;  %v4784_v10 = vld [vmem:[#allocation4 + $0xf8] sm:$0xf0] }
  0x16   :  { %v4783_v8 = vor.u32 %v5073_v6, %v4782_v5  ;;  %v4758_v11 = vld [vmem:[#allocation4 + $0xc0] sm:$0xf]  ;;  %358 = vmatpush.bf16.msra.mxu0 %v4775_v3  ;;  %v4787_v12 = vor.u32 %v5071_v9, %v4784_v10  ;;  %v5068_v13 = vld [vmem:[#allocation4 + $0xcc] sm:$0xf0]  ;;  %v5066_v14 = vld [vmem:[#allocation4 + $0xc4] sm:$0xf] }
  0x17   :  { %v4760_v15 = vld [vmem:[#allocation4 + $0xd0] sm:$0xf0]  ;;  %407 = vmatpush.bf16.msra.mxu1 %v4779_v7  ;;  %v4759_v16 = vor.u32 %v5068_v13, %v4758_v11  ;;  %v4766_v18 = vld [vmem:[#allocation4 + $0xc8] sm:$0xf]  ;;  %v5069_v19 = vld [vmem:[#allocation4 + $0xd4] sm:$0xf0] }
  0x18   :  { %456 = vmatpush.bf16.msra.mxu2 %v4783_v8  ;;  %v4763_v17 = vor.u32 %v5066_v14, %v4760_v15  ;;  %v5067_v20 = vld [vmem:[#allocation4 + $0xcc] sm:$0xf]  ;;  %505 = vmatpush.bf16.msra.mxu3 %v4787_v12  ;;  %v4767_v21 = vor.u32 %v5069_v19, %v4766_v18  ;;  %v4768_v22 = vld [vmem:[#allocation4 + $0xd8] sm:$0xf0]  ;;  %v4742_v23 = vld [vmem:[#allocation4 + $0xa0] sm:$0xf] }
  0x19   :  { %v5064_v24 = vld [vmem:[#allocation4 + $0xac] sm:$0xf0]  ;;  %v4771_v25 = vor.u32 %v5067_v20, %v4768_v22  ;;  %v5062_v26 = vld [vmem:[#allocation4 + $0xa4] sm:$0xf]  ;;  %v4744_v27 = vld [vmem:[#allocation4 + $0xb0] sm:$0xf0] }
  0x1a   :  { %v4750_v28 = vld [vmem:[#allocation4 + $0xa8] sm:$0xf]  ;;  %359 = vmatpush.bf16.msra.mxu0 %v4759_v16  ;;  %v4743_v29 = vor.u32 %v5064_v24, %v4742_v23  ;;  %v5065_v30 = vld [vmem:[#allocation4 + $0xb4] sm:$0xf0]  ;;  %v5063_v31 = vld [vmem:[#allocation4 + $0xac] sm:$0xf]  ;;  %v4747_v33 = vor.u32 %v5062_v26, %v4744_v27 }
  0x1b   :  { %v4752_v32 = vld [vmem:[#allocation4 + $0xb8] sm:$0xf0]  ;;  %408 = vmatpush.bf16.msra.mxu1 %v4763_v17  ;;  %v4751_v34 = vor.u32 %v5065_v30, %v4750_v28  ;;  %v4726_v35 = vld [vmem:[#allocation4 + $0x80] sm:$0xf]  ;;  %v5060_v36 = vld [vmem:[#allocation4 + $0x8c] sm:$0xf0] }
  0x1c   :  { %457 = vmatpush.bf16.msra.mxu2 %v4767_v21  ;;  %v5058_v37 = vld [vmem:[#allocation4 + $0x84] sm:$0xf]  ;;  %506 = vmatpush.bf16.msra.mxu3 %v4771_v25  ;;  %v4755_v38 = vor.u32 %v5063_v31, %v4752_v32  ;;  %v4728_v39 = vld [vmem:[#allocation4 + $0x90] sm:$0xf0]  ;;  %v4734_v40 = vld [vmem:[#allocation4 + $0x88] sm:$0xf]  ;;  %v4727_v44 = vor.u32 %v5060_v36, %v4726_v35 }
  0x1d   :  { %v5061_v41 = vld [vmem:[#allocation4 + $0x94] sm:$0xf0]  ;;  %v5059_v42 = vld [vmem:[#allocation4 + $0x8c] sm:$0xf]  ;;  %v4736_v43 = vld [vmem:[#allocation4 + $0x98] sm:$0xf0]  ;;  %v4731_v45 = vor.u32 %v5058_v37, %v4728_v39 }
  0x1e   :  { %360 = vmatpush.bf16.msra.mxu0 %v4743_v29  ;;  %v4735_v46 = vor.u32 %v5061_v41, %v4734_v40  ;;  %v4710_v47 = vld [vmem:[#allocation4 + $0x60] sm:$0xf]  ;;  %v5056_v48 = vld [vmem:[#allocation4 + $0x6c] sm:$0xf0]  ;;  %v5054_v49 = vld [vmem:[#allocation4 + $0x64] sm:$0xf]  ;;  %v4739_v50 = vor.u32 %v5059_v42, %v4736_v43 }
  0x1f   :  { %409 = vmatpush.bf16.msra.mxu1 %v4747_v33  ;;  %v4712_v51 = vld [vmem:[#allocation4 + $0x70] sm:$0xf0]  ;;  %v4718_v52 = vld [vmem:[#allocation4 + $0x68] sm:$0xf]  ;;  %v5057_v53 = vld [vmem:[#allocation4 + $0x74] sm:$0xf0]  ;;  %v4711_v56 = vor.u32 %v5056_v48, %v4710_v47 }
  0x20   :  { %458 = vmatpush.bf16.msra.mxu2 %v4751_v34  ;;  %507 = vmatpush.bf16.msra.mxu3 %v4755_v38  ;;  %v5055_v54 = vld [vmem:[#allocation4 + $0x6c] sm:$0xf]  ;;  %v4720_v55 = vld [vmem:[#allocation4 + $0x78] sm:$0xf0]  ;;  %v4715_v57 = vor.u32 %v5054_v49, %v4712_v51  ;;  %v4719_v58 = vor.u32 %v5057_v53, %v4718_v52  ;;  %v4694_v59 = vld [vmem:[#allocation4 + $0x40] sm:$0xf] }
  0x21   :  { %v5052_v60 = vld [vmem:[#allocation4 + $0x4c] sm:$0xf0]  ;;  %v5050_v61 = vld [vmem:[#allocation4 + $0x44] sm:$0xf]  ;;  %v4723_v62 = vor.u32 %v5055_v54, %v4720_v55  ;;  %v4696_v63 = vld [vmem:[#allocation4 + $0x50] sm:$0xf0] }
  0x22   :  { %361 = vmatpush.bf16.msra.mxu0 %v4727_v44  ;;  %v4702_v0 = vld [vmem:[#allocation4 + $0x48] sm:$0xf]  ;;  %v5053_v1 = vld [vmem:[#allocation4 + $0x54] sm:$0xf0]  ;;  %v5051_v2 = vld [vmem:[#allocation4 + $0x4c] sm:$0xf]  ;;  %v4695_v4 = vor.u32 %v5052_v60, %v4694_v59  ;;  %v4699_v5 = vor.u32 %v5050_v61, %v4696_v63 }
  0x23   :  { %410 = vmatpush.bf16.msra.mxu1 %v4731_v45  ;;  %v4704_v3 = vld [vmem:[#allocation4 + $0x58] sm:$0xf0]  ;;  %v4703_v6 = vor.u32 %v5053_v1, %v4702_v0  ;;  %v4678_v7 = vld [vmem:[#allocation4 + $0x20] sm:$0xf]  ;;  %v5048_v8 = vld [vmem:[#allocation4 + $0x2c] sm:$0xf0] }
  0x24   :  { %459 = vmatpush.bf16.msra.mxu2 %v4735_v46  ;;  %508 = vmatpush.bf16.msra.mxu3 %v4739_v50  ;;  %v5046_v9 = vld [vmem:[#allocation4 + $0x24] sm:$0xf]  ;;  %v4707_v10 = vor.u32 %v5051_v2, %v4704_v3  ;;  %v4680_v11 = vld [vmem:[#allocation4 + $0x30] sm:$0xf0]  ;;  %v4686_v12 = vld [vmem:[#allocation4 + $0x28] sm:$0xf]  ;;  %v4679_v16 = vor.u32 %v5048_v8, %v4678_v7 }
  0x25   :  { %v5049_v13 = vld [vmem:[#allocation4 + $0x34] sm:$0xf0]  ;;  %v5047_v14 = vld [vmem:[#allocation4 + $0x2c] sm:$0xf]  ;;  %v4688_v15 = vld [vmem:[#allocation4 + $0x38] sm:$0xf0]  ;;  %v4683_v18 = vor.u32 %v5046_v9, %v4680_v11 }
  0x26   :  { %362 = vmatpush.bf16.msra.mxu0 %v4711_v56  ;;  %v4662_v17 = vld [vmem:[#allocation4] sm:$0xf]  ;;  %v4687_v19 = vor.u32 %v5049_v13, %v4686_v12  ;;  %v5044_v20 = vld [vmem:[#allocation4 + $0xc] sm:$0xf0]  ;;  %v5042_v21 = vld [vmem:[#allocation4 + $0x4] sm:$0xf]  ;;  %v4691_v23 = vor.u32 %v5047_v14, %v4688_v15 }
  0x27   :  { %411 = vmatpush.bf16.msra.mxu1 %v4715_v57  ;;  %v4664_v22 = vld [vmem:[#allocation4 + $0x10] sm:$0xf0]  ;;  %v4670_v24 = vld [vmem:[#allocation4 + $0x8] sm:$0xf]  ;;  %v5045_v25 = vld [vmem:[#allocation4 + $0x14] sm:$0xf0]  ;;  %v4663_v30 = vor.u32 %v5044_v20, %v4662_v17 }
  0x28   :  { %460 = vmatpush.bf16.msra.mxu2 %v4719_v58  ;;  %509 = vmatpush.bf16.msra.mxu3 %v4723_v62  ;;  %v5043_v26 = vld [vmem:[#allocation4 + $0xc] sm:$0xf]  ;;  %v4672_v27 = vld [vmem:[#allocation4 + $0x18] sm:$0xf0]  ;;  %v4926_v28 = vld [vmem:[#allocation8 + $0xe0] sm:$0xf]  ;;  %v4667_v33 = vor.u32 %v5042_v21, %v4664_v22  ;;  %v4671_v34 = vor.u32 %v5045_v25, %v4670_v24 }
  0x29   :  { %v5110_v29 = vld [vmem:[#allocation8 + $0xec] sm:$0xf0]  ;;  %v5108_v31 = vld [vmem:[#allocation8 + $0xe4] sm:$0xf]  ;;  %v4928_v32 = vld [vmem:[#allocation8 + $0xf0] sm:$0xf0]  ;;  %v4675_v36 = vor.u32 %v5043_v26, %v4672_v27 }
  0x2a   :  { %363 = vmatpush.bf16.msra.mxu0 %v4695_v4  ;;  %v5034_v35 = vld [vmem:[%s8612_s0] sm:$0xff]  ;;  %v4927_v37 = vor.u32 %v5110_v29, %v4926_v28  ;;  %v5109_v38 = vld [vmem:[#allocation8 + $0xec] sm:$0xf]  ;;  %v4934_v39 = vld [vmem:[#allocation8 + $0xe8] sm:$0xf]  ;;  %v4931_v41 = vor.u32 %v5108_v31, %v4928_v32 }
  0x2b   :  { %412 = vmatpush.bf16.msra.mxu1 %v4699_v5  ;;  %v5111_v40 = vld [vmem:[#allocation8 + $0xf4] sm:$0xf0]  ;;  %v4936_v42 = vld [vmem:[#allocation8 + $0xf8] sm:$0xf0]  ;;  %v4910_v43 = vld [vmem:[#allocation8 + $0xc0] sm:$0xf] }
  0x2c   :  { %461 = vmatpush.bf16.msra.mxu2 %v4703_v6  ;;  %510 = vmatpush.bf16.msra.mxu3 %v4707_v10  ;;  %v5106_v44 = vld [vmem:[#allocation8 + $0xcc] sm:$0xf0]  ;;  %v5104_v45 = vld [vmem:[#allocation8 + $0xc4] sm:$0xf]  ;;  %v4912_v46 = vld [vmem:[#allocation8 + $0xd0] sm:$0xf0]  ;;  %v4935_v47 = vor.u32 %v5111_v40, %v4934_v39  ;;  %v4939_v48 = vor.u32 %v5109_v38, %v4936_v42 }
  0x2d   :  { %v4911_v49 = vor.u32 %v5106_v44, %v4910_v43  ;;  %v4918_v50 = vld [vmem:[#allocation8 + $0xc8] sm:$0xf]  ;;  %v5107_v51 = vld [vmem:[#allocation8 + $0xd4] sm:$0xf0]  ;;  %v4915_v52 = vor.u32 %v5104_v45, %v4912_v46  ;;  %v5105_v53 = vld [vmem:[#allocation8 + $0xcc] sm:$0xf] }
  0x2e   :  { %364 = vmatpush.bf16.msra.mxu0 %v4679_v16  ;;  %v4920_v54 = vld [vmem:[#allocation8 + $0xd8] sm:$0xf0]  ;;  %v4919_v55 = vor.u32 %v5107_v51, %v4918_v50  ;;  %v4894_v56 = vld [vmem:[#allocation8 + $0xa0] sm:$0xf]  ;;  %v5102_v57 = vld [vmem:[#allocation8 + $0xac] sm:$0xf0] }
  0x2f   :  { %413 = vmatpush.bf16.msra.mxu1 %v4683_v18  ;;  %v5100_v58 = vld [vmem:[#allocation8 + $0xa4] sm:$0xf]  ;;  %v4923_v59 = vor.u32 %v5105_v53, %v4920_v54  ;;  %v4895_v60 = vor.u32 %v5102_v57, %v4894_v56  ;;  %v4896_v61 = vld [vmem:[#allocation8 + $0xb0] sm:$0xf0]  ;;  %v5101_v62 = vld [vmem:[#allocation8 + $0xac] sm:$0xf] }
  0x30   :  { %462 = vmatpush.bf16.msra.mxu2 %v4687_v19  ;;  %511 = vmatpush.bf16.msra.mxu3 %v4691_v23  ;;  %v4899_v63 = vor.u32 %v5100_v58, %v4896_v61  ;;  %v4904_v0 = vld [vmem:[#allocation8 + $0xb8] sm:$0xf0]  ;;  %v4902_v1 = vld [vmem:[#allocation8 + $0xa8] sm:$0xf]  ;;  %v5103_v2 = vld [vmem:[#allocation8 + $0xb4] sm:$0xf0] }
  0x31   :  { %v4903_v3 = vor.u32 %v5103_v2, %v4902_v1  ;;  %v4907_v4 = vor.u32 %v5101_v62, %v4904_v0  ;;  %v5035_v5 = vld [vmem:[%s8612_s0 + $0x8] sm:$0xff]  ;;  %v4878_v6 = vld [vmem:[#allocation8 + $0x80] sm:$0xf]  ;;  %v5098_v7 = vld [vmem:[#allocation8 + $0x8c] sm:$0xf0] }
  0x32   :  { %365 = vmatpush.bf16.msra.mxu0 %v4663_v30  ;;  %v5096_v8 = vld [vmem:[#allocation8 + $0x84] sm:$0xf]  ;;  %v4879_v9 = vor.u32 %v5098_v7, %v4878_v6  ;;  %v4880_v10 = vld [vmem:[#allocation8 + $0x90] sm:$0xf0]  ;;  %v5097_v11 = vld [vmem:[#allocation8 + $0x8c] sm:$0xf] }
  0x33   :  { %414 = vmatpush.bf16.msra.mxu1 %v4667_v33  ;;  %v4888_v12 = vld [vmem:[#allocation8 + $0x98] sm:$0xf0]  ;;  %v4883_v13 = vor.u32 %v5096_v8, %v4880_v10  ;;  %v4886_v15 = vld [vmem:[#allocation8 + $0x88] sm:$0xf]  ;;  %v5099_v16 = vld [vmem:[#allocation8 + $0x94] sm:$0xf0] }
  0x34   :  { %463 = vmatpush.bf16.msra.mxu2 %v4671_v34  ;;  %512 = vmatpush.bf16.msra.mxu3 %v4675_v36  ;;  %v4891_v14 = vor.u32 %v5097_v11, %v4888_v12  ;;  %v4887_v17 = vor.u32 %v5099_v16, %v4886_v15  ;;  %v5036_v18 = vld [vmem:[%s8612_s0 + $0x10] sm:$0xff]  ;;  %v4862_v19 = vld [vmem:[#allocation8 + $0x60] sm:$0xf]  ;;  %v5092_v21 = vld [vmem:[#allocation8 + $0x64] sm:$0xf] }
  0x35   :  { %366 = vmatmul.bf16.vlgmr.msra.gmra.mxu0 %v5034_v35  ;;  %v5094_v20 = vld [vmem:[#allocation8 + $0x6c] sm:$0xf0]  ;;  %v4864_v23 = vld [vmem:[#allocation8 + $0x70] sm:$0xf0]  ;;  %v5093_v24 = vld [vmem:[#allocation8 + $0x6c] sm:$0xf] }
  0x36   :  { %868 = vmatpush.bf16.msrb.mxu0 %v4927_v37  ;;  %415 = vmatmul.bf16.vlgmr.msra.gmra.mxu1 %v5034_v35  ;;  %v4863_v22 = vor.u32 %v5094_v20, %v4862_v19  ;;  %v4872_v25 = vld [vmem:[#allocation8 + $0x78] sm:$0xf0]  ;;  %v4867_v26 = vor.u32 %v5092_v21, %v4864_v23  ;;  %v4870_v28 = vld [vmem:[#allocation8 + $0x68] sm:$0xf]  ;;  %v5095_v29 = vld [vmem:[#allocation8 + $0x74] sm:$0xf0] }
  0x37   :  { %907 = vmatpush.bf16.msrb.mxu1 %v4931_v41  ;;  %464 = vmatmul.bf16.vlgmr.msra.gmra.mxu2 %v5034_v35  ;;  %v4875_v27 = vor.u32 %v5093_v24, %v4872_v25  ;;  %v4871_v30 = vor.u32 %v5095_v29, %v4870_v28  ;;  %v5037_v31 = vld [vmem:[%s8612_s0 + $0x18] sm:$0xff]  ;;  %v4846_v32 = vld [vmem:[#allocation8 + $0x40] sm:$0xf]  ;;  %v5090_v33 = vld [vmem:[#allocation8 + $0x4c] sm:$0xf0] }
  0x38   :  { %513 = vmatmul.bf16.vlgmr.msra.gmra.mxu3 %v5034_v35  ;;  %946 = vmatpush.bf16.msrb.mxu2 %v4935_v47  ;;  %v5088_v34 = vld [vmem:[#allocation8 + $0x44] sm:$0xf]  ;;  %v4847_v35 = vor.u32 %v5090_v33, %v4846_v32  ;;  %v4848_v36 = vld [vmem:[#allocation8 + $0x50] sm:$0xf0]  ;;  %v5089_v37 = vld [vmem:[#allocation8 + $0x4c] sm:$0xf] }
  0x39   :  { %985 = vmatpush.bf16.msrb.mxu3 %v4939_v48  ;;  %v4856_v38 = vld [vmem:[#allocation8 + $0x58] sm:$0xf0]  ;;  %v4851_v39 = vor.u32 %v5088_v34, %v4848_v36  ;;  %v4854_v41 = vld [vmem:[#allocation8 + $0x48] sm:$0xf]  ;;  %v5091_v42 = vld [vmem:[#allocation8 + $0x54] sm:$0xf0] }
  0x3a   :  { %869 = vmatpush.bf16.msrb.mxu0 %v4911_v49  ;;  %v4859_v40 = vor.u32 %v5089_v37, %v4856_v38  ;;  %v4855_v43 = vor.u32 %v5091_v42, %v4854_v41  ;;  %v5038_v44 = vld [vmem:[%s8612_s0 + $0x20] sm:$0xff]  ;;  %v5086_v46 = vld [vmem:[#allocation8 + $0x2c] sm:$0xf0]  ;;  %v4832_v49 = vld [vmem:[#allocation8 + $0x30] sm:$0xf0] }
  0x3b   :  { %908 = vmatpush.bf16.msrb.mxu1 %v4915_v52  ;;  %v4830_v45 = vld [vmem:[#allocation8 + $0x20] sm:$0xf]  ;;  %v5084_v47 = vld [vmem:[#allocation8 + $0x24] sm:$0xf]  ;;  %v5085_v50 = vld [vmem:[#allocation8 + $0x2c] sm:$0xf] }
  0x3c   :  { %947 = vmatpush.bf16.msrb.mxu2 %v4919_v55  ;;  %v4831_v48 = vor.u32 %v5086_v46, %v4830_v45  ;;  %v4840_v51 = vld [vmem:[#allocation8 + $0x38] sm:$0xf0]  ;;  %v4835_v52 = vor.u32 %v5084_v47, %v4832_v49  ;;  %v4838_v54 = vld [vmem:[#allocation8 + $0x28] sm:$0xf]  ;;  %v5087_v55 = vld [vmem:[#allocation8 + $0x34] sm:$0xf0] }
  0x3d   :  { %986 = vmatpush.bf16.msrb.mxu3 %v4923_v59  ;;  %v4843_v53 = vor.u32 %v5085_v50, %v4840_v51  ;;  %v4839_v56 = vor.u32 %v5087_v55, %v4838_v54  ;;  %v5039_v57 = vld [vmem:[%s8612_s0 + $0x28] sm:$0xff]  ;;  %v4814_v58 = vld [vmem:[#allocation8] sm:$0xf]  ;;  %v5082_v59 = vld [vmem:[#allocation8 + $0xc] sm:$0xf0] }
  0x3e   :  { %870 = vmatpush.bf16.msrb.mxu0 %v4895_v60  ;;  %v5080_v60 = vld [vmem:[#allocation8 + $0x4] sm:$0xf]  ;;  %v4815_v61 = vor.u32 %v5082_v59, %v4814_v58  ;;  %v4816_v62 = vld [vmem:[#allocation8 + $0x10] sm:$0xf0]  ;;  %v4824_v0 = vld [vmem:[#allocation8 + $0x18] sm:$0xf0] }
  0x3f   :  { %909 = vmatpush.bf16.msrb.mxu1 %v4899_v63  ;;  %v5081_v63 = vld [vmem:[#allocation8 + $0xc] sm:$0xf]  ;;  %v4819_v1 = vor.u32 %v5080_v60, %v4816_v62  ;;  %v5985_v7 = vld [vmem:[#allocation6 + $0x1e0] sm:$0xff]  ;;  %v5041_v12 = vld [vmem:[%s8612_s0 + $0x38] sm:$0xff] }
  0x40   :  { %948 = vmatpush.bf16.msrb.mxu2 %v4903_v3  ;;  %v4827_v2 = vor.u32 %v5081_v63, %v4824_v0  ;;  %v5040_v3 = vld [vmem:[%s8612_s0 + $0x30] sm:$0xff]  ;;  %8834 = vst [vmem:[#allocation14_spill] sm:$0xff] %v5985_v7  ;;  %v5987_v8 = vld [vmem:[#allocation6 + $0x1e8] sm:$0xff]  ;;  %v5993_v10 = vld [vmem:[#allocation6 + $0x1c0] sm:$0xff] }
  0x41   :  { %987 = vmatpush.bf16.msrb.mxu3 %v4907_v4  ;;  %v4822_v4 = vld [vmem:[#allocation8 + $0x8] sm:$0xf]  ;;  %v6009_v16 = vld [vmem:[#allocation6 + $0x1f0] sm:$0xff]  ;;  %v140_v20 = vld [vmem:[%s8616_s4] sm:$0xf] }
  0x42   :  { %871 = vmatpush.bf16.msrb.mxu0 %v4879_v9  ;;  %v5991_v9 = vld [vmem:[#allocation6 + $0x1f8] sm:$0xff]  ;;  %v5995_v11 = vld [vmem:[#allocation6 + $0x1c8] sm:$0xff]  ;;  %v6027_v21 = vld [vmem:[#allocation6 + $0x1d0] sm:$0xff]  ;;  %v6033_v24 = vperm.slane %v140_v20, 0  ;;  %v6052_v34 = vperm.slane %v140_v20, 2  ;;  %v6060_v38 = vperm.slane %v140_v20, 3 }
  0x43   :  { %910 = vmatpush.bf16.msrb.mxu1 %v4883_v13  ;;  %8835 = vst [vmem:[#allocation15_spill] sm:$0xff] %v5995_v11  ;;  %v6003_v13 = vld [vmem:[#allocation6 + $0x1d8] sm:$0xff]  ;;  %v6007_v15 = vld [vmem:[#allocation6 + $0x1a8] sm:$0xff]  ;;  %v6031_v23 = vld [vmem:[#allocation6 + $0x160] sm:$0xff] }
  0x44   :  { %949 = vmatpush.bf16.msrb.mxu2 %v4887_v17  ;;  %v6012_v17 = vld [vmem:[#allocation6 + $0x1b8] sm:$0xff]  ;;  %v6016_v19 = vld [vmem:[#allocation6 + $0x188] sm:$0xff]  ;;  %8836 = vst [vmem:[#allocation16_spill] sm:$0xff] %v6033_v24  ;;  %v6048_v32 = vld [vmem:[#allocation6 + $0x1b0] sm:$0xff] }
  0x45   :  { %371 = vmatmul.bf16.gmra.mxu0 %v5035_v5  ;;  %988 = vmatpush.bf16.msrb.mxu3 %v4891_v14  ;;  %v6005_v14 = vld [vmem:[#allocation6 + $0x1a0] sm:$0xff]  ;;  %v6037_v25 = vld [vmem:[#allocation6 + $0x168] sm:$0xff]  ;;  %8839 = vst [vmem:[#allocation19_spill] sm:$0xff] %v6052_v34  ;;  %v6075_v49 = vld [vmem:[#allocation6 + $0x158] sm:$0xff] }
  0x46   :  { %420 = vmatmul.bf16.gmra.mxu1 %v5035_v5  ;;  %872 = vmatpush.bf16.msrb.mxu0 %v4863_v22  ;;  %v6029_v22 = vld [vmem:[#allocation6 + $0x198] sm:$0xff]  ;;  %v6056_v36 = vld [vmem:[#allocation6 + $0x140] sm:$0xff]  ;;  %v6058_v37 = vld [vmem:[#allocation6 + $0x148] sm:$0xff]  ;;  %8841 = vst [vmem:[#allocation21_spill] sm:$0xff] %v6060_v38 }
  0x47   :  { %469 = vmatmul.bf16.gmra.mxu2 %v5035_v5  ;;  %911 = vmatpush.bf16.msrb.mxu1 %v4867_v26  ;;  %v6039_v26 = vperm.slane %v140_v20, 1  ;;  %8840 = vst [vmem:[#allocation20_spill] sm:$0xff] %v6056_v36  ;;  %v6077_v50 = vld [vmem:[#allocation6 + $0x120] sm:$0xff]  ;;  %v6079_v51 = vld [vmem:[#allocation6 + $0x128] sm:$0xff]  ;;  %v6087_v54 = vld [vmem:[#allocation6 + $0x138] sm:$0xff] }
  0x48   :  { %518 = vmatmul.bf16.gmra.mxu3 %v5035_v5  ;;  %950 = vmatpush.bf16.msrb.mxu2 %v4871_v30  ;;  %v5083_v5 = vld [vmem:[#allocation8 + $0x14] sm:$0xf0]  ;;  %v6089_v55 = vld [vmem:[#allocation6 + $0x100] sm:$0xff]  ;;  %v5075_v58 = vld [vmem:[%s8613_s1 + $0x8] sm:$0xff] }
  0x49   :  { %989 = vmatpush.bf16.msrb.mxu3 %v4875_v27  ;;  %v4823_v6 = vor.u32 %v5083_v5, %v4822_v4  ;;  %8837 = vst [vmem:[#allocation17_spill] sm:$0xff] %v6039_v26  ;;  %v5074_v27 = vld [vmem:[%s8613_s1] sm:$0xff]  ;;  %v6109_v4 = vld [vmem:[#allocation6 + $0x150] sm:$0xff]  ;;  %v6111_v5 = vld [vmem:[#allocation6 + $0x118] sm:$0xff] }
  0x4a   :  { %873 = vmatpush.bf16.msrb.mxu0 %v4847_v35  ;;  %v6054_v35 = vld [vmem:[#allocation6 + $0x178] sm:$0xff] }
  0x4b   :  { %912 = vmatpush.bf16.msrb.mxu1 %v4851_v39  ;;  %v6063_v39 = vld [vmem:[#allocation6 + $0x190] sm:$0xff] }
  0x4c   :  { %951 = vmatpush.bf16.msrb.mxu2 %v4855_v43 }
  0x4d   :  { %990 = vmatpush.bf16.msrb.mxu3 %v4859_v40 }
  0x4e   :  { %874 = vmatpush.bf16.msrb.mxu0 %v4831_v48 }
  0x4f   :  { %913 = vmatpush.bf16.msrb.mxu1 %v4835_v52 }
  0x50   :  { %952 = vmatpush.bf16.msrb.mxu2 %v4839_v56  ;;  %v6093_v56 = vld [vmem:[#allocation6 + $0x108] sm:$0xff] }
  0x51   :  { %991 = vmatpush.bf16.msrb.mxu3 %v4843_v53  ;;  %v6085_v53 = vld [vmem:[#allocation6 + $0x170] sm:$0xff] }
  0x52   :  { %875 = vmatpush.bf16.msrb.mxu0 %v4815_v61 }
  0x53   :  { %914 = vmatpush.bf16.msrb.mxu1 %v4819_v1 }
  0x54   :  { %953 = vmatpush.bf16.msrb.mxu2 %v4823_v6  ;;  %v6114_v6 = vld [vmem:[#allocation6 + $0xe0] sm:$0xff] }
  0x55   :  { %376 = vmatmul.bf16.gmra.mxu0 %v5036_v18  ;;  %992 = vmatpush.bf16.msrb.mxu3 %v4827_v2 }
  0x56   :  { %425 = vmatmul.bf16.gmra.mxu1 %v5036_v18  ;;  %1215 = vmatpush.msra.mxu0 %v5985_v7 }
  0x57   :  { %474 = vmatmul.bf16.gmra.mxu2 %v5036_v18  ;;  %1238 = vmatpush.msra.mxu1 %v5987_v8 }
  0x58   :  { %523 = vmatmul.bf16.gmra.mxu3 %v5036_v18  ;;  %1216 = vmatpush.msra.mxu0 %v5993_v10  ;;  %v6014_v18 = vld [vmem:[#allocation6 + $0x180] sm:$0xff] }
  0x59   :  { %1284 = vmatpush.msra.mxu3 %v5991_v9  ;;  %1239 = vmatpush.msra.mxu1 %v5995_v11 }
  0x5a   :  { %1217 = vmatpush.msra.mxu0 %v6005_v14  ;;  %1261 = vmatpush.msra.mxu2 %v6009_v16 }
  0x5b   :  { %1285 = vmatpush.msra.mxu3 %v6003_v13  ;;  %1240 = vmatpush.msra.mxu1 %v6007_v15 }
  0x5c   :  { %1218 = vmatpush.msra.mxu0 %v6014_v18  ;;  %1262 = vmatpush.msra.mxu2 %v6027_v21 }
  0x5d   :  { %1286 = vmatpush.msra.mxu3 %v6012_v17  ;;  %1241 = vmatpush.msra.mxu1 %v6016_v19 }
  0x5e   :  { %1219 = vmatpush.msra.mxu0 %v6031_v23  ;;  %1263 = vmatpush.msra.mxu2 %v6048_v32 }
  0x5f   :  { %1287 = vmatpush.msra.mxu3 %v6029_v22  ;;  %1242 = vmatpush.msra.mxu1 %v6037_v25 }
  0x60   :  { %1220 = vmatpush.msra.mxu0 %v6056_v36  ;;  %1264 = vmatpush.msra.mxu2 %v6063_v39 }
  0x61   :  { %1288 = vmatpush.msra.mxu3 %v6054_v35  ;;  %1243 = vmatpush.msra.mxu1 %v6058_v37 }
  0x62   :  { %1221 = vmatpush.msra.mxu0 %v6077_v50  ;;  %1265 = vmatpush.msra.mxu2 %v6085_v53 }
  0x63   :  { %1289 = vmatpush.msra.mxu3 %v6075_v49  ;;  %1244 = vmatpush.msra.mxu1 %v6079_v51 }
  0x64   :  { %1222 = vmatpush.msra.mxu0 %v6089_v55  ;;  %1266 = vmatpush.msra.mxu2 %v6109_v4 }
  0x65   :  { %381 = vmatmul.bf16.gmra.mxu0 %v5037_v31  ;;  %1290 = vmatpush.msra.mxu3 %v6087_v54 }
  0x66   :  { %430 = vmatmul.bf16.gmra.mxu1 %v5037_v31  ;;  %1223 = vmatpush.msra.mxu0 %v6114_v6 }
  0x67   :  { %479 = vmatmul.bf16.gmra.mxu2 %v5037_v31  ;;  %1245 = vmatpush.msra.mxu1 %v6093_v56 }
  0x68   :  { %528 = vmatmul.bf16.gmra.mxu3 %v5037_v31 }
  0x69   :  { %1291 = vmatpush.msra.mxu3 %v6111_v5 }
  0x75   :  { %386 = vmatmul.bf16.gmra.mxu0 %v5038_v44 }
  0x76   :  { %435 = vmatmul.bf16.gmra.mxu1 %v5038_v44 }
  0x77   :  { %484 = vmatmul.bf16.gmra.mxu2 %v5038_v44 }
  0x78   :  { %533 = vmatmul.bf16.gmra.mxu3 %v5038_v44 }
  0x85   :  { %391 = vmatmul.bf16.gmra.mxu0 %v5039_v57 }
  0x86   :  { %440 = vmatmul.bf16.gmra.mxu1 %v5039_v57 }
  0x87   :  { %489 = vmatmul.bf16.gmra.mxu2 %v5039_v57 }
  0x88   :  { %538 = vmatmul.bf16.gmra.mxu3 %v5039_v57 }
  0x95   :  { %396 = vmatmul.bf16.gmra.mxu0 %v5040_v3 }
  0x96   :  { %445 = vmatmul.bf16.gmra.mxu1 %v5040_v3 }
  0x97   :  { %494 = vmatmul.bf16.gmra.mxu2 %v5040_v3 }
  0x98   :  { %543 = vmatmul.bf16.gmra.mxu3 %v5040_v3 }
  0xa5   :  { %401 = vmatmul.bf16.gmra.mxu0 %v5041_v12 }
  0xa6   :  { %450 = vmatmul.bf16.gmra.mxu1 %v5041_v12 }
  0xa7   :  { %499 = vmatmul.bf16.gmra.mxu2 %v5041_v12 }
  0xa8   :  { %548 = vmatmul.bf16.gmra.mxu3 %v5041_v12  ;;  %v6116_v12 = vld [vmem:[#allocation6 + $0xe8] sm:$0xff] }
  0xa9   :  { %1246 = vmatpush.msra.mxu1 %v6116_v12 }
  0xb2   :  { %v367_v28 = vpop.f32.mrf.mxu0 }
  0xb3   :  { %v368_v29 = vadd.f32 %v367_v28, %v6033_v24  ;;  %v416_v30 = vpop.f32.mrf.mxu1 }
  0xb4   :  { %v417_v31 = vadd.f32 %v416_v30, %v6039_v26 }
  0xb5   :  { %876 = vmatmul.bf16.vlgmr.msrb.gmra.mxu0 %v5074_v27 }
  0xb6   :  { %v6050_v33 = vpack.c.bf16 %v417_v31, %v368_v29  ;;  %915 = vmatmul.bf16.vlgmr.msrb.gmra.mxu1 %v5074_v27 }
  0xb7   :  { %954 = vmatmul.bf16.vlgmr.msrb.gmra.mxu2 %v5074_v27 }
  0xb8   :  { %8838 = vst [vmem:[#allocation18_spill] sm:$0xff] %v6050_v33  ;;  %993 = vmatmul.bf16.vlgmr.msrb.gmra.mxu3 %v5074_v27 }
  0xba   :  { %v465_v40 = vpop.f32.mrf.mxu2  ;;  %v369_v43 = vpop.f32.mrf.mxu0 }
  0xbb   :  { %v466_v41 = vadd.f32 %v465_v40, %v6052_v34  ;;  %v514_v42 = vpop.f32.mrf.mxu3  ;;  %v370_v45 = vadd.f32 %v369_v43, %v6033_v24  ;;  %v418_v46 = vpop.f32.mrf.mxu1  ;;  %v6127_v43 = vld [vmem:[#allocation6 + $0x130] sm:$0xff] }
  0xbc   :  { %v515_v44 = vadd.f32 %v514_v42, %v6060_v38  ;;  %v419_v47 = vadd.f32 %v418_v46, %v6039_v26  ;;  %1267 = vmatpush.msra.mxu2 %v6127_v43  ;;  %v6134_v46 = vld [vmem:[#allocation6 + $0xc0] sm:$0xff] }
  0xbd   :  { %1224 = vmatpush.msra.mxu0 %v6134_v46 }
  0xbe   :  { %v6073_v48 = vpack.c.bf16 %v515_v44, %v466_v41  ;;  %v6081_v52 = vpack.c.bf16 %v419_v47, %v370_v45  ;;  %v6132_v45 = vld [vmem:[#allocation6 + $0xf8] sm:$0xff]  ;;  %v6136_v47 = vld [vmem:[#allocation6 + $0xc8] sm:$0xff] }
  0xbf   :  { %1292 = vmatpush.msra.mxu3 %v6132_v45  ;;  %1247 = vmatpush.msra.mxu1 %v6136_v47 }
  0xc0   :  { %8842 = vst [vmem:[#allocation22_spill] sm:$0xff] %v6073_v48  ;;  %v6256_v48 = vld [vmem:[#allocation6 + $0x50] sm:$0xff] }
  0xc1   :  { %8843 = vst [vmem:[#allocation23_spill] sm:$0xff] %v6081_v52  ;;  %v6213_v52 = vld [vmem:[#allocation6 + $0x48] sm:$0xff] }
  0xc2   :  { %v467_v57 = vpop.f32.mrf.mxu2  ;;  %v372_v61 = vpop.f32.mrf.mxu0 }
  0xc3   :  { %v468_v59 = vadd.f32 %v467_v57, %v6052_v34  ;;  %v516_v60 = vpop.f32.mrf.mxu3  ;;  %v373_v63 = vadd.f32 %v372_v61, %v6033_v24  ;;  %v421_v0 = vpop.f32.mrf.mxu1  ;;  %v6140_v57 = vld [vmem:[#allocation6 + $0x110] sm:$0xff] }
  0xc4   :  { %v517_v62 = vadd.f32 %v516_v60, %v6060_v38  ;;  %v422_v1 = vadd.f32 %v421_v0, %v6039_v26  ;;  %1268 = vmatpush.msra.mxu2 %v6140_v57 }
  0xc5   :  { %881 = vmatmul.bf16.gmra.mxu0 %v5075_v58 }
  0xc6   :  { %v6105_v2 = vpack.c.bf16 %v517_v62, %v468_v59  ;;  %v6107_v3 = vpack.c.bf16 %v422_v1, %v373_v63  ;;  %920 = vmatmul.bf16.gmra.mxu1 %v5075_v58  ;;  %v5076_v59 = vld [vmem:[%s8613_s1 + $0x10] sm:$0xff] }
  0xc7   :  { %959 = vmatmul.bf16.gmra.mxu2 %v5075_v58 }
  0xc8   :  { %8844 = vst [vmem:[#allocation24_spill] sm:$0xff] %v6105_v2  ;;  %998 = vmatmul.bf16.gmra.mxu3 %v5075_v58  ;;  %v6211_v2 = vld [vmem:[#allocation6 + $0x40] sm:$0xff] }
  0xc9   :  { %8845 = vst [vmem:[#allocation25_spill] sm:$0xff] %v6107_v3  ;;  %v6209_v3 = vld [vmem:[#allocation6 + $0x78] sm:$0xff] }
  0xca   :  { %v470_v20 = vpop.f32.mrf.mxu2  ;;  %v374_v29 = vpop.f32.mrf.mxu0 }
  0xcb   :  { %v471_v27 = vadd.f32 %v470_v20, %v6052_v34  ;;  %v519_v28 = vpop.f32.mrf.mxu3  ;;  %v375_v31 = vadd.f32 %v374_v29, %v6033_v24  ;;  %v423_v40 = vpop.f32.mrf.mxu1  ;;  %v6155_v20 = vld [vmem:[#allocation6 + $0xd8] sm:$0xff]  ;;  %v6161_v29 = vld [vmem:[#allocation6 + $0xf0] sm:$0xff]  ;;  %v6188_v24 = vld [vmem:[#allocation6 + $0x60] sm:$0xff] }
  0xcc   :  { %v520_v30 = vadd.f32 %v519_v28, %v6060_v38  ;;  %v424_v41 = vadd.f32 %v423_v40, %v6039_v26  ;;  %v6159_v28 = vld [vmem:[#allocation6 + $0xa8] sm:$0xff]  ;;  %1293 = vmatpush.msra.mxu3 %v6155_v20  ;;  %1269 = vmatpush.msra.mxu2 %v6161_v29  ;;  %v6184_v26 = vld [vmem:[#allocation6 + $0xd0] sm:$0xff] }
  0xcd   :  { %v6168_v40 = vld [vmem:[#allocation6 + $0x88] sm:$0xff]  ;;  %1248 = vmatpush.msra.mxu1 %v6159_v28 }
  0xce   :  { %v6125_v42 = vpack.c.bf16 %v520_v30, %v471_v27  ;;  %v6129_v44 = vpack.c.bf16 %v424_v41, %v375_v31  ;;  %v6157_v27 = vld [vmem:[#allocation6 + $0xa0] sm:$0xff]  ;;  %v6164_v30 = vld [vmem:[#allocation6 + $0xb8] sm:$0xff]  ;;  %1270 = vmatpush.msra.mxu2 %v6184_v26 }
  0xcf   :  { %1225 = vmatpush.msra.mxu0 %v6157_v27  ;;  %v6166_v31 = vld [vmem:[#allocation6 + $0x80] sm:$0xff]  ;;  %1294 = vmatpush.msra.mxu3 %v6164_v30 }
  0xd0   :  { %8846 = vst [vmem:[#allocation26_spill] sm:$0xff] %v6125_v42  ;;  %1249 = vmatpush.msra.mxu1 %v6168_v40  ;;  %v6207_v42 = vld [vmem:[#allocation6 + $0xb0] sm:$0xff] }
  0xd1   :  { %8847 = vst [vmem:[#allocation27_spill] sm:$0xff] %v6129_v44  ;;  %1226 = vmatpush.msra.mxu0 %v6166_v31  ;;  %1271 = vmatpush.msra.mxu2 %v6207_v42 }
  0xd2   :  { %v472_v58 = vpop.f32.mrf.mxu2  ;;  %v6148_v62 = vpop.f32.mrf.mxu0 }
  0xd3   :  { %v473_v60 = vadd.f32 %v472_v58, %v6052_v34  ;;  %v521_v61 = vpop.f32.mrf.mxu3  ;;  %8848 = vst [vmem:[#allocation28_spill] sm:$0xff] %v6148_v62  ;;  %v6151_v0 = vpop.f32.mrf.mxu1  ;;  %v6186_v62 = vld [vmem:[#allocation6 + $0x98] sm:$0xff]  ;;  %1227 = vmatpush.msra.mxu0 %v6188_v24 }
  0xd4   :  { %v522_v63 = vadd.f32 %v521_v61, %v6060_v38  ;;  %8849 = vst [vmem:[#allocation29_spill] sm:$0xff] %v6151_v0  ;;  %1295 = vmatpush.msra.mxu3 %v6186_v62 }
  0xd5   :  { %886 = vmatmul.bf16.gmra.mxu0 %v5076_v59 }
  0xd6   :  { %v6153_v1 = vpack.c.bf16 %v522_v63, %v473_v60  ;;  %925 = vmatmul.bf16.gmra.mxu1 %v5076_v59  ;;  %1296 = vmatpush.msra.mxu3 %v6209_v3 }
  0xd7   :  { %964 = vmatmul.bf16.gmra.mxu2 %v5076_v59  ;;  %1228 = vmatpush.msra.mxu0 %v6211_v2 }
  0xd8   :  { %8850 = vst [vmem:[#allocation30_spill] sm:$0xff] %v6153_v1  ;;  %1003 = vmatmul.bf16.gmra.mxu3 %v5076_v59 }
  0xda   :  { %v475_v41 = vpop.f32.mrf.mxu2  ;;  %v6175_v60 = vpop.f32.mrf.mxu0 }
  0xdb   :  { %v476_v58 = vadd.f32 %v475_v41, %v6052_v34  ;;  %v524_v59 = vpop.f32.mrf.mxu3  ;;  %8851 = vst [vmem:[#allocation31_spill] sm:$0xff] %v6175_v60  ;;  %v6180_v63 = vpop.f32.mrf.mxu1  ;;  %v6192_v41 = vld [vmem:[#allocation6 + $0x68] sm:$0xff] }
  0xdc   :  { %v525_v61 = vadd.f32 %v524_v59, %v6060_v38  ;;  %8852 = vst [vmem:[#allocation32_spill] sm:$0xff] %v6180_v63  ;;  %1250 = vmatpush.msra.mxu1 %v6192_v41 }
  0xde   :  { %v6182_v0 = vpack.c.bf16 %v525_v61, %v476_v58  ;;  %v5077_v58 = vld [vmem:[%s8613_s1 + $0x18] sm:$0xff]  ;;  %1251 = vmatpush.msra.mxu1 %v6213_v52 }
  0xe0   :  { %8853 = vst [vmem:[#allocation33_spill] sm:$0xff] %v6182_v0 }
  0xe2   :  { %v477_v59 = vpop.f32.mrf.mxu2  ;;  %v6200_v63 = vpop.f32.mrf.mxu0 }
  0xe3   :  { %v478_v61 = vadd.f32 %v477_v59, %v6052_v34  ;;  %v526_v0 = vpop.f32.mrf.mxu3  ;;  %8854 = vst [vmem:[#allocation34_spill] sm:$0xff] %v6200_v63  ;;  %v6203_v1 = vpop.f32.mrf.mxu1  ;;  %v6216_v59 = vld [vmem:[#allocation6 + $0x90] sm:$0xff]  ;;  %v6232_v34 = vld [vmem:[#allocation6 + $0x20] sm:$0xff]  ;;  %v6240_v63 = vld [vmem:[#allocation6 + $0x38] sm:$0xff] }
  0xe4   :  { %v527_v60 = vadd.f32 %v526_v0, %v6060_v38  ;;  %8855 = vst [vmem:[#allocation35_spill] sm:$0xff] %v6203_v1  ;;  %1272 = vmatpush.msra.mxu2 %v6216_v59  ;;  %v6234_v1 = vld [vmem:[#allocation6 + $0x28] sm:$0xff]  ;;  %1229 = vmatpush.msra.mxu0 %v6232_v34 }
  0xe5   :  { %891 = vmatmul.bf16.gmra.mxu0 %v5077_v58  ;;  %8862 = vst [vmem:[#allocation42_spill] sm:$0xff] %v6232_v34  ;;  %1252 = vmatpush.msra.mxu1 %v6234_v1 }
  0xe6   :  { %v6205_v44 = vpack.c.bf16 %v527_v60, %v478_v61  ;;  %930 = vmatmul.bf16.gmra.mxu1 %v5077_v58  ;;  %8863 = vst [vmem:[#allocation43_spill] sm:$0xff] %v6234_v1 }
  0xe7   :  { %969 = vmatmul.bf16.gmra.mxu2 %v5077_v58 }
  0xe8   :  { %8856 = vst [vmem:[#allocation36_spill] sm:$0xff] %v6205_v44  ;;  %1008 = vmatmul.bf16.gmra.mxu3 %v5077_v58  ;;  %v6230_v58 = vld [vmem:[#allocation6 + $0x58] sm:$0xff]  ;;  %v6242_v44 = vld [vmem:[#allocation6] sm:$0xff] }
  0xe9   :  { %8861 = vst [vmem:[#allocation41_spill] sm:$0xff] %v6230_v58  ;;  %1297 = vmatpush.msra.mxu3 %v6230_v58  ;;  %1230 = vmatpush.msra.mxu0 %v6242_v44 }
  0xea   :  { %v6220_v0 = vpop.f32.mrf.mxu2  ;;  %v6226_v61 = vpop.f32.mrf.mxu0  ;;  %8864 = vst [vmem:[#allocation44_spill] sm:$0xff] %v6242_v44 }
  0xeb   :  { %8857 = vst [vmem:[#allocation37_spill] sm:$0xff] %v6220_v0  ;;  %v6224_v60 = vpop.f32.mrf.mxu3  ;;  %v6228_v38 = vpop.f32.mrf.mxu1  ;;  %v6238_v0 = vld [vmem:[#allocation6 + $0x70] sm:$0xff]  ;;  %1298 = vmatpush.msra.mxu3 %v6240_v63  ;;  %1456 = vmatpush.msrb.mxu0 %v5985_v7 }
  0xec   :  { %8858 = vst [vmem:[#allocation38_spill] sm:$0xff] %v6224_v60  ;;  %1273 = vmatpush.msra.mxu2 %v6238_v0  ;;  %v5078_v60 = vld [vmem:[%s8613_s1 + $0x20] sm:$0xff]  ;;  %v6272_v7 = vld [vmem:[#allocation6 + $0x10] sm:$0xff] }
  0xed   :  { %8859 = vst [vmem:[#allocation39_spill] sm:$0xff] %v6226_v61  ;;  %1457 = vmatpush.msrb.mxu0 %v5993_v10 }
  0xee   :  { %8860 = vst [vmem:[#allocation40_spill] sm:$0xff] %v6228_v38  ;;  %v6246_v38 = vld [vmem:[#allocation6 + $0x8] sm:$0xff]  ;;  %1274 = vmatpush.msra.mxu2 %v6256_v48 }
  0xef   :  { %1253 = vmatpush.msra.mxu1 %v6246_v38  ;;  %1458 = vmatpush.msrb.mxu0 %v6005_v14 }
  0xf1   :  { %1479 = vmatpush.msrb.mxu1 %v5987_v8  ;;  %1459 = vmatpush.msrb.mxu0 %v6014_v18 }
  0xf2   :  { %v6250_v61 = vpop.f32.mrf.mxu2  ;;  %v6261_v1 = vpop.f32.mrf.mxu0 }
  0xf3   :  { %8865 = vst [vmem:[#allocation45_spill] sm:$0xff] %v6250_v61  ;;  %v6259_v33 = vpop.f32.mrf.mxu3  ;;  %v6265_v44 = vpop.f32.mrf.mxu1  ;;  %v6267_v61 = vld [vmem:[#allocation6 + $0x30] sm:$0xff]  ;;  %1480 = vmatpush.msrb.mxu1 %v5995_v11  ;;  %1460 = vmatpush.msrb.mxu0 %v6031_v23 }
  0xf4   :  { %8866 = vst [vmem:[#allocation46_spill] sm:$0xff] %v6259_v33  ;;  %1275 = vmatpush.msra.mxu2 %v6267_v61  ;;  %v6274_v33 = vld [vmem:[#allocation6 + $0x18] sm:$0xff] }
  0xf5   :  { %8867 = vst [vmem:[#allocation47_spill] sm:$0xff] %v6261_v1  ;;  %896 = vmatmul.bf16.gmra.mxu0 %v5078_v60  ;;  %1299 = vmatpush.msra.mxu3 %v6274_v33 }
  0xf6   :  { %8868 = vst [vmem:[#allocation48_spill] sm:$0xff] %v6265_v44  ;;  %935 = vmatmul.bf16.gmra.mxu1 %v5078_v60  ;;  %1276 = vmatpush.msra.mxu2 %v6272_v7 }
  0xf7   :  { %974 = vmatmul.bf16.gmra.mxu2 %v5078_v60  ;;  %1525 = vmatpush.msrb.mxu3 %v5991_v9 }
  0xf8   :  { %1013 = vmatmul.bf16.gmra.mxu3 %v5078_v60  ;;  %1502 = vmatpush.msrb.mxu2 %v6009_v16 }
  0xf9   :  { %1481 = vmatpush.msrb.mxu1 %v6007_v15  ;;  %1526 = vmatpush.msrb.mxu3 %v6003_v13 }
  0xfa   :  { %v6279_v44 = vpop.f32.mrf.mxu2  ;;  %v6285_v11 = vpop.f32.mrf.mxu0  ;;  %1503 = vmatpush.msrb.mxu2 %v6027_v21  ;;  %1461 = vmatpush.msrb.mxu0 %v6056_v36 }
  0xfb   :  { %8869 = vst [vmem:[#allocation49_spill] sm:$0xff] %v6279_v44  ;;  %v6283_v1 = vpop.f32.mrf.mxu3  ;;  %v6289_v60 = vpop.f32.mrf.mxu1  ;;  %1482 = vmatpush.msrb.mxu1 %v6016_v19  ;;  %1527 = vmatpush.msrb.mxu3 %v6012_v17 }
  0xfc   :  { %8870 = vst [vmem:[#allocation50_spill] sm:$0xff] %v6283_v1  ;;  %1504 = vmatpush.msrb.mxu2 %v6048_v32  ;;  %1462 = vmatpush.msrb.mxu0 %v6077_v50 }
  0xfd   :  { %8871 = vst [vmem:[#allocation51_spill] sm:$0xff] %v6285_v11  ;;  %1483 = vmatpush.msrb.mxu1 %v6037_v25  ;;  %1528 = vmatpush.msrb.mxu3 %v6029_v22  ;;  %v5079_v11 = vld [vmem:[%s8613_s1 + $0x28] sm:$0xff] }
  0xfe   :  { %8872 = vst [vmem:[#allocation52_spill] sm:$0xff] %v6289_v60  ;;  %1505 = vmatpush.msrb.mxu2 %v6063_v39  ;;  %1463 = vmatpush.msrb.mxu0 %v6089_v55 }
  0xff   :  { %1484 = vmatpush.msrb.mxu1 %v6058_v37  ;;  %1529 = vmatpush.msrb.mxu3 %v6054_v35 }
 0x100   :  { %1506 = vmatpush.msrb.mxu2 %v6085_v53  ;;  %1464 = vmatpush.msrb.mxu0 %v6114_v6 }
 0x101   :  { %1485 = vmatpush.msrb.mxu1 %v6079_v51  ;;  %1530 = vmatpush.msrb.mxu3 %v6075_v49 }
 0x102   :  { %v6303_v60 = vpop.f32.mrf.mxu2  ;;  %v6312_v44 = vpop.f32.mrf.mxu0  ;;  %1507 = vmatpush.msrb.mxu2 %v6109_v4  ;;  %1465 = vmatpush.msrb.mxu0 %v6134_v46 }
 0x103   :  { %8873 = vst [vmem:[#allocation53_spill] sm:$0xff] %v6303_v60  ;;  %v6310_v1 = vpop.f32.mrf.mxu3  ;;  %v6316_v36 = vpop.f32.mrf.mxu1  ;;  %1486 = vmatpush.msrb.mxu1 %v6093_v56  ;;  %1531 = vmatpush.msrb.mxu3 %v6087_v54  ;;  %v8885_v60 = vld [vmem:[#allocation43_spill] sm:$0xff] }
 0x104   :  { %8874 = vst [vmem:[#allocation54_spill] sm:$0xff] %v6310_v1  ;;  %1508 = vmatpush.msrb.mxu2 %v6127_v43  ;;  %1466 = vmatpush.msrb.mxu0 %v6157_v27 }
 0x105   :  { %8875 = vst [vmem:[#allocation55_spill] sm:$0xff] %v6312_v44  ;;  %901 = vmatmul.bf16.gmra.mxu0 %v5079_v11  ;;  %1532 = vmatpush.msrb.mxu3 %v6111_v5 }
 0x106   :  { %8876 = vst [vmem:[#allocation56_spill] sm:$0xff] %v6316_v36  ;;  %940 = vmatmul.bf16.gmra.mxu1 %v5079_v11  ;;  %1509 = vmatpush.msrb.mxu2 %v6140_v57 }
 0x107   :  { %979 = vmatmul.bf16.gmra.mxu2 %v5079_v11  ;;  %1487 = vmatpush.msrb.mxu1 %v6116_v12 }
 0x108   :  { %1018 = vmatmul.bf16.gmra.mxu3 %v5079_v11  ;;  %1510 = vmatpush.msrb.mxu2 %v6161_v29 }
 0x109   :  { %1533 = vmatpush.msrb.mxu3 %v6132_v45  ;;  %1488 = vmatpush.msrb.mxu1 %v6136_v47 }
 0x10a   :  { %v6326_v36 = vpop.f32.mrf.mxu2  ;;  %v6332_v1 = vpop.f32.mrf.mxu0  ;;  %1511 = vmatpush.msrb.mxu2 %v6184_v26  ;;  %1467 = vmatpush.msrb.mxu0 %v6166_v31 }
 0x10b   :  { %8877 = vst [vmem:[#allocation57_spill] sm:$0xff] %v6326_v36  ;;  %v6330_v44 = vpop.f32.mrf.mxu3  ;;  %v6336_v11 = vpop.f32.mrf.mxu1  ;;  %1534 = vmatpush.msrb.mxu3 %v6155_v20  ;;  %1489 = vmatpush.msrb.mxu1 %v6159_v28 }
 0x10c   :  { %8878 = vst [vmem:[#allocation58_spill] sm:$0xff] %v6330_v44  ;;  %1512 = vmatpush.msrb.mxu2 %v6207_v42  ;;  %1468 = vmatpush.msrb.mxu0 %v6188_v24 }
 0x10d   :  { %8879 = vst [vmem:[#allocation59_spill] sm:$0xff] %v6332_v1  ;;  %1535 = vmatpush.msrb.mxu3 %v6164_v30  ;;  %1490 = vmatpush.msrb.mxu1 %v6168_v40 }
 0x10e   :  { %8880 = vst [vmem:[#allocation60_spill] sm:$0xff] %v6336_v11  ;;  %1513 = vmatpush.msrb.mxu2 %v6216_v59  ;;  %1469 = vmatpush.msrb.mxu0 %v6211_v2 }
 0x10f   :  { %1536 = vmatpush.msrb.mxu3 %v6186_v62  ;;  %1491 = vmatpush.msrb.mxu1 %v6192_v41 }
 0x110   :  { %1514 = vmatpush.msrb.mxu2 %v6238_v0  ;;  %1470 = vmatpush.msrb.mxu0 %v6232_v34 }
 0x111   :  { %1537 = vmatpush.msrb.mxu3 %v6209_v3  ;;  %1492 = vmatpush.msrb.mxu1 %v6213_v52 }
 0x112   :  { %v6350_v11 = vpop.f32.mrf.mxu2  ;;  %v6356_v44 = vpop.f32.mrf.mxu0  ;;  %1515 = vmatpush.msrb.mxu2 %v6256_v48 }
 0x113   :  { %8881 = vst [vmem:[#allocation61_spill] sm:$0xff] %v6350_v11  ;;  %v6354_v1 = vpop.f32.mrf.mxu3  ;;  %v6360_v36 = vpop.f32.mrf.mxu1  ;;  %1538 = vmatpush.msrb.mxu3 %v6230_v58  ;;  %v5906_v11 = vmov 0.0   ;;  %1493 = vmatpush.msrb.mxu1 %v8885_v60  ;;  %v8890_v60 = vld [vmem:[#allocation14_spill] sm:$0xff] }
 0x114   :  { %8882 = vst [vmem:[#allocation62_spill] sm:$0xff] %v6354_v1  ;;  %1516 = vmatpush.msrb.mxu2 %v6267_v61 }
 0x115   :  { %8883 = vst [vmem:[#allocation63_spill] sm:$0xff] %v6356_v44  ;;  %1231 = vmatmul.f32.vlgmr.msra.gmra.mxu0 %v5906_v11  ;;  %1539 = vmatpush.msrb.mxu3 %v6240_v63 }
 0x116   :  { %8884 = vst [vmem:[#allocation64_spill] sm:$0xff] %v6360_v36  ;;  %1254 = vmatmul.f32.vlgmr.msra.gmra.mxu1 %v5906_v11  ;;  %v8886_v36 = vld [vmem:[#allocation44_spill] sm:$0xff]  ;;  %1517 = vmatpush.msrb.mxu2 %v6272_v7 }
 0x117   :  { %1277 = vmatmul.f32.vlgmr.msra.gmra.mxu2 %v5906_v11  ;;  %1471 = vmatpush.msrb.mxu0 %v8886_v36 }
 0x118   :  { %1300 = vmatmul.f32.vlgmr.msra.gmra.mxu3 %v5906_v11  ;;  %1494 = vmatpush.msrb.mxu1 %v6246_v38 }
 0x119   :  { %1540 = vmatpush.msrb.mxu3 %v6274_v33  ;;  %1697 = vmatpush.msra.mxu0 %v8890_v60 }
 0x11a   :  { %v6370_v44 = vpop.f32.mrf.mxu2  ;;  %v6376_v34 = vpop.f32.mrf.mxu0  ;;  %1720 = vmatpush.msra.mxu1 %v5987_v8  ;;  %1743 = vmatpush.msra.mxu2 %v6009_v16 }
 0x11b   :  { %8887 = vst [vmem:[#allocation44_spill] sm:$0xff] %v6370_v44  ;;  %v6374_v1 = vpop.f32.mrf.mxu3  ;;  %v6380_v58 = vpop.f32.mrf.mxu1  ;;  %1766 = vmatpush.msra.mxu3 %v5991_v9  ;;  %1698 = vmatpush.msra.mxu0 %v5993_v10  ;;  %v8892_v44 = vld [vmem:[#allocation15_spill] sm:$0xff] }
 0x11c   :  { %8888 = vst [vmem:[#allocation65_spill] sm:$0xff] %v6374_v1  ;;  %1721 = vmatpush.msra.mxu1 %v8892_v44  ;;  %1744 = vmatpush.msra.mxu2 %v6027_v21  ;;  %v6736_v1 = vld [vmem:[#allocation6 + $0xf8] sm:$0xff] }
 0x11d   :  { %8889 = vst [vmem:[#allocation66_spill] sm:$0xff] %v6376_v34  ;;  %1234 = vmatmul.f32.gmra.mxu0 %v5906_v11  ;;  %1767 = vmatpush.msra.mxu3 %v6003_v13  ;;  %v8897_v13 = vld [vmem:[#allocation20_spill] sm:$0xff]  ;;  %v6732_v34 = vld [vmem:[#allocation6 + $0xe8] sm:$0xff] }
 0x11e   :  { %8891 = vst [vmem:[#allocation14_spill] sm:$0xff] %v6380_v58  ;;  %1257 = vmatmul.f32.gmra.mxu1 %v5906_v11  ;;  %1699 = vmatpush.msra.mxu0 %v6005_v14  ;;  %v6729_v58 = vld [vmem:[#allocation6 + $0xe0] sm:$0xff] }
 0x11f   :  { %1280 = vmatmul.f32.gmra.mxu2 %v5906_v11  ;;  %1722 = vmatpush.msra.mxu1 %v6007_v15 }
 0x120   :  { %1303 = vmatmul.f32.gmra.mxu3 %v5906_v11  ;;  %1745 = vmatpush.msra.mxu2 %v6048_v32 }
 0x121   :  { %1768 = vmatpush.msra.mxu3 %v6012_v17  ;;  %1700 = vmatpush.msra.mxu0 %v6014_v18 }
 0x122   :  { %v6390_v60 = vpop.f32.mrf.mxu2  ;;  %v6396_v9 = vpop.f32.mrf.mxu0  ;;  %1723 = vmatpush.msra.mxu1 %v6016_v19  ;;  %1746 = vmatpush.msra.mxu2 %v6063_v39 }
 0x123   :  { %8893 = vst [vmem:[#allocation15_spill] sm:$0xff] %v6390_v60  ;;  %v6394_v8 = vpop.f32.mrf.mxu3  ;;  %v6400_v10 = vpop.f32.mrf.mxu1  ;;  %1769 = vmatpush.msra.mxu3 %v6029_v22  ;;  %1701 = vmatpush.msra.mxu0 %v6031_v23  ;;  %v8906_v23 = vld [vmem:[#allocation41_spill] sm:$0xff] }
 0x124   :  { %8894 = vst [vmem:[#allocation67_spill] sm:$0xff] %v6394_v8  ;;  %1724 = vmatpush.msra.mxu1 %v6037_v25  ;;  %1747 = vmatpush.msra.mxu2 %v6085_v53  ;;  %v8907_v25 = vld [vmem:[#allocation42_spill] sm:$0xff]  ;;  %v6723_v8 = vld [vmem:[#allocation6 + $0x110] sm:$0xff]  ;;  %v6726_v60 = vld [vmem:[#allocation6 + $0x118] sm:$0xff] }
 0x125   :  { %8895 = vst [vmem:[#allocation68_spill] sm:$0xff] %v6396_v9  ;;  %1770 = vmatpush.msra.mxu3 %v6054_v35  ;;  %1702 = vmatpush.msra.mxu0 %v8897_v13  ;;  %v8909_v35 = vld [vmem:[#allocation43_spill] sm:$0xff] }
 0x126   :  { %8896 = vst [vmem:[#allocation69_spill] sm:$0xff] %v6400_v10  ;;  %1725 = vmatpush.msra.mxu1 %v6058_v37  ;;  %1748 = vmatpush.msra.mxu2 %v6109_v4  ;;  %v6720_v9 = vld [vmem:[#allocation6 + $0x108] sm:$0xff] }
 0x127   :  { %1771 = vmatpush.msra.mxu3 %v6075_v49  ;;  %1703 = vmatpush.msra.mxu0 %v6077_v50 }
 0x128   :  { %1726 = vmatpush.msra.mxu1 %v6079_v51  ;;  %1749 = vmatpush.msra.mxu2 %v6127_v43 }
 0x129   :  { %1772 = vmatpush.msra.mxu3 %v6087_v54  ;;  %1704 = vmatpush.msra.mxu0 %v6089_v55 }
 0x12a   :  { %v6414_v14 = vpop.f32.mrf.mxu2  ;;  %v6420_v16 = vpop.f32.mrf.mxu0  ;;  %1727 = vmatpush.msra.mxu1 %v6093_v56  ;;  %1750 = vmatpush.msra.mxu2 %v6140_v57 }
 0x12b   :  { %8898 = vst [vmem:[#allocation20_spill] sm:$0xff] %v6414_v14  ;;  %v6418_v15 = vpop.f32.mrf.mxu3  ;;  %v6424_v17 = vpop.f32.mrf.mxu1  ;;  %1773 = vmatpush.msra.mxu3 %v6111_v5  ;;  %1705 = vmatpush.msra.mxu0 %v6114_v6 }
 0x12c   :  { %8899 = vst [vmem:[#allocation70_spill] sm:$0xff] %v6418_v15  ;;  %1728 = vmatpush.msra.mxu1 %v6116_v12  ;;  %1751 = vmatpush.msra.mxu2 %v6161_v29 }
 0x12d   :  { %8900 = vst [vmem:[#allocation71_spill] sm:$0xff] %v6420_v16  ;;  %1774 = vmatpush.msra.mxu3 %v6132_v45  ;;  %1706 = vmatpush.msra.mxu0 %v6134_v46 }
 0x12e   :  { %8901 = vst [vmem:[#allocation72_spill] sm:$0xff] %v6424_v17  ;;  %1729 = vmatpush.msra.mxu1 %v6136_v47  ;;  %1752 = vmatpush.msra.mxu2 %v6184_v26 }
 0x12f   :  { %1775 = vmatpush.msra.mxu3 %v6155_v20  ;;  %1707 = vmatpush.msra.mxu0 %v6157_v27 }
 0x130   :  { %1730 = vmatpush.msra.mxu1 %v6159_v28  ;;  %1753 = vmatpush.msra.mxu2 %v6207_v42 }
 0x131   :  { %1776 = vmatpush.msra.mxu3 %v6164_v30  ;;  %1708 = vmatpush.msra.mxu0 %v6166_v31 }
 0x132   :  { %v6438_v18 = vpop.f32.mrf.mxu2  ;;  %v6444_v21 = vpop.f32.mrf.mxu0  ;;  %1731 = vmatpush.msra.mxu1 %v6168_v40  ;;  %1754 = vmatpush.msra.mxu2 %v6216_v59 }
 0x133   :  { %8902 = vst [vmem:[#allocation73_spill] sm:$0xff] %v6438_v18  ;;  %v6442_v19 = vpop.f32.mrf.mxu3  ;;  %v6448_v22 = vpop.f32.mrf.mxu1  ;;  %1777 = vmatpush.msra.mxu3 %v6186_v62  ;;  %1709 = vmatpush.msra.mxu0 %v6188_v24 }
 0x134   :  { %8903 = vst [vmem:[#allocation74_spill] sm:$0xff] %v6442_v19  ;;  %1732 = vmatpush.msra.mxu1 %v6192_v41  ;;  %1755 = vmatpush.msra.mxu2 %v6238_v0 }
 0x135   :  { %8904 = vst [vmem:[#allocation75_spill] sm:$0xff] %v6444_v21  ;;  %1778 = vmatpush.msra.mxu3 %v6209_v3  ;;  %1710 = vmatpush.msra.mxu0 %v6211_v2 }
 0x136   :  { %8905 = vst [vmem:[#allocation76_spill] sm:$0xff] %v6448_v22  ;;  %1733 = vmatpush.msra.mxu1 %v6213_v52  ;;  %1756 = vmatpush.msra.mxu2 %v6256_v48 }
 0x137   :  { %1779 = vmatpush.msra.mxu3 %v8906_v23  ;;  %1711 = vmatpush.msra.mxu0 %v8907_v25 }
 0x138   :  { %1734 = vmatpush.msra.mxu1 %v8909_v35  ;;  %1757 = vmatpush.msra.mxu2 %v6267_v61 }
 0x139   :  { %1780 = vmatpush.msra.mxu3 %v6240_v63  ;;  %1712 = vmatpush.msra.mxu0 %v8886_v36 }
 0x13a   :  { %v6462_v32 = vpop.f32.mrf.mxu2  ;;  %v6468_v39 = vpop.f32.mrf.mxu0  ;;  %1735 = vmatpush.msra.mxu1 %v6246_v38  ;;  %1758 = vmatpush.msra.mxu2 %v6272_v7 }
 0x13b   :  { %8908 = vst [vmem:[#allocation41_spill] sm:$0xff] %v6462_v32  ;;  %v6466_v37 = vpop.f32.mrf.mxu3  ;;  %v6472_v49 = vpop.f32.mrf.mxu1  ;;  %1781 = vmatpush.msra.mxu3 %v6274_v33 }
 0x13c   :  { %8910 = vst [vmem:[#allocation42_spill] sm:$0xff] %v6466_v37 }
 0x13d   :  { %8911 = vst [vmem:[#allocation43_spill] sm:$0xff] %v6468_v39  ;;  %v8958_v39 = vld [vmem:[#allocation24_spill] sm:$0xff] }
 0x13e   :  { %8912 = vst [vmem:[#allocation77_spill] sm:$0xff] %v6472_v49  ;;  %v1214_v37 = vunpack.c.h.bf16 %v8958_v39 }
 0x142   :  { %v6477_v50 = vpop.f32.mrf.mxu2  ;;  %v6481_v53 = vpop.f32.mrf.mxu0 }
 0x143   :  { %8913 = vst [vmem:[#allocation78_spill] sm:$0xff] %v6477_v50  ;;  %v6479_v51 = vpop.f32.mrf.mxu3  ;;  %v6483_v54 = vpop.f32.mrf.mxu1 }
 0x144   :  { %8914 = vst [vmem:[#allocation79_spill] sm:$0xff] %v6479_v51 }
 0x145   :  { %8915 = vst [vmem:[#allocation80_spill] sm:$0xff] %v6481_v53 }
 0x146   :  { %8916 = vst [vmem:[#allocation81_spill] sm:$0xff] %v6483_v54 }
 0x14a   :  { %v6485_v55 = vpop.f32.mrf.mxu2  ;;  %v6489_v4 = vpop.f32.mrf.mxu0 }
 0x14b   :  { %8917 = vst [vmem:[#allocation82_spill] sm:$0xff] %v6485_v55  ;;  %v6487_v56 = vpop.f32.mrf.mxu3  ;;  %v6491_v5 = vpop.f32.mrf.mxu1 }
 0x14c   :  { %8918 = vst [vmem:[#allocation83_spill] sm:$0xff] %v6487_v56 }
 0x14d   :  { %8919 = vst [vmem:[#allocation84_spill] sm:$0xff] %v6489_v4 }
 0x14e   :  { %8920 = vst [vmem:[#allocation85_spill] sm:$0xff] %v6491_v5 }
 0x152   :  { %v6493_v6 = vpop.f32.mrf.mxu2  ;;  %v6497_v43 = vpop.f32.mrf.mxu0 }
 0x153   :  { %8921 = vst [vmem:[#allocation86_spill] sm:$0xff] %v6493_v6  ;;  %v6495_v12 = vpop.f32.mrf.mxu3  ;;  %v6499_v44 = vpop.f32.mrf.mxu1 }
 0x154   :  { %8922 = vst [vmem:[#allocation87_spill] sm:$0xff] %v6495_v12 }
 0x155   :  { %8923 = vst [vmem:[#allocation88_spill] sm:$0xff] %v6497_v43 }
 0x156   :  { %8924 = vst [vmem:[#allocation89_spill] sm:$0xff] %v6499_v44 }
 0x15a   :  { %v6501_v45 = vpop.f32.mrf.mxu2  ;;  %v6505_v47 = vpop.f32.mrf.mxu0 }
 0x15b   :  { %8925 = vst [vmem:[#allocation90_spill] sm:$0xff] %v6501_v45  ;;  %v6503_v46 = vpop.f32.mrf.mxu3  ;;  %v6507_v57 = vpop.f32.mrf.mxu1 }
 0x15c   :  { %8926 = vst [vmem:[#allocation91_spill] sm:$0xff] %v6503_v46 }
 0x15d   :  { %8927 = vst [vmem:[#allocation92_spill] sm:$0xff] %v6505_v47 }
 0x15e   :  { %8928 = vst [vmem:[#allocation93_spill] sm:$0xff] %v6507_v57 }
 0x162   :  { %v6509_v11 = vpop.f32.mrf.mxu2  ;;  %v6513_v5 = vpop.f32.mrf.mxu0 }
 0x163   :  { %8929 = vst [vmem:[#allocation94_spill] sm:$0xff] %v6509_v11  ;;  %v6511_v13 = vpop.f32.mrf.mxu3  ;;  %v6515_v6 = vpop.f32.mrf.mxu1 }
 0x164   :  { %8930 = vst [vmem:[#allocation95_spill] sm:$0xff] %v6511_v13 }
 0x165   :  { %8931 = vst [vmem:[#allocation96_spill] sm:$0xff] %v6513_v5 }
 0x166   :  { %8932 = vst [vmem:[#allocation97_spill] sm:$0xff] %v6515_v6 }
 0x16a   :  { %v6517_v12 = vpop.f32.mrf.mxu2  ;;  %v6521_v44 = vpop.f32.mrf.mxu0 }
 0x16b   :  { %8933 = vst [vmem:[#allocation98_spill] sm:$0xff] %v6517_v12  ;;  %v6519_v43 = vpop.f32.mrf.mxu3  ;;  %v6523_v45 = vpop.f32.mrf.mxu1 }
 0x16c   :  { %8934 = vst [vmem:[#allocation99_spill] sm:$0xff] %v6519_v43 }
 0x16d   :  { %8935 = vst [vmem:[#allocation100_spill] sm:$0xff] %v6521_v44 }
 0x16e   :  { %8936 = vst [vmem:[#allocation101_spill] sm:$0xff] %v6523_v45 }
 0x172   :  { %v6525_v46 = vpop.f32.mrf.mxu2  ;;  %v6529_v57 = vpop.f32.mrf.mxu0 }
 0x173   :  { %8937 = vst [vmem:[#allocation102_spill] sm:$0xff] %v6525_v46  ;;  %v6527_v47 = vpop.f32.mrf.mxu3  ;;  %v6531_v11 = vpop.f32.mrf.mxu1 }
 0x174   :  { %8938 = vst [vmem:[#allocation103_spill] sm:$0xff] %v6527_v47 }
 0x175   :  { %8939 = vst [vmem:[#allocation104_spill] sm:$0xff] %v6529_v57 }
 0x176   :  { %8940 = vst [vmem:[#allocation105_spill] sm:$0xff] %v6531_v11 }
 0x17a   :  { %v6533_v13 = vpop.f32.mrf.mxu2  ;;  %v6537_v6 = vpop.f32.mrf.mxu0 }
 0x17b   :  { %8941 = vst [vmem:[#allocation106_spill] sm:$0xff] %v6533_v13  ;;  %v6535_v5 = vpop.f32.mrf.mxu3  ;;  %v6539_v12 = vpop.f32.mrf.mxu1 }
 0x17c   :  { %8942 = vst [vmem:[#allocation107_spill] sm:$0xff] %v6535_v5  ;;  %v8953_v5 = vld [vmem:[#allocation18_spill] sm:$0xff] }
 0x17d   :  { %8943 = vst [vmem:[#allocation108_spill] sm:$0xff] %v6537_v6  ;;  %v1207_v6 = vunpack.c.l.bf16 %v8953_v5 }
 0x17e   :  { %8944 = vst [vmem:[#allocation109_spill] sm:$0xff] %v6539_v12 }
 0x182   :  { %v6543_v44 = vpop.f32.mrf.mxu0  ;;  %v6545_v45 = vpop.f32.mrf.mxu2 }
 0x183   :  { %v6541_v43 = vpop.f32.mrf.mxu3  ;;  %8946 = vst [vmem:[#allocation111_spill] sm:$0xff] %v6543_v44  ;;  %v6547_v46 = vpop.f32.mrf.mxu1 }
 0x184   :  { %8945 = vst [vmem:[#allocation110_spill] sm:$0xff] %v6541_v43  ;;  %v1208_v43 = vunpack.c.h.bf16 %v8953_v5 }
 0x185   :  { %8947 = vst [vmem:[#allocation112_spill] sm:$0xff] %v6545_v45 }
 0x186   :  { %8948 = vst [vmem:[#allocation113_spill] sm:$0xff] %v6547_v46 }
 0x18a   :  { %v6551_v57 = vpop.f32.mrf.mxu0  ;;  %v6555_v13 = vpop.f32.mrf.mxu2 }
 0x18b   :  { %v6549_v47 = vpop.f32.mrf.mxu3  ;;  %8950 = vst [vmem:[#allocation115_spill] sm:$0xff] %v6551_v57  ;;  %v6553_v11 = vpop.f32.mrf.mxu1  ;;  %v8956_v57 = vld [vmem:[#allocation22_spill] sm:$0xff] }
 0x18c   :  { %8949 = vst [vmem:[#allocation114_spill] sm:$0xff] %v6549_v47  ;;  %v8957_v47 = vld [vmem:[#allocation23_spill] sm:$0xff] }
 0x18d   :  { %8951 = vst [vmem:[#allocation116_spill] sm:$0xff] %v6553_v11  ;;  %v1210_v11 = vunpack.c.h.bf16 %v8956_v57 }
 0x18e   :  { %8952 = vst [vmem:[#allocation117_spill] sm:$0xff] %v6555_v13  ;;  %v1211_v13 = vunpack.c.l.bf16 %v8957_v47 }
 0x18f   :  { %8963 = vst [vmem:[#allocation22_spill] sm:$0xff] %v6720_v9 }
 0x190   :  { %8964 = vst [vmem:[#allocation23_spill] sm:$0xff] %v6723_v8 }
 0x192   :  { %v1232_v12 = vpop.f32.mrf.mxu0  ;;  %v6561_v54 = vpop.f32.mrf.mxu2 }
 0x193   :  { %v6558_v4 = vpop.f32.mrf.mxu3  ;;  %v1307_v44 = vadd.f32 %v1232_v12, %v1207_v6  ;;  %v1255_v56 = vpop.f32.mrf.mxu1  ;;  %8955 = vst [vmem:[#allocation118_spill] sm:$0xff] %v6561_v54 }
 0x194   :  { %8954 = vst [vmem:[#allocation18_spill] sm:$0xff] %v6558_v4  ;;  %v1308_v45 = vadd.f32 %v1255_v56, %v1208_v43  ;;  %v1212_v4 = vunpack.c.h.bf16 %v8957_v47 }
 0x195   :  { %v4940_v55 = vmul.f32 -1.442695, %v1307_v44 }
 0x196   :  { %v4942_v46 = vmul.f32 -1.442695, %v1308_v45 }
 0x197   :  { %5156 = vpow2.f32 %v4940_v55 }
 0x198   :  { %5158 = vpow2.f32 %v4942_v46 }
 0x19a   :  { %v1235_v51 = vpop.f32.mrf.mxu0  ;;  %v1278_v46 = vpop.f32.mrf.mxu2 }
 0x19b   :  { %v1301_v53 = vpop.f32.mrf.mxu3  ;;  %v1311_v49 = vadd.f32 %v1235_v51, %v1211_v13  ;;  %v1258_v5 = vpop.f32.mrf.mxu1 }
 0x19c   :  { %v1310_v50 = vadd.f32 %v1301_v53, %v1210_v11  ;;  %v1312_v6 = vadd.f32 %v1258_v5, %v1212_v4  ;;  %v1209_v53 = vunpack.c.l.bf16 %v8956_v57 }
 0x19d   :  { %v5157_v12 = vpop.eup %5156  ;;  %v4941_v45 = vmul.f32 -1.442695, %v1311_v49 }
 0x19e   :  { %v4944_v56 = vmul.f32 -1.442695, %v1310_v50  ;;  %v5159_v43 = vpop.eup %5158  ;;  %v1321_v44 = vadd.f32 1.0, %v5157_v12  ;;  %v4943_v55 = vmul.f32 -1.442695, %v1312_v6  ;;  %v1309_v47 = vadd.f32 %v1278_v46, %v1209_v53 }
 0x19f   :  { %v1359_v54 = vadd.f32 1.0, %v5159_v43 }
 0x1a0   :  { %5160 = vpow2.f32 %v4944_v56  ;;  %v1332_v57 = vand.u32 2147483647, %v1321_v44  ;;  %vm1328_vm3 = vweird.f32 %v1321_v44 }
 0x1a1   :  { %5162 = vrcp.f32 %v1321_v44  ;;  %v1372_v53 = vand.u32 2147483648, %v1359_v54  ;;  %v1370_v22 = vand.u32 2147483647, %v1359_v54  ;;  %vm1366_vm2 = vweird.f32 %v1359_v54 }
 0x1a2   :  { %5164 = vrcp.f32 %v1359_v54  ;;  %vm1333_vm5 = vcmp.eq.f32.partialorder %v1332_v57, 8.507059e+37 }
 0x1a3   :  { %5166 = vpow2.f32 %v4941_v45  ;;  %v1304_v32 = vpop.f32.mrf.mxu3  ;;  %v1373_v19 = vor.u32 1.1754944e-38, %v1372_v53  ;;  %vm1371_vm7 = vcmp.eq.f32.partialorder %v1370_v22, 8.507059e+37 }
 0x1a4   :  { %5168 = vpow2.f32 %v4943_v55  ;;  %v1314_v51 = vadd.f32 %v1304_v32, %v1214_v37  ;;  %v1213_v32 = vunpack.c.l.bf16 %v8958_v39  ;;  %v1334_v55 = vand.u32 2147483648, %v1321_v44 }
 0x1a6   :  { %v5161_v4 = vpop.eup %5160  ;;  %v4945_v50 = vmul.f32 -1.442695, %v1314_v51 }
 0x1a7   :  { %v5163_v11 = vpop.eup %5162  ;;  %v6568_v13 = vadd.f32 1.0, %v5161_v4  ;;  %v1281_v4 = vpop.f32.mrf.mxu2 }
 0x1a8   :  { %v5165_v49 = vpop.eup %5164  ;;  %v1324_v5 = vmul.f32 %v5163_v11, %v1321_v44  ;;  %5170 = vpow2.f32 %v4945_v50  ;;  %vm1329_vm0 = vweird.f32 %v5163_v11 }
 0x1a9   :  { %v5167_v6 = vpop.eup %5166  ;;  %v1362_v12 = vmul.f32 %v5165_v49, %v1359_v54  ;;  %5172 = vrcp.f32 %v6568_v13  ;;  %vm1367_vm1 = vweird.f32 %v5165_v49  ;;  %vm1330_vm4 = vmor %vm1328_vm3, %vm1329_vm0  ;;  %vm1406_vm8 = vweird.f32 %v6568_v13 }
 0x1aa   :  { %v5169_v56 = vpop.eup %5168  ;;  %v1325_v43 = vsub.f32 1.0, %v1324_v5  ;;  %5174 = vtanh.f32 %v1309_v47  ;;  %v6571_v45 = vadd.f32 1.0, %v5167_v6  ;;  %v1335_v6 = vor.u32 1.1754944e-38, %v1334_v55  ;;  %vm1368_vm6 = vmor %vm1366_vm2, %vm1367_vm1 }
 0x1ab   :  { %v1363_v37 = vsub.f32 1.0, %v1362_v12  ;;  %v6574_v46 = vadd.f32 1.0, %v5169_v56  ;;  %v1313_v56 = vadd.f32 %v1281_v4, %v1213_v32  ;;  %v1412_v57 = vand.u32 2147483648, %v6568_v13 }
 0x1ac   :  { %v1326_v51 = vmul.f32 %v5163_v11, %v1325_v43  ;;  %5176 = vrcp.f32 %v6571_v45  ;;  %vm1343_vm13 = vweird.f32 %v6571_v45 }
 0x1ad   :  { %v1364_v50 = vmul.f32 %v5165_v49, %v1363_v37  ;;  %5178 = vrcp.f32 %v6574_v46  ;;  %vm1381_vm12 = vweird.f32 %v6574_v46 }
 0x1ae   :  { %v5171_v47 = vpop.eup %5170  ;;  %v1327_v5 = vadd.f32 %v5163_v11, %v1326_v51 }
 0x1af   :  { %v6578_v39 = vpop.eup %5172  ;;  %v1365_v12 = vadd.f32 %v5165_v49, %v1364_v50  ;;  %v6580_v43 = vadd.f32 1.0, %v5171_v47 }
 0x1b0   :  { %v5175_v21 = vpop.eup %5174  ;;  %v1331_v18 = vsel %vm1330_vm4, %v5163_v11, %v1327_v5  ;;  %v1402_v37 = vmul.f32 %v6578_v39, %v6568_v13  ;;  %vm1407_vm9 = vweird.f32 %v6578_v39 }
 0x1b1   :  { %v1336_v54 = vsel %vm1333_vm5, %v1335_v6, %v1331_v18  ;;  %v1369_v51 = vsel %vm1368_vm6, %v5165_v49, %v1365_v12  ;;  %5180 = vrcp.f32 %v6580_v43  ;;  %v1349_v6 = vand.u32 2147483648, %v6571_v45  ;;  %vm6609_vm14 = vmor %vm1406_vm8, %vm1407_vm9 }
 0x1b2   :  { %v5177_v44 = vpop.eup %5176  ;;  %v1374_v55 = vsel %vm1371_vm7, %v1373_v19, %v1369_v51  ;;  %v1433_v50 = vmul.f32 %v5175_v21, %v1336_v54  ;;  %v1403_v32 = vsub.f32 1.0, %v1402_v37  ;;  %5182 = vtanh.f32 %v1313_v56 }
 0x1b3   :  { %v5179_v4 = vpop.eup %5178  ;;  %v1431_v47 = vmul.f32 0.0, %v1374_v55  ;;  %v1339_v53 = vmul.f32 %v5177_v44, %v6571_v45  ;;  %v1347_v19 = vand.u32 2147483647, %v6571_v45  ;;  %v1410_v21 = vand.u32 2147483647, %v6568_v13 }
 0x1b4   :  { %v1404_v11 = vmul.f32 %v6578_v39, %v1403_v32  ;;  %v1377_v18 = vmul.f32 %v5179_v4, %v6574_v46  ;;  %v1387_v37 = vand.u32 2147483648, %v6574_v46  ;;  %vm1344_vm10 = vweird.f32 %v5177_v44 }
 0x1b5   :  { %v6591_v22 = vadd.f32 %v1433_v50, %v1431_v47  ;;  %v1340_v49 = vsub.f32 1.0, %v1339_v53  ;;  %vm1382_vm11 = vweird.f32 %v5179_v4  ;;  %v1385_v55 = vand.u32 2147483647, %v6574_v46  ;;  %vm1345_vm15 = vmor %vm1343_vm13, %vm1344_vm10 }
 0x1b6   :  { %v1378_v5 = vsub.f32 1.0, %v1377_v18  ;;  %v1405_v12 = vadd.f32 %v6578_v39, %v1404_v11  ;;  %v1350_v11 = vor.u32 1.1754944e-38, %v1349_v6  ;;  %v1388_v17 = vor.u32 1.1754944e-38, %v1387_v37  ;;  %vm1383_vm1 = vmor %vm1381_vm12, %vm1382_vm11 }
 0x1b7   :  { %v6598_v56 = vpop.eup %5180  ;;  %5184 = vtanh.f32 %v6591_v22  ;;  %v1341_v54 = vmul.f32 %v5177_v44, %v1340_v49  ;;  %vm1348_vm0 = vcmp.eq.f32.partialorder %v1347_v19, 8.507059e+37  ;;  %v1413_v45 = vor.u32 1.1754944e-38, %v1412_v57  ;;  %v6642_v57 = vld [vmem:[#allocation6 + $0x1c0] sm:$0xff]  ;;  %v6645_v19 = vld [vmem:[#allocation6 + $0x1c8] sm:$0xff] }
 0x1b8   :  { %v1379_v51 = vmul.f32 %v5179_v4, %v1378_v5  ;;  %v1417_v50 = vmul.f32 %v6598_v56, %v6580_v43  ;;  %v5183_v32 = vpop.eup %5182  ;;  %v1409_v5 = vsel %vm6609_vm14, %v6578_v39, %v1405_v12  ;;  %vm1386_vm2 = vcmp.eq.f32.partialorder %v1385_v55, 8.507059e+37  ;;  %v6654_v12 = vld [vmem:[#allocation6 + $0x1d8] sm:$0xff]  ;;  %v6657_v55 = vld [vmem:[#allocation6 + $0x1a0] sm:$0xff] }
 0x1b9   :  { %v1342_v47 = vadd.f32 %v5177_v44, %v1341_v54  ;;  %vm1411_vm3 = vcmp.eq.f32.partialorder %v1410_v21, 8.507059e+37  ;;  %vm1422_vm4 = vweird.f32 %v6598_v56  ;;  %vm1421_vm5 = vweird.f32 %v6580_v43  ;;  %v6651_v21 = vld [vmem:[#allocation6 + $0x1d0] sm:$0xff] }
 0x1ba   :  { %v1380_v18 = vadd.f32 %v5179_v4, %v1379_v51  ;;  %v1418_v49 = vsub.f32 1.0, %v1417_v50  ;;  %v1414_v6 = vsel %vm1411_vm3, %v1413_v45, %v1409_v5  ;;  %vm6638_vm6 = vmor %vm1421_vm5, %vm1422_vm4  ;;  %v6672_v5 = vld [vmem:[#allocation6 + $0x188] sm:$0xff] }
 0x1bb   :  { %v1346_v16 = vsel %vm1345_vm15, %v5177_v44, %v1342_v47  ;;  %v6635_v44 = vld [vmem:[#allocation6 + $0x1f8] sm:$0xff]  ;;  %v6663_v47 = vld [vmem:[#allocation6 + $0x1b0] sm:$0xff] }
 0x1bc   :  { %v1351_v46 = vsel %vm1348_vm0, %v1350_v11, %v1346_v16  ;;  %v1384_v13 = vsel %vm1383_vm1, %v5179_v4, %v1380_v18  ;;  %v1419_v51 = vmul.f32 %v6598_v56, %v1418_v49  ;;  %v1427_v16 = vand.u32 2147483648, %v6580_v43  ;;  %v6669_v49 = vld [vmem:[#allocation6 + $0x180] sm:$0xff]  ;;  %v6702_v4 = vld [vmem:[#allocation6 + $0x158] sm:$0xff] }
 0x1bd   :  { %v5185_v54 = vpop.eup %5184  ;;  %v1389_v15 = vsel %vm1386_vm2, %v1388_v17, %v1384_v13  ;;  %v1434_v14 = vmul.f32 %v5183_v32, %v1351_v46  ;;  %v6624_v17 = vld [vmem:[#allocation6 + $0x1e0] sm:$0xff]  ;;  %v6660_v32 = vld [vmem:[#allocation6 + $0x1a8] sm:$0xff]  ;;  %v6675_v46 = vld [vmem:[#allocation6 + $0x190] sm:$0xff] }
 0x1be   :  { %v1432_v50 = vmul.f32 0.0, %v1389_v15  ;;  %v1439_v10 = vmul.f32 %v5185_v54, %v1414_v6  ;;  %v1420_v39 = vadd.f32 %v6598_v56, %v1419_v51  ;;  %v6627_v15 = vld [vmem:[#allocation6 + $0x1e8] sm:$0xff]  ;;  %v1428_v37 = vor.u32 1.1754944e-38, %v1427_v16  ;;  %v6678_v13 = vld [vmem:[#allocation6 + $0x198] sm:$0xff]  ;;  %v6681_v54 = vld [vmem:[#allocation6 + $0x160] sm:$0xff] }
 0x1bf   :  { %v6684_v6 = vld [vmem:[#allocation6 + $0x168] sm:$0xff]  ;;  %v6687_v51 = vld [vmem:[#allocation6 + $0x170] sm:$0xff] }
 0x1c0   :  { %v6618_v53 = vadd.f32 %v1434_v14, %v1432_v50  ;;  %1472 = vmatmul.f32.vlgmr.msrb.gmra.mxu0 %v1439_v10  ;;  %1495 = vmatmul.f32.vlgmr.msrb.gmra.mxu1 %v1439_v10  ;;  %v6632_v14 = vld [vmem:[#allocation6 + $0x1f0] sm:$0xff]  ;;  %v6690_v50 = vld [vmem:[#allocation6 + $0x178] sm:$0xff]  ;;  %v6696_v16 = vld [vmem:[#allocation6 + $0x148] sm:$0xff] }
 0x1c1   :  { %1518 = vmatmul.f32.vlgmr.msrb.gmra.mxu2 %v1439_v10  ;;  %1541 = vmatmul.f32.vlgmr.msrb.gmra.mxu3 %v1439_v10  ;;  %v1425_v10 = vand.u32 2147483647, %v6580_v43  ;;  %v1424_v43 = vsel %vm6638_vm6, %v6598_v56, %v1420_v39  ;;  %v6666_v56 = vld [vmem:[#allocation6 + $0x1b8] sm:$0xff]  ;;  %v6693_v39 = vld [vmem:[#allocation6 + $0x140] sm:$0xff] }
 0x1c2   :  { %5186 = vtanh.f32 %v6618_v53  ;;  %1938 = vmatpush.msrb.mxu0 %v6624_v17  ;;  %1961 = vmatpush.msrb.mxu1 %v6627_v15 }
 0x1c3   :  { %1984 = vmatpush.msrb.mxu2 %v6632_v14  ;;  %2007 = vmatpush.msrb.mxu3 %v6635_v44  ;;  %vm1426_vm7 = vcmp.eq.f32.partialorder %v1425_v10, 8.507059e+37  ;;  %v6699_v10 = vld [vmem:[#allocation6 + $0x150] sm:$0xff] }
 0x1c4   :  { %1939 = vmatpush.msrb.mxu0 %v6642_v57  ;;  %1962 = vmatpush.msrb.mxu1 %v6645_v19  ;;  %v1429_v18 = vsel %vm1426_vm7, %v1428_v37, %v1424_v43  ;;  %v6705_v43 = vld [vmem:[#allocation6 + $0x120] sm:$0xff]  ;;  %v6708_v37 = vld [vmem:[#allocation6 + $0x128] sm:$0xff] }
 0x1c5   :  { %1985 = vmatpush.msrb.mxu2 %v6651_v21  ;;  %2008 = vmatpush.msrb.mxu3 %v6654_v12 }
 0x1c6   :  { %1940 = vmatpush.msrb.mxu0 %v6657_v55  ;;  %1963 = vmatpush.msrb.mxu1 %v6660_v32 }
 0x1c7   :  { %1986 = vmatpush.msrb.mxu2 %v6663_v47  ;;  %2009 = vmatpush.msrb.mxu3 %v6666_v56 }
 0x1c8   :  { %v5187_v11 = vpop.eup %5186  ;;  %1941 = vmatpush.msrb.mxu0 %v6669_v49  ;;  %1964 = vmatpush.msrb.mxu1 %v6672_v5 }
 0x1c9   :  { %v1440_v45 = vmul.f32 %v5187_v11, %v1429_v18  ;;  %1987 = vmatpush.msrb.mxu2 %v6675_v46  ;;  %2010 = vmatpush.msrb.mxu3 %v6678_v13  ;;  %v6711_v11 = vld [vmem:[#allocation6 + $0x130] sm:$0xff]  ;;  %v6714_v18 = vld [vmem:[#allocation6 + $0x138] sm:$0xff] }
 0x1ca   :  { %1942 = vmatpush.msrb.mxu0 %v6681_v54  ;;  %1965 = vmatpush.msrb.mxu1 %v6684_v6 }
 0x1cb   :  { %1475 = vmatmul.f32.gmra.mxu0 %v1440_v45  ;;  %1498 = vmatmul.f32.gmra.mxu1 %v1440_v45 }
 0x1cc   :  { %1521 = vmatmul.f32.gmra.mxu2 %v1440_v45  ;;  %1544 = vmatmul.f32.gmra.mxu3 %v1440_v45  ;;  %v6717_v45 = vld [vmem:[#allocation6 + $0x100] sm:$0xff] }
 0x1cd   :  { %1988 = vmatpush.msrb.mxu2 %v6687_v51  ;;  %2011 = vmatpush.msrb.mxu3 %v6690_v50 }
 0x1ce   :  { %1943 = vmatpush.msrb.mxu0 %v6693_v39  ;;  %1966 = vmatpush.msrb.mxu1 %v6696_v16 }
 0x1cf   :  { %1989 = vmatpush.msrb.mxu2 %v6699_v10  ;;  %2012 = vmatpush.msrb.mxu3 %v6702_v4 }
 0x1d0   :  { %1944 = vmatpush.msrb.mxu0 %v6705_v43  ;;  %1967 = vmatpush.msrb.mxu1 %v6708_v37 }
 0x1d1   :  { %1990 = vmatpush.msrb.mxu2 %v6711_v11  ;;  %2013 = vmatpush.msrb.mxu3 %v6714_v18 }
 0x1d2   :  { %1945 = vmatpush.msrb.mxu0 %v6717_v45  ;;  %1968 = vmatpush.msrb.mxu1 %v6720_v9  ;;  %v6739_v9 = vld [vmem:[#allocation6 + $0xc0] sm:$0xff] }
 0x1d3   :  { %1991 = vmatpush.msrb.mxu2 %v6723_v8  ;;  %2014 = vmatpush.msrb.mxu3 %v6726_v60  ;;  %8965 = vst [vmem:[#allocation24_spill] sm:$0xff] %v6739_v9  ;;  %v6742_v8 = vld [vmem:[#allocation6 + $0xc8] sm:$0xff] }
 0x1d4   :  { %1946 = vmatpush.msrb.mxu0 %v6729_v58  ;;  %1969 = vmatpush.msrb.mxu1 %v6732_v34  ;;  %8966 = vst [vmem:[#allocation119_spill] sm:$0xff] %v6742_v8 }
 0x1d5   :  { %1992 = vmatpush.msrb.mxu2 %v6161_v29  ;;  %2015 = vmatpush.msrb.mxu3 %v6736_v1 }
 0x1d6   :  { %1947 = vmatpush.msrb.mxu0 %v6739_v9  ;;  %1970 = vmatpush.msrb.mxu1 %v6742_v8 }
 0x1d7   :  { %1993 = vmatpush.msrb.mxu2 %v6184_v26  ;;  %2016 = vmatpush.msrb.mxu3 %v6155_v20 }
 0x1d8   :  { %1948 = vmatpush.msrb.mxu0 %v6157_v27  ;;  %1971 = vmatpush.msrb.mxu1 %v6159_v28  ;;  %v8968_v27 = vld [vmem:[#allocation26_spill] sm:$0xff] }
 0x1d9   :  { %1994 = vmatpush.msrb.mxu2 %v6207_v42  ;;  %2017 = vmatpush.msrb.mxu3 %v6164_v30 }
 0x1da   :  { %1949 = vmatpush.msrb.mxu0 %v6166_v31  ;;  %1972 = vmatpush.msrb.mxu1 %v6168_v40 }
 0x1db   :  { %1995 = vmatpush.msrb.mxu2 %v6216_v59  ;;  %2018 = vmatpush.msrb.mxu3 %v6186_v62 }
 0x1dc   :  { %1950 = vmatpush.msrb.mxu0 %v6188_v24  ;;  %1973 = vmatpush.msrb.mxu1 %v6192_v41  ;;  %v8967_v24 = vld [vmem:[#allocation25_spill] sm:$0xff] }
 0x1dd   :  { %1996 = vmatpush.msrb.mxu2 %v6238_v0  ;;  %2019 = vmatpush.msrb.mxu3 %v6209_v3  ;;  %v1448_v26 = vunpack.c.l.bf16 %v8967_v24 }
 0x1de   :  { %1951 = vmatpush.msrb.mxu0 %v6211_v2  ;;  %1974 = vmatpush.msrb.mxu1 %v6213_v52 }
 0x1df   :  { %1997 = vmatpush.msrb.mxu2 %v6256_v48  ;;  %2020 = vmatpush.msrb.mxu3 %v8906_v23  ;;  %v1449_v48 = vunpack.c.h.bf16 %v8967_v24 }
 0x1e0   :  { %1952 = vmatpush.msrb.mxu0 %v8907_v25  ;;  %1975 = vmatpush.msrb.mxu1 %v8909_v35 }
 0x1e1   :  { %1998 = vmatpush.msrb.mxu2 %v6267_v61  ;;  %2021 = vmatpush.msrb.mxu3 %v6240_v63 }
 0x1e2   :  { %1953 = vmatpush.msrb.mxu0 %v8886_v36  ;;  %1976 = vmatpush.msrb.mxu1 %v6246_v38  ;;  %v1451_v36 = vunpack.c.h.bf16 %v8968_v27 }
 0x1e3   :  { %1999 = vmatpush.msrb.mxu2 %v6272_v7  ;;  %2022 = vmatpush.msrb.mxu3 %v6274_v33  ;;  %v8969_v7 = vld [vmem:[#allocation27_spill] sm:$0xff] }
 0x1e4   :  { %v1452_v30 = vunpack.c.l.bf16 %v8969_v7  ;;  %v1453_v33 = vunpack.c.h.bf16 %v8969_v7 }
 0x23d   :  { %v1473_v52 = vpop.f32.mrf.mxu0  ;;  %v1496_v2 = vpop.f32.mrf.mxu1 }
 0x23e   :  { %v1548_v3 = vadd.f32 %v1473_v52, %v1448_v26  ;;  %v1549_v42 = vadd.f32 %v1496_v2, %v1449_v48  ;;  %v1450_v26 = vunpack.c.l.bf16 %v8968_v27  ;;  %v8970_v48 = vld [vmem:[#allocation30_spill] sm:$0xff] }
 0x23f   :  { %v1455_v52 = vunpack.c.h.bf16 %v8970_v48 }
 0x240   :  { %v4946_v62 = vmul.f32 -1.442695, %v1548_v3  ;;  %v4948_v20 = vmul.f32 -1.442695, %v1549_v42 }
 0x242   :  { %5188 = vpow2.f32 %v4946_v62 }
 0x243   :  { %5190 = vpow2.f32 %v4948_v20 }
 0x244   :  { %v1542_v28 = vpop.f32.mrf.mxu3  ;;  %v1519_v25 = vpop.f32.mrf.mxu2 }
 0x245   :  { %v1551_v38 = vadd.f32 %v1542_v28, %v1451_v36  ;;  %v1550_v42 = vadd.f32 %v1519_v25, %v1450_v26 }
 0x247   :  { %v4950_v29 = vmul.f32 -1.442695, %v1551_v38 }
 0x248   :  { %v5189_v31 = vpop.eup %5188  ;;  %v1476_v40 = vpop.f32.mrf.mxu0 }
 0x249   :  { %v1499_v63 = vpop.f32.mrf.mxu1  ;;  %v5191_v41 = vpop.eup %5190  ;;  %v1562_v59 = vadd.f32 1.0, %v5189_v31  ;;  %5192 = vpow2.f32 %v4950_v29  ;;  %v1552_v0 = vadd.f32 %v1476_v40, %v1452_v30 }
 0x24a   :  { %v1553_v61 = vadd.f32 %v1499_v63, %v1453_v33  ;;  %v1600_v23 = vadd.f32 1.0, %v5191_v41 }
 0x24b   :  { %5194 = vrcp.f32 %v1562_v59  ;;  %v4947_v35 = vmul.f32 -1.442695, %v1552_v0  ;;  %v1573_v40 = vand.u32 2147483647, %v1562_v59  ;;  %v1575_v63 = vand.u32 2147483648, %v1562_v59 }
 0x24c   :  { %5196 = vrcp.f32 %v1600_v23  ;;  %v4949_v24 = vmul.f32 -1.442695, %v1553_v61  ;;  %v1613_v31 = vand.u32 2147483648, %v1600_v23  ;;  %vm1607_vm10 = vweird.f32 %v1600_v23 }
 0x24d   :  { %5198 = vpow2.f32 %v4947_v35  ;;  %v1611_v35 = vand.u32 2147483647, %v1600_v23  ;;  %vm1569_vm11 = vweird.f32 %v1562_v59  ;;  %vm1574_vm14 = vcmp.eq.f32.partialorder %v1573_v40, 8.507059e+37 }
 0x24e   :  { %5200 = vpow2.f32 %v4949_v24 }
 0x24f   :  { %v5193_v2 = vpop.eup %5192  ;;  %v1545_v3 = vpop.f32.mrf.mxu3  ;;  %vm1612_vm15 = vcmp.eq.f32.partialorder %v1611_v35, 8.507059e+37 }
 0x250   :  { %v6778_v62 = vadd.f32 1.0, %v5193_v2  ;;  %v1555_v20 = vadd.f32 %v1545_v3, %v1455_v52  ;;  %v1576_v2 = vor.u32 1.1754944e-38, %v1575_v63  ;;  %v1454_v63 = vunpack.c.l.bf16 %v8970_v48 }
 0x251   :  { %v5195_v36 = vpop.eup %5194 }
 0x252   :  { %v5197_v28 = vpop.eup %5196  ;;  %v1565_v38 = vmul.f32 %v5195_v36, %v1562_v59  ;;  %5202 = vrcp.f32 %v6778_v62  ;;  %v4951_v30 = vmul.f32 -1.442695, %v1555_v20  ;;  %vm1570_vm8 = vweird.f32 %v5195_v36  ;;  %v1522_v59 = vpop.f32.mrf.mxu2 }
 0x253   :  { %v1603_v29 = vmul.f32 %v5197_v28, %v1600_v23  ;;  %5204 = vtanh.f32 %v1550_v42  ;;  %v5199_v27 = vpop.eup %5198  ;;  %vm1608_vm9 = vweird.f32 %v5197_v28  ;;  %vm1571_vm12 = vmor %vm1569_vm11, %vm1570_vm8  ;;  %v1653_v35 = vand.u32 2147483648, %v6778_v62 }
 0x254   :  { %v1566_v7 = vsub.f32 1.0, %v1565_v38  ;;  %v5201_v41 = vpop.eup %5200  ;;  %v6781_v61 = vadd.f32 1.0, %v5199_v27  ;;  %5206 = vpow2.f32 %v4951_v30  ;;  %vm1609_vm13 = vmor %vm1607_vm10, %vm1608_vm9  ;;  %v1614_v38 = vor.u32 1.1754944e-38, %v1613_v31 }
 0x255   :  { %v1604_v33 = vsub.f32 1.0, %v1603_v29  ;;  %v6783_v24 = vadd.f32 1.0, %v5201_v41  ;;  %v1554_v31 = vadd.f32 %v1522_v59, %v1454_v63  ;;  %vm1647_vm1 = vweird.f32 %v6778_v62 }
 0x256   :  { %v1567_v0 = vmul.f32 %v5195_v36, %v1566_v7  ;;  %5208 = vrcp.f32 %v6781_v61  ;;  %v1654_v59 = vor.u32 1.1754944e-38, %v1653_v35  ;;  %vm1584_vm6 = vweird.f32 %v6781_v61 }
 0x257   :  { %v1605_v25 = vmul.f32 %v5197_v28, %v1604_v33  ;;  %5210 = vrcp.f32 %v6783_v24  ;;  %vm1622_vm5 = vweird.f32 %v6783_v24 }
 0x258   :  { %v6785_v26 = vpop.eup %5202  ;;  %v1568_v52 = vadd.f32 %v5195_v36, %v1567_v0 }
 0x259   :  { %v1606_v3 = vadd.f32 %v5197_v28, %v1605_v25  ;;  %v1643_v42 = vmul.f32 %v6785_v26, %v6778_v62  ;;  %v5205_v20 = vpop.eup %5204  ;;  %vm1648_vm0 = vweird.f32 %v6785_v26 }
 0x25a   :  { %v1572_v29 = vsel %vm1571_vm12, %v5195_v36, %v1568_v52  ;;  %v5207_v27 = vpop.eup %5206  ;;  %vm6811_vm3 = vmor %vm1647_vm1, %vm1648_vm0 }
 0x25b   :  { %v1577_v7 = vsel %vm1574_vm14, %v1576_v2, %v1572_v29  ;;  %v1610_v30 = vsel %vm1609_vm13, %v5197_v28, %v1606_v3  ;;  %v1644_v23 = vsub.f32 1.0, %v1643_v42  ;;  %v6794_v8 = vadd.f32 1.0, %v5207_v27 }
 0x25c   :  { %v1615_v33 = vsel %vm1612_vm15, %v1614_v38, %v1610_v30  ;;  %v1674_v41 = vmul.f32 %v5205_v20, %v1577_v7  ;;  %v5209_v9 = vpop.eup %5208  ;;  %v1651_v2 = vand.u32 2147483647, %v6778_v62  ;;  %v1588_v42 = vand.u32 2147483647, %v6781_v61 }
 0x25d   :  { %v1672_v0 = vmul.f32 %v1615_v33, %v6591_v22  ;;  %v1645_v25 = vmul.f32 %v6785_v26, %v1644_v23  ;;  %v5211_v36 = vpop.eup %5210  ;;  %v1580_v28 = vmul.f32 %v5209_v9, %v6781_v61  ;;  %5212 = vrcp.f32 %v6794_v8 }
 0x25e   :  { %v1618_v52 = vmul.f32 %v5211_v36, %v6783_v24  ;;  %v1590_v20 = vand.u32 2147483648, %v6781_v61  ;;  %v1628_v38 = vand.u32 2147483648, %v6783_v24  ;;  %vm1585_vm2 = vweird.f32 %v5209_v9 }
 0x25f   :  { %v6796_v40 = vadd.f32 %v1674_v41, %v1672_v0  ;;  %v1646_v48 = vadd.f32 %v6785_v26, %v1645_v25  ;;  %v1581_v22 = vsub.f32 1.0, %v1580_v28  ;;  %v1626_v7 = vand.u32 2147483647, %v6783_v24  ;;  %vm1586_vm8 = vmor %vm1584_vm6, %vm1585_vm2 }
 0x260   :  { %v1619_v3 = vsub.f32 1.0, %v1618_v52  ;;  %vm1623_vm4 = vweird.f32 %v5211_v36  ;;  %vm1652_vm7 = vcmp.eq.f32.partialorder %v1651_v2, 8.507059e+37  ;;  %vm1589_vm9 = vcmp.eq.f32.partialorder %v1588_v42, 8.507059e+37 }
 0x261   :  { %5214 = vtanh.f32 %v6796_v40  ;;  %v1582_v29 = vmul.f32 %v5209_v9, %v1581_v22  ;;  %v1650_v62 = vsel %vm6811_vm3, %v6785_v26, %v1646_v48  ;;  %v1591_v41 = vor.u32 1.1754944e-38, %v1590_v20  ;;  %vm1624_vm10 = vmor %vm1622_vm5, %vm1623_vm4 }
 0x262   :  { %5216 = vtanh.f32 %v1554_v31  ;;  %v1620_v23 = vmul.f32 %v5211_v36, %v1619_v3  ;;  %v1629_v31 = vor.u32 1.1754944e-38, %v1628_v38  ;;  %vm1627_vm11 = vcmp.eq.f32.partialorder %v1626_v7, 8.507059e+37 }
 0x263   :  { %v5213_v27 = vpop.eup %5212  ;;  %v1583_v33 = vadd.f32 %v5209_v9, %v1582_v29  ;;  %v1655_v26 = vsel %vm1652_vm7, %v1654_v59, %v1650_v62  ;;  %vm1662_vm13 = vweird.f32 %v6794_v8  ;;  %v8974_v62 = vld [vmem:[#allocation23_spill] sm:$0xff]  ;;  %v6862_v59 = vld [vmem:[#allocation6 + $0xf0] sm:$0xff] }
 0x264   :  { %v1621_v63 = vadd.f32 %v5211_v36, %v1620_v23  ;;  %v1658_v0 = vmul.f32 %v5213_v27, %v6794_v8  ;;  %vm1663_vm12 = vweird.f32 %v5213_v27  ;;  %v8973_v23 = vld [vmem:[#allocation22_spill] sm:$0xff] }
 0x265   :  { %v1587_v28 = vsel %vm1586_vm8, %v5209_v9, %v1583_v33  ;;  %vm1664_vm14 = vmor %vm1662_vm13, %vm1663_vm12  ;;  %v8976_v33 = vld [vmem:[#allocation119_spill] sm:$0xff] }
 0x266   :  { %v1592_v52 = vsel %vm1589_vm9, %v1591_v41, %v1587_v28  ;;  %v1625_v48 = vsel %vm1624_vm10, %v5211_v36, %v1621_v63  ;;  %v1659_v24 = vsub.f32 1.0, %v1658_v0  ;;  %v1666_v36 = vand.u32 2147483647, %v6794_v8  ;;  %v6868_v41 = vld [vmem:[#allocation6 + $0xd0] sm:$0xff]  ;;  %v6871_v63 = vld [vmem:[#allocation6 + $0xd8] sm:$0xff]  ;;  %v6874_v0 = vld [vmem:[#allocation6 + $0xa0] sm:$0xff] }
 0x267   :  { %v5215_v25 = vpop.eup %5214  ;;  %v1630_v3 = vsel %vm1627_vm11, %v1629_v31, %v1625_v48  ;;  %8977 = vst [vmem:[#allocation25_spill] sm:$0xff] %v6868_v41  ;;  %v6880_v31 = vld [vmem:[#allocation6 + $0xb0] sm:$0xff]  ;;  %v6883_v28 = vld [vmem:[#allocation6 + $0xb8] sm:$0xff] }
 0x268   :  { %v5217_v35 = vpop.eup %5216  ;;  %v1680_v22 = vmul.f32 %v5215_v25, %v1655_v26  ;;  %v1673_v2 = vmul.f32 %v1630_v3, %v6618_v53  ;;  %v1660_v42 = vmul.f32 %v5213_v27, %v1659_v24  ;;  %v1668_v53 = vand.u32 2147483648, %v6794_v8  ;;  %8978 = vst [vmem:[#allocation26_spill] sm:$0xff] %v6871_v63  ;;  %v6877_v25 = vld [vmem:[#allocation6 + $0xa8] sm:$0xff]  ;;  %v6886_v26 = vld [vmem:[#allocation6 + $0x80] sm:$0xff]  ;;  %v6895_v48 = vld [vmem:[#allocation6 + $0x98] sm:$0xff] }
 0x269   :  { %v1675_v61 = vmul.f32 %v5217_v35, %v1592_v52  ;;  %vm1667_vm15 = vcmp.eq.f32.partialorder %v1666_v36, 8.507059e+37  ;;  %8979 = vst [vmem:[#allocation27_spill] sm:$0xff] %v6874_v0  ;;  %v6889_v35 = vld [vmem:[#allocation6 + $0x88] sm:$0xff]  ;;  %v6892_v52 = vld [vmem:[#allocation6 + $0x90] sm:$0xff]  ;;  %v6898_v24 = vld [vmem:[#allocation6 + $0x60] sm:$0xff] }
 0x26a   :  { %1713 = vmatmul.f32.vlgmr.msra.gmra.mxu0 %v1680_v22  ;;  %1736 = vmatmul.f32.vlgmr.msra.gmra.mxu1 %v1680_v22  ;;  %v1661_v9 = vadd.f32 %v5213_v27, %v1660_v42  ;;  %v1669_v29 = vor.u32 1.1754944e-38, %v1668_v53  ;;  %8980 = vst [vmem:[#allocation30_spill] sm:$0xff] %v6877_v25  ;;  %v6904_v3 = vld [vmem:[#allocation6 + $0x70] sm:$0xff]  ;;  %v6913_v42 = vld [vmem:[#allocation6 + $0x48] sm:$0xff]  ;;  %v6919_v53 = vld [vmem:[#allocation6 + $0x58] sm:$0xff] }
 0x26b   :  { %1759 = vmatmul.f32.vlgmr.msra.gmra.mxu2 %v1680_v22  ;;  %1782 = vmatmul.f32.vlgmr.msra.gmra.mxu3 %v1680_v22  ;;  %v6822_v20 = vadd.f32 %v1675_v61, %v1673_v2  ;;  %8981 = vst [vmem:[#allocation22_spill] sm:$0xff] %v6880_v31  ;;  %v6901_v22 = vld [vmem:[#allocation6 + $0x68] sm:$0xff]  ;;  %v6907_v61 = vld [vmem:[#allocation6 + $0x78] sm:$0xff]  ;;  %v6910_v2 = vld [vmem:[#allocation6 + $0x40] sm:$0xff] }
 0x26c   :  { %2179 = vmatpush.msra.mxu0 %v6624_v17  ;;  %2202 = vmatpush.msra.mxu1 %v6627_v15  ;;  %v1665_v38 = vsel %vm1664_vm14, %v5213_v27, %v1661_v9  ;;  %v8975_v27 = vld [vmem:[#allocation24_spill] sm:$0xff]  ;;  %8982 = vst [vmem:[#allocation23_spill] sm:$0xff] %v6883_v28  ;;  %v6922_v36 = vld [vmem:[#allocation6 + $0x20] sm:$0xff] }
 0x26d   :  { %2225 = vmatpush.msra.mxu2 %v6632_v14  ;;  %2248 = vmatpush.msra.mxu3 %v6635_v44  ;;  %5218 = vtanh.f32 %v6822_v20  ;;  %v1670_v7 = vsel %vm1667_vm15, %v1669_v29, %v1665_v38  ;;  %8983 = vst [vmem:[#allocation24_spill] sm:$0xff] %v6886_v26  ;;  %v6916_v9 = vld [vmem:[#allocation6 + $0x50] sm:$0xff]  ;;  %v6925_v38 = vld [vmem:[#allocation6 + $0x28] sm:$0xff] }
 0x26e   :  { %2180 = vmatpush.msra.mxu0 %v6642_v57  ;;  %2203 = vmatpush.msra.mxu1 %v6645_v19  ;;  %8984 = vst [vmem:[#allocation120_spill] sm:$0xff] %v6889_v35  ;;  %v6928_v29 = vld [vmem:[#allocation6 + $0x30] sm:$0xff] }
 0x26f   :  { %2226 = vmatpush.msra.mxu2 %v6651_v21  ;;  %2249 = vmatpush.msra.mxu3 %v6654_v12  ;;  %8985 = vst [vmem:[#allocation121_spill] sm:$0xff] %v6892_v52 }
 0x270   :  { %2181 = vmatpush.msra.mxu0 %v6657_v55  ;;  %2204 = vmatpush.msra.mxu1 %v6660_v32  ;;  %8986 = vst [vmem:[#allocation122_spill] sm:$0xff] %v6895_v48 }
 0x271   :  { %2227 = vmatpush.msra.mxu2 %v6663_v47  ;;  %2250 = vmatpush.msra.mxu3 %v6666_v56  ;;  %8987 = vst [vmem:[#allocation123_spill] sm:$0xff] %v6898_v24 }
 0x272   :  { %2182 = vmatpush.msra.mxu0 %v6669_v49  ;;  %2205 = vmatpush.msra.mxu1 %v6672_v5  ;;  %8988 = vst [vmem:[#allocation124_spill] sm:$0xff] %v6901_v22 }
 0x273   :  { %2228 = vmatpush.msra.mxu2 %v6675_v46  ;;  %2251 = vmatpush.msra.mxu3 %v6678_v13  ;;  %v5219_v8 = vpop.eup %5218  ;;  %8989 = vst [vmem:[#allocation125_spill] sm:$0xff] %v6904_v3 }
 0x274   :  { %2183 = vmatpush.msra.mxu0 %v6681_v54  ;;  %2206 = vmatpush.msra.mxu1 %v6684_v6  ;;  %v1681_v30 = vmul.f32 %v5219_v8, %v1670_v7  ;;  %8990 = vst [vmem:[#allocation126_spill] sm:$0xff] %v6907_v61  ;;  %v6931_v8 = vld [vmem:[#allocation6 + $0x38] sm:$0xff]  ;;  %v6934_v7 = vld [vmem:[#allocation6] sm:$0xff] }
 0x275   :  { %2229 = vmatpush.msra.mxu2 %v6687_v51  ;;  %2252 = vmatpush.msra.mxu3 %v6690_v50  ;;  %8991 = vst [vmem:[#allocation127_spill] sm:$0xff] %v6910_v2 }
 0x276   :  { %2184 = vmatpush.msra.mxu0 %v6693_v39  ;;  %2207 = vmatpush.msra.mxu1 %v6696_v16  ;;  %8992 = vst [vmem:[#allocation128_spill] sm:$0xff] %v6913_v42 }
 0x277   :  { %1716 = vmatmul.f32.gmra.mxu0 %v1681_v30  ;;  %1739 = vmatmul.f32.gmra.mxu1 %v1681_v30  ;;  %8993 = vst [vmem:[#allocation129_spill] sm:$0xff] %v6916_v9 }
 0x278   :  { %1762 = vmatmul.f32.gmra.mxu2 %v1681_v30  ;;  %1785 = vmatmul.f32.gmra.mxu3 %v1681_v30  ;;  %8994 = vst [vmem:[#allocation130_spill] sm:$0xff] %v6919_v53  ;;  %v6937_v30 = vld [vmem:[#allocation6 + $0x8] sm:$0xff] }
 0x279   :  { %2230 = vmatpush.msra.mxu2 %v6699_v10  ;;  %2253 = vmatpush.msra.mxu3 %v6702_v4  ;;  %8995 = vst [vmem:[#allocation131_spill] sm:$0xff] %v6922_v36 }
 0x27a   :  { %2185 = vmatpush.msra.mxu0 %v6705_v43  ;;  %2208 = vmatpush.msra.mxu1 %v6708_v37  ;;  %8996 = vst [vmem:[#allocation132_spill] sm:$0xff] %v6925_v38 }
 0x27b   :  { %2231 = vmatpush.msra.mxu2 %v6711_v11  ;;  %2254 = vmatpush.msra.mxu3 %v6714_v18  ;;  %8997 = vst [vmem:[#allocation133_spill] sm:$0xff] %v6928_v29 }
 0x27c   :  { %2186 = vmatpush.msra.mxu0 %v6717_v45  ;;  %2209 = vmatpush.msra.mxu1 %v8973_v23  ;;  %8998 = vst [vmem:[#allocation134_spill] sm:$0xff] %v6931_v8 }
 0x27d   :  { %2232 = vmatpush.msra.mxu2 %v8974_v62  ;;  %2255 = vmatpush.msra.mxu3 %v6726_v60  ;;  %8999 = vst [vmem:[#allocation135_spill] sm:$0xff] %v6934_v7 }
 0x27e   :  { %2187 = vmatpush.msra.mxu0 %v6729_v58  ;;  %2210 = vmatpush.msra.mxu1 %v6732_v34  ;;  %9000 = vst [vmem:[#allocation136_spill] sm:$0xff] %v6937_v30 }
 0x27f   :  { %2233 = vmatpush.msra.mxu2 %v6862_v59  ;;  %2256 = vmatpush.msra.mxu3 %v6736_v1 }
 0x280   :  { %2188 = vmatpush.msra.mxu0 %v8975_v27  ;;  %2211 = vmatpush.msra.mxu1 %v8976_v33 }
 0x281   :  { %2234 = vmatpush.msra.mxu2 %v6868_v41  ;;  %2257 = vmatpush.msra.mxu3 %v6871_v63 }
 0x282   :  { %2189 = vmatpush.msra.mxu0 %v6874_v0  ;;  %2212 = vmatpush.msra.mxu1 %v6877_v25 }
 0x283   :  { %2235 = vmatpush.msra.mxu2 %v6880_v31  ;;  %2258 = vmatpush.msra.mxu3 %v6883_v28 }
 0x284   :  { %2190 = vmatpush.msra.mxu0 %v6886_v26  ;;  %2213 = vmatpush.msra.mxu1 %v6889_v35 }
 0x285   :  { %2236 = vmatpush.msra.mxu2 %v6892_v52  ;;  %2259 = vmatpush.msra.mxu3 %v6895_v48 }
 0x286   :  { %2191 = vmatpush.msra.mxu0 %v6898_v24  ;;  %2214 = vmatpush.msra.mxu1 %v6901_v22 }
 0x287   :  { %2237 = vmatpush.msra.mxu2 %v6904_v3  ;;  %2260 = vmatpush.msra.mxu3 %v6907_v61 }
 0x288   :  { %2192 = vmatpush.msra.mxu0 %v6910_v2  ;;  %2215 = vmatpush.msra.mxu1 %v6913_v42  ;;  %v9006_v42 = vld [vmem:[#allocation29_spill] sm:$0xff] }
 0x289   :  { %2238 = vmatpush.msra.mxu2 %v6916_v9  ;;  %2261 = vmatpush.msra.mxu3 %v6919_v53  ;;  %v9004_v53 = vld [vmem:[#allocation28_spill] sm:$0xff] }
 0x28a   :  { %2193 = vmatpush.msra.mxu0 %v6922_v36  ;;  %2216 = vmatpush.msra.mxu1 %v6925_v38  ;;  %v6940_v36 = vld [vmem:[#allocation6 + $0x10] sm:$0xff]  ;;  %v6943_v38 = vld [vmem:[#allocation6 + $0x18] sm:$0xff] }
 0x28b   :  { %2239 = vmatpush.msra.mxu2 %v6928_v29  ;;  %2262 = vmatpush.msra.mxu3 %v6931_v8  ;;  %9001 = vst [vmem:[#allocation137_spill] sm:$0xff] %v6940_v36  ;;  %v9003_v29 = vld [vmem:[#allocation16_spill] sm:$0xff]  ;;  %v9005_v8 = vld [vmem:[#allocation17_spill] sm:$0xff] }
 0x28c   :  { %2194 = vmatpush.msra.mxu0 %v6934_v7  ;;  %2217 = vmatpush.msra.mxu1 %v6937_v30  ;;  %9002 = vst [vmem:[#allocation138_spill] sm:$0xff] %v6943_v38  ;;  %v378_v9 = vadd.f32 %v9004_v53, %v9003_v29  ;;  %v427_v2 = vadd.f32 %v9006_v42, %v9005_v8  ;;  %v9009_v53 = vld [vmem:[#allocation33_spill] sm:$0xff] }
 0x28d   :  { %2240 = vmatpush.msra.mxu2 %v6940_v36  ;;  %2263 = vmatpush.msra.mxu3 %v6943_v38  ;;  %v9007_v36 = vld [vmem:[#allocation31_spill] sm:$0xff]  ;;  %v9008_v38 = vld [vmem:[#allocation32_spill] sm:$0xff]  ;;  %v1692_v31 = vunpack.c.h.bf16 %v9009_v53 }
 0x28e   :  { %v562_v61 = vpack.c.bf16 %v427_v2, %v378_v9  ;;  %v380_v26 = vadd.f32 %v9007_v36, %v9003_v29  ;;  %v429_v28 = vadd.f32 %v9008_v38, %v9005_v8  ;;  %v1691_v8 = vunpack.c.l.bf16 %v9009_v53 }
 0x290   :  { %v1689_v7 = vunpack.c.l.bf16 %v562_v61  ;;  %v1690_v3 = vunpack.c.h.bf16 %v562_v61  ;;  %v564_v9 = vpack.c.bf16 %v429_v28, %v380_v26 }
 0x292   :  { %v1694_v36 = vunpack.c.h.bf16 %v564_v9 }
 0x2e7   :  { %v1714_v22 = vpop.f32.mrf.mxu0  ;;  %v1737_v24 = vpop.f32.mrf.mxu1 }
 0x2e8   :  { %v1789_v30 = vadd.f32 %v1714_v22, %v1689_v7  ;;  %v1790_v48 = vadd.f32 %v1737_v24, %v1690_v3  ;;  %v1693_v3 = vunpack.c.l.bf16 %v564_v9  ;;  %v9010_v9 = vld [vmem:[#allocation36_spill] sm:$0xff] }
 0x2e9   :  { %v1696_v29 = vunpack.c.h.bf16 %v9010_v9 }
 0x2ea   :  { %v4952_v52 = vmul.f32 -1.442695, %v1789_v30  ;;  %v4954_v35 = vmul.f32 -1.442695, %v1790_v48 }
 0x2ec   :  { %5220 = vpow2.f32 %v4952_v52 }
 0x2ed   :  { %5222 = vpow2.f32 %v4954_v35 }
 0x2ee   :  { %v1783_v42 = vpop.f32.mrf.mxu3  ;;  %v1760_v35 = vpop.f32.mrf.mxu2 }
 0x2ef   :  { %v1792_v2 = vadd.f32 %v1783_v42, %v1692_v31 }
 0x2f1   :  { %v4956_v61 = vmul.f32 -1.442695, %v1792_v2 }
 0x2f2   :  { %v5221_v25 = vpop.eup %5220 }
 0x2f3   :  { %v5223_v0 = vpop.eup %5222  ;;  %v1803_v22 = vadd.f32 1.0, %v5221_v25  ;;  %5224 = vpow2.f32 %v4956_v61  ;;  %v1791_v25 = vadd.f32 %v1760_v35, %v1691_v8 }
 0x2f4   :  { %v1841_v24 = vadd.f32 1.0, %v5223_v0  ;;  %v1717_v48 = vpop.f32.mrf.mxu0  ;;  %v1740_v52 = vpop.f32.mrf.mxu1 }
 0x2f5   :  { %5226 = vrcp.f32 %v1803_v22  ;;  %v1793_v7 = vadd.f32 %v1717_v48, %v1693_v3  ;;  %v1794_v38 = vadd.f32 %v1740_v52, %v1694_v36  ;;  %v1814_v53 = vand.u32 2147483647, %v1803_v22 }
 0x2f6   :  { %5228 = vrcp.f32 %v1841_v24  ;;  %vm1810_vm2 = vweird.f32 %v1803_v22  ;;  %v1852_v63 = vand.u32 2147483647, %v1841_v24  ;;  %vm1848_vm3 = vweird.f32 %v1841_v24 }
 0x2f7   :  { %v4953_v31 = vmul.f32 -1.442695, %v1793_v7  ;;  %v4955_v28 = vmul.f32 -1.442695, %v1794_v38  ;;  %v1816_v7 = vand.u32 2147483648, %v1803_v22  ;;  %v1854_v38 = vand.u32 2147483648, %v1841_v24 }
 0x2f8   :  { %vm1815_vm5 = vcmp.eq.f32.partialorder %v1814_v53, 8.507059e+37  ;;  %vm1853_vm7 = vcmp.eq.f32.partialorder %v1852_v63, 8.507059e+37 }
 0x2f9   :  { %v5225_v30 = vpop.eup %5224  ;;  %5230 = vpow2.f32 %v4953_v31 }
 0x2fa   :  { %v6956_v26 = vadd.f32 1.0, %v5225_v30 }
 0x2fb   :  { %v5227_v42 = vpop.eup %5226  ;;  %v1786_v0 = vpop.f32.mrf.mxu3 }
 0x2fc   :  { %v5229_v2 = vpop.eup %5228  ;;  %v1806_v61 = vmul.f32 %v5227_v42, %v1803_v22  ;;  %5232 = vrcp.f32 %v6956_v26  ;;  %v1796_v3 = vadd.f32 %v1786_v0, %v1696_v29  ;;  %vm1811_vm0 = vweird.f32 %v5227_v42 }
 0x2fd   :  { %v1844_v48 = vmul.f32 %v5229_v2, %v1841_v24  ;;  %5234 = vpow2.f32 %v4955_v28  ;;  %vm1849_vm1 = vweird.f32 %v5229_v2  ;;  %vm1812_vm4 = vmor %vm1810_vm2, %vm1811_vm0  ;;  %v1894_v63 = vand.u32 2147483648, %v6956_v26 }
 0x2fe   :  { %v1807_v52 = vsub.f32 1.0, %v1806_v61  ;;  %5236 = vtanh.f32 %v1791_v25  ;;  %v4957_v8 = vmul.f32 -1.442695, %v1796_v3  ;;  %v1817_v25 = vor.u32 1.1754944e-38, %v1816_v7  ;;  %vm1850_vm6 = vmor %vm1848_vm3, %vm1849_vm1 }
 0x2ff   :  { %v1845_v36 = vsub.f32 1.0, %v1844_v48  ;;  %v5231_v35 = vpop.eup %5230  ;;  %v1855_v48 = vor.u32 1.1754944e-38, %v1854_v38  ;;  %vm1888_vm9 = vweird.f32 %v6956_v26 }
 0x300   :  { %v1808_v30 = vmul.f32 %v5227_v42, %v1807_v52  ;;  %v6962_v28 = vadd.f32 1.0, %v5231_v35  ;;  %5238 = vpow2.f32 %v4957_v8 }
 0x301   :  { %v1846_v31 = vmul.f32 %v5229_v2, %v1845_v36 }
 0x302   :  { %v6960_v41 = vpop.eup %5232  ;;  %v1809_v33 = vadd.f32 %v5227_v42, %v1808_v30  ;;  %5240 = vrcp.f32 %v6962_v28  ;;  %vm1825_vm12 = vweird.f32 %v6962_v28 }
 0x303   :  { %v5235_v29 = vpop.eup %5234  ;;  %v1847_v0 = vadd.f32 %v5229_v2, %v1846_v31  ;;  %v1884_v61 = vmul.f32 %v6960_v41, %v6956_v26  ;;  %v1763_v31 = vpop.f32.mrf.mxu2  ;;  %vm1889_vm8 = vweird.f32 %v6960_v41 }
 0x304   :  { %v1813_v52 = vsel %vm1812_vm4, %v5227_v42, %v1809_v33  ;;  %v6967_v22 = vadd.f32 1.0, %v5235_v29  ;;  %v5237_v24 = vpop.eup %5236  ;;  %v1695_v33 = vunpack.c.l.bf16 %v9010_v9  ;;  %v1892_v9 = vand.u32 2147483647, %v6956_v26  ;;  %vm6985_vm10 = vmor %vm1888_vm9, %vm1889_vm8 }
 0x305   :  { %v1818_v3 = vsel %vm1815_vm5, %v1817_v25, %v1813_v52  ;;  %v1851_v36 = vsel %vm1850_vm6, %v5229_v2, %v1847_v0  ;;  %v1885_v30 = vsub.f32 1.0, %v1884_v61  ;;  %v1829_v26 = vand.u32 2147483647, %v6962_v28 }
 0x306   :  { %v1856_v8 = vsel %vm1853_vm7, %v1855_v48, %v1851_v36  ;;  %v1915_v35 = vmul.f32 %v5237_v24, %v1818_v3  ;;  %5242 = vrcp.f32 %v6967_v22  ;;  %v5239_v38 = vpop.eup %5238  ;;  %v1795_v2 = vadd.f32 %v1763_v31, %v1695_v33 }
 0x307   :  { %v1913_v53 = vmul.f32 %v1856_v8, %v6796_v40  ;;  %v1886_v7 = vmul.f32 %v6960_v41, %v1885_v30  ;;  %v6975_v29 = vadd.f32 1.0, %v5239_v38  ;;  %v1895_v3 = vor.u32 1.1754944e-38, %v1894_v63 }
 0x308   :  { %v5241_v25 = vpop.eup %5240  ;;  %v1831_v36 = vand.u32 2147483648, %v6962_v28  ;;  %vm1893_vm13 = vcmp.eq.f32.partialorder %v1892_v9, 8.507059e+37  ;;  %vm1863_vm15 = vweird.f32 %v6967_v22  ;;  %vm1830_vm1 = vcmp.eq.f32.partialorder %v1829_v26, 8.507059e+37  ;;  %v9043_v26 = vld [vmem:[#allocation35_spill] sm:$0xff] }
 0x309   :  { %v6973_v42 = vadd.f32 %v1915_v35, %v1913_v53  ;;  %v1887_v0 = vadd.f32 %v6960_v41, %v1886_v7  ;;  %v1821_v40 = vmul.f32 %v5241_v25, %v6962_v28  ;;  %vm1826_vm11 = vweird.f32 %v5241_v25 }
 0x30a   :  { %v1869_v53 = vand.u32 2147483648, %v6967_v22  ;;  %v1867_v7 = vand.u32 2147483647, %v6967_v22  ;;  %vm1827_vm0 = vmor %vm1825_vm12, %vm1826_vm11  ;;  %vm1903_vm5 = vweird.f32 %v6975_v29 }
 0x30b   :  { %5244 = vtanh.f32 %v6973_v42  ;;  %v1822_v52 = vsub.f32 1.0, %v1821_v40  ;;  %v1891_v30 = vsel %vm6985_vm10, %v6960_v41, %v1887_v0  ;;  %v1832_v41 = vor.u32 1.1754944e-38, %v1831_v36 }
 0x30c   :  { %v5243_v61 = vpop.eup %5242  ;;  %5246 = vrcp.f32 %v6975_v29  ;;  %v1896_v63 = vsel %vm1893_vm13, %v1895_v3, %v1891_v30  ;;  %vm1868_vm3 = vcmp.eq.f32.partialorder %v1867_v7, 8.507059e+37 }
 0x30d   :  { %v1859_v24 = vmul.f32 %v5243_v61, %v6967_v22  ;;  %5248 = vtanh.f32 %v1795_v2  ;;  %v1823_v35 = vmul.f32 %v5241_v25, %v1822_v52  ;;  %vm1864_vm14 = vweird.f32 %v5243_v61 }
 0x30e   :  { %vm1865_vm2 = vmor %vm1863_vm15, %vm1864_vm14 }
 0x30f   :  { %v1860_v8 = vsub.f32 1.0, %v1859_v24  ;;  %v1824_v33 = vadd.f32 %v5241_v25, %v1823_v35  ;;  %v1870_v24 = vor.u32 1.1754944e-38, %v1869_v53  ;;  %v9042_v35 = vld [vmem:[#allocation17_spill] sm:$0xff] }
 0x310   :  { %v432_v53 = vadd.f32 %v9043_v26, %v9042_v35  ;;  %v9051_v26 = vld [vmem:[#allocation46_spill] sm:$0xff] }
 0x311   :  { %v5245_v31 = vpop.eup %5244  ;;  %v1861_v38 = vmul.f32 %v5243_v61, %v1860_v8  ;;  %v1828_v40 = vsel %vm1827_vm0, %v5241_v25, %v1824_v33 }
 0x312   :  { %v5247_v2 = vpop.eup %5246  ;;  %v1921_v0 = vmul.f32 %v5245_v31, %v1896_v63  ;;  %v1833_v9 = vsel %vm1830_vm1, %v1832_v41, %v1828_v40  ;;  %v9044_v31 = vld [vmem:[#allocation19_spill] sm:$0xff]  ;;  %v9046_v63 = vld [vmem:[#allocation21_spill] sm:$0xff] }
 0x313   :  { %v1862_v48 = vadd.f32 %v5243_v61, %v1861_v38  ;;  %v1899_v52 = vmul.f32 %v5247_v2, %v6975_v29  ;;  %v5249_v28 = vpop.eup %5248  ;;  %vm1904_vm4 = vweird.f32 %v5247_v2  ;;  %v9045_v38 = vld [vmem:[#allocation37_spill] sm:$0xff] }
 0x314   :  { %1954 = vmatmul.f32.vlgmr.msrb.gmra.mxu0 %v1921_v0  ;;  %1977 = vmatmul.f32.vlgmr.msrb.gmra.mxu1 %v1921_v0  ;;  %v1916_v3 = vmul.f32 %v5249_v28, %v1833_v9  ;;  %vm1905_vm6 = vmor %vm1903_vm5, %vm1904_vm4  ;;  %v481_v33 = vadd.f32 %v9045_v38, %v9044_v31 }
 0x315   :  { %v1866_v8 = vsel %vm1865_vm2, %v5243_v61, %v1862_v48  ;;  %v1900_v30 = vsub.f32 1.0, %v1899_v52  ;;  %2000 = vmatmul.f32.vlgmr.msrb.gmra.mxu2 %v1921_v0  ;;  %2023 = vmatmul.f32.vlgmr.msrb.gmra.mxu3 %v1921_v0 }
 0x316   :  { %v1871_v22 = vsel %vm1868_vm3, %v1870_v24, %v1866_v8  ;;  %2420 = vmatpush.msrb.mxu0 %v6624_v17  ;;  %2443 = vmatpush.msrb.mxu1 %v6627_v15  ;;  %v1909_v15 = vand.u32 2147483648, %v6975_v29 }
 0x317   :  { %v1914_v25 = vmul.f32 %v1871_v22, %v6822_v20  ;;  %v1901_v36 = vmul.f32 %v5247_v2, %v1900_v30  ;;  %2466 = vmatpush.msrb.mxu2 %v6632_v14  ;;  %2489 = vmatpush.msrb.mxu3 %v6635_v44  ;;  %v1907_v14 = vand.u32 2147483647, %v6975_v29  ;;  %v9038_v20 = vld [vmem:[#allocation137_spill] sm:$0xff]  ;;  %v9048_v22 = vld [vmem:[#allocation39_spill] sm:$0xff] }
 0x318   :  { %2421 = vmatpush.msrb.mxu0 %v6642_v57  ;;  %2444 = vmatpush.msrb.mxu1 %v6645_v19  ;;  %v1910_v57 = vor.u32 1.1754944e-38, %v1909_v15 }
 0x319   :  { %v7007_v61 = vadd.f32 %v1916_v3, %v1914_v25  ;;  %2467 = vmatpush.msrb.mxu2 %v6651_v21  ;;  %2490 = vmatpush.msrb.mxu3 %v6654_v12  ;;  %v1902_v17 = vadd.f32 %v5247_v2, %v1901_v36  ;;  %vm1908_vm7 = vcmp.eq.f32.partialorder %v1907_v14, 8.507059e+37  ;;  %v9049_v36 = vld [vmem:[#allocation40_spill] sm:$0xff] }
 0x31a   :  { %2422 = vmatpush.msrb.mxu0 %v6657_v55  ;;  %2445 = vmatpush.msrb.mxu1 %v6660_v32  ;;  %v9013_v55 = vld [vmem:[#allocation119_spill] sm:$0xff]  ;;  %v9014_v32 = vld [vmem:[#allocation25_spill] sm:$0xff] }
 0x31b   :  { %5250 = vtanh.f32 %v7007_v61  ;;  %2468 = vmatpush.msrb.mxu2 %v6663_v47  ;;  %2491 = vmatpush.msrb.mxu3 %v6666_v56  ;;  %v1906_v44 = vsel %vm1905_vm6, %v5247_v2, %v1902_v17  ;;  %v9015_v47 = vld [vmem:[#allocation26_spill] sm:$0xff]  ;;  %v9016_v56 = vld [vmem:[#allocation27_spill] sm:$0xff]  ;;  %v434_v17 = vadd.f32 %v9049_v36, %v9042_v35 }
 0x31c   :  { %2423 = vmatpush.msrb.mxu0 %v6669_v49  ;;  %2446 = vmatpush.msrb.mxu1 %v6672_v5  ;;  %v1911_v21 = vsel %vm1908_vm7, %v1910_v57, %v1906_v44  ;;  %v9017_v49 = vld [vmem:[#allocation30_spill] sm:$0xff]  ;;  %v9021_v5 = vld [vmem:[#allocation120_spill] sm:$0xff] }
 0x31d   :  { %2469 = vmatpush.msrb.mxu2 %v6675_v46  ;;  %2492 = vmatpush.msrb.mxu3 %v6678_v13  ;;  %v9023_v46 = vld [vmem:[#allocation122_spill] sm:$0xff]  ;;  %v9024_v13 = vld [vmem:[#allocation123_spill] sm:$0xff] }
 0x31e   :  { %2424 = vmatpush.msrb.mxu0 %v6681_v54  ;;  %2447 = vmatpush.msrb.mxu1 %v6684_v6  ;;  %v9025_v54 = vld [vmem:[#allocation124_spill] sm:$0xff]  ;;  %v9026_v6 = vld [vmem:[#allocation125_spill] sm:$0xff]  ;;  %v9047_v2 = vld [vmem:[#allocation38_spill] sm:$0xff] }
 0x31f   :  { %2470 = vmatpush.msrb.mxu2 %v6687_v51  ;;  %2493 = vmatpush.msrb.mxu3 %v6690_v50  ;;  %v9027_v51 = vld [vmem:[#allocation126_spill] sm:$0xff]  ;;  %v9028_v50 = vld [vmem:[#allocation127_spill] sm:$0xff]  ;;  %v530_v41 = vadd.f32 %v9047_v2, %v9046_v63 }
 0x320   :  { %2425 = vmatpush.msrb.mxu0 %v6693_v39  ;;  %2448 = vmatpush.msrb.mxu1 %v6696_v16  ;;  %v9029_v39 = vld [vmem:[#allocation128_spill] sm:$0xff]  ;;  %v9030_v16 = vld [vmem:[#allocation129_spill] sm:$0xff] }
 0x321   :  { %v5251_v19 = vpop.eup %5250  ;;  %2471 = vmatpush.msrb.mxu2 %v6699_v10  ;;  %2494 = vmatpush.msrb.mxu3 %v6702_v4  ;;  %v9031_v10 = vld [vmem:[#allocation130_spill] sm:$0xff]  ;;  %v9032_v4 = vld [vmem:[#allocation131_spill] sm:$0xff]  ;;  %v567_v9 = vpack.c.bf16 %v530_v41, %v481_v33 }
 0x322   :  { %v1922_v12 = vmul.f32 %v5251_v19, %v1911_v21  ;;  %2426 = vmatpush.msrb.mxu0 %v6705_v43  ;;  %2449 = vmatpush.msrb.mxu1 %v6708_v37  ;;  %v9033_v43 = vld [vmem:[#allocation132_spill] sm:$0xff]  ;;  %v9034_v37 = vld [vmem:[#allocation133_spill] sm:$0xff] }
 0x323   :  { %2472 = vmatpush.msrb.mxu2 %v6711_v11  ;;  %2495 = vmatpush.msrb.mxu3 %v6714_v18  ;;  %v9035_v11 = vld [vmem:[#allocation134_spill] sm:$0xff]  ;;  %v9036_v18 = vld [vmem:[#allocation135_spill] sm:$0xff]  ;;  %v1933_v30 = vunpack.c.h.bf16 %v567_v9 }
 0x324   :  { %1957 = vmatmul.f32.gmra.mxu0 %v1922_v12  ;;  %1980 = vmatmul.f32.gmra.mxu1 %v1922_v12 }
 0x325   :  { %2003 = vmatmul.f32.gmra.mxu2 %v1922_v12  ;;  %2026 = vmatmul.f32.gmra.mxu3 %v1922_v12 }
 0x326   :  { %2427 = vmatpush.msrb.mxu0 %v6717_v45  ;;  %2450 = vmatpush.msrb.mxu1 %v8973_v23  ;;  %v9037_v45 = vld [vmem:[#allocation136_spill] sm:$0xff]  ;;  %v9039_v23 = vld [vmem:[#allocation138_spill] sm:$0xff] }
 0x327   :  { %2473 = vmatpush.msrb.mxu2 %v8974_v62  ;;  %2496 = vmatpush.msrb.mxu3 %v6726_v60  ;;  %v9018_v60 = vld [vmem:[#allocation22_spill] sm:$0xff]  ;;  %v9040_v62 = vld [vmem:[#allocation16_spill] sm:$0xff] }
 0x328   :  { %2428 = vmatpush.msrb.mxu0 %v6729_v58  ;;  %2451 = vmatpush.msrb.mxu1 %v6732_v34  ;;  %v9019_v58 = vld [vmem:[#allocation23_spill] sm:$0xff]  ;;  %v9020_v34 = vld [vmem:[#allocation24_spill] sm:$0xff]  ;;  %v385_v25 = vadd.f32 %v9048_v22, %v9040_v62 }
 0x329   :  { %2474 = vmatpush.msrb.mxu2 %v6862_v59  ;;  %2497 = vmatpush.msrb.mxu3 %v6736_v1  ;;  %v9022_v1 = vld [vmem:[#allocation121_spill] sm:$0xff] }
 0x32a   :  { %2429 = vmatpush.msrb.mxu0 %v8975_v27  ;;  %2452 = vmatpush.msrb.mxu1 %v9013_v55  ;;  %v9041_v27 = vld [vmem:[#allocation34_spill] sm:$0xff]  ;;  %v568_v19 = vpack.c.bf16 %v434_v17, %v385_v25 }
 0x32b   :  { %2475 = vmatpush.msrb.mxu2 %v9014_v32  ;;  %2498 = vmatpush.msrb.mxu3 %v9015_v47  ;;  %v383_v29 = vadd.f32 %v9041_v27, %v9040_v62  ;;  %v9050_v27 = vld [vmem:[#allocation45_spill] sm:$0xff] }
 0x32c   :  { %2430 = vmatpush.msrb.mxu0 %v9016_v56  ;;  %2453 = vmatpush.msrb.mxu1 %v9017_v49  ;;  %v1935_v38 = vunpack.c.h.bf16 %v568_v19 }
 0x32d   :  { %2476 = vmatpush.msrb.mxu2 %v9018_v60  ;;  %2499 = vmatpush.msrb.mxu3 %v9019_v58  ;;  %v566_v7 = vpack.c.bf16 %v432_v53, %v383_v29  ;;  %v483_v29 = vadd.f32 %v9050_v27, %v9044_v31  ;;  %v532_v53 = vadd.f32 %v9051_v26, %v9046_v63 }
 0x32e   :  { %2431 = vmatpush.msrb.mxu0 %v9020_v34  ;;  %2454 = vmatpush.msrb.mxu1 %v9021_v5 }
 0x32f   :  { %2477 = vmatpush.msrb.mxu2 %v9022_v1  ;;  %2500 = vmatpush.msrb.mxu3 %v9023_v46  ;;  %v1930_v0 = vunpack.c.l.bf16 %v566_v7  ;;  %v1931_v40 = vunpack.c.h.bf16 %v566_v7  ;;  %v1934_v7 = vunpack.c.l.bf16 %v568_v19 }
 0x330   :  { %2432 = vmatpush.msrb.mxu0 %v9024_v13  ;;  %2455 = vmatpush.msrb.mxu1 %v9025_v54 }
 0x331   :  { %2478 = vmatpush.msrb.mxu2 %v9026_v6  ;;  %2501 = vmatpush.msrb.mxu3 %v9027_v51 }
 0x332   :  { %2433 = vmatpush.msrb.mxu0 %v9028_v50  ;;  %2456 = vmatpush.msrb.mxu1 %v9029_v39 }
 0x333   :  { %2479 = vmatpush.msrb.mxu2 %v9030_v16  ;;  %2502 = vmatpush.msrb.mxu3 %v9031_v10 }
 0x334   :  { %2434 = vmatpush.msrb.mxu0 %v9032_v4  ;;  %2457 = vmatpush.msrb.mxu1 %v9033_v43 }
 0x335   :  { %2480 = vmatpush.msrb.mxu2 %v9034_v37  ;;  %2503 = vmatpush.msrb.mxu3 %v9035_v11 }
 0x336   :  { %2435 = vmatpush.msrb.mxu0 %v9036_v18  ;;  %2458 = vmatpush.msrb.mxu1 %v9037_v45 }
 0x337   :  { %2481 = vmatpush.msrb.mxu2 %v9038_v20  ;;  %2504 = vmatpush.msrb.mxu3 %v9039_v23 }
 0x391   :  { %v1955_v48 = vpop.f32.mrf.mxu0  ;;  %v1978_v52 = vpop.f32.mrf.mxu1 }
 0x392   :  { %v2030_v28 = vadd.f32 %v1955_v48, %v1930_v0  ;;  %v2031_v24 = vadd.f32 %v1978_v52, %v1931_v40  ;;  %v7087_v52 = vpack.c.bf16 %v532_v53, %v483_v29 }
 0x394   :  { %v4958_v8 = vmul.f32 -1.442695, %v2030_v28  ;;  %v4960_v3 = vmul.f32 -1.442695, %v2031_v24  ;;  %v1932_v28 = vunpack.c.l.bf16 %v567_v9 }
 0x396   :  { %5252 = vpow2.f32 %v4958_v8 }
 0x397   :  { %5254 = vpow2.f32 %v4960_v3 }
 0x398   :  { %v2024_v15 = vpop.f32.mrf.mxu3  ;;  %v2001_v41 = vpop.f32.mrf.mxu2 }
 0x399   :  { %v2033_v14 = vadd.f32 %v2024_v15, %v1933_v30  ;;  %v2032_v22 = vadd.f32 %v2001_v41, %v1932_v28  ;;  %v1937_v15 = vunpack.c.h.bf16 %v7087_v52 }
 0x39b   :  { %v4962_v44 = vmul.f32 -1.442695, %v2033_v14 }
 0x39c   :  { %v5253_v57 = vpop.eup %5252 }
 0x39d   :  { %v5255_v21 = vpop.eup %5254  ;;  %v2044_v12 = vadd.f32 1.0, %v5253_v57  ;;  %5256 = vpow2.f32 %v4962_v44 }
 0x39e   :  { %v2082_v55 = vadd.f32 1.0, %v5255_v21 }
 0x39f   :  { %5258 = vrcp.f32 %v2044_v12  ;;  %v2055_v44 = vand.u32 2147483647, %v2044_v12  ;;  %v2057_v9 = vand.u32 2147483648, %v2044_v12  ;;  %vm2051_vm11 = vweird.f32 %v2044_v12 }
 0x3a0   :  { %5260 = vrcp.f32 %v2082_v55  ;;  %v2095_v27 = vand.u32 2147483648, %v2082_v55  ;;  %v2093_v26 = vand.u32 2147483647, %v2082_v55  ;;  %vm2089_vm10 = vweird.f32 %v2082_v55 }
 0x3a1   :  { %v1958_v33 = vpop.f32.mrf.mxu0  ;;  %v1981_v2 = vpop.f32.mrf.mxu1  ;;  %vm2056_vm12 = vcmp.eq.f32.partialorder %v2055_v44, 8.507059e+37  ;;  %v2058_v41 = vor.u32 1.1754944e-38, %v2057_v9 }
 0x3a2   :  { %v2034_v0 = vadd.f32 %v1958_v33, %v1934_v7  ;;  %v2035_v40 = vadd.f32 %v1981_v2, %v1935_v38  ;;  %v2096_v28 = vor.u32 1.1754944e-38, %v2095_v27  ;;  %vm2094_vm15 = vcmp.eq.f32.partialorder %v2093_v26, 8.507059e+37 }
 0x3a3   :  { %v5257_v48 = vpop.eup %5256 }
 0x3a4   :  { %v7089_v24 = vadd.f32 1.0, %v5257_v48  ;;  %v4959_v8 = vmul.f32 -1.442695, %v2034_v0  ;;  %v4961_v3 = vmul.f32 -1.442695, %v2035_v40 }
 0x3a5   :  { %v5259_v30 = vpop.eup %5258 }
 0x3a6   :  { %v5261_v25 = vpop.eup %5260  ;;  %v2047_v36 = vmul.f32 %v5259_v30, %v2044_v12  ;;  %5262 = vrcp.f32 %v7089_v24  ;;  %vm2052_vm8 = vweird.f32 %v5259_v30  ;;  %v2133_v26 = vand.u32 2147483647, %v7089_v24 }
 0x3a7   :  { %v2085_v17 = vmul.f32 %v5261_v25, %v2082_v55  ;;  %5264 = vpow2.f32 %v4959_v8  ;;  %vm2090_vm9 = vweird.f32 %v5261_v25  ;;  %vm2053_vm13 = vmor %vm2051_vm11, %vm2052_vm8  ;;  %vm2129_vm1 = vweird.f32 %v7089_v24 }
 0x3a8   :  { %v2048_v14 = vsub.f32 1.0, %v2047_v36  ;;  %5266 = vpow2.f32 %v4961_v3  ;;  %v2027_v57 = vpop.f32.mrf.mxu3  ;;  %vm2091_vm14 = vmor %vm2089_vm10, %vm2090_vm9  ;;  %vm2134_vm3 = vcmp.eq.f32.partialorder %v2133_v26, 8.507059e+37 }
 0x3a9   :  { %v2086_v19 = vsub.f32 1.0, %v2085_v17  ;;  %5268 = vtanh.f32 %v2032_v22  ;;  %v2037_v21 = vadd.f32 %v2027_v57, %v1937_v15 }
 0x3aa   :  { %v2049_v29 = vmul.f32 %v5259_v30, %v2048_v14 }
 0x3ab   :  { %v2087_v53 = vmul.f32 %v5261_v25, %v2086_v19  ;;  %v4963_v7 = vmul.f32 -1.442695, %v2037_v21  ;;  %v2004_v21 = vpop.f32.mrf.mxu2 }
 0x3ac   :  { %v5263_v38 = vpop.eup %5262  ;;  %v2050_v33 = vadd.f32 %v5259_v30, %v2049_v29 }
 0x3ad   :  { %v5265_v2 = vpop.eup %5264  ;;  %v2088_v0 = vadd.f32 %v5261_v25, %v2087_v53  ;;  %v2125_v40 = vmul.f32 %v5263_v38, %v7089_v24  ;;  %5270 = vpow2.f32 %v4963_v7  ;;  %vm2130_vm0 = vweird.f32 %v5263_v38 }
 0x3ae   :  { %v5267_v48 = vpop.eup %5266  ;;  %v2054_v8 = vsel %vm2053_vm13, %v5259_v30, %v2050_v33  ;;  %v2045_v3 = vadd.f32 1.0, %v5265_v2  ;;  %v1936_v30 = vunpack.c.l.bf16 %v7087_v52  ;;  %vm7104_vm2 = vmor %vm2129_vm1, %vm2130_vm0  ;;  %v7121_v33 = vld [vmem:[#allocation6 + $0x1e0] sm:$0xff] }
 0x3af   :  { %v5269_v22 = vpop.eup %5268  ;;  %v2059_v36 = vsel %vm2056_vm12, %v2058_v41, %v2054_v8  ;;  %v2092_v17 = vsel %vm2091_vm14, %v5261_v25, %v2088_v0  ;;  %v2126_v55 = vsub.f32 1.0, %v2125_v40  ;;  %v2083_v15 = vadd.f32 1.0, %v5267_v48 }
 0x3b0   :  { %v2097_v12 = vsel %vm2094_vm15, %v2096_v28, %v2092_v17  ;;  %v2156_v14 = vmul.f32 %v5269_v22, %v2059_v36  ;;  %5272 = vrcp.f32 %v2045_v3  ;;  %v2135_v25 = vand.u32 2147483648, %v7089_v24 }
 0x3b1   :  { %v2154_v44 = vmul.f32 %v2097_v12, %v6973_v42  ;;  %v2127_v57 = vmul.f32 %v5263_v38, %v2126_v55  ;;  %5274 = vrcp.f32 %v2083_v15  ;;  %v2036_v42 = vadd.f32 %v2004_v21, %v1936_v30  ;;  %v7176_v30 = vld [vmem:[#allocation6 + $0x198] sm:$0xff] }
 0x3b2   :  { %v2136_v0 = vor.u32 1.1754944e-38, %v2135_v25  ;;  %v2110_v28 = vand.u32 2147483648, %v2083_v15  ;;  %v2072_v8 = vand.u32 2147483648, %v2045_v3  ;;  %v2070_v36 = vand.u32 2147483647, %v2045_v3 }
 0x3b3   :  { %v5271_v19 = vpop.eup %5270  ;;  %v7095_v9 = vadd.f32 %v2156_v14, %v2154_v44  ;;  %v2128_v27 = vadd.f32 %v5263_v38, %v2127_v57  ;;  %v2108_v12 = vand.u32 2147483647, %v2083_v15  ;;  %vm2066_vm6 = vweird.f32 %v2045_v3 }
 0x3b4   :  { %v7100_v29 = vadd.f32 1.0, %v5271_v19  ;;  %vm2104_vm7 = vweird.f32 %v2083_v15  ;;  %vm2071_vm10 = vcmp.eq.f32.partialorder %v2070_v36, 8.507059e+37  ;;  %v7152_v36 = vld [vmem:[#allocation6 + $0x1a8] sm:$0xff] }
 0x3b5   :  { %5276 = vtanh.f32 %v7095_v9  ;;  %v2132_v41 = vsel %vm7104_vm2, %v5263_v38, %v2128_v27  ;;  %v2073_v38 = vor.u32 1.1754944e-38, %v2072_v8  ;;  %v2111_v27 = vor.u32 1.1754944e-38, %v2110_v28  ;;  %v7138_v28 = vld [vmem:[#allocation6 + $0x1c8] sm:$0xff]  ;;  %v7141_v8 = vld [vmem:[#allocation6 + $0x1d0] sm:$0xff] }
 0x3b6   :  { %v5273_v53 = vpop.eup %5272  ;;  %5278 = vrcp.f32 %v7100_v29  ;;  %v2137_v17 = vsel %vm2134_vm3, %v2136_v0, %v2132_v41  ;;  %vm2109_vm11 = vcmp.eq.f32.partialorder %v2108_v12, 8.507059e+37  ;;  %v7127_v41 = vld [vmem:[#allocation6 + $0x1f0] sm:$0xff]  ;;  %v7130_v0 = vld [vmem:[#allocation6 + $0x1f8] sm:$0xff]  ;;  %vm2144_vm13 = vweird.f32 %v7100_v29 }
 0x3b7   :  { %v5275_v7 = vpop.eup %5274  ;;  %v2062_v2 = vmul.f32 %v5273_v53, %v2045_v3  ;;  %5280 = vtanh.f32 %v2036_v42  ;;  %vm2067_vm4 = vweird.f32 %v5273_v53  ;;  %v7160_v12 = vld [vmem:[#allocation6 + $0x1b8] sm:$0xff] }
 0x3b8   :  { %v2100_v52 = vmul.f32 %v5275_v7, %v2083_v15  ;;  %vm2105_vm5 = vweird.f32 %v5275_v7  ;;  %vm2068_vm8 = vmor %vm2066_vm6, %vm2067_vm4 }
 0x3b9   :  { %v2063_v40 = vsub.f32 1.0, %v2062_v2  ;;  %vm7115_vm9 = vmor %vm2104_vm7, %vm2105_vm5  ;;  %v7124_v2 = vld [vmem:[#allocation6 + $0x1e8] sm:$0xff] }
 0x3ba   :  { %v2101_v48 = vsub.f32 1.0, %v2100_v52 }
 0x3bb   :  { %v5277_v24 = vpop.eup %5276  ;;  %v2064_v22 = vmul.f32 %v5273_v53, %v2063_v40 }
 0x3bc   :  { %v2102_v55 = vmul.f32 %v5275_v7, %v2101_v48  ;;  %v2162_v14 = vmul.f32 %v5277_v24, %v2137_v17  ;;  %v7111_v44 = vpop.eup %5278  ;;  %v7135_v48 = vld [vmem:[#allocation6 + $0x1c0] sm:$0xff]  ;;  %v7144_v24 = vld [vmem:[#allocation6 + $0x1d8] sm:$0xff] }
 0x3bd   :  { %v2065_v57 = vadd.f32 %v5273_v53, %v2064_v22  ;;  %v2140_v21 = vmul.f32 %v7111_v44, %v7100_v29  ;;  %v5281_v26 = vpop.eup %5280  ;;  %vm2145_vm12 = vweird.f32 %v7111_v44 }
 0x3be   :  { %v2103_v19 = vadd.f32 %v5275_v7, %v2102_v55  ;;  %2195 = vmatmul.f32.vlgmr.msra.gmra.mxu0 %v2162_v14  ;;  %2218 = vmatmul.f32.vlgmr.msra.gmra.mxu1 %v2162_v14  ;;  %v7157_v55 = vld [vmem:[#allocation6 + $0x1b0] sm:$0xff]  ;;  %vm7181_vm14 = vmor %vm2144_vm13, %vm2145_vm12 }
 0x3bf   :  { %v2069_v25 = vsel %vm2068_vm8, %v5273_v53, %v2065_v57  ;;  %2241 = vmatmul.f32.vlgmr.msra.gmra.mxu2 %v2162_v14  ;;  %2264 = vmatmul.f32.vlgmr.msra.gmra.mxu3 %v2162_v14  ;;  %v2141_v42 = vsub.f32 1.0, %v2140_v21  ;;  %v2150_v14 = vand.u32 2147483648, %v7100_v29  ;;  %v7165_v57 = vld [vmem:[#allocation6 + $0x180] sm:$0xff]  ;;  %v7173_v21 = vld [vmem:[#allocation6 + $0x190] sm:$0xff] }
 0x3c0   :  { %v2074_v3 = vsel %vm2071_vm10, %v2073_v38, %v2069_v25  ;;  %v2107_v15 = vsel %vm7115_vm9, %v5275_v7, %v2103_v19  ;;  %2661 = vmatpush.msra.mxu0 %v7121_v33  ;;  %2684 = vmatpush.msra.mxu1 %v7124_v2  ;;  %v7168_v38 = vld [vmem:[#allocation6 + $0x188] sm:$0xff]  ;;  %v2148_v19 = vand.u32 2147483647, %v7100_v29  ;;  %v7185_v25 = vld [vmem:[#allocation6 + $0x160] sm:$0xff] }
 0x3c1   :  { %v2112_v52 = vsel %vm2109_vm11, %v2111_v27, %v2107_v15  ;;  %v2157_v53 = vmul.f32 %v5281_v26, %v2074_v3  ;;  %2707 = vmatpush.msra.mxu2 %v7127_v41  ;;  %2730 = vmatpush.msra.mxu3 %v7130_v0  ;;  %v2142_v40 = vmul.f32 %v7111_v44, %v2141_v42  ;;  %v7188_v26 = vld [vmem:[#allocation6 + $0x168] sm:$0xff]  ;;  %v7194_v3 = vld [vmem:[#allocation6 + $0x170] sm:$0xff]  ;;  %v7197_v15 = vld [vmem:[#allocation6 + $0x178] sm:$0xff]  ;;  %v2151_v42 = vor.u32 1.1754944e-38, %v2150_v14 }
 0x3c2   :  { %v2155_v7 = vmul.f32 %v2112_v52, %v7007_v61  ;;  %2662 = vmatpush.msra.mxu0 %v7135_v48  ;;  %2685 = vmatpush.msra.mxu1 %v7138_v28  ;;  %v7149_v61 = vld [vmem:[#allocation6 + $0x1a0] sm:$0xff]  ;;  %vm2149_vm15 = vcmp.eq.f32.partialorder %v2148_v19, 8.507059e+37  ;;  %v7215_v27 = vld [vmem:[#allocation6 + $0x128] sm:$0xff]  ;;  %v7218_v19 = vld [vmem:[#allocation6 + $0x130] sm:$0xff] }
 0x3c3   :  { %2708 = vmatpush.msra.mxu2 %v7141_v8  ;;  %2731 = vmatpush.msra.mxu3 %v7144_v24  ;;  %v2143_v17 = vadd.f32 %v7111_v44, %v2142_v40  ;;  %v7200_v52 = vld [vmem:[#allocation6 + $0x140] sm:$0xff] }
 0x3c4   :  { %v7147_v22 = vadd.f32 %v2157_v53, %v2155_v7  ;;  %2663 = vmatpush.msra.mxu0 %v7149_v61  ;;  %2686 = vmatpush.msra.mxu1 %v7152_v36  ;;  %v7203_v53 = vld [vmem:[#allocation6 + $0x148] sm:$0xff]  ;;  %v7206_v7 = vld [vmem:[#allocation6 + $0x150] sm:$0xff]  ;;  %v7212_v14 = vld [vmem:[#allocation6 + $0x120] sm:$0xff] }
 0x3c5   :  { %2709 = vmatpush.msra.mxu2 %v7157_v55  ;;  %2732 = vmatpush.msra.mxu3 %v7160_v12  ;;  %v2147_v29 = vsel %vm7181_vm14, %v7111_v44, %v2143_v17  ;;  %9058 = vst [vmem:[#allocation28_spill] sm:$0xff] %v7203_v53  ;;  %v7209_v44 = vld [vmem:[#allocation6 + $0x158] sm:$0xff] }
 0x3c6   :  { %5282 = vtanh.f32 %v7147_v22  ;;  %2664 = vmatpush.msra.mxu0 %v7165_v57  ;;  %2687 = vmatpush.msra.mxu1 %v7168_v38  ;;  %9059 = vst [vmem:[#allocation29_spill] sm:$0xff] %v7206_v7  ;;  %v2152_v17 = vsel %vm2149_vm15, %v2151_v42, %v2147_v29  ;;  %v7227_v29 = vld [vmem:[#allocation6 + $0x108] sm:$0xff]  ;;  %v7230_v42 = vld [vmem:[#allocation6 + $0x110] sm:$0xff] }
 0x3c7   :  { %2710 = vmatpush.msra.mxu2 %v7173_v21  ;;  %2733 = vmatpush.msra.mxu3 %v7176_v30  ;;  %9060 = vst [vmem:[#allocation31_spill] sm:$0xff] %v7209_v44 }
 0x3c8   :  { %2665 = vmatpush.msra.mxu0 %v7185_v25  ;;  %2688 = vmatpush.msra.mxu1 %v7188_v26  ;;  %9062 = vst [vmem:[#allocation33_spill] sm:$0xff] %v7227_v29 }
 0x3c9   :  { %2711 = vmatpush.msra.mxu2 %v7194_v3  ;;  %2734 = vmatpush.msra.mxu3 %v7197_v15  ;;  %9063 = vst [vmem:[#allocation36_spill] sm:$0xff] %v7230_v42 }
 0x3ca   :  { %2666 = vmatpush.msra.mxu0 %v7200_v52  ;;  %2689 = vmatpush.msra.mxu1 %v7203_v53 }
 0x3cb   :  { %2712 = vmatpush.msra.mxu2 %v7206_v7  ;;  %2735 = vmatpush.msra.mxu3 %v7209_v44  ;;  %v7221_v7 = vld [vmem:[#allocation6 + $0x138] sm:$0xff]  ;;  %v7224_v44 = vld [vmem:[#allocation6 + $0x100] sm:$0xff] }
 0x3cc   :  { %v5283_v40 = vpop.eup %5282  ;;  %2667 = vmatpush.msra.mxu0 %v7212_v14  ;;  %2690 = vmatpush.msra.mxu1 %v7215_v27  ;;  %9061 = vst [vmem:[#allocation32_spill] sm:$0xff] %v7224_v44 }
 0x3cd   :  { %v2163_v53 = vmul.f32 %v5283_v40, %v2152_v17  ;;  %2713 = vmatpush.msra.mxu2 %v7218_v19  ;;  %2736 = vmatpush.msra.mxu3 %v7221_v7  ;;  %v7233_v40 = vld [vmem:[#allocation6 + $0x118] sm:$0xff]  ;;  %v7236_v17 = vld [vmem:[#allocation6 + $0xe0] sm:$0xff] }
 0x3ce   :  { %2668 = vmatpush.msra.mxu0 %v7224_v44  ;;  %2691 = vmatpush.msra.mxu1 %v7227_v29  ;;  %v7239_v44 = vld [vmem:[#allocation6 + $0xe8] sm:$0xff]  ;;  %v7243_v29 = vld [vmem:[#allocation6 + $0xf8] sm:$0xff] }
 0x3cf   :  { %2198 = vmatmul.f32.gmra.mxu0 %v2163_v53  ;;  %2221 = vmatmul.f32.gmra.mxu1 %v2163_v53 }
 0x3d0   :  { %2244 = vmatmul.f32.gmra.mxu2 %v2163_v53  ;;  %2267 = vmatmul.f32.gmra.mxu3 %v2163_v53  ;;  %v7246_v53 = vld [vmem:[#allocation6 + $0xc0] sm:$0xff] }
 0x3d1   :  { %2714 = vmatpush.msra.mxu2 %v7230_v42  ;;  %2737 = vmatpush.msra.mxu3 %v7233_v40  ;;  %v7249_v42 = vld [vmem:[#allocation6 + $0xc8] sm:$0xff] }
 0x3d2   :  { %2669 = vmatpush.msra.mxu0 %v7236_v17  ;;  %2692 = vmatpush.msra.mxu1 %v7239_v44 }
 0x3d3   :  { %2715 = vmatpush.msra.mxu2 %v6862_v59  ;;  %2738 = vmatpush.msra.mxu3 %v7243_v29  ;;  %v9064_v59 = vld [vmem:[#allocation47_spill] sm:$0xff] }
 0x3d4   :  { %2670 = vmatpush.msra.mxu0 %v7246_v53  ;;  %2693 = vmatpush.msra.mxu1 %v7249_v42 }
 0x3d5   :  { %2716 = vmatpush.msra.mxu2 %v9014_v32  ;;  %2739 = vmatpush.msra.mxu3 %v9015_v47  ;;  %v388_v32 = vadd.f32 %v9064_v59, %v9040_v62  ;;  %v9065_v47 = vld [vmem:[#allocation48_spill] sm:$0xff] }
 0x3d6   :  { %2671 = vmatpush.msra.mxu0 %v9016_v56  ;;  %2694 = vmatpush.msra.mxu1 %v9017_v49  ;;  %v437_v56 = vadd.f32 %v9065_v47, %v9042_v35 }
 0x3d7   :  { %2717 = vmatpush.msra.mxu2 %v9018_v60  ;;  %2740 = vmatpush.msra.mxu3 %v9019_v58  ;;  %v9066_v60 = vld [vmem:[#allocation49_spill] sm:$0xff] }
 0x3d8   :  { %2672 = vmatpush.msra.mxu0 %v9020_v34  ;;  %2695 = vmatpush.msra.mxu1 %v9021_v5  ;;  %v570_v49 = vpack.c.bf16 %v437_v56, %v388_v32  ;;  %v486_v58 = vadd.f32 %v9066_v60, %v9044_v31  ;;  %v9067_v34 = vld [vmem:[#allocation50_spill] sm:$0xff] }
 0x3d9   :  { %2718 = vmatpush.msra.mxu2 %v9022_v1  ;;  %2741 = vmatpush.msra.mxu3 %v9023_v46  ;;  %v535_v5 = vadd.f32 %v9067_v34, %v9046_v63 }
 0x3da   :  { %2673 = vmatpush.msra.mxu0 %v9024_v13  ;;  %2696 = vmatpush.msra.mxu1 %v9025_v54  ;;  %v2171_v1 = vunpack.c.l.bf16 %v570_v49  ;;  %v2172_v46 = vunpack.c.h.bf16 %v570_v49  ;;  %v9070_v49 = vld [vmem:[#allocation53_spill] sm:$0xff] }
 0x3db   :  { %2719 = vmatpush.msra.mxu2 %v9026_v6  ;;  %2742 = vmatpush.msra.mxu3 %v9027_v51  ;;  %v488_v60 = vadd.f32 %v9070_v49, %v9044_v31 }
 0x3dc   :  { %2674 = vmatpush.msra.mxu0 %v9028_v50  ;;  %2697 = vmatpush.msra.mxu1 %v9029_v39  ;;  %v571_v50 = vpack.c.bf16 %v535_v5, %v486_v58  ;;  %v9071_v58 = vld [vmem:[#allocation54_spill] sm:$0xff] }
 0x3dd   :  { %2720 = vmatpush.msra.mxu2 %v9030_v16  ;;  %2743 = vmatpush.msra.mxu3 %v9031_v10  ;;  %v537_v34 = vadd.f32 %v9071_v58, %v9046_v63 }
 0x3de   :  { %2675 = vmatpush.msra.mxu0 %v9032_v4  ;;  %2698 = vmatpush.msra.mxu1 %v9033_v43  ;;  %v2174_v10 = vunpack.c.h.bf16 %v571_v50  ;;  %v9068_v43 = vld [vmem:[#allocation51_spill] sm:$0xff] }
 0x3df   :  { %2721 = vmatpush.msra.mxu2 %v9034_v37  ;;  %2744 = vmatpush.msra.mxu3 %v9035_v11  ;;  %v390_v37 = vadd.f32 %v9068_v43, %v9040_v62  ;;  %v9069_v11 = vld [vmem:[#allocation52_spill] sm:$0xff] }
 0x3e0   :  { %2676 = vmatpush.msra.mxu0 %v9036_v18  ;;  %2699 = vmatpush.msra.mxu1 %v9037_v45  ;;  %v439_v18 = vadd.f32 %v9069_v11, %v9042_v35 }
 0x3e1   :  { %2722 = vmatpush.msra.mxu2 %v9038_v20  ;;  %2745 = vmatpush.msra.mxu3 %v9039_v23 }
 0x3e2   :  { %v572_v32 = vpack.c.bf16 %v439_v18, %v390_v37 }
 0x43b   :  { %v2196_v13 = vpop.f32.mrf.mxu0  ;;  %v2219_v54 = vpop.f32.mrf.mxu1 }
 0x43c   :  { %v2271_v6 = vadd.f32 %v2196_v13, %v2171_v1  ;;  %v2272_v51 = vadd.f32 %v2219_v54, %v2172_v46  ;;  %v2175_v1 = vunpack.c.l.bf16 %v572_v32  ;;  %v2176_v46 = vunpack.c.h.bf16 %v572_v32 }
 0x43e   :  { %v4964_v39 = vmul.f32 -1.442695, %v2271_v6  ;;  %v4966_v16 = vmul.f32 -1.442695, %v2272_v51  ;;  %v2173_v51 = vunpack.c.l.bf16 %v571_v50 }
 0x440   :  { %5284 = vpow2.f32 %v4964_v39 }
 0x441   :  { %5286 = vpow2.f32 %v4966_v16 }
 0x442   :  { %v2265_v4 = vpop.f32.mrf.mxu3  ;;  %v2242_v5 = vpop.f32.mrf.mxu2 }
 0x443   :  { %v2274_v45 = vadd.f32 %v2265_v4, %v2174_v10  ;;  %v7294_v10 = vpack.c.bf16 %v537_v34, %v488_v60  ;;  %v2273_v37 = vadd.f32 %v2242_v5, %v2173_v51 }
 0x445   :  { %v4968_v20 = vmul.f32 -1.442695, %v2274_v45  ;;  %v2178_v50 = vunpack.c.h.bf16 %v7294_v10 }
 0x446   :  { %v5285_v23 = vpop.eup %5284 }
 0x447   :  { %v5287_v59 = vpop.eup %5286  ;;  %v2285_v47 = vadd.f32 1.0, %v5285_v23  ;;  %5288 = vpow2.f32 %v4968_v20 }
 0x448   :  { %v2323_v56 = vadd.f32 1.0, %v5287_v59 }
 0x449   :  { %5290 = vrcp.f32 %v2285_v47  ;;  %v2296_v32 = vand.u32 2147483647, %v2285_v47  ;;  %v2298_v58 = vand.u32 2147483648, %v2285_v47  ;;  %vm2292_vm2 = vweird.f32 %v2285_v47 }
 0x44a   :  { %5292 = vrcp.f32 %v2323_v56  ;;  %v2336_v60 = vand.u32 2147483648, %v2323_v56  ;;  %v2334_v5 = vand.u32 2147483647, %v2323_v56  ;;  %vm2330_vm3 = vweird.f32 %v2323_v56 }
 0x44b   :  { %vm2297_vm4 = vcmp.eq.f32.partialorder %v2296_v32, 8.507059e+37 }
 0x44c   :  { %v2199_v13 = vpop.f32.mrf.mxu0  ;;  %v2222_v54 = vpop.f32.mrf.mxu1  ;;  %vm2335_vm7 = vcmp.eq.f32.partialorder %v2334_v5, 8.507059e+37 }
 0x44d   :  { %v5289_v6 = vpop.eup %5288  ;;  %v2275_v39 = vadd.f32 %v2199_v13, %v2175_v1  ;;  %v2276_v16 = vadd.f32 %v2222_v54, %v2176_v46 }
 0x44e   :  { %v7296_v4 = vadd.f32 1.0, %v5289_v6 }
 0x44f   :  { %v5291_v43 = vpop.eup %5290  ;;  %v4965_v11 = vmul.f32 -1.442695, %v2275_v39  ;;  %v4967_v18 = vmul.f32 -1.442695, %v2276_v16  ;;  %v2337_v16 = vor.u32 1.1754944e-38, %v2336_v60 }
 0x450   :  { %v5293_v45 = vpop.eup %5292  ;;  %v2288_v20 = vmul.f32 %v5291_v43, %v2285_v47  ;;  %5294 = vrcp.f32 %v7296_v4  ;;  %vm2293_vm0 = vweird.f32 %v5291_v43  ;;  %vm2370_vm9 = vweird.f32 %v7296_v4 }
 0x451   :  { %v2326_v23 = vmul.f32 %v5293_v45, %v2323_v56  ;;  %5296 = vpow2.f32 %v4965_v11  ;;  %vm2331_vm1 = vweird.f32 %v5293_v45  ;;  %vm2294_vm5 = vmor %vm2292_vm2, %vm2293_vm0  ;;  %v2299_v11 = vor.u32 1.1754944e-38, %v2298_v58 }
 0x452   :  { %v2289_v59 = vsub.f32 1.0, %v2288_v20  ;;  %5298 = vpow2.f32 %v4967_v18  ;;  %vm2332_vm6 = vmor %vm2330_vm3, %vm2331_vm1 }
 0x453   :  { %v2327_v49 = vsub.f32 1.0, %v2326_v23  ;;  %5300 = vtanh.f32 %v2273_v37  ;;  %v2268_v34 = vpop.f32.mrf.mxu3 }
 0x454   :  { %v2290_v1 = vmul.f32 %v5291_v43, %v2289_v59  ;;  %v2278_v46 = vadd.f32 %v2268_v34, %v2178_v50 }
 0x455   :  { %v2328_v13 = vmul.f32 %v5293_v45, %v2327_v49 }
 0x456   :  { %v5295_v54 = vpop.eup %5294  ;;  %v2291_v6 = vadd.f32 %v5291_v43, %v2290_v1  ;;  %v4969_v51 = vmul.f32 -1.442695, %v2278_v46 }
 0x457   :  { %v5297_v39 = vpop.eup %5296  ;;  %v2329_v18 = vadd.f32 %v5293_v45, %v2328_v13  ;;  %v2366_v37 = vmul.f32 %v5295_v54, %v7296_v4  ;;  %v2245_v13 = vpop.f32.mrf.mxu2  ;;  %vm2371_vm8 = vweird.f32 %v5295_v54 }
 0x458   :  { %v5299_v20 = vpop.eup %5298  ;;  %v2295_v23 = vsel %vm2294_vm5, %v5291_v43, %v2291_v6  ;;  %v2286_v59 = vadd.f32 1.0, %v5297_v39  ;;  %5302 = vpow2.f32 %v4969_v51  ;;  %v2177_v43 = vunpack.c.l.bf16 %v7294_v10  ;;  %vm7311_vm10 = vmor %vm2370_vm9, %vm2371_vm8 }
 0x459   :  { %v5301_v50 = vpop.eup %5300  ;;  %v2300_v47 = vsel %vm2297_vm4, %v2299_v11, %v2295_v23  ;;  %v2333_v49 = vsel %vm2332_vm6, %v5293_v45, %v2329_v18  ;;  %v2367_v56 = vsub.f32 1.0, %v2366_v37  ;;  %v2324_v34 = vadd.f32 1.0, %v5299_v20 }
 0x45a   :  { %v2338_v32 = vsel %vm2335_vm7, %v2337_v16, %v2333_v49  ;;  %v2397_v1 = vmul.f32 %v5301_v50, %v2300_v47  ;;  %5304 = vrcp.f32 %v2286_v59  ;;  %v2376_v45 = vand.u32 2147483648, %v7296_v4 }
 0x45b   :  { %v2395_v60 = vmul.f32 %v2338_v32, %v7095_v9  ;;  %v2368_v58 = vmul.f32 %v5295_v54, %v2367_v56  ;;  %5306 = vrcp.f32 %v2324_v34  ;;  %v2374_v51 = vand.u32 2147483647, %v7296_v4 }
 0x45c   :  { %v2277_v9 = vadd.f32 %v2245_v13, %v2177_v43  ;;  %v2351_v50 = vand.u32 2147483648, %v2324_v34  ;;  %v2313_v47 = vand.u32 2147483648, %v2286_v59  ;;  %v2311_v56 = vand.u32 2147483647, %v2286_v59 }
 0x45d   :  { %v7302_v46 = vadd.f32 %v2397_v1, %v2395_v60  ;;  %v2369_v5 = vadd.f32 %v5295_v54, %v2368_v58  ;;  %vm2375_vm11 = vcmp.eq.f32.partialorder %v2374_v51, 8.507059e+37  ;;  %v2349_v60 = vand.u32 2147483647, %v2324_v34 }
 0x45e   :  { %v5303_v63 = vpop.eup %5302  ;;  %vm2307_vm14 = vweird.f32 %v2286_v59  ;;  %vm2345_vm15 = vweird.f32 %v2324_v34  ;;  %v2352_v51 = vor.u32 1.1754944e-38, %v2351_v50  ;;  %vm2312_vm2 = vcmp.eq.f32.partialorder %v2311_v56, 8.507059e+37  ;;  %v5726_v50 = vld [vmem:[#allocation6 + $0x30] sm:$0xff] }
 0x45f   :  { %5308 = vtanh.f32 %v7302_v46  ;;  %v7307_v6 = vadd.f32 1.0, %v5303_v63  ;;  %v2373_v37 = vsel %vm7311_vm10, %v5295_v54, %v2369_v5  ;;  %v2377_v63 = vor.u32 1.1754944e-38, %v2376_v45  ;;  %v5730_v56 = vld [vmem:[#allocation6 + $0x10] sm:$0xff] }
 0x460   :  { %v5305_v39 = vpop.eup %5304  ;;  %v2314_v54 = vor.u32 1.1754944e-38, %v2313_v47  ;;  %vm2350_vm3 = vcmp.eq.f32.partialorder %v2349_v60, 8.507059e+37  ;;  %v5727_v47 = vld [vmem:[#allocation6 + $0x38] sm:$0xff] }
 0x461   :  { %v5307_v16 = vpop.eup %5306  ;;  %v2303_v18 = vmul.f32 %v5305_v39, %v2286_v59  ;;  %5310 = vrcp.f32 %v7307_v6  ;;  %vm2308_vm12 = vweird.f32 %v5305_v39  ;;  %v2378_v32 = vsel %vm2375_vm11, %v2377_v63, %v2373_v37 }
 0x462   :  { %v2341_v10 = vmul.f32 %v5307_v16, %v2324_v34  ;;  %5312 = vtanh.f32 %v2277_v9  ;;  %vm2346_vm13 = vweird.f32 %v5307_v16  ;;  %vm2309_vm0 = vmor %vm2307_vm14, %vm2308_vm12  ;;  %vm2385_vm5 = vweird.f32 %v7307_v6 }
 0x463   :  { %v2304_v20 = vsub.f32 1.0, %v2303_v18  ;;  %vm2347_vm1 = vmor %vm2345_vm15, %vm2346_vm13 }
 0x464   :  { %v2342_v23 = vsub.f32 1.0, %v2341_v10 }
 0x465   :  { %v5309_v4 = vpop.eup %5308  ;;  %v2305_v49 = vmul.f32 %v5305_v39, %v2304_v20  ;;  %v5724_v20 = vld [vmem:[#allocation6 + $0x20] sm:$0xff] }
 0x466   :  { %v2343_v1 = vmul.f32 %v5307_v16, %v2342_v23  ;;  %v2403_v58 = vmul.f32 %v5309_v4, %v2378_v32  ;;  %v5725_v23 = vld [vmem:[#allocation6 + $0x28] sm:$0xff]  ;;  %v5728_v4 = vld [vmem:[#allocation6] sm:$0xff]  ;;  %v5731_v32 = vld [vmem:[#allocation6 + $0x18] sm:$0xff] }
 0x467   :  { %v7318_v13 = vpop.eup %5310  ;;  %v2306_v43 = vadd.f32 %v5305_v39, %v2305_v49  ;;  %v5729_v49 = vld [vmem:[#allocation6 + $0x8] sm:$0xff] }
 0x468   :  { %v2344_v5 = vadd.f32 %v5307_v16, %v2343_v1  ;;  %v2381_v45 = vmul.f32 %v7318_v13, %v7307_v6  ;;  %2436 = vmatmul.f32.vlgmr.msrb.gmra.mxu0 %v2403_v58  ;;  %2459 = vmatmul.f32.vlgmr.msrb.gmra.mxu1 %v2403_v58  ;;  %v5313_v11 = vpop.eup %5312  ;;  %vm2386_vm4 = vweird.f32 %v7318_v13  ;;  %v9080_v1 = vld [vmem:[#allocation55_spill] sm:$0xff] }
 0x469   :  { %v2310_v9 = vsel %vm2309_vm0, %v5305_v39, %v2306_v43  ;;  %2482 = vmatmul.f32.vlgmr.msrb.gmra.mxu2 %v2403_v58  ;;  %2505 = vmatmul.f32.vlgmr.msrb.gmra.mxu3 %v2403_v58  ;;  %vm2387_vm6 = vmor %vm2385_vm5, %vm2386_vm4  ;;  %v393_v60 = vadd.f32 %v9080_v1, %v9040_v62  ;;  %v9081_v58 = vld [vmem:[#allocation56_spill] sm:$0xff] }
 0x46a   :  { %v2315_v18 = vsel %vm2312_vm2, %v2314_v54, %v2310_v9  ;;  %v2348_v10 = vsel %vm2347_vm1, %v5307_v16, %v2344_v5  ;;  %v2382_v59 = vsub.f32 1.0, %v2381_v45  ;;  %2902 = vmatpush.msrb.mxu0 %v7121_v33  ;;  %2925 = vmatpush.msrb.mxu1 %v7124_v2  ;;  %v5723_v16 = vld [vmem:[#allocation6 + $0x58] sm:$0xff] }
 0x46b   :  { %v2353_v34 = vsel %vm2350_vm3, %v2352_v51, %v2348_v10  ;;  %v2398_v37 = vmul.f32 %v5313_v11, %v2315_v18  ;;  %2948 = vmatpush.msrb.mxu2 %v7127_v41  ;;  %2971 = vmatpush.msrb.mxu3 %v7130_v0  ;;  %v2391_v41 = vand.u32 2147483648, %v7307_v6  ;;  %v2389_v0 = vand.u32 2147483647, %v7307_v6  ;;  %v5722_v6 = vld [vmem:[#allocation6 + $0x50] sm:$0xff]  ;;  %v9082_v54 = vld [vmem:[#allocation57_spill] sm:$0xff]  ;;  %v9084_v51 = vld [vmem:[#allocation58_spill] sm:$0xff] }
 0x46c   :  { %v2396_v39 = vmul.f32 %v2353_v34, %v7147_v22  ;;  %v2383_v63 = vmul.f32 %v7318_v13, %v2382_v59  ;;  %2903 = vmatpush.msrb.mxu0 %v7135_v48  ;;  %2926 = vmatpush.msrb.mxu1 %v7138_v28  ;;  %v9076_v22 = vld [vmem:[#allocation31_spill] sm:$0xff]  ;;  %v491_v5 = vadd.f32 %v9082_v54, %v9044_v31  ;;  %v9083_v45 = vld [vmem:[#allocation21_spill] sm:$0xff] }
 0x46d   :  { %2949 = vmatpush.msrb.mxu2 %v7141_v8  ;;  %2972 = vmatpush.msrb.mxu3 %v7144_v24  ;;  %v2392_v28 = vor.u32 1.1754944e-38, %v2391_v41  ;;  %v9074_v8 = vld [vmem:[#allocation28_spill] sm:$0xff]  ;;  %vm2390_vm7 = vcmp.eq.f32.partialorder %v2389_v0, 8.507059e+37  ;;  %v9075_v24 = vld [vmem:[#allocation29_spill] sm:$0xff]  ;;  %v540_v9 = vadd.f32 %v9084_v51, %v9083_v45 }
 0x46e   :  { %v7332_v33 = vadd.f32 %v2398_v37, %v2396_v39  ;;  %2904 = vmatpush.msrb.mxu0 %v7149_v61  ;;  %2927 = vmatpush.msrb.mxu1 %v7152_v36  ;;  %v2384_v2 = vadd.f32 %v7318_v13, %v2383_v63 }
 0x46f   :  { %2950 = vmatpush.msrb.mxu2 %v7157_v55  ;;  %2973 = vmatpush.msrb.mxu3 %v7160_v12  ;;  %v9077_v12 = vld [vmem:[#allocation32_spill] sm:$0xff]  ;;  %v575_v39 = vpack.c.bf16 %v540_v9, %v491_v5 }
 0x470   :  { %5314 = vtanh.f32 %v7332_v33  ;;  %2905 = vmatpush.msrb.mxu0 %v7165_v57  ;;  %2928 = vmatpush.msrb.mxu1 %v7168_v38  ;;  %v2388_v48 = vsel %vm2387_vm6, %v7318_v13, %v2384_v2  ;;  %v9078_v57 = vld [vmem:[#allocation33_spill] sm:$0xff]  ;;  %v9079_v38 = vld [vmem:[#allocation36_spill] sm:$0xff]  ;;  %v442_v13 = vadd.f32 %v9081_v58, %v9042_v35 }
 0x471   :  { %2951 = vmatpush.msrb.mxu2 %v7173_v21  ;;  %2974 = vmatpush.msrb.mxu3 %v7176_v30  ;;  %v2393_v36 = vsel %vm2390_vm7, %v2392_v28, %v2388_v48  ;;  %v5705_v21 = vld [vmem:[#allocation6 + $0xf0] sm:$0xff]  ;;  %v2415_v41 = vunpack.c.h.bf16 %v575_v39  ;;  %v9085_v48 = vld [vmem:[#allocation59_spill] sm:$0xff] }
 0x472   :  { %2906 = vmatpush.msrb.mxu0 %v7185_v25  ;;  %2929 = vmatpush.msrb.mxu1 %v7188_v26  ;;  %v5706_v30 = vld [vmem:[#allocation6 + $0xd0] sm:$0xff]  ;;  %v5707_v25 = vld [vmem:[#allocation6 + $0xd8] sm:$0xff]  ;;  %v5708_v26 = vld [vmem:[#allocation6 + $0xa0] sm:$0xff]  ;;  %v574_v43 = vpack.c.bf16 %v442_v13, %v393_v60  ;;  %v395_v28 = vadd.f32 %v9085_v48, %v9040_v62 }
 0x473   :  { %2952 = vmatpush.msrb.mxu2 %v7194_v3  ;;  %2975 = vmatpush.msrb.mxu3 %v7197_v15  ;;  %v5709_v3 = vld [vmem:[#allocation6 + $0xa8] sm:$0xff]  ;;  %v5710_v15 = vld [vmem:[#allocation6 + $0xb0] sm:$0xff] }
 0x474   :  { %2907 = vmatpush.msrb.mxu0 %v7200_v52  ;;  %2930 = vmatpush.msrb.mxu1 %v9074_v8  ;;  %v5711_v52 = vld [vmem:[#allocation6 + $0xb8] sm:$0xff]  ;;  %v2412_v11 = vunpack.c.l.bf16 %v574_v43  ;;  %v2413_v18 = vunpack.c.h.bf16 %v574_v43  ;;  %v9086_v8 = vld [vmem:[#allocation60_spill] sm:$0xff] }
 0x475   :  { %2953 = vmatpush.msrb.mxu2 %v9075_v24  ;;  %2976 = vmatpush.msrb.mxu3 %v9076_v22  ;;  %v444_v24 = vadd.f32 %v9086_v8, %v9042_v35 }
 0x476   :  { %v5315_v61 = vpop.eup %5314  ;;  %2908 = vmatpush.msrb.mxu0 %v7212_v14  ;;  %2931 = vmatpush.msrb.mxu1 %v7215_v27  ;;  %v5714_v14 = vld [vmem:[#allocation6 + $0x90] sm:$0xff]  ;;  %v5715_v27 = vld [vmem:[#allocation6 + $0x98] sm:$0xff] }
 0x477   :  { %v2404_v55 = vmul.f32 %v5315_v61, %v2393_v36  ;;  %2954 = vmatpush.msrb.mxu2 %v7218_v19  ;;  %2977 = vmatpush.msrb.mxu3 %v7221_v7  ;;  %v5712_v7 = vld [vmem:[#allocation6 + $0x80] sm:$0xff] }
 0x478   :  { %2909 = vmatpush.msrb.mxu0 %v9077_v12  ;;  %2932 = vmatpush.msrb.mxu1 %v9078_v57  ;;  %v5716_v19 = vld [vmem:[#allocation6 + $0x60] sm:$0xff]  ;;  %v576_v12 = vpack.c.bf16 %v444_v24, %v395_v28 }
 0x479   :  { %2439 = vmatmul.f32.gmra.mxu0 %v2404_v55  ;;  %2462 = vmatmul.f32.gmra.mxu1 %v2404_v55 }
 0x47a   :  { %2485 = vmatmul.f32.gmra.mxu2 %v2404_v55  ;;  %2508 = vmatmul.f32.gmra.mxu3 %v2404_v55 }
 0x47b   :  { %2955 = vmatpush.msrb.mxu2 %v9079_v38  ;;  %2978 = vmatpush.msrb.mxu3 %v7233_v40  ;;  %v5719_v40 = vld [vmem:[#allocation6 + $0x78] sm:$0xff] }
 0x47c   :  { %2910 = vmatpush.msrb.mxu0 %v7236_v17  ;;  %2933 = vmatpush.msrb.mxu1 %v7239_v44  ;;  %v5713_v44 = vld [vmem:[#allocation6 + $0x88] sm:$0xff]  ;;  %v5720_v17 = vld [vmem:[#allocation6 + $0x40] sm:$0xff] }
 0x47d   :  { %2956 = vmatpush.msrb.mxu2 %v5705_v21  ;;  %2979 = vmatpush.msrb.mxu3 %v7243_v29  ;;  %v5717_v29 = vld [vmem:[#allocation6 + $0x68] sm:$0xff]  ;;  %v9087_v21 = vld [vmem:[#allocation61_spill] sm:$0xff] }
 0x47e   :  { %2911 = vmatpush.msrb.mxu0 %v7246_v53  ;;  %2934 = vmatpush.msrb.mxu1 %v7249_v42  ;;  %v5718_v42 = vld [vmem:[#allocation6 + $0x70] sm:$0xff]  ;;  %v5721_v53 = vld [vmem:[#allocation6 + $0x48] sm:$0xff] }
 0x47f   :  { %2957 = vmatpush.msrb.mxu2 %v5706_v30  ;;  %2980 = vmatpush.msrb.mxu3 %v5707_v25  ;;  %v493_v30 = vadd.f32 %v9087_v21, %v9044_v31  ;;  %v9088_v25 = vld [vmem:[#allocation62_spill] sm:$0xff] }
 0x480   :  { %2912 = vmatpush.msrb.mxu0 %v5708_v26  ;;  %2935 = vmatpush.msrb.mxu1 %v5709_v3  ;;  %v542_v26 = vadd.f32 %v9088_v25, %v9083_v45 }
 0x481   :  { %2958 = vmatpush.msrb.mxu2 %v5710_v15  ;;  %2981 = vmatpush.msrb.mxu3 %v5711_v52  ;;  %v2416_v15 = vunpack.c.l.bf16 %v576_v12  ;;  %v2417_v52 = vunpack.c.h.bf16 %v576_v12 }
 0x482   :  { %2913 = vmatpush.msrb.mxu0 %v5712_v7  ;;  %2936 = vmatpush.msrb.mxu1 %v5713_v44 }
 0x483   :  { %2959 = vmatpush.msrb.mxu2 %v5714_v14  ;;  %2982 = vmatpush.msrb.mxu3 %v5715_v27  ;;  %v2414_v27 = vunpack.c.l.bf16 %v575_v39 }
 0x484   :  { %2914 = vmatpush.msrb.mxu0 %v5716_v19  ;;  %2937 = vmatpush.msrb.mxu1 %v5717_v29 }
 0x485   :  { %2960 = vmatpush.msrb.mxu2 %v5718_v42  ;;  %2983 = vmatpush.msrb.mxu3 %v5719_v40  ;;  %v7386_v42 = vpack.c.bf16 %v542_v26, %v493_v30 }
 0x486   :  { %2915 = vmatpush.msrb.mxu0 %v5720_v17  ;;  %2938 = vmatpush.msrb.mxu1 %v5721_v53 }
 0x487   :  { %2961 = vmatpush.msrb.mxu2 %v5722_v6  ;;  %2984 = vmatpush.msrb.mxu3 %v5723_v16 }
 0x488   :  { %2916 = vmatpush.msrb.mxu0 %v5724_v20  ;;  %2939 = vmatpush.msrb.mxu1 %v5725_v23 }
 0x489   :  { %2962 = vmatpush.msrb.mxu2 %v5726_v50  ;;  %2985 = vmatpush.msrb.mxu3 %v5727_v47 }
 0x48a   :  { %2917 = vmatpush.msrb.mxu0 %v5728_v4  ;;  %2940 = vmatpush.msrb.mxu1 %v5729_v49  ;;  %v2419_v49 = vunpack.c.h.bf16 %v7386_v42 }
 0x48b   :  { %2963 = vmatpush.msrb.mxu2 %v5730_v56  ;;  %2986 = vmatpush.msrb.mxu3 %v5731_v32 }
 0x4e5   :  { %v2437_v10 = vpop.f32.mrf.mxu0  ;;  %v2460_v59 = vpop.f32.mrf.mxu1 }
 0x4e6   :  { %v2512_v34 = vadd.f32 %v2437_v10, %v2412_v11  ;;  %v2513_v37 = vadd.f32 %v2460_v59, %v2413_v18 }
 0x4e8   :  { %v4970_v63 = vmul.f32 -1.442695, %v2512_v34  ;;  %v4972_v2 = vmul.f32 -1.442695, %v2513_v37 }
 0x4ea   :  { %5316 = vpow2.f32 %v4970_v63 }
 0x4eb   :  { %5318 = vpow2.f32 %v4972_v2 }
 0x4ec   :  { %v2506_v0 = vpop.f32.mrf.mxu3  ;;  %v2483_v3 = vpop.f32.mrf.mxu2 }
 0x4ed   :  { %v2515_v22 = vadd.f32 %v2506_v0, %v2415_v41  ;;  %v2514_v53 = vadd.f32 %v2483_v3, %v2414_v27 }
 0x4ef   :  { %v4974_v61 = vmul.f32 -1.442695, %v2515_v22 }
 0x4f0   :  { %v5317_v36 = vpop.eup %5316 }
 0x4f1   :  { %v5319_v55 = vpop.eup %5318  ;;  %v2526_v57 = vadd.f32 1.0, %v5317_v36  ;;  %5320 = vpow2.f32 %v4974_v61 }
 0x4f2   :  { %v2564_v38 = vadd.f32 1.0, %v5319_v55 }
 0x4f3   :  { %5322 = vrcp.f32 %v2526_v57  ;;  %v2537_v4 = vand.u32 2147483647, %v2526_v57  ;;  %v2539_v1 = vand.u32 2147483648, %v2526_v57  ;;  %vm2533_vm10 = vweird.f32 %v2526_v57 }
 0x4f4   :  { %5324 = vrcp.f32 %v2564_v38  ;;  %v2577_v32 = vand.u32 2147483648, %v2564_v38  ;;  %v2575_v13 = vand.u32 2147483647, %v2564_v38  ;;  %vm2571_vm11 = vweird.f32 %v2564_v38 }
 0x4f5   :  { %vm2538_vm12 = vcmp.eq.f32.partialorder %v2537_v4, 8.507059e+37  ;;  %v2540_v10 = vor.u32 1.1754944e-38, %v2539_v1 }
 0x4f6   :  { %v2440_v7 = vpop.f32.mrf.mxu0  ;;  %v2463_v44 = vpop.f32.mrf.mxu1  ;;  %v2578_v18 = vor.u32 1.1754944e-38, %v2577_v32  ;;  %vm2576_vm15 = vcmp.eq.f32.partialorder %v2575_v13, 8.507059e+37 }
 0x4f7   :  { %v5321_v14 = vpop.eup %5320  ;;  %v2516_v19 = vadd.f32 %v2440_v7, %v2416_v15  ;;  %v2517_v29 = vadd.f32 %v2463_v44, %v2417_v52 }
 0x4f8   :  { %v7388_v40 = vadd.f32 1.0, %v5321_v14 }
 0x4f9   :  { %v5323_v17 = vpop.eup %5322  ;;  %v4971_v6 = vmul.f32 -1.442695, %v2516_v19  ;;  %v4973_v16 = vmul.f32 -1.442695, %v2517_v29 }
 0x4fa   :  { %v5325_v20 = vpop.eup %5324  ;;  %v2529_v23 = vmul.f32 %v5323_v17, %v2526_v57  ;;  %5326 = vrcp.f32 %v7388_v40  ;;  %vm2534_vm8 = vweird.f32 %v5323_v17  ;;  %v2418_v57 = vunpack.c.l.bf16 %v7386_v42 }
 0x4fb   :  { %v2567_v50 = vmul.f32 %v5325_v20, %v2564_v38  ;;  %5328 = vpow2.f32 %v4971_v6  ;;  %vm2572_vm9 = vweird.f32 %v5325_v20  ;;  %vm2535_vm13 = vmor %vm2533_vm10, %vm2534_vm8  ;;  %v2617_v21 = vand.u32 2147483648, %v7388_v40 }
 0x4fc   :  { %v2530_v47 = vsub.f32 1.0, %v2529_v23  ;;  %5330 = vpow2.f32 %v4973_v16  ;;  %vm2573_vm14 = vmor %vm2571_vm11, %vm2572_vm9  ;;  %v2615_v25 = vand.u32 2147483647, %v7388_v40  ;;  %vm2611_vm1 = vweird.f32 %v7388_v40 }
 0x4fd   :  { %v2568_v56 = vsub.f32 1.0, %v2567_v50  ;;  %5332 = vtanh.f32 %v2514_v53  ;;  %v2509_v60 = vpop.f32.mrf.mxu3  ;;  %v2486_v55 = vpop.f32.mrf.mxu2  ;;  %v2618_v14 = vor.u32 1.1754944e-38, %v2617_v21 }
 0x4fe   :  { %v2531_v58 = vmul.f32 %v5323_v17, %v2530_v47  ;;  %v2519_v43 = vadd.f32 %v2509_v60, %v2419_v49  ;;  %vm2616_vm3 = vcmp.eq.f32.partialorder %v2615_v25, 8.507059e+37 }
 0x4ff   :  { %v2569_v54 = vmul.f32 %v5325_v20, %v2568_v56 }
 0x500   :  { %v5327_v5 = vpop.eup %5326  ;;  %v2532_v51 = vadd.f32 %v5323_v17, %v2531_v58  ;;  %v4975_v9 = vmul.f32 -1.442695, %v2519_v43 }
 0x501   :  { %v5329_v11 = vpop.eup %5328  ;;  %v2570_v59 = vadd.f32 %v5325_v20, %v2569_v54  ;;  %v2607_v34 = vmul.f32 %v5327_v5, %v7388_v40  ;;  %vm2612_vm0 = vweird.f32 %v5327_v5 }
 0x502   :  { %v5331_v37 = vpop.eup %5330  ;;  %v2536_v39 = vsel %vm2535_vm13, %v5323_v17, %v2532_v51  ;;  %v2527_v63 = vadd.f32 1.0, %v5329_v11  ;;  %5334 = vpow2.f32 %v4975_v9  ;;  %vm7401_vm2 = vmor %vm2611_vm1, %vm2612_vm0 }
 0x503   :  { %v5333_v2 = vpop.eup %5332  ;;  %v2541_v41 = vsel %vm2538_vm12, %v2540_v10, %v2536_v39  ;;  %v2574_v0 = vsel %vm2573_vm14, %v5325_v20, %v2570_v59  ;;  %v2608_v48 = vsub.f32 1.0, %v2607_v34  ;;  %v2565_v28 = vadd.f32 1.0, %v5331_v37 }
 0x504   :  { %v2579_v8 = vsel %vm2576_vm15, %v2578_v18, %v2574_v0  ;;  %v2638_v24 = vmul.f32 %v5333_v2, %v2541_v41  ;;  %5336 = vrcp.f32 %v2527_v63  ;;  %v2554_v42 = vand.u32 2147483648, %v2527_v63  ;;  %v9092_v0 = vld [vmem:[#allocation64_spill] sm:$0xff] }
 0x505   :  { %v2636_v22 = vmul.f32 %v2579_v8, %v7302_v46  ;;  %v2609_v61 = vmul.f32 %v5327_v5, %v2608_v48  ;;  %5338 = vrcp.f32 %v2565_v28  ;;  %v2518_v46 = vadd.f32 %v2486_v55, %v2418_v57  ;;  %v9093_v8 = vld [vmem:[#allocation44_spill] sm:$0xff] }
 0x506   :  { %v2592_v29 = vand.u32 2147483648, %v2565_v28  ;;  %v2552_v53 = vand.u32 2147483647, %v2527_v63  ;;  %v2590_v20 = vand.u32 2147483647, %v2565_v28  ;;  %vm2548_vm6 = vweird.f32 %v2527_v63 }
 0x507   :  { %v7394_v36 = vadd.f32 %v2638_v24, %v2636_v22  ;;  %v2610_v38 = vadd.f32 %v5327_v5, %v2609_v61  ;;  %vm2586_vm7 = vweird.f32 %v2565_v28  ;;  %v2555_v4 = vor.u32 1.1754944e-38, %v2554_v42  ;;  %v9094_v22 = vld [vmem:[#allocation65_spill] sm:$0xff] }
 0x508   :  { %v5335_v12 = vpop.eup %5334  ;;  %v2593_v32 = vor.u32 1.1754944e-38, %v2592_v29  ;;  %vm2553_vm10 = vcmp.eq.f32.partialorder %v2552_v53, 8.507059e+37  ;;  %vm2591_vm11 = vcmp.eq.f32.partialorder %v2590_v20, 8.507059e+37  ;;  %v447_v48 = vadd.f32 %v9092_v0, %v9042_v35  ;;  %v9098_v20 = vld [vmem:[#allocation67_spill] sm:$0xff] }
 0x509   :  { %5340 = vtanh.f32 %v7394_v36  ;;  %v2605_v30 = vadd.f32 1.0, %v5335_v12  ;;  %v2614_v44 = vsel %vm7401_vm2, %v5327_v5, %v2610_v38  ;;  %v496_v24 = vadd.f32 %v9093_v8, %v9044_v31 }
 0x50a   :  { %v5337_v26 = vpop.eup %5336  ;;  %v2619_v6 = vsel %vm2616_vm3, %v2618_v14, %v2614_v44  ;;  %v545_v61 = vadd.f32 %v9094_v22, %v9083_v45  ;;  %v9096_v44 = vld [vmem:[#allocation14_spill] sm:$0xff] }
 0x50b   :  { %v5339_v3 = vpop.eup %5338  ;;  %v2544_v52 = vmul.f32 %v5337_v26, %v2527_v63  ;;  %5342 = vrcp.f32 %v2605_v30  ;;  %vm2549_vm4 = vweird.f32 %v5337_v26  ;;  %v2632_v10 = vand.u32 2147483648, %v2605_v30 }
 0x50c   :  { %v2582_v7 = vmul.f32 %v5339_v3, %v2565_v28  ;;  %5344 = vtanh.f32 %v2518_v46  ;;  %vm2587_vm5 = vweird.f32 %v5339_v3  ;;  %vm2550_vm8 = vmor %vm2548_vm6, %vm2549_vm4  ;;  %vm2626_vm13 = vweird.f32 %v2605_v30 }
 0x50d   :  { %v2545_v27 = vsub.f32 1.0, %v2544_v52  ;;  %vm2588_vm9 = vmor %vm2586_vm7, %vm2587_vm5  ;;  %v2630_v59 = vand.u32 2147483647, %v2605_v30  ;;  %v2633_v37 = vor.u32 1.1754944e-38, %v2632_v10  ;;  %v579_v25 = vpack.c.bf16 %v545_v61, %v496_v24  ;;  %v9095_v52 = vld [vmem:[#allocation66_spill] sm:$0xff] }
 0x50e   :  { %v2583_v19 = vsub.f32 1.0, %v2582_v7  ;;  %v400_v7 = vadd.f32 %v9095_v52, %v9040_v62  ;;  %v449_v14 = vadd.f32 %v9096_v44, %v9042_v35 }
 0x50f   :  { %v5341_v40 = vpop.eup %5340  ;;  %v2546_v17 = vmul.f32 %v5337_v26, %v2545_v27  ;;  %vm2631_vm15 = vcmp.eq.f32.partialorder %v2630_v59, 8.507059e+37 }
 0x510   :  { %v2584_v16 = vmul.f32 %v5339_v3, %v2583_v19  ;;  %v2644_v23 = vmul.f32 %v5341_v40, %v2619_v6  ;;  %v580_v40 = vpack.c.bf16 %v449_v14, %v400_v7  ;;  %v9097_v6 = vld [vmem:[#allocation15_spill] sm:$0xff] }
 0x511   :  { %v5343_v50 = vpop.eup %5342  ;;  %v2547_v47 = vadd.f32 %v5337_v26, %v2546_v17 }
 0x512   :  { %v2585_v49 = vadd.f32 %v5339_v3, %v2584_v16  ;;  %v2622_v56 = vmul.f32 %v5343_v50, %v2605_v30  ;;  %2677 = vmatmul.f32.vlgmr.msra.gmra.mxu0 %v2644_v23  ;;  %2700 = vmatmul.f32.vlgmr.msra.gmra.mxu1 %v2644_v23  ;;  %v5345_v60 = vpop.eup %5344  ;;  %vm2627_vm12 = vweird.f32 %v5343_v50  ;;  %v498_v16 = vadd.f32 %v9097_v6, %v9044_v31 }
 0x513   :  { %v2551_v1 = vsel %vm2550_vm8, %v5337_v26, %v2547_v47  ;;  %2723 = vmatmul.f32.vlgmr.msra.gmra.mxu2 %v2644_v23  ;;  %2746 = vmatmul.f32.vlgmr.msra.gmra.mxu3 %v2644_v23  ;;  %vm2628_vm14 = vmor %vm2626_vm13, %vm2627_vm12  ;;  %v547_v23 = vadd.f32 %v9098_v20, %v9083_v45  ;;  %v2657_v47 = vunpack.c.l.bf16 %v580_v40 }
 0x514   :  { %v2556_v58 = vsel %vm2553_vm10, %v2555_v4, %v2551_v1  ;;  %v2589_v13 = vsel %vm2588_vm9, %v5339_v3, %v2585_v49  ;;  %v2623_v43 = vsub.f32 1.0, %v2622_v56  ;;  %v2656_v3 = vunpack.c.h.bf16 %v579_v25 }
 0x515   :  { %v2594_v54 = vsel %vm2591_vm11, %v2593_v32, %v2589_v13  ;;  %v2639_v5 = vmul.f32 %v5345_v60, %v2556_v58  ;;  %v2658_v4 = vunpack.c.h.bf16 %v580_v40  ;;  %v2655_v1 = vunpack.c.l.bf16 %v579_v25 }
 0x516   :  { %v2637_v51 = vmul.f32 %v2594_v54, %v7332_v33  ;;  %v2624_v9 = vmul.f32 %v5343_v50, %v2623_v43  ;;  %v9091_v33 = vld [vmem:[#allocation63_spill] sm:$0xff]  ;;  %v7427_v13 = vpack.c.bf16 %v547_v23, %v498_v16 }
 0x517   :  { %v398_v41 = vadd.f32 %v9091_v33, %v9040_v62 }
 0x518   :  { %v7408_v11 = vadd.f32 %v2639_v5, %v2637_v51  ;;  %v2625_v18 = vadd.f32 %v5343_v50, %v2624_v9 }
 0x519   :  { %v578_v28 = vpack.c.bf16 %v447_v48, %v398_v41 }
 0x51a   :  { %5346 = vtanh.f32 %v7408_v11  ;;  %v2629_v34 = vsel %vm2628_vm14, %v5343_v50, %v2625_v18 }
 0x51b   :  { %v2634_v63 = vsel %vm2631_vm15, %v2633_v37, %v2629_v34  ;;  %v2653_v55 = vunpack.c.l.bf16 %v578_v28  ;;  %v2654_v12 = vunpack.c.h.bf16 %v578_v28 }
 0x520   :  { %v5347_v39 = vpop.eup %5346 }
 0x521   :  { %v2645_v2 = vmul.f32 %v5347_v39, %v2634_v63  ;;  %v2660_v39 = vunpack.c.h.bf16 %v7427_v13 }
 0x523   :  { %2680 = vmatmul.f32.gmra.mxu0 %v2645_v2  ;;  %2703 = vmatmul.f32.gmra.mxu1 %v2645_v2 }
 0x524   :  { %2726 = vmatmul.f32.gmra.mxu2 %v2645_v2  ;;  %2749 = vmatmul.f32.gmra.mxu3 %v2645_v2 }
 0x58f   :  { %v2678_v57 = vpop.f32.mrf.mxu0  ;;  %v2701_v38 = vpop.f32.mrf.mxu1 }
 0x590   :  { %v2753_v21 = vadd.f32 %v2678_v57, %v2653_v55  ;;  %v2754_v30 = vadd.f32 %v2701_v38, %v2654_v12 }
 0x592   :  { %v4976_v26 = vmul.f32 -1.442695, %v2753_v21  ;;  %v4978_v46 = vmul.f32 -1.442695, %v2754_v30 }
 0x594   :  { %5348 = vpow2.f32 %v4976_v26 }
 0x595   :  { %5350 = vpow2.f32 %v4978_v46 }
 0x596   :  { %v2747_v15 = vpop.f32.mrf.mxu3  ;;  %v2724_v50 = vpop.f32.mrf.mxu2 }
 0x597   :  { %v2756_v27 = vadd.f32 %v2747_v15, %v2656_v3  ;;  %v2755_v5 = vadd.f32 %v2724_v50, %v2655_v1 }
 0x599   :  { %v4980_v19 = vmul.f32 -1.442695, %v2756_v27 }
 0x59a   :  { %v5349_v29 = vpop.eup %5348 }
 0x59b   :  { %v5351_v42 = vpop.eup %5350  ;;  %v2767_v17 = vadd.f32 1.0, %v5349_v29  ;;  %5352 = vpow2.f32 %v4980_v19 }
 0x59c   :  { %v2805_v53 = vadd.f32 1.0, %v5351_v42 }
 0x59d   :  { %5354 = vrcp.f32 %v2767_v17  ;;  %v2778_v37 = vand.u32 2147483647, %v2767_v17  ;;  %v2780_v33 = vand.u32 2147483648, %v2767_v17  ;;  %vm2774_vm2 = vweird.f32 %v2767_v17 }
 0x59e   :  { %5356 = vrcp.f32 %v2805_v53  ;;  %v2818_v2 = vand.u32 2147483648, %v2805_v53  ;;  %v2816_v48 = vand.u32 2147483647, %v2805_v53  ;;  %vm2812_vm3 = vweird.f32 %v2805_v53 }
 0x59f   :  { %vm2779_vm4 = vcmp.eq.f32.partialorder %v2778_v37, 8.507059e+37  ;;  %v2781_v57 = vor.u32 1.1754944e-38, %v2780_v33 }
 0x5a0   :  { %v2681_v49 = vpop.f32.mrf.mxu0  ;;  %v2704_v56 = vpop.f32.mrf.mxu1  ;;  %v2819_v12 = vor.u32 1.1754944e-38, %v2818_v2  ;;  %vm2817_vm7 = vcmp.eq.f32.partialorder %v2816_v48, 8.507059e+37 }
 0x5a1   :  { %v5353_v32 = vpop.eup %5352  ;;  %v2757_v60 = vadd.f32 %v2681_v49, %v2657_v47  ;;  %v2758_v58 = vadd.f32 %v2704_v56, %v2658_v4  ;;  %v7496_v47 = vld [vmem:[#allocation9 + $0x190] sm:$0xff] }
 0x5a2   :  { %v7429_v43 = vadd.f32 1.0, %v5353_v32 }
 0x5a3   :  { %v5355_v54 = vpop.eup %5354  ;;  %v4977_v51 = vmul.f32 -1.442695, %v2757_v60  ;;  %v4979_v9 = vmul.f32 -1.442695, %v2758_v58 }
 0x5a4   :  { %v5357_v18 = vpop.eup %5356  ;;  %v2770_v10 = vmul.f32 %v5355_v54, %v2767_v17  ;;  %5358 = vrcp.f32 %v7429_v43  ;;  %vm2775_vm0 = vweird.f32 %v5355_v54  ;;  %v2659_v17 = vunpack.c.l.bf16 %v7427_v13 }
 0x5a5   :  { %v2808_v59 = vmul.f32 %v5357_v18, %v2805_v53  ;;  %5360 = vpow2.f32 %v4977_v51  ;;  %vm2813_vm1 = vweird.f32 %v5357_v18  ;;  %vm2776_vm5 = vmor %vm2774_vm2, %vm2775_vm0  ;;  %v2858_v6 = vand.u32 2147483648, %v7429_v43 }
 0x5a6   :  { %v2771_v34 = vsub.f32 1.0, %v2770_v10  ;;  %5362 = vpow2.f32 %v4979_v9  ;;  %vm2814_vm6 = vmor %vm2812_vm3, %vm2813_vm1  ;;  %v2856_v20 = vand.u32 2147483647, %v7429_v43  ;;  %vm2852_vm9 = vweird.f32 %v7429_v43 }
 0x5a7   :  { %v2809_v63 = vsub.f32 1.0, %v2808_v59  ;;  %5364 = vtanh.f32 %v2755_v5  ;;  %v2750_v41 = vpop.f32.mrf.mxu3  ;;  %v2727_v42 = vpop.f32.mrf.mxu2  ;;  %v2859_v32 = vor.u32 1.1754944e-38, %v2858_v6  ;;  %v7480_v6 = vld [vmem:[#allocation9 + $0x1a0] sm:$0xff] }
 0x5a8   :  { %v2772_v0 = vmul.f32 %v5355_v54, %v2771_v34  ;;  %v2760_v28 = vadd.f32 %v2750_v41, %v2660_v39  ;;  %vm2857_vm11 = vcmp.eq.f32.partialorder %v2856_v20, 8.507059e+37  ;;  %9107 = vst [vmem:[#allocation30_spill] sm:$0xff] %v7480_v6  ;;  %v7484_v20 = vld [vmem:[#allocation9 + $0x1b0] sm:$0xff] }
 0x5a9   :  { %v2810_v8 = vmul.f32 %v5357_v18, %v2809_v63 }
 0x5aa   :  { %v5359_v24 = vpop.eup %5358  ;;  %v2773_v22 = vadd.f32 %v5355_v54, %v2772_v0  ;;  %v4981_v61 = vmul.f32 -1.442695, %v2760_v28 }
 0x5ab   :  { %v5361_v55 = vpop.eup %5360  ;;  %v2811_v38 = vadd.f32 %v5357_v18, %v2810_v8  ;;  %v2848_v21 = vmul.f32 %v5359_v24, %v7429_v43  ;;  %vm2853_vm8 = vweird.f32 %v5359_v24 }
 0x5ac   :  { %v5363_v30 = vpop.eup %5362  ;;  %v2777_v25 = vsel %vm2776_vm5, %v5355_v54, %v2773_v22  ;;  %v2768_v26 = vadd.f32 1.0, %v5361_v55  ;;  %5366 = vpow2.f32 %v4981_v61  ;;  %vm7442_vm10 = vmor %vm2852_vm9, %vm2853_vm8 }
 0x5ad   :  { %v5365_v46 = vpop.eup %5364  ;;  %v2782_v3 = vsel %vm2779_vm4, %v2781_v57, %v2777_v25  ;;  %v2815_v15 = vsel %vm2814_vm6, %v5357_v18, %v2811_v38  ;;  %v2849_v52 = vsub.f32 1.0, %v2848_v21  ;;  %v2806_v7 = vadd.f32 1.0, %v5363_v30 }
 0x5ae   :  { %v2820_v44 = vsel %vm2817_vm7, %v2819_v12, %v2815_v15  ;;  %v2879_v14 = vmul.f32 %v5365_v46, %v2782_v3  ;;  %5368 = vrcp.f32 %v2768_v26  ;;  %v2795_v13 = vand.u32 2147483648, %v2768_v26  ;;  %v9103_v15 = vld [vmem:[#allocation69_spill] sm:$0xff] }
 0x5af   :  { %v2877_v27 = vmul.f32 %v2820_v44, %v7394_v36  ;;  %v2850_v19 = vmul.f32 %v5359_v24, %v2849_v52  ;;  %5370 = vrcp.f32 %v2806_v7  ;;  %v2759_v36 = vadd.f32 %v2727_v42, %v2659_v17  ;;  %v7458_v44 = vld [vmem:[#allocation9 + $0x1e8] sm:$0xff]  ;;  %v7476_v17 = vld [vmem:[#allocation9 + $0x1d8] sm:$0xff] }
 0x5b0   :  { %v2833_v58 = vand.u32 2147483648, %v2806_v7  ;;  %v2793_v5 = vand.u32 2147483647, %v2768_v26  ;;  %v2831_v18 = vand.u32 2147483647, %v2806_v7  ;;  %vm2789_vm14 = vweird.f32 %v2768_v26  ;;  %3165 = vmatpush.msra.mxu1 %v7458_v44  ;;  %v7470_v42 = vld [vmem:[#allocation9 + $0x1c8] sm:$0xff] }
 0x5b1   :  { %v7435_v29 = vadd.f32 %v2879_v14, %v2877_v27  ;;  %v2851_v53 = vadd.f32 %v5359_v24, %v2850_v19  ;;  %vm2827_vm15 = vweird.f32 %v2806_v7  ;;  %v2796_v37 = vor.u32 1.1754944e-38, %v2795_v13  ;;  %v7460_v14 = vld [vmem:[#allocation9 + $0x1f0] sm:$0xff]  ;;  %v7464_v27 = vld [vmem:[#allocation9 + $0x1f8] sm:$0xff]  ;;  %v7468_v19 = vld [vmem:[#allocation9 + $0x1c0] sm:$0xff]  ;;  %9105 = vst [vmem:[#allocation26_spill] sm:$0xff] %v7470_v42 }
 0x5b2   :  { %v5367_v40 = vpop.eup %5366  ;;  %v2834_v2 = vor.u32 1.1754944e-38, %v2833_v58  ;;  %vm2794_vm2 = vcmp.eq.f32.partialorder %v2793_v5, 8.507059e+37  ;;  %vm2832_vm3 = vcmp.eq.f32.partialorder %v2831_v18, 8.507059e+37  ;;  %v452_v52 = vadd.f32 %v9103_v15, %v9042_v35  ;;  %3188 = vmatpush.msra.mxu2 %v7460_v14  ;;  %3211 = vmatpush.msra.mxu3 %v7464_v27  ;;  %9104 = vst [vmem:[#allocation25_spill] sm:$0xff] %v7468_v19  ;;  %v7508_v13 = vld [vmem:[#allocation9 + $0x160] sm:$0xff]  ;;  %v7571_v15 = vld [vmem:[#allocation9 + $0xf8] sm:$0xff] }
 0x5b3   :  { %5372 = vtanh.f32 %v7435_v29  ;;  %v2846_v16 = vadd.f32 1.0, %v5367_v40  ;;  %v2855_v56 = vsel %vm7442_vm10, %v5359_v24, %v2851_v53  ;;  %v7472_v40 = vld [vmem:[#allocation9 + $0x1d0] sm:$0xff]  ;;  %3166 = vmatpush.msra.mxu1 %v7470_v42  ;;  %9106 = vst [vmem:[#allocation27_spill] sm:$0xff] %v7476_v17 }
 0x5b4   :  { %v5369_v23 = vpop.eup %5368  ;;  %v2860_v51 = vsel %vm2857_vm11, %v2859_v32, %v2855_v56  ;;  %3189 = vmatpush.msra.mxu2 %v7472_v40  ;;  %3212 = vmatpush.msra.mxu3 %v7476_v17  ;;  %v9110_v56 = vld [vmem:[#allocation70_spill] sm:$0xff] }
 0x5b5   :  { %v5371_v50 = vpop.eup %5370  ;;  %v2785_v4 = vmul.f32 %v5369_v23, %v2768_v26  ;;  %5374 = vrcp.f32 %v2846_v16  ;;  %vm2790_vm12 = vweird.f32 %v5369_v23  ;;  %v2873_v57 = vand.u32 2147483648, %v2846_v16 }
 0x5b6   :  { %v2823_v49 = vmul.f32 %v5371_v50, %v2806_v7  ;;  %5376 = vtanh.f32 %v2759_v36  ;;  %vm2828_vm13 = vweird.f32 %v5371_v50  ;;  %vm2791_vm0 = vmor %vm2789_vm14, %vm2790_vm12  ;;  %vm2867_vm5 = vweird.f32 %v2846_v16  ;;  %v7456_v7 = vld [vmem:[#allocation9 + $0x1e0] sm:$0xff]  ;;  %3190 = vmatpush.msra.mxu2 %v7484_v20 }
 0x5b7   :  { %v2786_v1 = vsub.f32 1.0, %v2785_v4  ;;  %vm2829_vm1 = vmor %vm2827_vm15, %vm2828_vm13  ;;  %v2871_v38 = vand.u32 2147483647, %v2846_v16  ;;  %v2874_v30 = vor.u32 1.1754944e-38, %v2873_v57  ;;  %3142 = vmatpush.msra.mxu0 %v7456_v7  ;;  %v7492_v36 = vld [vmem:[#allocation9 + $0x180] sm:$0xff]  ;;  %v9109_v4 = vld [vmem:[#allocation20_spill] sm:$0xff]  ;;  %v550_v32 = vadd.f32 %v9110_v56, %v9083_v45 }
 0x5b8   :  { %v2824_v60 = vsub.f32 1.0, %v2823_v49  ;;  %v501_v49 = vadd.f32 %v9109_v4, %v9044_v31  ;;  %3191 = vmatpush.msra.mxu2 %v7496_v47  ;;  %v7579_v4 = vld [vmem:[#allocation9 + $0xd0] sm:$0xff]  ;;  %v7587_v56 = vld [vmem:[#allocation9 + $0xa0] sm:$0xff] }
 0x5b9   :  { %v5373_v43 = vpop.eup %5372  ;;  %v2787_v54 = vmul.f32 %v5369_v23, %v2786_v1  ;;  %vm2872_vm7 = vcmp.eq.f32.partialorder %v2871_v38, 8.507059e+37  ;;  %3143 = vmatpush.msra.mxu0 %v7468_v19  ;;  %v7504_v1 = vld [vmem:[#allocation9 + $0x198] sm:$0xff]  ;;  %v7559_v38 = vld [vmem:[#allocation9 + $0xe0] sm:$0xff] }
 0x5ba   :  { %v2825_v9 = vmul.f32 %v5371_v50, %v2824_v60  ;;  %v2885_v10 = vmul.f32 %v5373_v43, %v2860_v51  ;;  %v7510_v43 = vld [vmem:[#allocation9 + $0x168] sm:$0xff] }
 0x5bb   :  { %v5375_v59 = vpop.eup %5374  ;;  %v2788_v34 = vadd.f32 %v5369_v23, %v2787_v54  ;;  %3144 = vmatpush.msra.mxu0 %v7480_v6  ;;  %v7512_v54 = vld [vmem:[#allocation9 + $0x170] sm:$0xff] }
 0x5bc   :  { %v2826_v39 = vadd.f32 %v5371_v50, %v2825_v9  ;;  %v2863_v63 = vmul.f32 %v5375_v59, %v2846_v16  ;;  %2918 = vmatmul.f32.vlgmr.msrb.gmra.mxu0 %v2885_v10  ;;  %2941 = vmatmul.f32.vlgmr.msrb.gmra.mxu1 %v2885_v10  ;;  %v5377_v41 = vpop.eup %5376  ;;  %vm2868_vm4 = vweird.f32 %v5375_v59  ;;  %v7482_v16 = vld [vmem:[#allocation9 + $0x1a8] sm:$0xff]  ;;  %v7516_v9 = vld [vmem:[#allocation9 + $0x178] sm:$0xff] }
 0x5bd   :  { %v2792_v33 = vsel %vm2791_vm0, %v5369_v23, %v2788_v34  ;;  %2964 = vmatmul.f32.vlgmr.msrb.gmra.mxu2 %v2885_v10  ;;  %2987 = vmatmul.f32.vlgmr.msrb.gmra.mxu3 %v2885_v10  ;;  %vm2869_vm6 = vmor %vm2867_vm5, %vm2868_vm4  ;;  %9108 = vst [vmem:[#allocation22_spill] sm:$0xff] %v7482_v16  ;;  %v7488_v23 = vld [vmem:[#allocation9 + $0x1b8] sm:$0xff]  ;;  %v7522_v34 = vld [vmem:[#allocation9 + $0x148] sm:$0xff] }
 0x5be   :  { %v2797_v0 = vsel %vm2794_vm2, %v2796_v37, %v2792_v33  ;;  %v2830_v48 = vsel %vm2829_vm1, %v5371_v50, %v2826_v39  ;;  %v2864_v28 = vsub.f32 1.0, %v2863_v63  ;;  %3167 = vmatpush.msra.mxu1 %v7482_v16  ;;  %3213 = vmatpush.msra.mxu3 %v7488_v23  ;;  %v7494_v50 = vld [vmem:[#allocation9 + $0x188] sm:$0xff]  ;;  %v7524_v37 = vld [vmem:[#allocation9 + $0x150] sm:$0xff]  ;;  %v7526_v39 = vpack.c.bf16 %v550_v32, %v501_v49  ;;  %v7530_v63 = vld [vmem:[#allocation9 + $0x158] sm:$0xff] }
 0x5bf   :  { %v2835_v8 = vsel %vm2832_vm3, %v2834_v2, %v2830_v48  ;;  %v2880_v24 = vmul.f32 %v5377_v41, %v2797_v0  ;;  %3145 = vmatpush.msra.mxu0 %v7492_v36  ;;  %3192 = vmatpush.msra.mxu2 %v7512_v54  ;;  %v7534_v41 = vld [vmem:[#allocation9 + $0x120] sm:$0xff]  ;;  %v7536_v0 = vld [vmem:[#allocation9 + $0x128] sm:$0xff]  ;;  %v7540_v48 = vld [vmem:[#allocation9 + $0x130] sm:$0xff] }
 0x5c0   :  { %v2878_v22 = vmul.f32 %v2835_v8, %v7408_v11  ;;  %v2865_v61 = vmul.f32 %v5375_v59, %v2864_v28  ;;  %v9102_v11 = vld [vmem:[#allocation68_spill] sm:$0xff]  ;;  %3168 = vmatpush.msra.mxu1 %v7494_v50  ;;  %3214 = vmatpush.msra.mxu3 %v7504_v1  ;;  %v7542_v28 = vld [vmem:[#allocation9 + $0x138] sm:$0xff]  ;;  %v7546_v8 = vld [vmem:[#allocation9 + $0x100] sm:$0xff] }
 0x5c1   :  { %v403_v3 = vadd.f32 %v9102_v11, %v9040_v62  ;;  %3146 = vmatpush.msra.mxu0 %v7508_v13  ;;  %3193 = vmatpush.msra.mxu2 %v7524_v37  ;;  %v7589_v32 = vld [vmem:[#allocation9 + $0xa8] sm:$0xff] }
 0x5c2   :  { %v7449_v55 = vadd.f32 %v2880_v24, %v2878_v22  ;;  %v2866_v12 = vadd.f32 %v5375_v59, %v2865_v61  ;;  %3169 = vmatpush.msra.mxu1 %v7510_v43  ;;  %3215 = vmatpush.msra.mxu3 %v7516_v9  ;;  %v7548_v24 = vld [vmem:[#allocation9 + $0x108] sm:$0xff]  ;;  %v7550_v22 = vld [vmem:[#allocation9 + $0x110] sm:$0xff]  ;;  %v2897_v61 = vunpack.c.h.bf16 %v7526_v39  ;;  %9113 = vst [vmem:[#allocation23_spill] sm:$0xff] %v7589_v32 }
 0x5c3   :  { %v582_v53 = vpack.c.bf16 %v452_v52, %v403_v3  ;;  %3194 = vmatpush.msra.mxu2 %v7540_v48  ;;  %v7575_v52 = vld [vmem:[#allocation9 + $0xc0] sm:$0xff] }
 0x5c4   :  { %9101 = vst [vmem:[#allocation119_spill] sm:$0xff] %v7449_v55  ;;  %5378 = vtanh.f32 %v7449_v55  ;;  %v2870_v21 = vsel %vm2869_vm6, %v5375_v59, %v2866_v12  ;;  %v7520_v59 = vld [vmem:[#allocation9 + $0x140] sm:$0xff]  ;;  %3170 = vmatpush.msra.mxu1 %v7522_v34  ;;  %3216 = vmatpush.msra.mxu3 %v7530_v63  ;;  %v7555_v12 = vld [vmem:[#allocation9 + $0x118] sm:$0xff] }
 0x5c5   :  { %v2875_v26 = vsel %vm2872_vm7, %v2874_v30, %v2870_v21  ;;  %v2894_v60 = vunpack.c.l.bf16 %v582_v53  ;;  %v2895_v58 = vunpack.c.h.bf16 %v582_v53  ;;  %3147 = vmatpush.msra.mxu0 %v7520_v59  ;;  %3195 = vmatpush.msra.mxu2 %v7550_v22  ;;  %v7561_v21 = vld [vmem:[#allocation9 + $0xe8] sm:$0xff]  ;;  %v7563_v30 = vld [vmem:[#allocation9 + $0xf0] sm:$0xff] }
 0x5c6   :  { %3171 = vmatpush.msra.mxu1 %v7536_v0  ;;  %3217 = vmatpush.msra.mxu3 %v7542_v28  ;;  %v7577_v53 = vld [vmem:[#allocation9 + $0xc8] sm:$0xff] }
 0x5c7   :  { %3148 = vmatpush.msra.mxu0 %v7534_v41  ;;  %3196 = vmatpush.msra.mxu2 %v7563_v30 }
 0x5c8   :  { %3172 = vmatpush.msra.mxu1 %v7548_v24  ;;  %3218 = vmatpush.msra.mxu3 %v7555_v12 }
 0x5c9   :  { %3149 = vmatpush.msra.mxu0 %v7546_v8  ;;  %3197 = vmatpush.msra.mxu2 %v7579_v4 }
 0x5ca   :  { %v5379_v25 = vpop.eup %5378  ;;  %3173 = vmatpush.msra.mxu1 %v7561_v21  ;;  %3219 = vmatpush.msra.mxu3 %v7571_v15 }
 0x5cb   :  { %v2886_v46 = vmul.f32 %v5379_v25, %v2875_v26  ;;  %v9111_v25 = vld [vmem:[#allocation71_spill] sm:$0xff]  ;;  %3150 = vmatpush.msra.mxu0 %v7559_v38 }
 0x5cc   :  { %v405_v26 = vadd.f32 %v9111_v25, %v9040_v62  ;;  %3174 = vmatpush.msra.mxu1 %v7577_v53  ;;  %v9120_v25 = vld [vmem:[#allocation73_spill] sm:$0xff] }
 0x5cd   :  { %2921 = vmatmul.f32.gmra.mxu0 %v2886_v46  ;;  %2944 = vmatmul.f32.gmra.mxu1 %v2886_v46 }
 0x5ce   :  { %2967 = vmatmul.f32.gmra.mxu2 %v2886_v46  ;;  %2990 = vmatmul.f32.gmra.mxu3 %v2886_v46  ;;  %v9112_v46 = vld [vmem:[#allocation72_spill] sm:$0xff] }
 0x5cf   :  { %v454_v11 = vadd.f32 %v9112_v46, %v9042_v35  ;;  %3151 = vmatpush.msra.mxu0 %v7575_v52  ;;  %v7583_v35 = vld [vmem:[#allocation9 + $0xd8] sm:$0xff]  ;;  %3175 = vmatpush.msra.mxu1 %v7589_v32  ;;  %v9121_v46 = vld [vmem:[#allocation74_spill] sm:$0xff]  ;;  %v7652_v32 = vld [vmem:[#allocation9 + $0x28] sm:$0xff] }
 0x5d0   :  { %3220 = vmatpush.msra.mxu3 %v7583_v35  ;;  %9129 = vst [vmem:[#allocation132_spill] sm:$0xff] %v7652_v32 }
 0x5d1   :  { %3152 = vmatpush.msra.mxu0 %v7587_v56 }
 0x639   :  { %v2919_v5 = vpop.f32.mrf.mxu0  ;;  %v2942_v51 = vpop.f32.mrf.mxu1 }
 0x63a   :  { %v2994_v18 = vadd.f32 %v2919_v5, %v2894_v60  ;;  %v2995_v10 = vadd.f32 %v2942_v51, %v2895_v58  ;;  %v7591_v60 = vld [vmem:[#allocation9 + $0xb0] sm:$0xff]  ;;  %v584_v5 = vpack.c.bf16 %v454_v11, %v405_v26  ;;  %v503_v26 = vadd.f32 %v9120_v25, %v9044_v31  ;;  %v7629_v31 = vld [vmem:[#allocation9 + $0x78] sm:$0xff] }
 0x63b   :  { %9114 = vst [vmem:[#allocation24_spill] sm:$0xff] %v7591_v60  ;;  %3198 = vmatpush.msra.mxu2 %v7591_v60  ;;  %v552_v11 = vadd.f32 %v9121_v46, %v9083_v45  ;;  %v7633_v46 = vld [vmem:[#allocation9 + $0x40] sm:$0xff] }
 0x63c   :  { %v4982_v2 = vmul.f32 -1.442695, %v2994_v18  ;;  %v4984_v33 = vmul.f32 -1.442695, %v2995_v10  ;;  %v7597_v18 = vld [vmem:[#allocation9 + $0xb8] sm:$0xff]  ;;  %v2898_v55 = vunpack.c.l.bf16 %v584_v5  ;;  %9125 = vst [vmem:[#allocation128_spill] sm:$0xff] %v7629_v31 }
 0x63d   :  { %9115 = vst [vmem:[#allocation120_spill] sm:$0xff] %v7597_v18  ;;  %3221 = vmatpush.msra.mxu3 %v7597_v18  ;;  %v7650_v60 = vld [vmem:[#allocation9 + $0x20] sm:$0xff] }
 0x63e   :  { %5380 = vpow2.f32 %v4982_v2  ;;  %v7603_v2 = vld [vmem:[#allocation9 + $0x80] sm:$0xff]  ;;  %9128 = vst [vmem:[#allocation131_spill] sm:$0xff] %v7650_v60 }
 0x63f   :  { %5382 = vpow2.f32 %v4984_v33  ;;  %9116 = vst [vmem:[#allocation121_spill] sm:$0xff] %v7603_v2  ;;  %v7605_v33 = vld [vmem:[#allocation9 + $0x88] sm:$0xff]  ;;  %3153 = vmatpush.msra.mxu0 %v7603_v2 }
 0x640   :  { %v2988_v57 = vpop.f32.mrf.mxu3  ;;  %9117 = vst [vmem:[#allocation122_spill] sm:$0xff] %v7605_v33  ;;  %3176 = vmatpush.msra.mxu1 %v7605_v33  ;;  %v2899_v33 = vunpack.c.h.bf16 %v584_v5  ;;  %v2896_v5 = vunpack.c.l.bf16 %v7526_v39 }
 0x641   :  { %v2997_v3 = vadd.f32 %v2988_v57, %v2897_v61  ;;  %v7607_v61 = vld [vmem:[#allocation9 + $0x90] sm:$0xff]  ;;  %v7612_v57 = vld [vmem:[#allocation9 + $0x98] sm:$0xff] }
 0x642   :  { %9118 = vst [vmem:[#allocation123_spill] sm:$0xff] %v7607_v61  ;;  %3199 = vmatpush.msra.mxu2 %v7607_v61  ;;  %3222 = vmatpush.msra.mxu3 %v7612_v57  ;;  %v7637_v61 = vld [vmem:[#allocation9 + $0x50] sm:$0xff] }
 0x643   :  { %v4986_v62 = vmul.f32 -1.442695, %v2997_v3  ;;  %9119 = vst [vmem:[#allocation124_spill] sm:$0xff] %v7612_v57  ;;  %v7621_v3 = vld [vmem:[#allocation9 + $0x60] sm:$0xff]  ;;  %v7635_v57 = vld [vmem:[#allocation9 + $0x48] sm:$0xff] }
 0x644   :  { %v5381_v49 = vpop.eup %5380  ;;  %9122 = vst [vmem:[#allocation125_spill] sm:$0xff] %v7621_v3  ;;  %3154 = vmatpush.msra.mxu0 %v7621_v3  ;;  %3223 = vmatpush.msra.mxu3 %v7629_v31 }
 0x645   :  { %v5383_v58 = vpop.eup %5382  ;;  %v7593_v51 = vadd.f32 1.0, %v5381_v49  ;;  %5384 = vpow2.f32 %v4986_v62  ;;  %v7623_v62 = vld [vmem:[#allocation9 + $0x68] sm:$0xff]  ;;  %v7625_v49 = vld [vmem:[#allocation9 + $0x70] sm:$0xff]  ;;  %9126 = vst [vmem:[#allocation129_spill] sm:$0xff] %v7637_v61 }
 0x646   :  { %v7599_v10 = vadd.f32 1.0, %v5383_v58  ;;  %9123 = vst [vmem:[#allocation126_spill] sm:$0xff] %v7623_v62  ;;  %v2965_v58 = vpop.f32.mrf.mxu2  ;;  %3177 = vmatpush.msra.mxu1 %v7623_v62  ;;  %3200 = vmatpush.msra.mxu2 %v7625_v49  ;;  %v7642_v62 = vld [vmem:[#allocation9 + $0x58] sm:$0xff] }
 0x647   :  { %5386 = vrcp.f32 %v7593_v51  ;;  %9124 = vst [vmem:[#allocation127_spill] sm:$0xff] %v7625_v49  ;;  %3155 = vmatpush.msra.mxu0 %v7633_v46  ;;  %v7644_v49 = vpack.c.bf16 %v552_v11, %v503_v26  ;;  %3224 = vmatpush.msra.mxu3 %v7642_v62  ;;  %vm3015_vm10 = vweird.f32 %v7593_v51 }
 0x648   :  { %5388 = vrcp.f32 %v7599_v10  ;;  %3178 = vmatpush.msra.mxu1 %v7635_v57  ;;  %9127 = vst [vmem:[#allocation130_spill] sm:$0xff] %v7642_v62  ;;  %3201 = vmatpush.msra.mxu2 %v7637_v61  ;;  %v3059_v61 = vand.u32 2147483648, %v7599_v10  ;;  %vm3053_vm11 = vweird.f32 %v7599_v10 }
 0x649   :  { %3156 = vmatpush.msra.mxu0 %v7650_v60 }
 0x64a   :  { %v2922_v45 = vpop.f32.mrf.mxu0  ;;  %v2945_v25 = vpop.f32.mrf.mxu1  ;;  %3179 = vmatpush.msra.mxu1 %v7652_v32  ;;  %v7679_v32 = vld [vmem:[#allocation9 + $0x18] sm:$0xff] }
 0x64b   :  { %v5385_v2 = vpop.eup %5384  ;;  %v2998_v3 = vadd.f32 %v2922_v45, %v2898_v55  ;;  %v2999_v18 = vadd.f32 %v2945_v25, %v2899_v33  ;;  %v7654_v55 = vld [vmem:[#allocation9 + $0x30] sm:$0xff]  ;;  %v2996_v33 = vadd.f32 %v2965_v58, %v2896_v5  ;;  %v7669_v58 = vld [vmem:[#allocation9] sm:$0xff] }
 0x64c   :  { %v7646_v31 = vadd.f32 1.0, %v5385_v2  ;;  %9130 = vst [vmem:[#allocation133_spill] sm:$0xff] %v7654_v55  ;;  %v7660_v2 = vld [vmem:[#allocation9 + $0x38] sm:$0xff]  ;;  %3202 = vmatpush.msra.mxu2 %v7654_v55  ;;  %3157 = vmatpush.msra.mxu0 %v7669_v58  ;;  %v3019_v55 = vand.u32 2147483647, %v7593_v51 }
 0x64d   :  { %v7656_v39 = vpop.eup %5386  ;;  %v4983_v45 = vmul.f32 -1.442695, %v2998_v3  ;;  %v4985_v25 = vmul.f32 -1.442695, %v2999_v18  ;;  %9131 = vst [vmem:[#allocation134_spill] sm:$0xff] %v7660_v2  ;;  %3225 = vmatpush.msra.mxu3 %v7660_v2  ;;  %v7671_v18 = vld [vmem:[#allocation9 + $0x8] sm:$0xff]  ;;  %v2901_v2 = vunpack.c.h.bf16 %v7644_v49 }
 0x64e   :  { %v7662_v26 = vpop.eup %5388  ;;  %v3011_v11 = vmul.f32 %v7656_v39, %v7593_v51  ;;  %5390 = vrcp.f32 %v7646_v31  ;;  %9132 = vst [vmem:[#allocation135_spill] sm:$0xff] %v7669_v58  ;;  %v7673_v3 = vld [vmem:[#allocation9 + $0x10] sm:$0xff]  ;;  %3180 = vmatpush.msra.mxu1 %v7671_v18  ;;  %3388 = vmatpush.msrb.mxu0 %v7456_v7  ;;  %vm3016_vm8 = vweird.f32 %v7656_v39  ;;  %vm7703_vm12 = vcmp.eq.f32.partialorder %v3019_v55, 8.507059e+37 }
 0x64f   :  { %9133 = vst [vmem:[#allocation136_spill] sm:$0xff] %v7671_v18  ;;  %v3049_v5 = vmul.f32 %v7662_v26, %v7599_v10  ;;  %5392 = vpow2.f32 %v4983_v45  ;;  %3203 = vmatpush.msra.mxu2 %v7673_v3  ;;  %3226 = vmatpush.msra.mxu3 %v7679_v32  ;;  %v3021_v45 = vand.u32 2147483648, %v7593_v51  ;;  %vm3054_vm9 = vweird.f32 %v7662_v26  ;;  %vm7711_vm13 = vmor %vm3015_vm10, %vm3016_vm8 }
 0x650   :  { %9134 = vst [vmem:[#allocation137_spill] sm:$0xff] %v7673_v3  ;;  %v3012_v60 = vsub.f32 1.0, %v3011_v11  ;;  %5394 = vpow2.f32 %v4985_v25  ;;  %3411 = vmatpush.msrb.mxu1 %v7458_v44  ;;  %v3057_v25 = vand.u32 2147483647, %v7599_v10  ;;  %3389 = vmatpush.msrb.mxu0 %v7468_v19  ;;  %vm3055_vm14 = vmor %vm3053_vm11, %vm3054_vm9  ;;  %vm3093_vm1 = vweird.f32 %v7646_v31 }
 0x651   :  { %v3050_v62 = vsub.f32 1.0, %v3049_v5  ;;  %5396 = vtanh.f32 %v2996_v33  ;;  %v2991_v58 = vpop.f32.mrf.mxu3  ;;  %3434 = vmatpush.msrb.mxu2 %v7460_v14  ;;  %3457 = vmatpush.msrb.mxu3 %v7464_v27  ;;  %v3022_v19 = vor.u32 1.1754944e-38, %v3021_v45 }
 0x652   :  { %v3013_v11 = vmul.f32 %v7656_v39, %v3012_v60  ;;  %v3001_v3 = vadd.f32 %v2991_v58, %v2901_v2  ;;  %3412 = vmatpush.msrb.mxu1 %v7470_v42  ;;  %3390 = vmatpush.msrb.mxu0 %v7480_v6  ;;  %vm3058_vm15 = vcmp.eq.f32.partialorder %v3057_v25, 8.507059e+37  ;;  %v3099_v2 = vand.u32 2147483648, %v7646_v31 }
 0x653   :  { %v3051_v5 = vmul.f32 %v7662_v26, %v3050_v62  ;;  %3435 = vmatpush.msrb.mxu2 %v7472_v40  ;;  %3458 = vmatpush.msrb.mxu3 %v7476_v17  ;;  %v3060_v62 = vor.u32 1.1754944e-38, %v3059_v61 }
 0x654   :  { %v7699_v60 = vpop.eup %5390  ;;  %v3014_v33 = vadd.f32 %v7656_v39, %v3013_v11  ;;  %v4987_v58 = vmul.f32 -1.442695, %v3001_v3  ;;  %3413 = vmatpush.msrb.mxu1 %v7482_v16  ;;  %3391 = vmatpush.msrb.mxu0 %v7492_v36 }
 0x655   :  { %v5393_v51 = vpop.eup %5392  ;;  %v3052_v11 = vadd.f32 %v7662_v26, %v3051_v5  ;;  %v3089_v55 = vmul.f32 %v7699_v60, %v7646_v31  ;;  %3436 = vmatpush.msrb.mxu2 %v7484_v20  ;;  %3459 = vmatpush.msrb.mxu3 %v7488_v23  ;;  %vm3094_vm0 = vweird.f32 %v7699_v60 }
 0x656   :  { %v5395_v3 = vpop.eup %5394  ;;  %v3018_v61 = vsel %vm7711_vm13, %v7656_v39, %v3014_v33  ;;  %v7727_v45 = vadd.f32 1.0, %v5393_v51  ;;  %5398 = vpow2.f32 %v4987_v58  ;;  %3414 = vmatpush.msrb.mxu1 %v7494_v50  ;;  %3392 = vmatpush.msrb.mxu0 %v7508_v13  ;;  %v3097_v51 = vand.u32 2147483647, %v7646_v31  ;;  %vm7769_vm2 = vmor %vm3093_vm1, %vm3094_vm0 }
 0x657   :  { %v5397_v5 = vpop.eup %5396  ;;  %v3023_v16 = vsel %vm7703_vm12, %v3022_v19, %v3018_v61  ;;  %v3056_v6 = vsel %vm3055_vm14, %v7662_v26, %v3052_v11  ;;  %v3090_v10 = vsub.f32 1.0, %v3089_v55  ;;  %v7734_v17 = vadd.f32 1.0, %v5395_v3  ;;  %3437 = vmatpush.msrb.mxu2 %v7496_v47  ;;  %3460 = vmatpush.msrb.mxu3 %v7504_v1  ;;  %v9142_v55 = vld [vmem:[#allocation23_spill] sm:$0xff] }
 0x658   :  { %v3061_v42 = vsel %vm3058_vm15, %v3060_v62, %v3056_v6  ;;  %v3120_v39 = vmul.f32 %v5397_v5, %v3023_v16  ;;  %5400 = vrcp.f32 %v7727_v45  ;;  %3415 = vmatpush.msrb.mxu1 %v7510_v43  ;;  %v2968_v16 = vpop.f32.mrf.mxu2  ;;  %3393 = vmatpush.msrb.mxu0 %v7520_v59  ;;  %v2900_v26 = vunpack.c.l.bf16 %v7644_v49 }
 0x659   :  { %v3118_v25 = vmul.f32 %v3061_v42, %v7435_v29  ;;  %v3091_v19 = vmul.f32 %v7699_v60, %v3090_v10  ;;  %5402 = vrcp.f32 %v7734_v17  ;;  %3438 = vmatpush.msrb.mxu2 %v7512_v54  ;;  %3461 = vmatpush.msrb.mxu3 %v7516_v9  ;;  %v3100_v5 = vor.u32 1.1754944e-38, %v3099_v2 }
 0x65a   :  { %3416 = vmatpush.msrb.mxu1 %v7522_v34  ;;  %3394 = vmatpush.msrb.mxu0 %v7534_v41  ;;  %v3000_v49 = vadd.f32 %v2968_v16, %v2900_v26  ;;  %vm3098_vm3 = vcmp.eq.f32.partialorder %v3097_v51, 8.507059e+37  ;;  %v3034_v16 = vand.u32 2147483647, %v7727_v45  ;;  %vm3030_vm6 = vweird.f32 %v7727_v45 }
 0x65b   :  { %v7748_v6 = vadd.f32 %v3120_v39, %v3118_v25  ;;  %v3092_v33 = vadd.f32 %v7699_v60, %v3091_v19  ;;  %3439 = vmatpush.msrb.mxu2 %v7524_v37  ;;  %3462 = vmatpush.msrb.mxu3 %v7530_v63  ;;  %v3074_v39 = vand.u32 2147483648, %v7734_v17  ;;  %v3036_v25 = vand.u32 2147483648, %v7727_v45 }
 0x65c   :  { %v5399_v29 = vpop.eup %5398  ;;  %3417 = vmatpush.msrb.mxu1 %v7536_v0  ;;  %3395 = vmatpush.msrb.mxu0 %v7546_v8  ;;  %vm3068_vm7 = vweird.f32 %v7734_v17  ;;  %vm3035_vm10 = vcmp.eq.f32.partialorder %v3034_v16, 8.507059e+37 }
 0x65d   :  { %9139 = vst [vmem:[#allocation138_spill] sm:$0xff] %v7748_v6  ;;  %5404 = vtanh.f32 %v7748_v6  ;;  %v7759_v58 = vadd.f32 1.0, %v5399_v29  ;;  %3440 = vmatpush.msrb.mxu2 %v7540_v48  ;;  %3463 = vmatpush.msrb.mxu3 %v7542_v28  ;;  %v3096_v61 = vsel %vm7769_vm2, %v7699_v60, %v3092_v33  ;;  %v3072_v33 = vand.u32 2147483647, %v7734_v17  ;;  %v9145_v6 = vld [vmem:[#allocation121_spill] sm:$0xff] }
 0x65e   :  { %v5401_v62 = vpop.eup %5400  ;;  %3418 = vmatpush.msrb.mxu1 %v7548_v24  ;;  %3396 = vmatpush.msrb.mxu0 %v7559_v38  ;;  %v3101_v29 = vsel %vm3098_vm3, %v3100_v5, %v3096_v61  ;;  %v3075_v5 = vor.u32 1.1754944e-38, %v3074_v39  ;;  %v9147_v39 = vld [vmem:[#allocation119_spill] sm:$0xff] }
 0x65f   :  { %v5403_v11 = vpop.eup %5402  ;;  %v3026_v3 = vmul.f32 %v5401_v62, %v7727_v45  ;;  %5406 = vrcp.f32 %v7759_v58  ;;  %3441 = vmatpush.msrb.mxu2 %v7550_v22  ;;  %3464 = vmatpush.msrb.mxu3 %v7555_v12  ;;  %vm3031_vm4 = vweird.f32 %v5401_v62  ;;  %vm3073_vm11 = vcmp.eq.f32.partialorder %v3072_v33, 8.507059e+37  ;;  %v9151_v33 = vld [vmem:[#allocation126_spill] sm:$0xff] }
 0x660   :  { %v3064_v31 = vmul.f32 %v5403_v11, %v7734_v17  ;;  %3419 = vmatpush.msrb.mxu1 %v7561_v21  ;;  %5408 = vtanh.f32 %v3000_v49  ;;  %3397 = vmatpush.msrb.mxu0 %v7575_v52  ;;  %vm3069_vm5 = vweird.f32 %v5403_v11  ;;  %vm3032_vm8 = vmor %vm3030_vm6, %vm3031_vm4  ;;  %vm3108_vm13 = vweird.f32 %v7759_v58 }
 0x661   :  { %v3027_v10 = vsub.f32 1.0, %v3026_v3  ;;  %3442 = vmatpush.msrb.mxu2 %v7563_v30  ;;  %3465 = vmatpush.msrb.mxu3 %v7571_v15  ;;  %v3037_v3 = vor.u32 1.1754944e-38, %v3036_v25  ;;  %vm3070_vm9 = vmor %vm3068_vm7, %vm3069_vm5  ;;  %v9144_v25 = vld [vmem:[#allocation120_spill] sm:$0xff] }
 0x662   :  { %v3065_v42 = vsub.f32 1.0, %v3064_v31  ;;  %3420 = vmatpush.msrb.mxu1 %v7577_v53  ;;  %3398 = vmatpush.msrb.mxu0 %v7587_v56 }
 0x663   :  { %v5405_v60 = vpop.eup %5404  ;;  %v3028_v19 = vmul.f32 %v5401_v62, %v3027_v10  ;;  %3443 = vmatpush.msrb.mxu2 %v7579_v4  ;;  %3466 = vmatpush.msrb.mxu3 %v7583_v35 }
 0x664   :  { %v3066_v26 = vmul.f32 %v5403_v11, %v3065_v42  ;;  %v3126_v2 = vmul.f32 %v5405_v60, %v3101_v29  ;;  %3421 = vmatpush.msrb.mxu1 %v9142_v55  ;;  %3399 = vmatpush.msrb.mxu0 %v9145_v6  ;;  %v9146_v55 = vld [vmem:[#allocation122_spill] sm:$0xff] }
 0x665   :  { %v7795_v51 = vpop.eup %5406  ;;  %v3029_v49 = vadd.f32 %v5401_v62, %v3028_v19  ;;  %v9143_v19 = vld [vmem:[#allocation24_spill] sm:$0xff]  ;;  %3467 = vmatpush.msrb.mxu3 %v9144_v25 }
 0x666   :  { %v3067_v31 = vadd.f32 %v5403_v11, %v3066_v26  ;;  %v3104_v61 = vmul.f32 %v7795_v51, %v7759_v58  ;;  %3158 = vmatmul.f32.vlgmr.msra.gmra.mxu0 %v3126_v2  ;;  %3181 = vmatmul.f32.vlgmr.msra.gmra.mxu1 %v3126_v2  ;;  %v5409_v45 = vpop.eup %5408  ;;  %vm3109_vm12 = vweird.f32 %v7795_v51 }
 0x667   :  { %v3033_v10 = vsel %vm3032_vm8, %v5401_v62, %v3029_v49  ;;  %3204 = vmatmul.f32.vlgmr.msra.gmra.mxu2 %v3126_v2  ;;  %3227 = vmatmul.f32.vlgmr.msra.gmra.mxu3 %v3126_v2  ;;  %v9148_v2 = vld [vmem:[#allocation123_spill] sm:$0xff]  ;;  %v9149_v49 = vld [vmem:[#allocation124_spill] sm:$0xff]  ;;  %vm3110_vm14 = vmor %vm3108_vm13, %vm3109_vm12 }
 0x668   :  { %v3038_v42 = vsel %vm3035_vm10, %v3037_v3, %v3033_v10  ;;  %v3071_v60 = vsel %vm3070_vm9, %v5403_v11, %v3067_v31  ;;  %v3105_v17 = vsub.f32 1.0, %v3104_v61  ;;  %3444 = vmatpush.msrb.mxu2 %v9143_v19  ;;  %3422 = vmatpush.msrb.mxu1 %v9146_v55  ;;  %v9150_v11 = vld [vmem:[#allocation125_spill] sm:$0xff]  ;;  %v9153_v31 = vld [vmem:[#allocation127_spill] sm:$0xff]  ;;  %v9154_v61 = vld [vmem:[#allocation128_spill] sm:$0xff]  ;;  %v3114_v10 = vand.u32 2147483648, %v7759_v58 }
 0x669   :  { %v3076_v29 = vsel %vm3073_vm11, %v3075_v5, %v3071_v60  ;;  %v3121_v26 = vmul.f32 %v5409_v45, %v3038_v42  ;;  %3468 = vmatpush.msrb.mxu3 %v9149_v49  ;;  %3400 = vmatpush.msrb.mxu0 %v9150_v11  ;;  %v9155_v45 = vld [vmem:[#allocation129_spill] sm:$0xff]  ;;  %v9156_v42 = vld [vmem:[#allocation130_spill] sm:$0xff]  ;;  %v3112_v60 = vand.u32 2147483647, %v7759_v58 }
 0x66a   :  { %v3119_v62 = vmul.f32 %v3076_v29, %v9147_v39  ;;  %v3106_v16 = vmul.f32 %v7795_v51, %v3105_v17  ;;  %3445 = vmatpush.msrb.mxu2 %v9148_v2  ;;  %3423 = vmatpush.msrb.mxu1 %v9151_v33  ;;  %v9157_v17 = vld [vmem:[#allocation131_spill] sm:$0xff]  ;;  %v9158_v29 = vld [vmem:[#allocation132_spill] sm:$0xff]  ;;  %v9160_v39 = vld [vmem:[#allocation134_spill] sm:$0xff] }
 0x66b   :  { %3469 = vmatpush.msrb.mxu3 %v9154_v61  ;;  %3401 = vmatpush.msrb.mxu0 %v7633_v46  ;;  %vm3113_vm15 = vcmp.eq.f32.partialorder %v3112_v60, 8.507059e+37 }
 0x66c   :  { %v7815_v3 = vadd.f32 %v3121_v26, %v3119_v62  ;;  %3446 = vmatpush.msrb.mxu2 %v9153_v31  ;;  %v3107_v5 = vadd.f32 %v7795_v51, %v3106_v16  ;;  %3424 = vmatpush.msrb.mxu1 %v7635_v57  ;;  %v9159_v26 = vld [vmem:[#allocation133_spill] sm:$0xff]  ;;  %v9161_v16 = vld [vmem:[#allocation135_spill] sm:$0xff] }
 0x66d   :  { %3470 = vmatpush.msrb.mxu3 %v9156_v42  ;;  %3402 = vmatpush.msrb.mxu0 %v9157_v17  ;;  %v9162_v42 = vld [vmem:[#allocation137_spill] sm:$0xff] }
 0x66e   :  { %9152 = vst [vmem:[#allocation16_spill] sm:$0xff] %v7815_v3  ;;  %5410 = vtanh.f32 %v7815_v3  ;;  %3447 = vmatpush.msrb.mxu2 %v9155_v45  ;;  %3425 = vmatpush.msrb.mxu1 %v9158_v29  ;;  %v3111_v62 = vsel %vm3110_vm14, %v7795_v51, %v3107_v5  ;;  %v3115_v3 = vor.u32 1.1754944e-38, %v3114_v10  ;;  %v9163_v5 = vld [vmem:[#allocation25_spill] sm:$0xff]  ;;  %v9165_v10 = vld [vmem:[#allocation27_spill] sm:$0xff] }
 0x66f   :  { %3471 = vmatpush.msrb.mxu3 %v9160_v39  ;;  %3403 = vmatpush.msrb.mxu0 %v9161_v16 }
 0x670   :  { %3448 = vmatpush.msrb.mxu2 %v9159_v26  ;;  %3426 = vmatpush.msrb.mxu1 %v7671_v18  ;;  %v3116_v26 = vsel %vm3113_vm15, %v3115_v3, %v3111_v62  ;;  %v9164_v18 = vld [vmem:[#allocation26_spill] sm:$0xff] }
 0x671   :  { %3472 = vmatpush.msrb.mxu3 %v7679_v32  ;;  %3635 = vmatpush.msra.mxu0 %v7456_v7  ;;  %v9166_v7 = vld [vmem:[#allocation30_spill] sm:$0xff] }
 0x672   :  { %3449 = vmatpush.msrb.mxu2 %v9162_v42  ;;  %3658 = vmatpush.msra.mxu1 %v7458_v44  ;;  %v9167_v44 = vld [vmem:[#allocation22_spill] sm:$0xff] }
 0x673   :  { %3704 = vmatpush.msra.mxu3 %v7464_v27  ;;  %3636 = vmatpush.msra.mxu0 %v9163_v5  ;;  %v9169_v27 = vld [vmem:[#allocation130_spill] sm:$0xff] }
 0x674   :  { %v5411_v58 = vpop.eup %5410  ;;  %3681 = vmatpush.msra.mxu2 %v7460_v14  ;;  %3659 = vmatpush.msra.mxu1 %v9164_v18  ;;  %v9168_v14 = vld [vmem:[#allocation23_spill] sm:$0xff] }
 0x675   :  { %v3127_v51 = vmul.f32 %v5411_v58, %v3116_v26  ;;  %3705 = vmatpush.msra.mxu3 %v9165_v10  ;;  %3637 = vmatpush.msra.mxu0 %v9166_v7 }
 0x676   :  { %3682 = vmatpush.msra.mxu2 %v7472_v40  ;;  %3660 = vmatpush.msra.mxu1 %v9167_v44  ;;  %v9170_v40 = vld [vmem:[#allocation133_spill] sm:$0xff] }
 0x677   :  { %3161 = vmatmul.f32.gmra.mxu0 %v3127_v51  ;;  %3184 = vmatmul.f32.gmra.mxu1 %v3127_v51 }
 0x678   :  { %3207 = vmatmul.f32.gmra.mxu2 %v3127_v51  ;;  %3230 = vmatmul.f32.gmra.mxu3 %v3127_v51 }
 0x679   :  { %3683 = vmatpush.msra.mxu2 %v7484_v20  ;;  %3706 = vmatpush.msra.mxu3 %v7488_v23  ;;  %v9171_v20 = vld [vmem:[#allocation136_spill] sm:$0xff]  ;;  %v662_v23 = vld [vmem:[%s8619_s7] sm:$0xf] }
 0x67a   :  { %3638 = vmatpush.msra.mxu0 %v7492_v36  ;;  %3661 = vmatpush.msra.mxu1 %v7494_v50  ;;  %v7905_v36 = vperm.slane %v662_v23, 0  ;;  %v7907_v50 = vperm.slane %v662_v23, 1 }
 0x67b   :  { %3684 = vmatpush.msra.mxu2 %v7496_v47  ;;  %3707 = vmatpush.msra.mxu3 %v7504_v1  ;;  %v9174_v47 = vld [vmem:[#allocation75_spill] sm:$0xff] }
 0x67c   :  { %3639 = vmatpush.msra.mxu0 %v7508_v13  ;;  %3662 = vmatpush.msra.mxu1 %v7510_v43  ;;  %9172 = vst [vmem:[#allocation34_spill] sm:$0xff] %v7905_v36  ;;  %v878_v1 = vadd.f32 %v9174_v47, %v7905_v36  ;;  %v9175_v13 = vld [vmem:[#allocation76_spill] sm:$0xff] }
 0x67d   :  { %3685 = vmatpush.msra.mxu2 %v7512_v54  ;;  %3708 = vmatpush.msra.mxu3 %v7516_v9  ;;  %9173 = vst [vmem:[#allocation17_spill] sm:$0xff] %v7907_v50  ;;  %v917_v43 = vadd.f32 %v9175_v13, %v7907_v50  ;;  %v7913_v54 = vperm.slane %v662_v23, 2  ;;  %v7915_v9 = vperm.slane %v662_v23, 3 }
 0x67e   :  { %3640 = vmatpush.msra.mxu0 %v7520_v59  ;;  %3663 = vmatpush.msra.mxu1 %v7522_v34  ;;  %v9178_v34 = vld [vmem:[#allocation41_spill] sm:$0xff] }
 0x67f   :  { %3686 = vmatpush.msra.mxu2 %v7524_v37  ;;  %3709 = vmatpush.msra.mxu3 %v7530_v63  ;;  %9176 = vst [vmem:[#allocation35_spill] sm:$0xff] %v7913_v54  ;;  %v1024_v59 = vpack.c.bf16 %v917_v43, %v878_v1  ;;  %v956_v37 = vadd.f32 %v9178_v34, %v7913_v54  ;;  %v9179_v63 = vld [vmem:[#allocation42_spill] sm:$0xff] }
 0x680   :  { %3641 = vmatpush.msra.mxu0 %v7534_v41  ;;  %3664 = vmatpush.msra.mxu1 %v7536_v0  ;;  %9177 = vst [vmem:[#allocation19_spill] sm:$0xff] %v7915_v9  ;;  %v995_v41 = vadd.f32 %v9179_v63, %v7915_v9 }
 0x681   :  { %3687 = vmatpush.msra.mxu2 %v7540_v48  ;;  %3710 = vmatpush.msra.mxu3 %v7542_v28  ;;  %v3134_v0 = vunpack.c.l.bf16 %v1024_v59  ;;  %v3135_v48 = vunpack.c.h.bf16 %v1024_v59 }
 0x682   :  { %3642 = vmatpush.msra.mxu0 %v7546_v8  ;;  %3665 = vmatpush.msra.mxu1 %v7548_v24 }
 0x683   :  { %3688 = vmatpush.msra.mxu2 %v7550_v22  ;;  %3711 = vmatpush.msra.mxu3 %v7555_v12  ;;  %v1025_v12 = vpack.c.bf16 %v995_v41, %v956_v37 }
 0x684   :  { %3643 = vmatpush.msra.mxu0 %v7559_v38  ;;  %3666 = vmatpush.msra.mxu1 %v7561_v21 }
 0x685   :  { %3689 = vmatpush.msra.mxu2 %v7563_v30  ;;  %3712 = vmatpush.msra.mxu3 %v7571_v15  ;;  %v3137_v30 = vunpack.c.h.bf16 %v1025_v12 }
 0x686   :  { %3644 = vmatpush.msra.mxu0 %v7575_v52  ;;  %3667 = vmatpush.msra.mxu1 %v7577_v53  ;;  %v9180_v52 = vld [vmem:[#allocation43_spill] sm:$0xff] }
 0x687   :  { %3690 = vmatpush.msra.mxu2 %v7579_v4  ;;  %3713 = vmatpush.msra.mxu3 %v7583_v35  ;;  %v880_v53 = vadd.f32 %v9180_v52, %v7905_v36  ;;  %v9181_v4 = vld [vmem:[#allocation77_spill] sm:$0xff] }
 0x688   :  { %3645 = vmatpush.msra.mxu0 %v7587_v56  ;;  %3668 = vmatpush.msra.mxu1 %v9168_v14  ;;  %v919_v35 = vadd.f32 %v9181_v4, %v7907_v50 }
 0x689   :  { %3691 = vmatpush.msra.mxu2 %v9143_v19  ;;  %3714 = vmatpush.msra.mxu3 %v9144_v25  ;;  %v9182_v25 = vld [vmem:[#allocation78_spill] sm:$0xff] }
 0x68a   :  { %3646 = vmatpush.msra.mxu0 %v9145_v6  ;;  %3669 = vmatpush.msra.mxu1 %v9146_v55  ;;  %v1026_v6 = vpack.c.bf16 %v919_v35, %v880_v53 }
 0x68b   :  { %3692 = vmatpush.msra.mxu2 %v9148_v2  ;;  %3715 = vmatpush.msra.mxu3 %v9149_v49  ;;  %v958_v2 = vadd.f32 %v9182_v25, %v7913_v54  ;;  %v9183_v49 = vld [vmem:[#allocation79_spill] sm:$0xff] }
 0x68c   :  { %3647 = vmatpush.msra.mxu0 %v9150_v11  ;;  %3670 = vmatpush.msra.mxu1 %v9151_v33  ;;  %v997_v11 = vadd.f32 %v9183_v49, %v7915_v9  ;;  %v3138_v3 = vunpack.c.l.bf16 %v1026_v6 }
 0x68d   :  { %3693 = vmatpush.msra.mxu2 %v9153_v31  ;;  %3716 = vmatpush.msra.mxu3 %v9154_v61  ;;  %v3139_v31 = vunpack.c.h.bf16 %v1026_v6 }
 0x68e   :  { %3648 = vmatpush.msra.mxu0 %v7633_v46  ;;  %3671 = vmatpush.msra.mxu1 %v7635_v57  ;;  %v7929_v62 = vpack.c.bf16 %v997_v11, %v958_v2 }
 0x68f   :  { %3694 = vmatpush.msra.mxu2 %v9155_v45  ;;  %3717 = vmatpush.msra.mxu3 %v9169_v27 }
 0x690   :  { %3649 = vmatpush.msra.mxu0 %v9157_v17  ;;  %3672 = vmatpush.msra.mxu1 %v9158_v29  ;;  %v3136_v17 = vunpack.c.l.bf16 %v1025_v12  ;;  %v3141_v47 = vunpack.c.h.bf16 %v7929_v62  ;;  %v3140_v49 = vunpack.c.l.bf16 %v7929_v62 }
 0x691   :  { %3695 = vmatpush.msra.mxu2 %v9170_v40  ;;  %3718 = vmatpush.msra.mxu3 %v9160_v39 }
 0x692   :  { %3650 = vmatpush.msra.mxu0 %v9161_v16  ;;  %3673 = vmatpush.msra.mxu1 %v9171_v20 }
 0x693   :  { %3696 = vmatpush.msra.mxu2 %v9162_v42  ;;  %3719 = vmatpush.msra.mxu3 %v7679_v32 }
 0x6e3   :  { %v3159_v28 = vpop.f32.mrf.mxu0  ;;  %v3182_v8 = vpop.f32.mrf.mxu1 }
 0x6e4   :  { %v3234_v24 = vadd.f32 %v3159_v28, %v3134_v0  ;;  %v3235_v22 = vadd.f32 %v3182_v8, %v3135_v48 }
 0x6e6   :  { %v4988_v38 = vmul.f32 -1.442695, %v3234_v24  ;;  %v4990_v21 = vmul.f32 -1.442695, %v3235_v22 }
 0x6e8   :  { %5412 = vpow2.f32 %v4988_v38 }
 0x6e9   :  { %5414 = vpow2.f32 %v4990_v21 }
 0x6ea   :  { %v3228_v15 = vpop.f32.mrf.mxu3  ;;  %v3205_v33 = vpop.f32.mrf.mxu2 }
 0x6eb   :  { %v3237_v56 = vadd.f32 %v3228_v15, %v3137_v30  ;;  %v3236_v5 = vadd.f32 %v3205_v33, %v3136_v17  ;;  %v8124_v17 = vld [vmem:[#allocation9 + $0x80] sm:$0xff] }
 0x6ec   :  { %9202 = vst [vmem:[#allocation51_spill] sm:$0xff] %v8124_v17 }
 0x6ed   :  { %v4992_v57 = vmul.f32 -1.442695, %v3237_v56 }
 0x6ee   :  { %v5413_v46 = vpop.eup %5412 }
 0x6ef   :  { %v5415_v18 = vpop.eup %5414  ;;  %v3248_v55 = vadd.f32 1.0, %v5413_v46  ;;  %5416 = vpow2.f32 %v4992_v57 }
 0x6f0   :  { %v3286_v19 = vadd.f32 1.0, %v5415_v18  ;;  %v9184_v18 = vld [vmem:[#allocation138_spill] sm:$0xff] }
 0x6f1   :  { %5418 = vrcp.f32 %v3248_v55  ;;  %v3259_v23 = vand.u32 2147483647, %v3248_v55  ;;  %v3261_v43 = vand.u32 2147483648, %v3248_v55  ;;  %vm3255_vm2 = vweird.f32 %v3248_v55 }
 0x6f2   :  { %5420 = vrcp.f32 %v3286_v19  ;;  %v3299_v13 = vand.u32 2147483648, %v3286_v19  ;;  %v3297_v37 = vand.u32 2147483647, %v3286_v19  ;;  %vm3293_vm3 = vweird.f32 %v3286_v19 }
 0x6f3   :  { %vm3260_vm4 = vcmp.eq.f32.partialorder %v3259_v23, 8.507059e+37  ;;  %v3262_v22 = vor.u32 1.1754944e-38, %v3261_v43 }
 0x6f4   :  { %v3162_v61 = vpop.f32.mrf.mxu0  ;;  %v3185_v45 = vpop.f32.mrf.mxu1  ;;  %v3300_v24 = vor.u32 1.1754944e-38, %v3299_v13  ;;  %vm3298_vm7 = vcmp.eq.f32.partialorder %v3297_v37, 8.507059e+37 }
 0x6f5   :  { %v5417_v60 = vpop.eup %5416  ;;  %v3238_v29 = vadd.f32 %v3162_v61, %v3138_v3  ;;  %v3239_v26 = vadd.f32 %v3185_v45, %v3139_v31 }
 0x6f6   :  { %v7931_v58 = vadd.f32 1.0, %v5417_v60 }
 0x6f7   :  { %v5419_v51 = vpop.eup %5418  ;;  %v4989_v10 = vmul.f32 -1.442695, %v3238_v29  ;;  %v4991_v7 = vmul.f32 -1.442695, %v3239_v26 }
 0x6f8   :  { %v5421_v44 = vpop.eup %5420  ;;  %v3251_v14 = vmul.f32 %v5419_v51, %v3248_v55  ;;  %5422 = vrcp.f32 %v7931_v58  ;;  %vm3256_vm0 = vweird.f32 %v5419_v51  ;;  %v3339_v33 = vand.u32 2147483648, %v7931_v58 }
 0x6f9   :  { %v3289_v27 = vmul.f32 %v5421_v44, %v3286_v19  ;;  %5424 = vpow2.f32 %v4989_v10  ;;  %vm3294_vm1 = vweird.f32 %v5421_v44  ;;  %vm3257_vm5 = vmor %vm3255_vm2, %vm3256_vm0  ;;  %v3337_v31 = vand.u32 2147483647, %v7931_v58 }
 0x6fa   :  { %v3252_v40 = vsub.f32 1.0, %v3251_v14  ;;  %5426 = vpow2.f32 %v4991_v7  ;;  %vm3295_vm6 = vmor %vm3293_vm3, %vm3294_vm1  ;;  %vm3333_vm9 = vweird.f32 %v7931_v58 }
 0x6fb   :  { %v3290_v1 = vsub.f32 1.0, %v3289_v27  ;;  %5428 = vtanh.f32 %v3236_v5  ;;  %v3231_v59 = vpop.f32.mrf.mxu3  ;;  %v3208_v25 = vpop.f32.mrf.mxu2  ;;  %vm3338_vm11 = vcmp.eq.f32.partialorder %v3337_v31, 8.507059e+37  ;;  %v8016_v31 = vld [vmem:[#allocation9 + $0x188] sm:$0xff] }
 0x6fc   :  { %v3253_v34 = vmul.f32 %v5419_v51, %v3252_v40  ;;  %v3241_v63 = vadd.f32 %v3231_v59, %v3141_v47  ;;  %v3240_v45 = vadd.f32 %v3208_v25, %v3140_v49  ;;  %v8008_v49 = vld [vmem:[#allocation9 + $0x1b8] sm:$0xff] }
 0x6fd   :  { %v3291_v41 = vmul.f32 %v5421_v44, %v3290_v1 }
 0x6fe   :  { %v5423_v0 = vpop.eup %5422  ;;  %v3254_v48 = vadd.f32 %v5419_v51, %v3253_v34  ;;  %v4993_v28 = vmul.f32 -1.442695, %v3241_v63 }
 0x6ff   :  { %v5425_v8 = vpop.eup %5424  ;;  %v3292_v12 = vadd.f32 %v5421_v44, %v3291_v41  ;;  %v3329_v38 = vmul.f32 %v5423_v0, %v7931_v58  ;;  %vm3334_vm8 = vweird.f32 %v5423_v0 }
 0x700   :  { %v5427_v21 = vpop.eup %5426  ;;  %v3258_v30 = vsel %vm3257_vm5, %v5419_v51, %v3254_v48  ;;  %v3249_v15 = vadd.f32 1.0, %v5425_v8  ;;  %5430 = vpow2.f32 %v4993_v28  ;;  %vm7946_vm10 = vmor %vm3333_vm9, %vm3334_vm8  ;;  %v3340_v51 = vor.u32 1.1754944e-38, %v3339_v33  ;;  %v8013_v33 = vld [vmem:[#allocation9 + $0x180] sm:$0xff] }
 0x701   :  { %v5429_v52 = vpop.eup %5428  ;;  %v3263_v53 = vsel %vm3260_vm4, %v3262_v22, %v3258_v30  ;;  %v3296_v4 = vsel %vm3295_vm6, %v5421_v44, %v3292_v12  ;;  %v3330_v35 = vsub.f32 1.0, %v3329_v38  ;;  %v3287_v56 = vadd.f32 1.0, %v5427_v21  ;;  %v7969_v22 = vld [vmem:[#allocation9 + $0x1e0] sm:$0xff]  ;;  %v7972_v12 = vld [vmem:[#allocation9 + $0x1e8] sm:$0xff]  ;;  %v7975_v30 = vld [vmem:[#allocation9 + $0x1f0] sm:$0xff] }
 0x702   :  { %v3301_v57 = vsel %vm3298_vm7, %v3300_v24, %v3296_v4  ;;  %v3360_v46 = vmul.f32 %v5429_v52, %v3263_v53  ;;  %5432 = vrcp.f32 %v3249_v15  ;;  %v3276_v44 = vand.u32 2147483648, %v3249_v15  ;;  %v9189_v52 = vld [vmem:[#allocation16_spill] sm:$0xff] }
 0x703   :  { %v3358_v6 = vmul.f32 %v3301_v57, %v9184_v18  ;;  %v3331_v55 = vmul.f32 %v5423_v0, %v3330_v35  ;;  %5434 = vrcp.f32 %v3287_v56  ;;  %v3314_v7 = vand.u32 2147483648, %v3287_v56  ;;  %v7983_v35 = vld [vmem:[#allocation9 + $0x1c0] sm:$0xff]  ;;  %v7989_v57 = vld [vmem:[#allocation9 + $0x1d0] sm:$0xff] }
 0x704   :  { %v3274_v27 = vand.u32 2147483647, %v3249_v15  ;;  %v3312_v47 = vand.u32 2147483647, %v3287_v56  ;;  %vm3270_vm14 = vweird.f32 %v3249_v15  ;;  %vm3308_vm15 = vweird.f32 %v3287_v56 }
 0x705   :  { %v7937_v19 = vadd.f32 %v3360_v46, %v3358_v6  ;;  %v3332_v11 = vadd.f32 %v5423_v0, %v3331_v55  ;;  %v3277_v59 = vor.u32 1.1754944e-38, %v3276_v44  ;;  %v3315_v41 = vor.u32 1.1754944e-38, %v3314_v7  ;;  %v7992_v46 = vld [vmem:[#allocation9 + $0x1d8] sm:$0xff]  ;;  %v7997_v6 = vld [vmem:[#allocation9 + $0x1a0] sm:$0xff]  ;;  %v8000_v55 = vld [vmem:[#allocation9 + $0x1a8] sm:$0xff] }
 0x706   :  { %v5431_v2 = vpop.eup %5430  ;;  %vm3275_vm2 = vcmp.eq.f32.partialorder %v3274_v27, 8.507059e+37  ;;  %vm3313_vm3 = vcmp.eq.f32.partialorder %v3312_v47, 8.507059e+37  ;;  %v8051_v7 = vld [vmem:[#allocation9 + $0x148] sm:$0xff]  ;;  %v8054_v44 = vld [vmem:[#allocation9 + $0x150] sm:$0xff] }
 0x707   :  { %5436 = vtanh.f32 %v7937_v19  ;;  %v7942_v3 = vadd.f32 1.0, %v5431_v2  ;;  %v3336_v62 = vsel %vm7946_vm10, %v5423_v0, %v3332_v11  ;;  %v8005_v2 = vld [vmem:[#allocation9 + $0x1b0] sm:$0xff] }
 0x708   :  { %v5433_v61 = vpop.eup %5432  ;;  %v3341_v40 = vsel %vm3338_vm11, %v3340_v51, %v3336_v62  ;;  %v8042_v62 = vld [vmem:[#allocation9 + $0x170] sm:$0xff]  ;;  %v8045_v51 = vld [vmem:[#allocation9 + $0x178] sm:$0xff] }
 0x709   :  { %v5435_v60 = vpop.eup %5434  ;;  %v3266_v29 = vmul.f32 %v5433_v61, %v3249_v15  ;;  %5438 = vrcp.f32 %v7942_v3  ;;  %vm3271_vm12 = vweird.f32 %v5433_v61  ;;  %v7978_v15 = vld [vmem:[#allocation9 + $0x1f8] sm:$0xff]  ;;  %v3354_v11 = vand.u32 2147483648, %v7942_v3 }
 0x70a   :  { %v3304_v26 = vmul.f32 %v5435_v60, %v3287_v56  ;;  %5440 = vtanh.f32 %v3240_v45  ;;  %vm3309_vm13 = vweird.f32 %v5435_v60  ;;  %vm3272_vm0 = vmor %vm3270_vm14, %vm3271_vm12  ;;  %v7986_v56 = vld [vmem:[#allocation9 + $0x1c8] sm:$0xff]  ;;  %vm3348_vm5 = vweird.f32 %v7942_v3  ;;  %v8021_v45 = vld [vmem:[#allocation9 + $0x190] sm:$0xff] }
 0x70b   :  { %v3267_v5 = vsub.f32 1.0, %v3266_v29  ;;  %vm7961_vm1 = vmor %vm3308_vm15, %vm3309_vm13  ;;  %v8033_v29 = vld [vmem:[#allocation9 + $0x160] sm:$0xff] }
 0x70c   :  { %v3305_v10 = vsub.f32 1.0, %v3304_v26  ;;  %v8036_v26 = vld [vmem:[#allocation9 + $0x168] sm:$0xff] }
 0x70d   :  { %v5437_v58 = vpop.eup %5436  ;;  %v3268_v14 = vmul.f32 %v5433_v61, %v3267_v5  ;;  %v3355_v5 = vor.u32 1.1754944e-38, %v3354_v11  ;;  %v8118_v11 = vld [vmem:[#allocation9 + $0xb0] sm:$0xff] }
 0x70e   :  { %v3306_v23 = vmul.f32 %v5435_v60, %v3305_v10  ;;  %v7953_v1 = vmul.f32 %v5437_v58, %v3341_v40  ;;  %v8048_v10 = vld [vmem:[#allocation9 + $0x140] sm:$0xff]  ;;  %v8057_v58 = vld [vmem:[#allocation9 + $0x158] sm:$0xff]  ;;  %9200 = vst [vmem:[#allocation49_spill] sm:$0xff] %v8118_v11 }
 0x70f   :  { %v7955_v13 = vpop.eup %5438  ;;  %v3269_v43 = vadd.f32 %v5433_v61, %v3268_v14  ;;  %v8060_v40 = vld [vmem:[#allocation9 + $0x120] sm:$0xff] }
 0x710   :  { %v3307_v34 = vadd.f32 %v5435_v60, %v3306_v23  ;;  %v3344_v37 = vmul.f32 %v7955_v13, %v7942_v3  ;;  %3404 = vmatmul.f32.vlgmr.msrb.gmra.mxu0 %v7953_v1  ;;  %3427 = vmatmul.f32.vlgmr.msrb.gmra.mxu1 %v7953_v1  ;;  %v5441_v48 = vpop.eup %5440  ;;  %vm3349_vm4 = vweird.f32 %v7955_v13  ;;  %v8063_v23 = vld [vmem:[#allocation9 + $0x128] sm:$0xff] }
 0x711   :  { %v3273_v0 = vsel %vm3272_vm0, %v5433_v61, %v3269_v43  ;;  %3450 = vmatmul.f32.vlgmr.msrb.gmra.mxu2 %v7953_v1  ;;  %3473 = vmatmul.f32.vlgmr.msrb.gmra.mxu3 %v7953_v1  ;;  %v3352_v61 = vand.u32 2147483647, %v7942_v3  ;;  %vm8029_vm6 = vmor %vm3348_vm5, %vm3349_vm4  ;;  %v8069_v43 = vld [vmem:[#allocation9 + $0x138] sm:$0xff] }
 0x712   :  { %v3278_v28 = vsel %vm3275_vm2, %v3277_v59, %v3273_v0  ;;  %v3311_v8 = vsel %vm7961_vm1, %v5435_v60, %v3307_v34  ;;  %v3345_v24 = vsub.f32 1.0, %v3344_v37  ;;  %3882 = vmatpush.msrb.mxu0 %v7969_v22  ;;  %3905 = vmatpush.msrb.mxu1 %v7972_v12  ;;  %v8024_v60 = vld [vmem:[#allocation9 + $0x198] sm:$0xff]  ;;  %v8072_v59 = vld [vmem:[#allocation9 + $0x100] sm:$0xff]  ;;  %v8075_v34 = vld [vmem:[#allocation9 + $0x108] sm:$0xff]  ;;  %v3368_v37 = vmax.f32 %v7953_v1, 0.0 }
 0x713   :  { %v3316_v38 = vsel %vm3313_vm3, %v3315_v41, %v3311_v8  ;;  %v3361_v21 = vmul.f32 %v5441_v48, %v3278_v28  ;;  %3928 = vmatpush.msrb.mxu2 %v7975_v30  ;;  %3951 = vmatpush.msrb.mxu3 %v7978_v15  ;;  %vm3353_vm7 = vcmp.eq.f32.partialorder %v3352_v61, 8.507059e+37  ;;  %v8079_v0 = vld [vmem:[#allocation9 + $0x110] sm:$0xff]  ;;  %v8082_v48 = vld [vmem:[#allocation9 + $0x118] sm:$0xff]  ;;  %v8085_v28 = vld [vmem:[#allocation9 + $0xe0] sm:$0xff] }
 0x714   :  { %v3359_v53 = vmul.f32 %v3316_v38, %v9189_v52  ;;  %v3346_v4 = vmul.f32 %v7955_v13, %v3345_v24  ;;  %3883 = vmatpush.msrb.mxu0 %v7983_v35  ;;  %3906 = vmatpush.msrb.mxu1 %v7986_v56  ;;  %v8088_v8 = vld [vmem:[#allocation9 + $0xe8] sm:$0xff]  ;;  %v8094_v1 = vld [vmem:[#allocation9 + $0xf0] sm:$0xff]  ;;  %v8097_v24 = vld [vmem:[#allocation9 + $0xf8] sm:$0xff] }
 0x715   :  { %3929 = vmatpush.msrb.mxu2 %v7989_v57  ;;  %3952 = vmatpush.msrb.mxu3 %v7992_v46  ;;  %9192 = vst [vmem:[#allocation37_spill] sm:$0xff] %v8094_v1  ;;  %v8100_v38 = vld [vmem:[#allocation9 + $0xc0] sm:$0xff]  ;;  %v8106_v52 = vld [vmem:[#allocation9 + $0xd0] sm:$0xff]  ;;  %v8121_v61 = vld [vmem:[#allocation9 + $0xb8] sm:$0xff] }
 0x716   :  { %v7995_v18 = vadd.f32 %v3361_v21, %v3359_v53  ;;  %3884 = vmatpush.msrb.mxu0 %v7997_v6  ;;  %3907 = vmatpush.msrb.mxu1 %v8000_v55  ;;  %v3347_v25 = vadd.f32 %v7955_v13, %v3346_v4  ;;  %9193 = vst [vmem:[#allocation38_spill] sm:$0xff] %v8097_v24  ;;  %v8103_v21 = vld [vmem:[#allocation9 + $0xc8] sm:$0xff]  ;;  %v8109_v53 = vld [vmem:[#allocation9 + $0xd8] sm:$0xff]  ;;  %v8112_v4 = vld [vmem:[#allocation9 + $0xa0] sm:$0xff] }
 0x717   :  { %3930 = vmatpush.msrb.mxu2 %v8005_v2  ;;  %3953 = vmatpush.msrb.mxu3 %v8008_v49  ;;  %9194 = vst [vmem:[#allocation39_spill] sm:$0xff] %v8100_v38 }
 0x718   :  { %5442 = vtanh.f32 %v7995_v18  ;;  %3885 = vmatpush.msrb.mxu0 %v8013_v33  ;;  %3908 = vmatpush.msrb.mxu1 %v8016_v31  ;;  %v3351_v3 = vsel %vm8029_vm6, %v7955_v13, %v3347_v25  ;;  %v8066_v13 = vld [vmem:[#allocation9 + $0x130] sm:$0xff]  ;;  %9195 = vst [vmem:[#allocation40_spill] sm:$0xff] %v8103_v21  ;;  %v8115_v25 = vld [vmem:[#allocation9 + $0xa8] sm:$0xff] }
 0x719   :  { %3931 = vmatpush.msrb.mxu2 %v8021_v45  ;;  %3954 = vmatpush.msrb.mxu3 %v8024_v60  ;;  %v3356_v27 = vsel %vm3353_vm7, %v3355_v5, %v3351_v3  ;;  %9196 = vst [vmem:[#allocation45_spill] sm:$0xff] %v8106_v52  ;;  %v8127_v3 = vld [vmem:[#allocation9 + $0x88] sm:$0xff]  ;;  %v8130_v5 = vld [vmem:[#allocation9 + $0x90] sm:$0xff] }
 0x71a   :  { %3886 = vmatpush.msrb.mxu0 %v8033_v29  ;;  %3909 = vmatpush.msrb.mxu1 %v8036_v26  ;;  %9197 = vst [vmem:[#allocation46_spill] sm:$0xff] %v8109_v53 }
 0x71b   :  { %3932 = vmatpush.msrb.mxu2 %v8042_v62  ;;  %3955 = vmatpush.msrb.mxu3 %v8045_v51  ;;  %9198 = vst [vmem:[#allocation47_spill] sm:$0xff] %v8112_v4 }
 0x71c   :  { %3887 = vmatpush.msrb.mxu0 %v8048_v10  ;;  %3910 = vmatpush.msrb.mxu1 %v8051_v7  ;;  %9199 = vst [vmem:[#allocation48_spill] sm:$0xff] %v8115_v25 }
 0x71d   :  { %3933 = vmatpush.msrb.mxu2 %v8054_v44  ;;  %3956 = vmatpush.msrb.mxu3 %v8057_v58  ;;  %9201 = vst [vmem:[#allocation50_spill] sm:$0xff] %v8121_v61 }
 0x71e   :  { %v5443_v14 = vpop.eup %5442  ;;  %3888 = vmatpush.msrb.mxu0 %v8060_v40  ;;  %3911 = vmatpush.msrb.mxu1 %v8063_v23  ;;  %9203 = vst [vmem:[#allocation52_spill] sm:$0xff] %v8127_v3 }
 0x71f   :  { %v3367_v47 = vmul.f32 %v5443_v14, %v3356_v27  ;;  %3934 = vmatpush.msrb.mxu2 %v8066_v13  ;;  %3957 = vmatpush.msrb.mxu3 %v8069_v43  ;;  %9204 = vst [vmem:[#allocation53_spill] sm:$0xff] %v8130_v5  ;;  %v8133_v14 = vld [vmem:[#allocation9 + $0x98] sm:$0xff]  ;;  %v8136_v27 = vld [vmem:[#allocation9 + $0x60] sm:$0xff] }
 0x720   :  { %3889 = vmatpush.msrb.mxu0 %v8072_v59  ;;  %3912 = vmatpush.msrb.mxu1 %v8075_v34  ;;  %9205 = vst [vmem:[#allocation54_spill] sm:$0xff] %v8133_v14 }
 0x721   :  { %v3369_v63 = vmax.f32 %v3367_v47, 0.0  ;;  %3407 = vmatmul.f32.gmra.mxu0 %v3367_v47  ;;  %3430 = vmatmul.f32.gmra.mxu1 %v3367_v47  ;;  %9206 = vst [vmem:[#allocation28_spill] sm:$0xff] %v8136_v27 }
 0x722   :  { %3453 = vmatmul.f32.gmra.mxu2 %v3367_v47  ;;  %3476 = vmatmul.f32.gmra.mxu3 %v3367_v47  ;;  %v8139_v47 = vld [vmem:[#allocation9 + $0x68] sm:$0xff] }
 0x723   :  { %v5115_v41 = vpack.c.bf16 %v3369_v63, %v3368_v37  ;;  %3935 = vmatpush.msrb.mxu2 %v8079_v0  ;;  %3958 = vmatpush.msrb.mxu3 %v8082_v48  ;;  %9207 = vst [vmem:[#allocation29_spill] sm:$0xff] %v8139_v47  ;;  %v8142_v37 = vld [vmem:[#allocation9 + $0x70] sm:$0xff]  ;;  %v8145_v63 = vld [vmem:[#allocation9 + $0x78] sm:$0xff] }
 0x724   :  { %3890 = vmatpush.msrb.mxu0 %v8085_v28  ;;  %3913 = vmatpush.msrb.mxu1 %v8088_v8  ;;  %9208 = vst [vmem:[#allocation31_spill] sm:$0xff] %v8142_v37 }
 0x725   :  { %5116 = vst [vmem:[%s8620_s8] sm:$0xff] %v5115_v41   ;;  %3936 = vmatpush.msrb.mxu2 %v8094_v1  ;;  %3959 = vmatpush.msrb.mxu3 %v8097_v24  ;;  %v8148_v41 = vld [vmem:[#allocation9 + $0x40] sm:$0xff] }
 0x726   :  { %3891 = vmatpush.msrb.mxu0 %v8100_v38  ;;  %3914 = vmatpush.msrb.mxu1 %v8103_v21  ;;  %9209 = vst [vmem:[#allocation32_spill] sm:$0xff] %v8145_v63 }
 0x727   :  { %3937 = vmatpush.msrb.mxu2 %v8106_v52  ;;  %3960 = vmatpush.msrb.mxu3 %v8109_v53  ;;  %9210 = vst [vmem:[#allocation33_spill] sm:$0xff] %v8148_v41 }
 0x728   :  { %3892 = vmatpush.msrb.mxu0 %v8112_v4  ;;  %3915 = vmatpush.msrb.mxu1 %v8115_v25 }
 0x729   :  { %3938 = vmatpush.msrb.mxu2 %v8118_v11  ;;  %3961 = vmatpush.msrb.mxu3 %v8121_v61 }
 0x72a   :  { %3893 = vmatpush.msrb.mxu0 %v8124_v17  ;;  %3916 = vmatpush.msrb.mxu1 %v8127_v3 }
 0x72b   :  { %3939 = vmatpush.msrb.mxu2 %v8130_v5  ;;  %3962 = vmatpush.msrb.mxu3 %v8133_v14  ;;  %v8151_v14 = vld [vmem:[#allocation9 + $0x48] sm:$0xff]  ;;  %v9219_v5 = vld [vmem:[#allocation82_spill] sm:$0xff] }
 0x72c   :  { %3894 = vmatpush.msrb.mxu0 %v8136_v27  ;;  %3917 = vmatpush.msrb.mxu1 %v8139_v47  ;;  %9211 = vst [vmem:[#allocation36_spill] sm:$0xff] %v8151_v14  ;;  %v8154_v27 = vld [vmem:[#allocation9 + $0x50] sm:$0xff]  ;;  %v8157_v47 = vld [vmem:[#allocation9 + $0x58] sm:$0xff] }
 0x72d   :  { %3940 = vmatpush.msrb.mxu2 %v8142_v37  ;;  %3963 = vmatpush.msrb.mxu3 %v8145_v63  ;;  %9212 = vst [vmem:[#allocation55_spill] sm:$0xff] %v8154_v27  ;;  %v8160_v37 = vld [vmem:[#allocation9 + $0x20] sm:$0xff]  ;;  %v8163_v63 = vld [vmem:[#allocation9 + $0x28] sm:$0xff] }
 0x72e   :  { %3895 = vmatpush.msrb.mxu0 %v8148_v41  ;;  %3918 = vmatpush.msrb.mxu1 %v8151_v14  ;;  %9213 = vst [vmem:[#allocation56_spill] sm:$0xff] %v8157_v47  ;;  %v8166_v41 = vld [vmem:[#allocation9 + $0x30] sm:$0xff] }
 0x72f   :  { %3941 = vmatpush.msrb.mxu2 %v8154_v27  ;;  %3964 = vmatpush.msrb.mxu3 %v8157_v47  ;;  %9214 = vst [vmem:[#allocation57_spill] sm:$0xff] %v8160_v37  ;;  %v9218_v27 = vld [vmem:[#allocation81_spill] sm:$0xff] }
 0x730   :  { %3896 = vmatpush.msrb.mxu0 %v8160_v37  ;;  %9215 = vst [vmem:[#allocation21_spill] sm:$0xff] %v8163_v63  ;;  %3919 = vmatpush.msrb.mxu1 %v8163_v63  ;;  %v9217_v37 = vld [vmem:[#allocation80_spill] sm:$0xff]  ;;  %v922_v63 = vadd.f32 %v9218_v27, %v7907_v50 }
 0x731   :  { %9216 = vst [vmem:[#allocation58_spill] sm:$0xff] %v8166_v41  ;;  %3942 = vmatpush.msrb.mxu2 %v8166_v41  ;;  %3965 = vmatpush.msrb.mxu3 %v9160_v39  ;;  %v883_v47 = vadd.f32 %v9217_v37, %v7905_v36  ;;  %v961_v41 = vadd.f32 %v9219_v5, %v7913_v54  ;;  %v9220_v39 = vld [vmem:[#allocation83_spill] sm:$0xff]  ;;  %v9222_v5 = vld [vmem:[#allocation85_spill] sm:$0xff] }
 0x732   :  { %3897 = vmatpush.msrb.mxu0 %v9161_v16  ;;  %3920 = vmatpush.msrb.mxu1 %v9171_v20  ;;  %v1000_v3 = vadd.f32 %v9220_v39, %v7915_v9  ;;  %v924_v53 = vadd.f32 %v9222_v5, %v7907_v50 }
 0x733   :  { %3943 = vmatpush.msrb.mxu2 %v9162_v42  ;;  %3966 = vmatpush.msrb.mxu3 %v7679_v32  ;;  %v1028_v14 = vpack.c.bf16 %v922_v63, %v883_v47  ;;  %v9221_v47 = vld [vmem:[#allocation84_spill] sm:$0xff] }
 0x734   :  { %v1029_v32 = vpack.c.bf16 %v1000_v3, %v961_v41  ;;  %v885_v63 = vadd.f32 %v9221_v47, %v7905_v36 }
 0x735   :  { %v3380_v16 = vunpack.c.l.bf16 %v1028_v14  ;;  %v3381_v17 = vunpack.c.h.bf16 %v1028_v14 }
 0x736   :  { %v3383_v37 = vunpack.c.h.bf16 %v1029_v32  ;;  %v1030_v38 = vpack.c.bf16 %v924_v53, %v885_v63  ;;  %v3382_v47 = vunpack.c.l.bf16 %v1029_v32 }
 0x738   :  { %v3384_v41 = vunpack.c.l.bf16 %v1030_v38 }
 0x78d   :  { %v3405_v20 = vpop.f32.mrf.mxu0  ;;  %v3428_v61 = vpop.f32.mrf.mxu1 }
 0x78e   :  { %v3480_v42 = vadd.f32 %v3405_v20, %v3380_v16  ;;  %v3481_v11 = vadd.f32 %v3428_v61, %v3381_v17  ;;  %v3385_v20 = vunpack.c.h.bf16 %v1030_v38 }
 0x790   :  { %v4994_v25 = vmul.f32 -1.442695, %v3480_v42  ;;  %v4996_v4 = vmul.f32 -1.442695, %v3481_v11  ;;  %v9224_v11 = vld [vmem:[#allocation87_spill] sm:$0xff] }
 0x791   :  { %v1002_v17 = vadd.f32 %v9224_v11, %v7915_v9 }
 0x792   :  { %5444 = vpow2.f32 %v4994_v25  ;;  %v9223_v25 = vld [vmem:[#allocation86_spill] sm:$0xff] }
 0x793   :  { %5446 = vpow2.f32 %v4996_v4  ;;  %v963_v4 = vadd.f32 %v9223_v25, %v7913_v54 }
 0x794   :  { %v3474_v27 = vpop.f32.mrf.mxu3  ;;  %v3451_v3 = vpop.f32.mrf.mxu2 }
 0x795   :  { %v3483_v39 = vadd.f32 %v3474_v27, %v3383_v37  ;;  %v8190_v63 = vpack.c.bf16 %v1002_v17, %v963_v4 }
 0x797   :  { %v4998_v52 = vmul.f32 -1.442695, %v3483_v39  ;;  %v3482_v39 = vadd.f32 %v3451_v3, %v3382_v47  ;;  %v3387_v32 = vunpack.c.h.bf16 %v8190_v63 }
 0x798   :  { %v5445_v14 = vpop.eup %5444 }
 0x799   :  { %v5447_v21 = vpop.eup %5446  ;;  %v3494_v16 = vadd.f32 1.0, %v5445_v14  ;;  %5448 = vpow2.f32 %v4998_v52 }
 0x79a   :  { %v3532_v61 = vadd.f32 1.0, %v5447_v21 }
 0x79b   :  { %5450 = vrcp.f32 %v3494_v16  ;;  %v3505_v50 = vand.u32 2147483647, %v3494_v16  ;;  %v3507_v17 = vand.u32 2147483648, %v3494_v16  ;;  %vm3501_vm10 = vweird.f32 %v3494_v16 }
 0x79c   :  { %5452 = vrcp.f32 %v3532_v61  ;;  %v3545_v4 = vand.u32 2147483648, %v3532_v61  ;;  %v3543_v3 = vand.u32 2147483647, %v3532_v61  ;;  %vm3539_vm11 = vweird.f32 %v3532_v61 }
 0x79d   :  { %vm3506_vm12 = vcmp.eq.f32.partialorder %v3505_v50, 8.507059e+37 }
 0x79e   :  { %v3408_v42 = vpop.f32.mrf.mxu0  ;;  %v3431_v37 = vpop.f32.mrf.mxu1  ;;  %vm3544_vm15 = vcmp.eq.f32.partialorder %v3543_v3, 8.507059e+37 }
 0x79f   :  { %v5449_v27 = vpop.eup %5448  ;;  %v3484_v5 = vadd.f32 %v3408_v42, %v3384_v41  ;;  %v3485_v53 = vadd.f32 %v3431_v37, %v3385_v20 }
 0x7a0   :  { %v8192_v21 = vadd.f32 1.0, %v5449_v27 }
 0x7a1   :  { %v5451_v52 = vpop.eup %5450  ;;  %v4995_v14 = vmul.f32 -1.442695, %v3484_v5  ;;  %v4997_v25 = vmul.f32 -1.442695, %v3485_v53 }
 0x7a2   :  { %v5453_v54 = vpop.eup %5452  ;;  %v3497_v11 = vmul.f32 %v5451_v52, %v3494_v16  ;;  %5454 = vrcp.f32 %v8192_v21  ;;  %vm3502_vm8 = vweird.f32 %v5451_v52  ;;  %vm3579_vm1 = vweird.f32 %v8192_v21 }
 0x7a3   :  { %v3535_v9 = vmul.f32 %v5453_v54, %v3532_v61  ;;  %5456 = vpow2.f32 %v4995_v14  ;;  %vm3540_vm9 = vweird.f32 %v5453_v54  ;;  %vm3503_vm13 = vmor %vm3501_vm10, %vm3502_vm8 }
 0x7a4   :  { %v3498_v38 = vsub.f32 1.0, %v3497_v11  ;;  %5458 = vpow2.f32 %v4997_v25  ;;  %v3546_v25 = vor.u32 1.1754944e-38, %v3545_v4  ;;  %vm3541_vm14 = vmor %vm3539_vm11, %vm3540_vm9 }
 0x7a5   :  { %v3536_v41 = vsub.f32 1.0, %v3535_v9  ;;  %5460 = vtanh.f32 %v3482_v39  ;;  %v3477_v20 = vpop.f32.mrf.mxu3  ;;  %v3508_v9 = vor.u32 1.1754944e-38, %v3507_v17  ;;  %v3454_v24 = vpop.f32.mrf.mxu2 }
 0x7a6   :  { %v3499_v42 = vmul.f32 %v5451_v52, %v3498_v38  ;;  %v3487_v37 = vadd.f32 %v3477_v20, %v3387_v32 }
 0x7a7   :  { %v3537_v27 = vmul.f32 %v5453_v54, %v3536_v41 }
 0x7a8   :  { %v5455_v47 = vpop.eup %5454  ;;  %v3500_v5 = vadd.f32 %v5451_v52, %v3499_v42  ;;  %v4999_v53 = vmul.f32 -1.442695, %v3487_v37 }
 0x7a9   :  { %v5457_v14 = vpop.eup %5456  ;;  %v3538_v11 = vadd.f32 %v5453_v54, %v3537_v27  ;;  %v3575_v39 = vmul.f32 %v5455_v47, %v8192_v21  ;;  %vm3580_vm0 = vweird.f32 %v5455_v47 }
 0x7aa   :  { %v5459_v36 = vpop.eup %5458  ;;  %v3504_v38 = vsel %vm3503_vm13, %v5451_v52, %v3500_v5  ;;  %v3495_v32 = vadd.f32 1.0, %v5457_v14  ;;  %5462 = vpow2.f32 %v4999_v53  ;;  %v3386_v52 = vunpack.c.l.bf16 %v8190_v63  ;;  %vm8207_vm2 = vmor %vm3579_vm1, %vm3580_vm0 }
 0x7ab   :  { %v5461_v41 = vpop.eup %5460  ;;  %v3509_v16 = vsel %vm3506_vm12, %v3508_v9, %v3504_v38  ;;  %v3542_v20 = vsel %vm3541_vm14, %v5453_v54, %v3538_v11  ;;  %v3576_v61 = vsub.f32 1.0, %v3575_v39  ;;  %v3533_v42 = vadd.f32 1.0, %v5459_v36 }
 0x7ac   :  { %v3547_v50 = vsel %vm3544_vm15, %v3546_v25, %v3542_v20  ;;  %v3606_v37 = vmul.f32 %v5461_v41, %v3509_v16  ;;  %5464 = vrcp.f32 %v3495_v32  ;;  %v3585_v54 = vand.u32 2147483648, %v8192_v21 }
 0x7ad   :  { %v3604_v4 = vmul.f32 %v3547_v50, %v7937_v19  ;;  %v3577_v17 = vmul.f32 %v5455_v47, %v3576_v61  ;;  %5466 = vrcp.f32 %v3533_v42  ;;  %v3583_v5 = vand.u32 2147483647, %v8192_v21 }
 0x7ae   :  { %v3486_v19 = vadd.f32 %v3454_v24, %v3386_v52  ;;  %v3560_v41 = vand.u32 2147483648, %v3533_v42  ;;  %v3522_v16 = vand.u32 2147483648, %v3495_v32  ;;  %v3520_v20 = vand.u32 2147483647, %v3495_v32 }
 0x7af   :  { %v8198_v27 = vadd.f32 %v3606_v37, %v3604_v4  ;;  %v3578_v3 = vadd.f32 %v5455_v47, %v3577_v17  ;;  %vm3584_vm3 = vcmp.eq.f32.partialorder %v3583_v5, 8.507059e+37  ;;  %v3558_v37 = vand.u32 2147483647, %v3533_v42 }
 0x7b0   :  { %v5463_v1 = vpop.eup %5462  ;;  %vm3516_vm6 = vweird.f32 %v3495_v32  ;;  %vm3554_vm7 = vweird.f32 %v3533_v42  ;;  %v3523_v52 = vor.u32 1.1754944e-38, %v3522_v16  ;;  %v3561_v5 = vor.u32 1.1754944e-38, %v3560_v41 }
 0x7b1   :  { %5468 = vtanh.f32 %v8198_v27  ;;  %v8203_v36 = vadd.f32 1.0, %v5463_v1  ;;  %v3582_v11 = vsel %vm8207_vm2, %v5455_v47, %v3578_v3  ;;  %v3586_v1 = vor.u32 1.1754944e-38, %v3585_v54 }
 0x7b2   :  { %v5465_v53 = vpop.eup %5464  ;;  %vm3521_vm10 = vcmp.eq.f32.partialorder %v3520_v20, 8.507059e+37  ;;  %vm3559_vm11 = vcmp.eq.f32.partialorder %v3558_v37, 8.507059e+37  ;;  %v9227_v37 = vld [vmem:[#allocation37_spill] sm:$0xff] }
 0x7b3   :  { %v5467_v14 = vpop.eup %5466  ;;  %v3512_v9 = vmul.f32 %v5465_v53, %v3495_v32  ;;  %5470 = vrcp.f32 %v8203_v36  ;;  %vm3517_vm4 = vweird.f32 %v5465_v53  ;;  %v3587_v61 = vsel %vm3584_vm3, %v3586_v1, %v3582_v11 }
 0x7b4   :  { %v3550_v63 = vmul.f32 %v5467_v14, %v3533_v42  ;;  %5472 = vtanh.f32 %v3486_v19  ;;  %vm3555_vm5 = vweird.f32 %v5467_v14  ;;  %vm3518_vm8 = vmor %vm3516_vm6, %vm3517_vm4  ;;  %vm3594_vm13 = vweird.f32 %v8203_v36 }
 0x7b5   :  { %v3513_v39 = vsub.f32 1.0, %v3512_v9  ;;  %vm3556_vm9 = vmor %vm3554_vm7, %vm3555_vm5 }
 0x7b6   :  { %v3551_v38 = vsub.f32 1.0, %v3550_v63 }
 0x7b7   :  { %v5469_v24 = vpop.eup %5468  ;;  %v3514_v21 = vmul.f32 %v5465_v53, %v3513_v39  ;;  %v3600_v39 = vand.u32 2147483648, %v8203_v36 }
 0x7b8   :  { %v3552_v50 = vmul.f32 %v5467_v14, %v3551_v38  ;;  %v8214_v4 = vmul.f32 %v5469_v24, %v3587_v61  ;;  %v3598_v38 = vand.u32 2147483647, %v8203_v36 }
 0x7b9   :  { %v8216_v17 = vpop.eup %5470  ;;  %v3515_v47 = vadd.f32 %v5465_v53, %v3514_v21  ;;  %v3601_v16 = vor.u32 1.1754944e-38, %v3600_v39  ;;  %v9245_v39 = vld [vmem:[#allocation33_spill] sm:$0xff] }
 0x7ba   :  { %v3553_v3 = vadd.f32 %v5467_v14, %v3552_v50  ;;  %v3590_v54 = vmul.f32 %v8216_v17, %v8203_v36  ;;  %3651 = vmatmul.f32.vlgmr.msra.gmra.mxu0 %v8214_v4  ;;  %3674 = vmatmul.f32.vlgmr.msra.gmra.mxu1 %v8214_v4  ;;  %v5473_v32 = vpop.eup %5472  ;;  %vm3595_vm12 = vweird.f32 %v8216_v17  ;;  %vm3599_vm15 = vcmp.eq.f32.partialorder %v3598_v38, 8.507059e+37  ;;  %v9246_v38 = vld [vmem:[#allocation36_spill] sm:$0xff] }
 0x7bb   :  { %v3519_v19 = vsel %vm3518_vm8, %v5465_v53, %v3515_v47  ;;  %3697 = vmatmul.f32.vlgmr.msra.gmra.mxu2 %v8214_v4  ;;  %3720 = vmatmul.f32.vlgmr.msra.gmra.mxu3 %v8214_v4  ;;  %vm3596_vm14 = vmor %vm3594_vm13, %vm3595_vm12  ;;  %v3614_v20 = vmax.f32 %v8214_v4, 0.0  ;;  %v9228_v4 = vld [vmem:[#allocation38_spill] sm:$0xff]  ;;  %v9230_v47 = vld [vmem:[#allocation40_spill] sm:$0xff] }
 0x7bc   :  { %v3524_v42 = vsel %vm3521_vm10, %v3523_v52, %v3519_v19  ;;  %v3557_v25 = vsel %vm3556_vm9, %v5467_v14, %v3553_v3  ;;  %v3591_v9 = vsub.f32 1.0, %v3590_v54  ;;  %4129 = vmatpush.msra.mxu0 %v7969_v22  ;;  %4152 = vmatpush.msra.mxu1 %v7972_v12  ;;  %v9231_v52 = vld [vmem:[#allocation45_spill] sm:$0xff]  ;;  %v9232_v3 = vld [vmem:[#allocation46_spill] sm:$0xff]  ;;  %v9233_v54 = vld [vmem:[#allocation47_spill] sm:$0xff] }
 0x7bd   :  { %v3562_v63 = vsel %vm3559_vm11, %v3561_v5, %v3557_v25  ;;  %v3607_v11 = vmul.f32 %v5473_v32, %v3524_v42  ;;  %4175 = vmatpush.msra.mxu2 %v7975_v30  ;;  %4198 = vmatpush.msra.mxu3 %v7978_v15  ;;  %v9234_v5 = vld [vmem:[#allocation48_spill] sm:$0xff]  ;;  %v9235_v19 = vld [vmem:[#allocation49_spill] sm:$0xff]  ;;  %v9236_v32 = vld [vmem:[#allocation50_spill] sm:$0xff] }
 0x7be   :  { %v3605_v53 = vmul.f32 %v3562_v63, %v7995_v18  ;;  %v3592_v1 = vmul.f32 %v8216_v17, %v3591_v9  ;;  %4130 = vmatpush.msra.mxu0 %v7983_v35  ;;  %4153 = vmatpush.msra.mxu1 %v7986_v56  ;;  %v9237_v42 = vld [vmem:[#allocation51_spill] sm:$0xff]  ;;  %v9238_v25 = vld [vmem:[#allocation52_spill] sm:$0xff]  ;;  %v9239_v9 = vld [vmem:[#allocation53_spill] sm:$0xff] }
 0x7bf   :  { %4176 = vmatpush.msra.mxu2 %v7989_v57  ;;  %4199 = vmatpush.msra.mxu3 %v7992_v46  ;;  %v9240_v63 = vld [vmem:[#allocation54_spill] sm:$0xff] }
 0x7c0   :  { %v8234_v14 = vadd.f32 %v3607_v11, %v3605_v53  ;;  %4131 = vmatpush.msra.mxu0 %v7997_v6  ;;  %4154 = vmatpush.msra.mxu1 %v8000_v55  ;;  %v3593_v18 = vadd.f32 %v8216_v17, %v3592_v1  ;;  %v9241_v11 = vld [vmem:[#allocation28_spill] sm:$0xff]  ;;  %v9242_v53 = vld [vmem:[#allocation29_spill] sm:$0xff]  ;;  %v9243_v1 = vld [vmem:[#allocation31_spill] sm:$0xff] }
 0x7c1   :  { %4177 = vmatpush.msra.mxu2 %v8005_v2  ;;  %4200 = vmatpush.msra.mxu3 %v8008_v49 }
 0x7c2   :  { %5474 = vtanh.f32 %v8234_v14  ;;  %4132 = vmatpush.msra.mxu0 %v8013_v33  ;;  %4155 = vmatpush.msra.mxu1 %v8016_v31  ;;  %v3597_v41 = vsel %vm3596_vm14, %v8216_v17, %v3593_v18  ;;  %v9229_v17 = vld [vmem:[#allocation39_spill] sm:$0xff]  ;;  %v9244_v18 = vld [vmem:[#allocation32_spill] sm:$0xff] }
 0x7c3   :  { %4178 = vmatpush.msra.mxu2 %v8021_v45  ;;  %4201 = vmatpush.msra.mxu3 %v8024_v60  ;;  %v3602_v24 = vsel %vm3599_vm15, %v3601_v16, %v3597_v41  ;;  %v9247_v41 = vld [vmem:[#allocation55_spill] sm:$0xff]  ;;  %v9248_v16 = vld [vmem:[#allocation56_spill] sm:$0xff] }
 0x7c4   :  { %4133 = vmatpush.msra.mxu0 %v8033_v29  ;;  %4156 = vmatpush.msra.mxu1 %v8036_v26 }
 0x7c5   :  { %4179 = vmatpush.msra.mxu2 %v8042_v62  ;;  %4202 = vmatpush.msra.mxu3 %v8045_v51 }
 0x7c6   :  { %4134 = vmatpush.msra.mxu0 %v8048_v10  ;;  %4157 = vmatpush.msra.mxu1 %v8051_v7 }
 0x7c7   :  { %4180 = vmatpush.msra.mxu2 %v8054_v44  ;;  %4203 = vmatpush.msra.mxu3 %v8057_v58 }
 0x7c8   :  { %v5475_v36 = vpop.eup %5474  ;;  %4135 = vmatpush.msra.mxu0 %v8060_v40  ;;  %4158 = vmatpush.msra.mxu1 %v8063_v23 }
 0x7c9   :  { %v3613_v21 = vmul.f32 %v5475_v36, %v3602_v24  ;;  %4181 = vmatpush.msra.mxu2 %v8066_v13  ;;  %4204 = vmatpush.msra.mxu3 %v8069_v43  ;;  %v9249_v36 = vld [vmem:[#allocation57_spill] sm:$0xff] }
 0x7ca   :  { %4136 = vmatpush.msra.mxu0 %v8072_v59  ;;  %4159 = vmatpush.msra.mxu1 %v8075_v34  ;;  %v9250_v24 = vld [vmem:[#allocation21_spill] sm:$0xff] }
 0x7cb   :  { %v3615_v61 = vmax.f32 %v3613_v21, 0.0  ;;  %3654 = vmatmul.f32.gmra.mxu0 %v3613_v21  ;;  %3677 = vmatmul.f32.gmra.mxu1 %v3613_v21 }
 0x7cc   :  { %3700 = vmatmul.f32.gmra.mxu2 %v3613_v21  ;;  %3723 = vmatmul.f32.gmra.mxu3 %v3613_v21  ;;  %v9251_v21 = vld [vmem:[#allocation58_spill] sm:$0xff] }
 0x7cd   :  { %v5120_v50 = vpack.c.bf16 %v3615_v61, %v3614_v20  ;;  %4182 = vmatpush.msra.mxu2 %v8079_v0  ;;  %4205 = vmatpush.msra.mxu3 %v8082_v48  ;;  %v8298_v20 = vld [vmem:[#allocation9 + $0x38] sm:$0xff]  ;;  %v8301_v61 = vld [vmem:[#allocation9] sm:$0xff] }
 0x7ce   :  { %4137 = vmatpush.msra.mxu0 %v8085_v28  ;;  %4160 = vmatpush.msra.mxu1 %v8088_v8  ;;  %9252 = vst [vmem:[#allocation59_spill] sm:$0xff] %v8298_v20 }
 0x7cf   :  { %5142 = vst [vmem:[%s8620_s8 + $0x8] sm:$0xff] %v5120_v50   ;;  %4183 = vmatpush.msra.mxu2 %v9227_v37  ;;  %4206 = vmatpush.msra.mxu3 %v9228_v4  ;;  %v8304_v50 = vld [vmem:[#allocation9 + $0x8] sm:$0xff] }
 0x7d0   :  { %4138 = vmatpush.msra.mxu0 %v9229_v17  ;;  %4161 = vmatpush.msra.mxu1 %v9230_v47  ;;  %9253 = vst [vmem:[#allocation60_spill] sm:$0xff] %v8301_v61 }
 0x7d1   :  { %4184 = vmatpush.msra.mxu2 %v9231_v52  ;;  %4207 = vmatpush.msra.mxu3 %v9232_v3  ;;  %9254 = vst [vmem:[#allocation61_spill] sm:$0xff] %v8304_v50 }
 0x7d2   :  { %4139 = vmatpush.msra.mxu0 %v9233_v54  ;;  %4162 = vmatpush.msra.mxu1 %v9234_v5 }
 0x7d3   :  { %4185 = vmatpush.msra.mxu2 %v9235_v19  ;;  %4208 = vmatpush.msra.mxu3 %v9236_v32 }
 0x7d4   :  { %4140 = vmatpush.msra.mxu0 %v9237_v42  ;;  %4163 = vmatpush.msra.mxu1 %v9238_v25 }
 0x7d5   :  { %4186 = vmatpush.msra.mxu2 %v9239_v9  ;;  %4209 = vmatpush.msra.mxu3 %v9240_v63 }
 0x7d6   :  { %4141 = vmatpush.msra.mxu0 %v9241_v11  ;;  %4164 = vmatpush.msra.mxu1 %v9242_v53  ;;  %v9263_v11 = vld [vmem:[#allocation19_spill] sm:$0xff] }
 0x7d7   :  { %4187 = vmatpush.msra.mxu2 %v9243_v1  ;;  %4210 = vmatpush.msra.mxu3 %v9244_v18  ;;  %v9262_v1 = vld [vmem:[#allocation90_spill] sm:$0xff] }
 0x7d8   :  { %4142 = vmatpush.msra.mxu0 %v9245_v39  ;;  %4165 = vmatpush.msra.mxu1 %v9246_v38  ;;  %v9260_v38 = vld [vmem:[#allocation89_spill] sm:$0xff] }
 0x7d9   :  { %4188 = vmatpush.msra.mxu2 %v9247_v41  ;;  %4211 = vmatpush.msra.mxu3 %v9248_v16  ;;  %v8307_v41 = vld [vmem:[#allocation9 + $0x10] sm:$0xff] }
 0x7da   :  { %4143 = vmatpush.msra.mxu0 %v9249_v36  ;;  %4166 = vmatpush.msra.mxu1 %v9250_v24  ;;  %9255 = vst [vmem:[#allocation62_spill] sm:$0xff] %v8307_v41  ;;  %v8310_v36 = vld [vmem:[#allocation9 + $0x18] sm:$0xff]  ;;  %v9258_v24 = vld [vmem:[#allocation88_spill] sm:$0xff] }
 0x7db   :  { %4189 = vmatpush.msra.mxu2 %v9251_v21  ;;  %4212 = vmatpush.msra.mxu3 %v8298_v20  ;;  %9256 = vst [vmem:[#allocation63_spill] sm:$0xff] %v8310_v36  ;;  %v9257_v21 = vld [vmem:[#allocation34_spill] sm:$0xff]  ;;  %v9259_v20 = vld [vmem:[#allocation17_spill] sm:$0xff] }
 0x7dc   :  { %4144 = vmatpush.msra.mxu0 %v8301_v61  ;;  %4167 = vmatpush.msra.mxu1 %v8304_v50  ;;  %v888_v16 = vadd.f32 %v9258_v24, %v9257_v21  ;;  %v927_v39 = vadd.f32 %v9260_v38, %v9259_v20  ;;  %v9261_v61 = vld [vmem:[#allocation35_spill] sm:$0xff] }
 0x7dd   :  { %4190 = vmatpush.msra.mxu2 %v8307_v41  ;;  %4213 = vmatpush.msra.mxu3 %v8310_v36  ;;  %v966_v53 = vadd.f32 %v9262_v1, %v9261_v61  ;;  %v9264_v50 = vld [vmem:[#allocation91_spill] sm:$0xff]  ;;  %v9266_v1 = vld [vmem:[#allocation93_spill] sm:$0xff] }
 0x7de   :  { %v1032_v18 = vpack.c.bf16 %v927_v39, %v888_v16  ;;  %v1005_v63 = vadd.f32 %v9264_v50, %v9263_v11  ;;  %v9265_v39 = vld [vmem:[#allocation92_spill] sm:$0xff]  ;;  %v929_v3 = vadd.f32 %v9266_v1, %v9259_v20 }
 0x7df   :  { %v890_v16 = vadd.f32 %v9265_v39, %v9257_v21 }
 0x7e0   :  { %v3627_v9 = vunpack.c.l.bf16 %v1032_v18  ;;  %v3628_v25 = vunpack.c.h.bf16 %v1032_v18  ;;  %v1033_v36 = vpack.c.bf16 %v1005_v63, %v966_v53 }
 0x7e1   :  { %v1034_v17 = vpack.c.bf16 %v929_v3, %v890_v16 }
 0x7e2   :  { %v3630_v24 = vunpack.c.h.bf16 %v1033_v36  ;;  %v3629_v39 = vunpack.c.l.bf16 %v1033_v36 }
 0x7e3   :  { %v3631_v63 = vunpack.c.l.bf16 %v1034_v17  ;;  %v3632_v53 = vunpack.c.h.bf16 %v1034_v17 }
 0x837   :  { %v3652_v41 = vpop.f32.mrf.mxu0  ;;  %v3675_v42 = vpop.f32.mrf.mxu1 }
 0x838   :  { %v3727_v32 = vadd.f32 %v3652_v41, %v3627_v9  ;;  %v3728_v19 = vadd.f32 %v3675_v42, %v3628_v25 }
 0x83a   :  { %v5002_v5 = vmul.f32 -1.442695, %v3727_v32  ;;  %v5004_v54 = vmul.f32 -1.442695, %v3728_v19  ;;  %v9268_v19 = vld [vmem:[#allocation95_spill] sm:$0xff] }
 0x83b   :  { %v1007_v32 = vadd.f32 %v9268_v19, %v9263_v11 }
 0x83c   :  { %5476 = vpow2.f32 %v5002_v5  ;;  %v9267_v5 = vld [vmem:[#allocation94_spill] sm:$0xff] }
 0x83d   :  { %5478 = vpow2.f32 %v5004_v54  ;;  %v968_v54 = vadd.f32 %v9267_v5, %v9261_v61 }
 0x83e   :  { %v3721_v38 = vpop.f32.mrf.mxu3  ;;  %v3698_v25 = vpop.f32.mrf.mxu2 }
 0x83f   :  { %v3730_v50 = vadd.f32 %v3721_v38, %v3630_v24  ;;  %v8329_v16 = vpack.c.bf16 %v1007_v32, %v968_v54 }
 0x841   :  { %v5006_v52 = vmul.f32 -1.442695, %v3730_v50  ;;  %v3729_v50 = vadd.f32 %v3698_v25, %v3629_v39  ;;  %v3634_v36 = vunpack.c.h.bf16 %v8329_v16 }
 0x842   :  { %v5477_v18 = vpop.eup %5476 }
 0x843   :  { %v5479_v47 = vpop.eup %5478  ;;  %v3741_v9 = vadd.f32 1.0, %v5477_v18  ;;  %5480 = vpow2.f32 %v5006_v52 }
 0x844   :  { %v3779_v42 = vadd.f32 1.0, %v5479_v47 }
 0x845   :  { %5482 = vrcp.f32 %v3741_v9  ;;  %v3752_v20 = vand.u32 2147483647, %v3741_v9  ;;  %v3754_v32 = vand.u32 2147483648, %v3741_v9  ;;  %vm3748_vm2 = vweird.f32 %v3741_v9 }
 0x846   :  { %5484 = vrcp.f32 %v3779_v42  ;;  %v3792_v54 = vand.u32 2147483648, %v3779_v42  ;;  %v3790_v25 = vand.u32 2147483647, %v3779_v42  ;;  %vm3786_vm3 = vweird.f32 %v3779_v42 }
 0x847   :  { %vm3753_vm4 = vcmp.eq.f32.partialorder %v3752_v20, 8.507059e+37 }
 0x848   :  { %v3655_v41 = vpop.f32.mrf.mxu0  ;;  %v3678_v24 = vpop.f32.mrf.mxu1  ;;  %vm3791_vm7 = vcmp.eq.f32.partialorder %v3790_v25, 8.507059e+37 }
 0x849   :  { %v5481_v38 = vpop.eup %5480  ;;  %v3731_v1 = vadd.f32 %v3655_v41, %v3631_v63  ;;  %v3732_v3 = vadd.f32 %v3678_v24, %v3632_v53 }
 0x84a   :  { %v8331_v47 = vadd.f32 1.0, %v5481_v38 }
 0x84b   :  { %v5483_v52 = vpop.eup %5482  ;;  %v5003_v18 = vmul.f32 -1.442695, %v3731_v1  ;;  %v5005_v5 = vmul.f32 -1.442695, %v3732_v3 }
 0x84c   :  { %v5485_v61 = vpop.eup %5484  ;;  %v3744_v19 = vmul.f32 %v5483_v52, %v3741_v9  ;;  %5486 = vrcp.f32 %v8331_v47  ;;  %vm3749_vm0 = vweird.f32 %v5483_v52  ;;  %vm3826_vm9 = vweird.f32 %v8331_v47 }
 0x84d   :  { %v3782_v11 = vmul.f32 %v5485_v61, %v3779_v42  ;;  %5488 = vpow2.f32 %v5003_v18  ;;  %vm3787_vm1 = vweird.f32 %v5485_v61  ;;  %vm3750_vm5 = vmor %vm3748_vm2, %vm3749_vm0 }
 0x84e   :  { %v3745_v17 = vsub.f32 1.0, %v3744_v19  ;;  %5490 = vpow2.f32 %v5005_v5  ;;  %v3793_v5 = vor.u32 1.1754944e-38, %v3792_v54  ;;  %vm3788_vm6 = vmor %vm3786_vm3, %vm3787_vm1 }
 0x84f   :  { %v3783_v63 = vsub.f32 1.0, %v3782_v11  ;;  %5492 = vtanh.f32 %v3729_v50  ;;  %v3724_v53 = vpop.f32.mrf.mxu3  ;;  %v3755_v11 = vor.u32 1.1754944e-38, %v3754_v32  ;;  %v3701_v4 = vpop.f32.mrf.mxu2 }
 0x850   :  { %v3746_v41 = vmul.f32 %v5483_v52, %v3745_v17  ;;  %v3734_v24 = vadd.f32 %v3724_v53, %v3634_v36 }
 0x851   :  { %v3784_v38 = vmul.f32 %v5485_v61, %v3783_v63 }
 0x852   :  { %v5487_v39 = vpop.eup %5486  ;;  %v3747_v1 = vadd.f32 %v5483_v52, %v3746_v41  ;;  %v5007_v3 = vmul.f32 -1.442695, %v3734_v24 }
 0x853   :  { %v5489_v18 = vpop.eup %5488  ;;  %v3785_v19 = vadd.f32 %v5485_v61, %v3784_v38  ;;  %v3822_v50 = vmul.f32 %v5487_v39, %v8331_v47  ;;  %vm3827_vm8 = vweird.f32 %v5487_v39 }
 0x854   :  { %v5491_v21 = vpop.eup %5490  ;;  %v3751_v17 = vsel %vm3750_vm5, %v5483_v52, %v3747_v1  ;;  %v3742_v36 = vadd.f32 1.0, %v5489_v18  ;;  %5494 = vpow2.f32 %v5007_v3  ;;  %v3633_v52 = vunpack.c.l.bf16 %v8329_v16  ;;  %vm8346_vm10 = vmor %vm3826_vm9, %vm3827_vm8 }
 0x855   :  { %v5493_v63 = vpop.eup %5492  ;;  %v3756_v9 = vsel %vm3753_vm4, %v3755_v11, %v3751_v17  ;;  %v3789_v53 = vsel %vm3788_vm6, %v5485_v61, %v3785_v19  ;;  %v3823_v42 = vsub.f32 1.0, %v3822_v50  ;;  %v3780_v41 = vadd.f32 1.0, %v5491_v21 }
 0x856   :  { %v3794_v20 = vsel %vm3791_vm7, %v3793_v5, %v3789_v53  ;;  %v3853_v24 = vmul.f32 %v5493_v63, %v3756_v9  ;;  %5496 = vrcp.f32 %v3742_v36  ;;  %v3832_v61 = vand.u32 2147483648, %v8331_v47 }
 0x857   :  { %v3851_v54 = vmul.f32 %v3794_v20, %v8198_v27  ;;  %v3824_v32 = vmul.f32 %v5487_v39, %v3823_v42  ;;  %5498 = vrcp.f32 %v3780_v41  ;;  %v3830_v1 = vand.u32 2147483647, %v8331_v47 }
 0x858   :  { %v3733_v27 = vadd.f32 %v3701_v4, %v3633_v52  ;;  %v3807_v63 = vand.u32 2147483648, %v3780_v41  ;;  %v3769_v9 = vand.u32 2147483648, %v3742_v36  ;;  %v3767_v53 = vand.u32 2147483647, %v3742_v36 }
 0x859   :  { %v8337_v38 = vadd.f32 %v3853_v24, %v3851_v54  ;;  %v3825_v25 = vadd.f32 %v5487_v39, %v3824_v32  ;;  %vm3831_vm11 = vcmp.eq.f32.partialorder %v3830_v1, 8.507059e+37  ;;  %v3805_v24 = vand.u32 2147483647, %v3780_v41 }
 0x85a   :  { %v5495_v37 = vpop.eup %5494  ;;  %vm3763_vm14 = vweird.f32 %v3742_v36  ;;  %vm3801_vm15 = vweird.f32 %v3780_v41  ;;  %v3770_v52 = vor.u32 1.1754944e-38, %v3769_v9  ;;  %v3808_v1 = vor.u32 1.1754944e-38, %v3807_v63  ;;  %v9298_v63 = vld [vmem:[#allocation61_spill] sm:$0xff]  ;;  %v9299_v9 = vld [vmem:[#allocation62_spill] sm:$0xff] }
 0x85b   :  { %5500 = vtanh.f32 %v8337_v38  ;;  %v8342_v21 = vadd.f32 1.0, %v5495_v37  ;;  %v3829_v19 = vsel %vm8346_vm10, %v5487_v39, %v3825_v25  ;;  %v3833_v37 = vor.u32 1.1754944e-38, %v3832_v61 }
 0x85c   :  { %v5497_v3 = vpop.eup %5496  ;;  %vm3768_vm2 = vcmp.eq.f32.partialorder %v3767_v53, 8.507059e+37  ;;  %vm3806_vm3 = vcmp.eq.f32.partialorder %v3805_v24, 8.507059e+37  ;;  %v9302_v53 = vld [vmem:[#allocation96_spill] sm:$0xff]  ;;  %v9304_v24 = vld [vmem:[#allocation97_spill] sm:$0xff] }
 0x85d   :  { %v5499_v18 = vpop.eup %5498  ;;  %v3759_v11 = vmul.f32 %v5497_v3, %v3742_v36  ;;  %5502 = vrcp.f32 %v8342_v21  ;;  %vm3764_vm12 = vweird.f32 %v5497_v3  ;;  %v3834_v42 = vsel %vm3831_vm11, %v3833_v37, %v3829_v19 }
 0x85e   :  { %v3797_v16 = vmul.f32 %v5499_v18, %v3780_v41  ;;  %5504 = vtanh.f32 %v3733_v27  ;;  %vm3802_vm13 = vweird.f32 %v5499_v18  ;;  %vm3765_vm0 = vmor %vm3763_vm14, %vm3764_vm12  ;;  %vm3841_vm5 = vweird.f32 %v8342_v21 }
 0x85f   :  { %v3760_v50 = vsub.f32 1.0, %v3759_v11  ;;  %vm3803_vm1 = vmor %vm3801_vm15, %vm3802_vm13 }
 0x860   :  { %v3798_v17 = vsub.f32 1.0, %v3797_v16 }
 0x861   :  { %v5501_v4 = vpop.eup %5500  ;;  %v3761_v47 = vmul.f32 %v5497_v3, %v3760_v50  ;;  %v9296_v50 = vld [vmem:[#allocation59_spill] sm:$0xff] }
 0x862   :  { %v3799_v20 = vmul.f32 %v5499_v18, %v3798_v17  ;;  %v8353_v54 = vmul.f32 %v5501_v4, %v3834_v42  ;;  %v9297_v17 = vld [vmem:[#allocation60_spill] sm:$0xff]  ;;  %v9300_v4 = vld [vmem:[#allocation63_spill] sm:$0xff] }
 0x863   :  { %v8355_v32 = vpop.eup %5502  ;;  %v3762_v39 = vadd.f32 %v5497_v3, %v3761_v47  ;;  %v9301_v47 = vld [vmem:[#allocation34_spill] sm:$0xff] }
 0x864   :  { %v3800_v25 = vadd.f32 %v5499_v18, %v3799_v20  ;;  %v3837_v61 = vmul.f32 %v8355_v32, %v8342_v21  ;;  %3898 = vmatmul.f32.vlgmr.msrb.gmra.mxu0 %v8353_v54  ;;  %3921 = vmatmul.f32.vlgmr.msrb.gmra.mxu1 %v8353_v54  ;;  %v5505_v36 = vpop.eup %5504  ;;  %vm3842_vm4 = vweird.f32 %v8355_v32  ;;  %v893_v42 = vadd.f32 %v9302_v53, %v9301_v47  ;;  %v9303_v20 = vld [vmem:[#allocation17_spill] sm:$0xff] }
 0x865   :  { %v3766_v27 = vsel %vm3765_vm0, %v5497_v3, %v3762_v39  ;;  %3944 = vmatmul.f32.vlgmr.msrb.gmra.mxu2 %v8353_v54  ;;  %3967 = vmatmul.f32.vlgmr.msrb.gmra.mxu3 %v8353_v54  ;;  %vm3843_vm6 = vmor %vm3841_vm5, %vm3842_vm4  ;;  %v9305_v39 = vld [vmem:[#allocation35_spill] sm:$0xff] }
 0x866   :  { %v3771_v41 = vsel %vm3768_vm2, %v3770_v52, %v3766_v27  ;;  %v3804_v5 = vsel %vm3803_vm1, %v5499_v18, %v3800_v25  ;;  %v3838_v11 = vsub.f32 1.0, %v3837_v61  ;;  %4376 = vmatpush.msrb.mxu0 %v7969_v22  ;;  %4399 = vmatpush.msrb.mxu1 %v7972_v12  ;;  %v9295_v18 = vld [vmem:[#allocation58_spill] sm:$0xff]  ;;  %v9307_v61 = vld [vmem:[#allocation19_spill] sm:$0xff] }
 0x867   :  { %v3809_v16 = vsel %vm3806_vm3, %v3808_v1, %v3804_v5  ;;  %v3854_v19 = vmul.f32 %v5505_v36, %v3771_v41  ;;  %4422 = vmatpush.msrb.mxu2 %v7975_v30  ;;  %4445 = vmatpush.msrb.mxu3 %v7978_v15  ;;  %v3847_v30 = vand.u32 2147483648, %v8342_v21  ;;  %v3845_v15 = vand.u32 2147483647, %v8342_v21  ;;  %v9294_v21 = vld [vmem:[#allocation21_spill] sm:$0xff]  ;;  %v9306_v52 = vld [vmem:[#allocation98_spill] sm:$0xff]  ;;  %v9308_v1 = vld [vmem:[#allocation99_spill] sm:$0xff] }
 0x868   :  { %v3852_v3 = vmul.f32 %v3809_v16, %v8234_v14  ;;  %v3839_v37 = vmul.f32 %v8355_v32, %v3838_v11  ;;  %4377 = vmatpush.msrb.mxu0 %v7983_v35  ;;  %4400 = vmatpush.msrb.mxu1 %v7986_v56  ;;  %v9293_v14 = vld [vmem:[#allocation57_spill] sm:$0xff]  ;;  %v971_v25 = vadd.f32 %v9306_v52, %v9305_v39 }
 0x869   :  { %4423 = vmatpush.msrb.mxu2 %v7989_v57  ;;  %4446 = vmatpush.msrb.mxu3 %v7992_v46  ;;  %v3848_v56 = vor.u32 1.1754944e-38, %v3847_v30  ;;  %vm3846_vm7 = vcmp.eq.f32.partialorder %v3845_v15, 8.507059e+37  ;;  %v1010_v27 = vadd.f32 %v9308_v1, %v9307_v61 }
 0x86a   :  { %v8373_v22 = vadd.f32 %v3854_v19, %v3852_v3  ;;  %4378 = vmatpush.msrb.mxu0 %v7997_v6  ;;  %4401 = vmatpush.msrb.mxu1 %v8000_v55  ;;  %v3840_v12 = vadd.f32 %v8355_v32, %v3839_v37  ;;  %v3861_v55 = vmax.f32 %v8353_v54, 0.0  ;;  %v932_v54 = vadd.f32 %v9304_v24, %v9303_v20 }
 0x86b   :  { %4424 = vmatpush.msrb.mxu2 %v8005_v2  ;;  %4447 = vmatpush.msrb.mxu3 %v8008_v49  ;;  %v1037_v3 = vpack.c.bf16 %v1010_v27, %v971_v25 }
 0x86c   :  { %5506 = vtanh.f32 %v8373_v22  ;;  %4379 = vmatpush.msrb.mxu0 %v8013_v33  ;;  %4402 = vmatpush.msrb.mxu1 %v8016_v31  ;;  %v3844_v35 = vsel %vm3843_vm6, %v8355_v32, %v3840_v12  ;;  %v9271_v33 = vld [vmem:[#allocation37_spill] sm:$0xff]  ;;  %v9272_v31 = vld [vmem:[#allocation38_spill] sm:$0xff]  ;;  %v1036_v32 = vpack.c.bf16 %v932_v54, %v893_v42 }
 0x86d   :  { %4425 = vmatpush.msrb.mxu2 %v8021_v45  ;;  %4448 = vmatpush.msrb.mxu3 %v8024_v60  ;;  %v3849_v46 = vsel %vm3846_vm7, %v3848_v56, %v3844_v35  ;;  %v9273_v45 = vld [vmem:[#allocation39_spill] sm:$0xff]  ;;  %v9274_v60 = vld [vmem:[#allocation40_spill] sm:$0xff]  ;;  %v3877_v30 = vunpack.c.h.bf16 %v1037_v3 }
 0x86e   :  { %4380 = vmatpush.msrb.mxu0 %v8033_v29  ;;  %4403 = vmatpush.msrb.mxu1 %v8036_v26  ;;  %v9275_v29 = vld [vmem:[#allocation45_spill] sm:$0xff]  ;;  %v9276_v26 = vld [vmem:[#allocation46_spill] sm:$0xff]  ;;  %v3874_v36 = vunpack.c.l.bf16 %v1036_v32  ;;  %v3875_v41 = vunpack.c.h.bf16 %v1036_v32  ;;  %v9309_v35 = vld [vmem:[#allocation100_spill] sm:$0xff] }
 0x86f   :  { %4426 = vmatpush.msrb.mxu2 %v8042_v62  ;;  %4449 = vmatpush.msrb.mxu3 %v8045_v51  ;;  %v9277_v62 = vld [vmem:[#allocation47_spill] sm:$0xff]  ;;  %v9278_v51 = vld [vmem:[#allocation48_spill] sm:$0xff]  ;;  %v895_v56 = vadd.f32 %v9309_v35, %v9301_v47 }
 0x870   :  { %4381 = vmatpush.msrb.mxu0 %v8048_v10  ;;  %4404 = vmatpush.msrb.mxu1 %v8051_v7  ;;  %v9279_v10 = vld [vmem:[#allocation49_spill] sm:$0xff]  ;;  %v9280_v7 = vld [vmem:[#allocation50_spill] sm:$0xff] }
 0x871   :  { %4427 = vmatpush.msrb.mxu2 %v8054_v44  ;;  %4450 = vmatpush.msrb.mxu3 %v8057_v58  ;;  %v9281_v44 = vld [vmem:[#allocation51_spill] sm:$0xff]  ;;  %v9282_v58 = vld [vmem:[#allocation52_spill] sm:$0xff] }
 0x872   :  { %v5507_v57 = vpop.eup %5506  ;;  %4382 = vmatpush.msrb.mxu0 %v8060_v40  ;;  %4405 = vmatpush.msrb.mxu1 %v8063_v23  ;;  %v9283_v40 = vld [vmem:[#allocation53_spill] sm:$0xff]  ;;  %v9284_v23 = vld [vmem:[#allocation54_spill] sm:$0xff] }
 0x873   :  { %v3860_v6 = vmul.f32 %v5507_v57, %v3849_v46  ;;  %4428 = vmatpush.msrb.mxu2 %v8066_v13  ;;  %4451 = vmatpush.msrb.mxu3 %v8069_v43  ;;  %v9285_v13 = vld [vmem:[#allocation28_spill] sm:$0xff]  ;;  %v9286_v43 = vld [vmem:[#allocation29_spill] sm:$0xff] }
 0x874   :  { %4383 = vmatpush.msrb.mxu0 %v8072_v59  ;;  %4406 = vmatpush.msrb.mxu1 %v8075_v34  ;;  %v9287_v59 = vld [vmem:[#allocation31_spill] sm:$0xff]  ;;  %v9288_v34 = vld [vmem:[#allocation32_spill] sm:$0xff]  ;;  %v9310_v57 = vld [vmem:[#allocation101_spill] sm:$0xff] }
 0x875   :  { %v3862_v2 = vmax.f32 %v3860_v6, 0.0  ;;  %3901 = vmatmul.f32.gmra.mxu0 %v3860_v6  ;;  %3924 = vmatmul.f32.gmra.mxu1 %v3860_v6  ;;  %v934_v46 = vadd.f32 %v9310_v57, %v9303_v20 }
 0x876   :  { %3947 = vmatmul.f32.gmra.mxu2 %v3860_v6  ;;  %3970 = vmatmul.f32.gmra.mxu3 %v3860_v6 }
 0x877   :  { %v5125_v49 = vpack.c.bf16 %v3862_v2, %v3861_v55  ;;  %4429 = vmatpush.msrb.mxu2 %v8079_v0  ;;  %4452 = vmatpush.msrb.mxu3 %v8082_v48  ;;  %v9289_v0 = vld [vmem:[#allocation33_spill] sm:$0xff]  ;;  %v9290_v48 = vld [vmem:[#allocation36_spill] sm:$0xff] }
 0x878   :  { %4384 = vmatpush.msrb.mxu0 %v8085_v28  ;;  %4407 = vmatpush.msrb.mxu1 %v8088_v8  ;;  %v9291_v28 = vld [vmem:[#allocation55_spill] sm:$0xff]  ;;  %v9292_v8 = vld [vmem:[#allocation56_spill] sm:$0xff] }
 0x879   :  { %5143 = vst [vmem:[%s8620_s8 + $0x10] sm:$0xff] %v5125_v49   ;;  %4430 = vmatpush.msrb.mxu2 %v9271_v33  ;;  %4453 = vmatpush.msrb.mxu3 %v9272_v31  ;;  %v1038_v33 = vpack.c.bf16 %v934_v46, %v895_v56 }
 0x87a   :  { %4385 = vmatpush.msrb.mxu0 %v9273_v45  ;;  %4408 = vmatpush.msrb.mxu1 %v9274_v60  ;;  %v9311_v60 = vld [vmem:[#allocation102_spill] sm:$0xff] }
 0x87b   :  { %4431 = vmatpush.msrb.mxu2 %v9275_v29  ;;  %4454 = vmatpush.msrb.mxu3 %v9276_v26  ;;  %v973_v29 = vadd.f32 %v9311_v60, %v9305_v39  ;;  %v9312_v26 = vld [vmem:[#allocation103_spill] sm:$0xff] }
 0x87c   :  { %4386 = vmatpush.msrb.mxu0 %v9277_v62  ;;  %4409 = vmatpush.msrb.mxu1 %v9278_v51  ;;  %v1012_v62 = vadd.f32 %v9312_v26, %v9307_v61 }
 0x87d   :  { %4432 = vmatpush.msrb.mxu2 %v9279_v10  ;;  %4455 = vmatpush.msrb.mxu3 %v9280_v7  ;;  %v3878_v10 = vunpack.c.l.bf16 %v1038_v33  ;;  %v3879_v7 = vunpack.c.h.bf16 %v1038_v33 }
 0x87e   :  { %4387 = vmatpush.msrb.mxu0 %v9281_v44  ;;  %4410 = vmatpush.msrb.mxu1 %v9282_v58 }
 0x87f   :  { %4433 = vmatpush.msrb.mxu2 %v9283_v40  ;;  %4456 = vmatpush.msrb.mxu3 %v9284_v23  ;;  %v3876_v23 = vunpack.c.l.bf16 %v1037_v3 }
 0x880   :  { %4388 = vmatpush.msrb.mxu0 %v9285_v13  ;;  %4411 = vmatpush.msrb.mxu1 %v9286_v43 }
 0x881   :  { %4434 = vmatpush.msrb.mxu2 %v9287_v59  ;;  %4457 = vmatpush.msrb.mxu3 %v9288_v34  ;;  %v8458_v59 = vpack.c.bf16 %v1012_v62, %v973_v29 }
 0x882   :  { %4389 = vmatpush.msrb.mxu0 %v9289_v0  ;;  %4412 = vmatpush.msrb.mxu1 %v9290_v48 }
 0x883   :  { %4435 = vmatpush.msrb.mxu2 %v9291_v28  ;;  %4458 = vmatpush.msrb.mxu3 %v9292_v8 }
 0x884   :  { %4390 = vmatpush.msrb.mxu0 %v9293_v14  ;;  %4413 = vmatpush.msrb.mxu1 %v9294_v21 }
 0x885   :  { %4436 = vmatpush.msrb.mxu2 %v9295_v18  ;;  %4459 = vmatpush.msrb.mxu3 %v9296_v50 }
 0x886   :  { %4391 = vmatpush.msrb.mxu0 %v9297_v17  ;;  %4414 = vmatpush.msrb.mxu1 %v9298_v63  ;;  %v3881_v63 = vunpack.c.h.bf16 %v8458_v59 }
 0x887   :  { %4437 = vmatpush.msrb.mxu2 %v9299_v9  ;;  %4460 = vmatpush.msrb.mxu3 %v9300_v4 }
 0x8e1   :  { %v3899_v5 = vpop.f32.mrf.mxu0  ;;  %v3922_v11 = vpop.f32.mrf.mxu1 }
 0x8e2   :  { %v3974_v16 = vadd.f32 %v3899_v5, %v3874_v36  ;;  %v3975_v19 = vadd.f32 %v3922_v11, %v3875_v41 }
 0x8e4   :  { %v5010_v37 = vmul.f32 -1.442695, %v3974_v16  ;;  %v5012_v12 = vmul.f32 -1.442695, %v3975_v19 }
 0x8e6   :  { %5508 = vpow2.f32 %v5010_v37 }
 0x8e7   :  { %5510 = vpow2.f32 %v5012_v12 }
 0x8e8   :  { %v3968_v15 = vpop.f32.mrf.mxu3  ;;  %v3945_v51 = vpop.f32.mrf.mxu2 }
 0x8e9   :  { %v3977_v6 = vadd.f32 %v3968_v15, %v3877_v30  ;;  %v3976_v48 = vadd.f32 %v3945_v51, %v3876_v23 }
 0x8eb   :  { %v5014_v55 = vmul.f32 -1.442695, %v3977_v6 }
 0x8ec   :  { %v5509_v2 = vpop.eup %5508 }
 0x8ed   :  { %v5511_v49 = vpop.eup %5510  ;;  %v3988_v31 = vadd.f32 1.0, %v5509_v2  ;;  %5512 = vpow2.f32 %v5014_v55 }
 0x8ee   :  { %v4026_v45 = vadd.f32 1.0, %v5511_v49 }
 0x8ef   :  { %5514 = vrcp.f32 %v3988_v31  ;;  %v3999_v17 = vand.u32 2147483647, %v3988_v31  ;;  %v4001_v53 = vand.u32 2147483648, %v3988_v31  ;;  %vm3995_vm10 = vweird.f32 %v3988_v31 }
 0x8f0   :  { %5516 = vrcp.f32 %v4026_v45  ;;  %v4039_v4 = vand.u32 2147483648, %v4026_v45  ;;  %v4037_v54 = vand.u32 2147483647, %v4026_v45  ;;  %vm4033_vm11 = vweird.f32 %v4026_v45 }
 0x8f1   :  { %vm4000_vm12 = vcmp.eq.f32.partialorder %v3999_v17, 8.507059e+37  ;;  %v4002_v5 = vor.u32 1.1754944e-38, %v4001_v53 }
 0x8f2   :  { %v3902_v44 = vpop.f32.mrf.mxu0  ;;  %v3925_v58 = vpop.f32.mrf.mxu1  ;;  %v4040_v41 = vor.u32 1.1754944e-38, %v4039_v4  ;;  %vm4038_vm15 = vcmp.eq.f32.partialorder %v4037_v54, 8.507059e+37 }
 0x8f3   :  { %v5513_v40 = vpop.eup %5512  ;;  %v3978_v13 = vadd.f32 %v3902_v44, %v3878_v10  ;;  %v3979_v43 = vadd.f32 %v3925_v58, %v3879_v7 }
 0x8f4   :  { %v8460_v34 = vadd.f32 1.0, %v5513_v40 }
 0x8f5   :  { %v5515_v0 = vpop.eup %5514  ;;  %v5011_v28 = vmul.f32 -1.442695, %v3978_v13  ;;  %v5013_v8 = vmul.f32 -1.442695, %v3979_v43 }
 0x8f6   :  { %v5517_v14 = vpop.eup %5516  ;;  %v3991_v21 = vmul.f32 %v5515_v0, %v3988_v31  ;;  %5518 = vrcp.f32 %v8460_v34  ;;  %vm3996_vm8 = vweird.f32 %v5515_v0  ;;  %v3880_v31 = vunpack.c.l.bf16 %v8458_v59 }
 0x8f7   :  { %v4029_v18 = vmul.f32 %v5517_v14, %v4026_v45  ;;  %5520 = vpow2.f32 %v5011_v28  ;;  %vm4034_vm9 = vweird.f32 %v5517_v14  ;;  %vm3997_vm13 = vmor %vm3995_vm10, %vm3996_vm8  ;;  %v4079_v60 = vand.u32 2147483648, %v8460_v34 }
 0x8f8   :  { %v3992_v50 = vsub.f32 1.0, %v3991_v21  ;;  %5522 = vpow2.f32 %v5013_v8  ;;  %vm4035_vm14 = vmor %vm4033_vm11, %vm4034_vm9  ;;  %v4077_v26 = vand.u32 2147483647, %v8460_v34  ;;  %vm4073_vm1 = vweird.f32 %v8460_v34 }
 0x8f9   :  { %v4030_v9 = vsub.f32 1.0, %v4029_v18  ;;  %5524 = vtanh.f32 %v3976_v48  ;;  %v3971_v42 = vpop.f32.mrf.mxu3  ;;  %v3948_v49 = vpop.f32.mrf.mxu2  ;;  %v4080_v40 = vor.u32 1.1754944e-38, %v4079_v60 }
 0x8fa   :  { %v3993_v24 = vmul.f32 %v5515_v0, %v3992_v50  ;;  %v3981_v32 = vadd.f32 %v3971_v42, %v3881_v63  ;;  %vm4078_vm3 = vcmp.eq.f32.partialorder %v4077_v26, 8.507059e+37 }
 0x8fb   :  { %v4031_v52 = vmul.f32 %v5517_v14, %v4030_v9 }
 0x8fc   :  { %v5519_v25 = vpop.eup %5518  ;;  %v3994_v1 = vadd.f32 %v5515_v0, %v3993_v24  ;;  %v5015_v27 = vmul.f32 -1.442695, %v3981_v32 }
 0x8fd   :  { %v5521_v36 = vpop.eup %5520  ;;  %v4032_v11 = vadd.f32 %v5517_v14, %v4031_v52  ;;  %v4069_v16 = vmul.f32 %v5519_v25, %v8460_v34  ;;  %vm4074_vm0 = vweird.f32 %v5519_v25 }
 0x8fe   :  { %v5523_v19 = vpop.eup %5522  ;;  %v3998_v3 = vsel %vm3997_vm13, %v5515_v0, %v3994_v1  ;;  %v3989_v37 = vadd.f32 1.0, %v5521_v36  ;;  %5526 = vpow2.f32 %v5015_v27  ;;  %vm8473_vm2 = vmor %vm4073_vm1, %vm4074_vm0 }
 0x8ff   :  { %v5525_v12 = vpop.eup %5524  ;;  %v4003_v30 = vsel %vm4000_vm12, %v4002_v5, %v3998_v3  ;;  %v4036_v15 = vsel %vm4035_vm14, %v5517_v14, %v4032_v11  ;;  %v4070_v35 = vsub.f32 1.0, %v4069_v16  ;;  %v4027_v56 = vadd.f32 1.0, %v5523_v19 }
 0x900   :  { %v4041_v57 = vsel %vm4038_vm15, %v4040_v41, %v4036_v15  ;;  %v4100_v46 = vmul.f32 %v5525_v12, %v4003_v30  ;;  %5528 = vrcp.f32 %v3989_v37  ;;  %v4016_v59 = vand.u32 2147483648, %v3989_v37 }
 0x901   :  { %v4098_v6 = vmul.f32 %v4041_v57, %v8337_v38  ;;  %v4071_v55 = vmul.f32 %v5519_v25, %v4070_v35  ;;  %5530 = vrcp.f32 %v4027_v56  ;;  %v3980_v38 = vadd.f32 %v3948_v49, %v3880_v31  ;;  %v9315_v35 = vld [vmem:[#allocation104_spill] sm:$0xff]  ;;  %v9316_v57 = vld [vmem:[#allocation105_spill] sm:$0xff] }
 0x902   :  { %v4054_v43 = vand.u32 2147483648, %v4027_v56  ;;  %v4014_v48 = vand.u32 2147483647, %v3989_v37  ;;  %v4052_v14 = vand.u32 2147483647, %v4027_v56  ;;  %vm4010_vm6 = vweird.f32 %v3989_v37 }
 0x903   :  { %v8466_v2 = vadd.f32 %v4100_v46, %v4098_v6  ;;  %v4072_v45 = vadd.f32 %v5519_v25, %v4071_v55  ;;  %vm4048_vm7 = vweird.f32 %v4027_v56  ;;  %v4017_v17 = vor.u32 1.1754944e-38, %v4016_v59  ;;  %v9317_v55 = vld [vmem:[#allocation106_spill] sm:$0xff] }
 0x904   :  { %v5527_v33 = vpop.eup %5526  ;;  %v4055_v4 = vor.u32 1.1754944e-38, %v4054_v43  ;;  %vm4015_vm10 = vcmp.eq.f32.partialorder %v4014_v48, 8.507059e+37  ;;  %vm4053_vm11 = vcmp.eq.f32.partialorder %v4052_v14, 8.507059e+37  ;;  %v937_v46 = vadd.f32 %v9316_v57, %v9303_v20 }
 0x905   :  { %5532 = vtanh.f32 %v8466_v2  ;;  %v4067_v29 = vadd.f32 1.0, %v5527_v33  ;;  %v4076_v58 = vsel %vm8473_vm2, %v5519_v25, %v4072_v45  ;;  %v976_v49 = vadd.f32 %v9317_v55, %v9305_v39  ;;  %v9318_v33 = vld [vmem:[#allocation107_spill] sm:$0xff] }
 0x906   :  { %v5529_v62 = vpop.eup %5528  ;;  %v4081_v28 = vsel %vm4078_vm3, %v4080_v40, %v4076_v58  ;;  %v1015_v31 = vadd.f32 %v9318_v33, %v9307_v61  ;;  %v9319_v40 = vld [vmem:[#allocation108_spill] sm:$0xff] }
 0x907   :  { %v5531_v51 = vpop.eup %5530  ;;  %v4006_v7 = vmul.f32 %v5529_v62, %v3989_v37  ;;  %5534 = vrcp.f32 %v4067_v29  ;;  %vm4011_vm4 = vweird.f32 %v5529_v62  ;;  %v4094_v5 = vand.u32 2147483648, %v4067_v29 }
 0x908   :  { %v4044_v44 = vmul.f32 %v5531_v51, %v4027_v56  ;;  %5536 = vtanh.f32 %v3980_v38  ;;  %vm4049_vm5 = vweird.f32 %v5531_v51  ;;  %vm4012_vm8 = vmor %vm4010_vm6, %vm4011_vm4  ;;  %vm4088_vm13 = vweird.f32 %v4067_v29 }
 0x909   :  { %v4007_v23 = vsub.f32 1.0, %v4006_v7  ;;  %vm4050_vm9 = vmor %vm4048_vm7, %vm4049_vm5  ;;  %v4092_v11 = vand.u32 2147483647, %v4067_v29  ;;  %v4095_v19 = vor.u32 1.1754944e-38, %v4094_v5  ;;  %v898_v56 = vadd.f32 %v9315_v35, %v9301_v47 }
 0x90a   :  { %v4045_v13 = vsub.f32 1.0, %v4044_v44 }
 0x90b   :  { %v5533_v34 = vpop.eup %5532  ;;  %v4008_v0 = vmul.f32 %v5529_v62, %v4007_v23  ;;  %vm4093_vm15 = vcmp.eq.f32.partialorder %v4092_v11, 8.507059e+37  ;;  %v1040_v6 = vpack.c.bf16 %v937_v46, %v898_v56  ;;  %v900_v23 = vadd.f32 %v9319_v40, %v9301_v47 }
 0x90c   :  { %v4046_v8 = vmul.f32 %v5531_v51, %v4045_v13  ;;  %v4106_v21 = vmul.f32 %v5533_v34, %v4081_v28  ;;  %v9320_v13 = vld [vmem:[#allocation109_spill] sm:$0xff] }
 0x90d   :  { %v5535_v18 = vpop.eup %5534  ;;  %v4009_v50 = vadd.f32 %v5529_v62, %v4008_v0  ;;  %v4121_v45 = vunpack.c.l.bf16 %v1040_v6  ;;  %v4122_v60 = vunpack.c.h.bf16 %v1040_v6  ;;  %v939_v43 = vadd.f32 %v9320_v13, %v9303_v20 }
 0x90e   :  { %v4047_v63 = vadd.f32 %v5531_v51, %v4046_v8  ;;  %v4084_v9 = vmul.f32 %v5535_v18, %v4067_v29  ;;  %4145 = vmatmul.f32.vlgmr.msra.gmra.mxu0 %v4106_v21  ;;  %4168 = vmatmul.f32.vlgmr.msra.gmra.mxu1 %v4106_v21  ;;  %v5537_v42 = vpop.eup %5536  ;;  %vm4089_vm12 = vweird.f32 %v5535_v18  ;;  %v4108_v30 = vmax.f32 %v4106_v21, 0.0 }
 0x90f   :  { %v4013_v53 = vsel %vm4012_vm8, %v5529_v62, %v4009_v50  ;;  %4191 = vmatmul.f32.vlgmr.msra.gmra.mxu2 %v4106_v21  ;;  %4214 = vmatmul.f32.vlgmr.msra.gmra.mxu3 %v4106_v21  ;;  %vm4090_vm14 = vmor %vm4088_vm13, %vm4089_vm12  ;;  %v1042_v28 = vpack.c.bf16 %v939_v43, %v900_v23  ;;  %v9321_v21 = vld [vmem:[#allocation112_spill] sm:$0xff]  ;;  %v9322_v50 = vld [vmem:[#allocation110_spill] sm:$0xff] }
 0x910   :  { %v4018_v24 = vsel %vm4015_vm10, %v4017_v17, %v4013_v53  ;;  %v4051_v54 = vsel %vm4050_vm9, %v5531_v51, %v4047_v63  ;;  %v4085_v32 = vsub.f32 1.0, %v4084_v9  ;;  %v1041_v51 = vpack.c.bf16 %v1015_v31, %v976_v49 }
 0x911   :  { %v4056_v52 = vsel %vm4053_vm11, %v4055_v4, %v4051_v54  ;;  %v4101_v25 = vmul.f32 %v5537_v42, %v4018_v24  ;;  %v1017_v17 = vadd.f32 %v9322_v50, %v9307_v61  ;;  %v4125_v9 = vunpack.c.l.bf16 %v1042_v28 }
 0x912   :  { %v4099_v1 = vmul.f32 %v4056_v52, %v8373_v22  ;;  %v4086_v27 = vmul.f32 %v5535_v18, %v4085_v32  ;;  %v4124_v44 = vunpack.c.h.bf16 %v1041_v51  ;;  %v4126_v4 = vunpack.c.h.bf16 %v1042_v28 }
 0x913   :  { %v4123_v54 = vunpack.c.l.bf16 %v1041_v51 }
 0x914   :  { %v8480_v36 = vadd.f32 %v4101_v25, %v4099_v1  ;;  %v4087_v41 = vadd.f32 %v5535_v18, %v4086_v27 }
 0x916   :  { %5538 = vtanh.f32 %v8480_v36  ;;  %v4091_v16 = vsel %vm4090_vm14, %v5535_v18, %v4087_v41  ;;  %v978_v18 = vadd.f32 %v9321_v21, %v9305_v39 }
 0x917   :  { %v4096_v37 = vsel %vm4093_vm15, %v4095_v19, %v4091_v16 }
 0x918   :  { %v8502_v25 = vpack.c.bf16 %v1017_v17, %v978_v18 }
 0x91c   :  { %v5539_v3 = vpop.eup %5538 }
 0x91d   :  { %v4107_v12 = vmul.f32 %v5539_v3, %v4096_v37 }
 0x91f   :  { %v4109_v15 = vmax.f32 %v4107_v12, 0.0  ;;  %4148 = vmatmul.f32.gmra.mxu0 %v4107_v12  ;;  %4171 = vmatmul.f32.gmra.mxu1 %v4107_v12 }
 0x920   :  { %4194 = vmatmul.f32.gmra.mxu2 %v4107_v12  ;;  %4217 = vmatmul.f32.gmra.mxu3 %v4107_v12 }
 0x921   :  { %v5130_v22 = vpack.c.bf16 %v4109_v15, %v4108_v30  ;;  %v4128_v30 = vunpack.c.h.bf16 %v8502_v25 }
 0x923   :  { %5144 = vst [vmem:[%s8620_s8 + $0x18] sm:$0xff] %v5130_v22  }
 0x98b   :  { %v4146_v29 = vpop.f32.mrf.mxu0  ;;  %v4169_v26 = vpop.f32.mrf.mxu1 }
 0x98c   :  { %v4221_v62 = vadd.f32 %v4146_v29, %v4121_v45  ;;  %v4222_v38 = vadd.f32 %v4169_v26, %v4122_v60 }
 0x98e   :  { %v5018_v10 = vmul.f32 -1.442695, %v4221_v62  ;;  %v5020_v7 = vmul.f32 -1.442695, %v4222_v38 }
 0x990   :  { %5540 = vpow2.f32 %v5018_v10 }
 0x991   :  { %5542 = vpow2.f32 %v5020_v7 }
 0x992   :  { %v4215_v58 = vpop.f32.mrf.mxu3  ;;  %v4192_v63 = vpop.f32.mrf.mxu2 }
 0x993   :  { %v4224_v59 = vadd.f32 %v4215_v58, %v4124_v44  ;;  %v4223_v41 = vadd.f32 %v4192_v63, %v4123_v54 }
 0x995   :  { %v5022_v34 = vmul.f32 -1.442695, %v4224_v59 }
 0x996   :  { %v5541_v0 = vpop.eup %5540 }
 0x997   :  { %v5543_v48 = vpop.eup %5542  ;;  %v4235_v8 = vadd.f32 1.0, %v5541_v0  ;;  %5544 = vpow2.f32 %v5022_v34 }
 0x998   :  { %v4273_v14 = vadd.f32 1.0, %v5543_v48 }
 0x999   :  { %5546 = vrcp.f32 %v4235_v8  ;;  %v4246_v12 = vand.u32 2147483647, %v4235_v8  ;;  %v4248_v35 = vand.u32 2147483648, %v4235_v8  ;;  %vm4242_vm2 = vweird.f32 %v4235_v8 }
 0x99a   :  { %5548 = vrcp.f32 %v4273_v14  ;;  %v4286_v22 = vand.u32 2147483648, %v4273_v14  ;;  %v4284_v46 = vand.u32 2147483647, %v4273_v14  ;;  %vm4280_vm3 = vweird.f32 %v4273_v14 }
 0x99b   :  { %vm4247_vm4 = vcmp.eq.f32.partialorder %v4246_v12, 8.507059e+37  ;;  %v4249_v29 = vor.u32 1.1754944e-38, %v4248_v35 }
 0x99c   :  { %v4149_v53 = vpop.f32.mrf.mxu0  ;;  %v4172_v42 = vpop.f32.mrf.mxu1  ;;  %v4287_v60 = vor.u32 1.1754944e-38, %v4286_v22  ;;  %vm4285_vm7 = vcmp.eq.f32.partialorder %v4284_v46, 8.507059e+37 }
 0x99d   :  { %v5545_v24 = vpop.eup %5544  ;;  %v4225_v32 = vadd.f32 %v4149_v53, %v4125_v9  ;;  %v4226_v52 = vadd.f32 %v4172_v42, %v4126_v4 }
 0x99e   :  { %v8504_v1 = vadd.f32 1.0, %v5545_v24 }
 0x99f   :  { %v5547_v27 = vpop.eup %5546  ;;  %v5019_v5 = vmul.f32 -1.442695, %v4225_v32  ;;  %v5021_v11 = vmul.f32 -1.442695, %v4226_v52 }
 0x9a0   :  { %v5549_v16 = vpop.eup %5548  ;;  %v4238_v19 = vmul.f32 %v5547_v27, %v4235_v8  ;;  %5550 = vrcp.f32 %v8504_v1  ;;  %vm4243_vm0 = vweird.f32 %v5547_v27  ;;  %v4127_v8 = vunpack.c.l.bf16 %v8502_v25 }
 0x9a1   :  { %v4276_v3 = vmul.f32 %v5549_v16, %v4273_v14  ;;  %5552 = vpow2.f32 %v5019_v5  ;;  %vm4281_vm1 = vweird.f32 %v5549_v16  ;;  %vm4244_vm5 = vmor %vm4242_vm2, %vm4243_vm0  ;;  %v4326_v21 = vand.u32 2147483648, %v8504_v1 }
 0x9a2   :  { %v4239_v37 = vsub.f32 1.0, %v4238_v19  ;;  %5554 = vpow2.f32 %v5021_v11  ;;  %vm4282_vm6 = vmor %vm4280_vm3, %vm4281_vm1  ;;  %v4324_v50 = vand.u32 2147483647, %v8504_v1  ;;  %vm4320_vm9 = vweird.f32 %v8504_v1 }
 0x9a3   :  { %v4277_v15 = vsub.f32 1.0, %v4276_v3  ;;  %5556 = vtanh.f32 %v4223_v41  ;;  %v4218_v56 = vpop.f32.mrf.mxu3  ;;  %v4195_v48 = vpop.f32.mrf.mxu2  ;;  %v4327_v24 = vor.u32 1.1754944e-38, %v4326_v21 }
 0x9a4   :  { %v4240_v57 = vmul.f32 %v5547_v27, %v4239_v37  ;;  %v4228_v6 = vadd.f32 %v4218_v56, %v4128_v30  ;;  %vm4325_vm11 = vcmp.eq.f32.partialorder %v4324_v50, 8.507059e+37 }
 0x9a5   :  { %v4278_v55 = vmul.f32 %v5549_v16, %v4277_v15 }
 0x9a6   :  { %v5551_v49 = vpop.eup %5550  ;;  %v4241_v33 = vadd.f32 %v5547_v27, %v4240_v57  ;;  %v5023_v31 = vmul.f32 -1.442695, %v4228_v6 }
 0x9a7   :  { %v5553_v45 = vpop.eup %5552  ;;  %v4279_v26 = vadd.f32 %v5549_v16, %v4278_v55  ;;  %v4316_v62 = vmul.f32 %v5551_v49, %v8504_v1  ;;  %vm4321_vm8 = vweird.f32 %v5551_v49 }
 0x9a8   :  { %v5555_v38 = vpop.eup %5554  ;;  %v4245_v51 = vsel %vm4244_vm5, %v5547_v27, %v4241_v33  ;;  %v4236_v10 = vadd.f32 1.0, %v5553_v45  ;;  %5558 = vpow2.f32 %v5023_v31  ;;  %vm8517_vm10 = vmor %vm4320_vm9, %vm4321_vm8 }
 0x9a9   :  { %v5557_v7 = vpop.eup %5556  ;;  %v4250_v44 = vsel %vm4247_vm4, %v4249_v29, %v4245_v51  ;;  %v4283_v58 = vsel %vm4282_vm6, %v5549_v16, %v4279_v26  ;;  %v4317_v40 = vsub.f32 1.0, %v4316_v62  ;;  %v4274_v23 = vadd.f32 1.0, %v5555_v38 }
 0x9aa   :  { %v4288_v13 = vsel %vm4285_vm7, %v4287_v60, %v4283_v58  ;;  %v4347_v43 = vmul.f32 %v5557_v7, %v4250_v44  ;;  %5560 = vrcp.f32 %v4236_v10  ;;  %v4263_v25 = vand.u32 2147483648, %v4236_v10 }
 0x9ab   :  { %v4345_v59 = vmul.f32 %v4288_v13, %v8466_v2  ;;  %v4318_v34 = vmul.f32 %v5551_v49, %v4317_v40  ;;  %5562 = vrcp.f32 %v4274_v23  ;;  %v4227_v2 = vadd.f32 %v4195_v48, %v4127_v8  ;;  %v9325_v40 = vld [vmem:[#allocation111_spill] sm:$0xff]  ;;  %v9326_v13 = vld [vmem:[#allocation113_spill] sm:$0xff] }
 0x9ac   :  { %v4301_v52 = vand.u32 2147483648, %v4274_v23  ;;  %v4261_v41 = vand.u32 2147483647, %v4236_v10  ;;  %v4299_v16 = vand.u32 2147483647, %v4274_v23  ;;  %vm4257_vm14 = vweird.f32 %v4236_v10 }
 0x9ad   :  { %v8510_v0 = vadd.f32 %v4347_v43, %v4345_v59  ;;  %v4319_v14 = vadd.f32 %v5551_v49, %v4318_v34  ;;  %vm4295_vm15 = vweird.f32 %v4274_v23  ;;  %v4264_v12 = vor.u32 1.1754944e-38, %v4263_v25  ;;  %v9327_v34 = vld [vmem:[#allocation117_spill] sm:$0xff] }
 0x9ae   :  { %v5559_v28 = vpop.eup %5558  ;;  %v4302_v22 = vor.u32 1.1754944e-38, %v4301_v52  ;;  %vm4262_vm2 = vcmp.eq.f32.partialorder %v4261_v41, 8.507059e+37  ;;  %vm4300_vm3 = vcmp.eq.f32.partialorder %v4299_v16, 8.507059e+37  ;;  %v942_v43 = vadd.f32 %v9326_v13, %v9303_v20 }
 0x9af   :  { %5564 = vtanh.f32 %v8510_v0  ;;  %v4314_v18 = vadd.f32 1.0, %v5559_v28  ;;  %v4323_v42 = vsel %vm8517_vm10, %v5551_v49, %v4319_v14  ;;  %v981_v48 = vadd.f32 %v9327_v34, %v9305_v39  ;;  %v9328_v28 = vld [vmem:[#allocation114_spill] sm:$0xff] }
 0x9b0   :  { %v5561_v17 = vpop.eup %5560  ;;  %v4328_v5 = vsel %vm4325_vm11, %v4327_v24, %v4323_v42  ;;  %v1020_v8 = vadd.f32 %v9328_v28, %v9307_v61  ;;  %v9329_v24 = vld [vmem:[#allocation115_spill] sm:$0xff] }
 0x9b1   :  { %v5563_v63 = vpop.eup %5562  ;;  %v4253_v4 = vmul.f32 %v5561_v17, %v4236_v10  ;;  %5566 = vrcp.f32 %v4314_v18  ;;  %vm4258_vm12 = vweird.f32 %v5561_v17  ;;  %v4341_v29 = vand.u32 2147483648, %v4314_v18 }
 0x9b2   :  { %v4291_v53 = vmul.f32 %v5563_v63, %v4274_v23  ;;  %5568 = vtanh.f32 %v4227_v2  ;;  %vm4296_vm13 = vweird.f32 %v5563_v63  ;;  %vm4259_vm0 = vmor %vm4257_vm14, %vm4258_vm12  ;;  %vm4335_vm5 = vweird.f32 %v4314_v18 }
 0x9b3   :  { %v4254_v54 = vsub.f32 1.0, %v4253_v4  ;;  %vm4297_vm1 = vmor %vm4295_vm15, %vm4296_vm13  ;;  %v4339_v26 = vand.u32 2147483647, %v4314_v18  ;;  %v4342_v38 = vor.u32 1.1754944e-38, %v4341_v29  ;;  %v903_v23 = vadd.f32 %v9325_v40, %v9301_v47 }
 0x9b4   :  { %v4292_v32 = vsub.f32 1.0, %v4291_v53 }
 0x9b5   :  { %v5565_v1 = vpop.eup %5564  ;;  %v4255_v27 = vmul.f32 %v5561_v17, %v4254_v54  ;;  %vm4340_vm7 = vcmp.eq.f32.partialorder %v4339_v26, 8.507059e+37  ;;  %v1044_v59 = vpack.c.bf16 %v942_v43, %v903_v23  ;;  %v905_v54 = vadd.f32 %v9329_v24, %v9301_v47  ;;  %v9332_v47 = vld [vmem:[#allocation18_spill] sm:$0xff] }
 0x9b6   :  { %v4293_v11 = vmul.f32 %v5563_v63, %v4292_v32  ;;  %v4353_v19 = vmul.f32 %v5565_v1, %v4328_v5  ;;  %v9330_v32 = vld [vmem:[#allocation116_spill] sm:$0xff] }
 0x9b7   :  { %v5567_v3 = vpop.eup %5566  ;;  %v4256_v37 = vadd.f32 %v5561_v17, %v4255_v27  ;;  %v4368_v14 = vunpack.c.l.bf16 %v1044_v59  ;;  %v4369_v21 = vunpack.c.h.bf16 %v1044_v59  ;;  %v944_v52 = vadd.f32 %v9330_v32, %v9303_v20 }
 0x9b8   :  { %v4294_v30 = vadd.f32 %v5563_v63, %v4293_v11  ;;  %v4331_v15 = vmul.f32 %v5567_v3, %v4314_v18  ;;  %4392 = vmatmul.f32.vlgmr.msrb.gmra.mxu0 %v4353_v19  ;;  %4415 = vmatmul.f32.vlgmr.msrb.gmra.mxu1 %v4353_v19  ;;  %v5569_v56 = vpop.eup %5568  ;;  %vm4336_vm4 = vweird.f32 %v5567_v3  ;;  %v4355_v44 = vmax.f32 %v4353_v19, 0.0 }
 0x9b9   :  { %v4260_v35 = vsel %vm4259_vm0, %v5561_v17, %v4256_v37  ;;  %4438 = vmatmul.f32.vlgmr.msrb.gmra.mxu2 %v4353_v19  ;;  %4461 = vmatmul.f32.vlgmr.msrb.gmra.mxu3 %v4353_v19  ;;  %vm4337_vm6 = vmor %vm4335_vm5, %vm4336_vm4  ;;  %v1046_v5 = vpack.c.bf16 %v944_v52, %v905_v54  ;;  %v9331_v19 = vld [vmem:[#allocation118_spill] sm:$0xff]  ;;  %v1022_v37 = vadd.f32 %v9332_v47, %v9307_v61 }
 0x9ba   :  { %v4265_v57 = vsel %vm4262_vm2, %v4264_v12, %v4260_v35  ;;  %v4298_v46 = vsel %vm4297_vm1, %v5563_v63, %v4294_v30  ;;  %v4332_v6 = vsub.f32 1.0, %v4331_v15  ;;  %v1045_v63 = vpack.c.bf16 %v1020_v8, %v981_v48 }
 0x9bb   :  { %v4303_v55 = vsel %vm4300_vm3, %v4302_v22, %v4298_v46  ;;  %v4348_v49 = vmul.f32 %v5569_v56, %v4265_v57  ;;  %v4372_v20 = vunpack.c.l.bf16 %v1046_v5  ;;  %v4373_v12 = vunpack.c.h.bf16 %v1046_v5 }
 0x9bc   :  { %v4346_v33 = vmul.f32 %v4303_v55, %v8480_v36  ;;  %v4333_v31 = vmul.f32 %v5567_v3, %v4332_v6  ;;  %v4371_v53 = vunpack.c.h.bf16 %v1045_v63 }
 0x9be   :  { %v8524_v45 = vadd.f32 %v4348_v49, %v4346_v33  ;;  %v4334_v60 = vadd.f32 %v5567_v3, %v4333_v31 }
 0x9c0   :  { %5570 = vtanh.f32 %v8524_v45  ;;  %v4338_v62 = vsel %vm4337_vm6, %v5567_v3, %v4334_v60  ;;  %v983_v3 = vadd.f32 %v9331_v19, %v9305_v39 }
 0x9c1   :  { %v4343_v10 = vsel %vm4340_vm7, %v4342_v38, %v4338_v62 }
 0x9c2   :  { %v1047_v57 = vpack.c.bf16 %v1022_v37, %v983_v3 }
 0x9c4   :  { %v4375_v61 = vunpack.c.h.bf16 %v1047_v57 }
 0x9c6   :  { %v5571_v51 = vpop.eup %5570 }
 0x9c7   :  { %v4354_v7 = vmul.f32 %v5571_v51, %v4343_v10 }
 0x9c9   :  { %v4356_v58 = vmax.f32 %v4354_v7, 0.0  ;;  %4395 = vmatmul.f32.gmra.mxu0 %v4354_v7  ;;  %4418 = vmatmul.f32.gmra.mxu1 %v4354_v7 }
 0x9ca   :  { %4441 = vmatmul.f32.gmra.mxu2 %v4354_v7  ;;  %4464 = vmatmul.f32.gmra.mxu3 %v4354_v7 }
 0x9cb   :  { %v5135_v36 = vpack.c.bf16 %v4356_v58, %v4355_v44  ;;  %v4370_v58 = vunpack.c.l.bf16 %v1045_v63 }
 0x9cd   :  { %5145 = vst [vmem:[%s8620_s8 + $0x20] sm:$0xff] %v5135_v36  }
 0xa35   :  { %v4393_v18 = vpop.f32.mrf.mxu0  ;;  %v4416_v50 = vpop.f32.mrf.mxu1 }
 0xa36   :  { %v4468_v17 = vadd.f32 %v4393_v18, %v4368_v14  ;;  %v4469_v2 = vadd.f32 %v4416_v50, %v4369_v21 }
 0xa38   :  { %v5026_v9 = vmul.f32 -1.442695, %v4468_v17  ;;  %v5028_v4 = vmul.f32 -1.442695, %v4469_v2  ;;  %v4374_v2 = vunpack.c.l.bf16 %v1047_v57 }
 0xa3a   :  { %5572 = vpow2.f32 %v5026_v9 }
 0xa3b   :  { %5574 = vpow2.f32 %v5028_v4 }
 0xa3c   :  { %v4462_v42 = vpop.f32.mrf.mxu3  ;;  %v4439_v29 = vpop.f32.mrf.mxu2 }
 0xa3d   :  { %v4471_v25 = vadd.f32 %v4462_v42, %v4371_v53  ;;  %v4470_v23 = vadd.f32 %v4439_v29, %v4370_v58 }
 0xa3f   :  { %v5030_v1 = vmul.f32 -1.442695, %v4471_v25 }
 0xa40   :  { %v5573_v27 = vpop.eup %5572 }
 0xa41   :  { %v5575_v41 = vpop.eup %5574  ;;  %v8542_v11 = vadd.f32 1.0, %v5573_v27  ;;  %5576 = vpow2.f32 %v5030_v1 }
 0xa42   :  { %v8544_v16 = vadd.f32 1.0, %v5575_v41 }
 0xa43   :  { %5578 = vrcp.f32 %v8542_v11  ;;  %v4495_v13 = vand.u32 2147483648, %v8542_v11  ;;  %vm4489_vm10 = vweird.f32 %v8542_v11  ;;  %v4493_v14 = vand.u32 2147483647, %v8542_v11 }
 0xa44   :  { %5580 = vrcp.f32 %v8544_v16  ;;  %v4533_v48 = vand.u32 2147483648, %v8544_v16  ;;  %vm4527_vm11 = vweird.f32 %v8544_v16  ;;  %v4531_v21 = vand.u32 2147483647, %v8544_v16 }
 0xa45   :  { %v4496_v9 = vor.u32 1.1754944e-38, %v4495_v13  ;;  %vm4494_vm14 = vcmp.eq.f32.partialorder %v4493_v14, 8.507059e+37 }
 0xa46   :  { %v4396_v30 = vpop.f32.mrf.mxu0  ;;  %v4419_v15 = vpop.f32.mrf.mxu1  ;;  %v4534_v53 = vor.u32 1.1754944e-38, %v4533_v48  ;;  %vm4532_vm15 = vcmp.eq.f32.partialorder %v4531_v21, 8.507059e+37 }
 0xa47   :  { %v4472_v22 = vadd.f32 %v4396_v30, %v4372_v20  ;;  %v4473_v35 = vadd.f32 %v4419_v15, %v4373_v12  ;;  %v5577_v56 = vpop.eup %5576 }
 0xa48   :  { %v8554_v26 = vadd.f32 1.0, %v5577_v56 }
 0xa49   :  { %v5579_v46 = vpop.eup %5578  ;;  %v5027_v6 = vmul.f32 -1.442695, %v4472_v22  ;;  %v5029_v55 = vmul.f32 -1.442695, %v4473_v35 }
 0xa4a   :  { %v5581_v49 = vpop.eup %5580  ;;  %v4485_v33 = vmul.f32 %v5579_v46, %v8542_v11  ;;  %vm4490_vm8 = vweird.f32 %v5579_v46  ;;  %v4571_v58 = vand.u32 2147483647, %v8554_v26 }
 0xa4b   :  { %v4523_v39 = vmul.f32 %v5581_v49, %v8544_v16  ;;  %5582 = vpow2.f32 %v5027_v6  ;;  %vm4528_vm9 = vweird.f32 %v5581_v49  ;;  %vm8569_vm12 = vmor %vm4489_vm10, %vm4490_vm8 }
 0xa4c   :  { %v4486_v31 = vsub.f32 1.0, %v4485_v33  ;;  %5584 = vpow2.f32 %v5029_v55  ;;  %vm8575_vm13 = vmor %vm4527_vm11, %vm4528_vm9  ;;  %vm4567_vm9 = vweird.f32 %v8554_v26 }
 0xa4d   :  { %v4524_v60 = vsub.f32 1.0, %v4523_v39  ;;  %v4465_v62 = vpop.f32.mrf.mxu3  ;;  %5586 = vrcp.f32 %v8554_v26  ;;  %v4442_v18 = vpop.f32.mrf.mxu2 }
 0xa4e   :  { %v4475_v38 = vadd.f32 %v4465_v62, %v4375_v61  ;;  %v4487_v7 = vmul.f32 %v5579_v46, %v4486_v31  ;;  %v4474_v24 = vadd.f32 %v4442_v18, %v4374_v2 }
 0xa4f   :  { %v4525_v10 = vmul.f32 %v5581_v49, %v4524_v60 }
 0xa50   :  { %v5031_v51 = vmul.f32 -1.442695, %v4475_v38  ;;  %v4488_v59 = vadd.f32 %v5579_v46, %v4487_v7  ;;  %v4573_v7 = vand.u32 2147483648, %v8554_v26 }
 0xa51   :  { %v5583_v44 = vpop.eup %5582  ;;  %v4526_v34 = vadd.f32 %v5581_v49, %v4525_v10 }
 0xa52   :  { %5588 = vpow2.f32 %v5031_v51  ;;  %v5585_v36 = vpop.eup %5584  ;;  %v8557_v40 = vadd.f32 1.0, %v5583_v44  ;;  %v4492_v63 = vsel %vm8569_vm12, %v5579_v46, %v4488_v59 }
 0xa53   :  { %v8560_v43 = vadd.f32 1.0, %v5585_v36  ;;  %v8566_v28 = vpop.eup %5586  ;;  %v4530_v4 = vsel %vm8575_vm13, %v5581_v49, %v4526_v34  ;;  %v4497_v25 = vsel %vm4494_vm14, %v4496_v9, %v4492_v63  ;;  %vm4572_vm14 = vcmp.eq.f32.partialorder %v4571_v58, 8.507059e+37 }
 0xa54   :  { %5590 = vrcp.f32 %v8557_v40  ;;  %v4563_v42 = vmul.f32 %v8566_v28, %v8554_v26  ;;  %v4535_v1 = vsel %vm4532_vm15, %v4534_v53, %v4530_v4  ;;  %v4510_v37 = vand.u32 2147483648, %v8557_v40 }
 0xa55   :  { %5592 = vrcp.f32 %v8560_v43  ;;  %v4592_v19 = vmul.f32 %v4535_v1, %v8510_v0  ;;  %v4548_v20 = vand.u32 2147483648, %v8560_v43  ;;  %v4508_v30 = vand.u32 2147483647, %v8557_v40 }
 0xa56   :  { %5594 = vtanh.f32 %v4470_v23  ;;  %v4564_v11 = vsub.f32 1.0, %v4563_v42  ;;  %v4546_v22 = vand.u32 2147483647, %v8560_v43  ;;  %vm4542_vm2 = vweird.f32 %v8560_v43 }
 0xa57   :  { %vm4504_vm3 = vweird.f32 %v8557_v40  ;;  %v4511_v57 = vor.u32 1.1754944e-38, %v4510_v37  ;;  %v4549_v33 = vor.u32 1.1754944e-38, %v4548_v20  ;;  %vm4509_vm6 = vcmp.eq.f32.partialorder %v4508_v30, 8.507059e+37 }
 0xa58   :  { %v5589_v50 = vpop.eup %5588  ;;  %v4565_v49 = vmul.f32 %v8566_v28, %v4564_v11  ;;  %vm4547_vm7 = vcmp.eq.f32.partialorder %v4546_v22, 8.507059e+37  ;;  %vm4568_vm8 = vweird.f32 %v8566_v28 }
 0xa59   :  { %v8585_v54 = vadd.f32 1.0, %v5589_v50  ;;  %vm4569_vm11 = vmor %vm4567_vm9, %vm4568_vm8 }
 0xa5a   :  { %v5591_v32 = vpop.eup %5590  ;;  %v4566_v10 = vadd.f32 %v8566_v28, %v4565_v49 }
 0xa5b   :  { %v5593_v52 = vpop.eup %5592  ;;  %v4500_v27 = vmul.f32 %v5591_v32, %v8557_v40  ;;  %5596 = vrcp.f32 %v8585_v54  ;;  %vm4505_vm0 = vweird.f32 %v5591_v32  ;;  %v4588_v40 = vand.u32 2147483648, %v8585_v54 }
 0xa5c   :  { %v4538_v41 = vmul.f32 %v5593_v52, %v8560_v43  ;;  %v5595_v5 = vpop.eup %5594  ;;  %5598 = vtanh.f32 %v4474_v24  ;;  %vm4543_vm1 = vweird.f32 %v5593_v52  ;;  %vm4506_vm4 = vmor %vm4504_vm3, %vm4505_vm0  ;;  %vm4582_vm12 = vweird.f32 %v8585_v54 }
 0xa5d   :  { %v4501_v16 = vsub.f32 1.0, %v4500_v27  ;;  %v4594_v3 = vmul.f32 %v5595_v5, %v4497_v25  ;;  %vm4544_vm5 = vmor %vm4542_vm2, %vm4543_vm1  ;;  %v4586_v23 = vand.u32 2147483647, %v8585_v54  ;;  %v4574_v43 = vor.u32 1.1754944e-38, %v4573_v7 }
 0xa5e   :  { %v4539_v47 = vsub.f32 1.0, %v4538_v41  ;;  %v4589_v48 = vor.u32 1.1754944e-38, %v4588_v40 }
 0xa5f   :  { %v4502_v12 = vmul.f32 %v5591_v32, %v4501_v16  ;;  %v4596_v0 = vadd.f32 %v4594_v3, %v4592_v19  ;;  %vm4587_vm15 = vcmp.eq.f32.partialorder %v4586_v23, 8.507059e+37 }
 0xa60   :  { %v4540_v15 = vmul.f32 %v5593_v52, %v4539_v47 }
 0xa61   :  { %v5597_v35 = vpop.eup %5596  ;;  %v4503_v56 = vadd.f32 %v5591_v32, %v4502_v12  ;;  %5600 = vtanh.f32 %v4596_v0 }
 0xa62   :  { %v4541_v46 = vadd.f32 %v5593_v52, %v4540_v15  ;;  %v4578_v6 = vmul.f32 %v5597_v35, %v8585_v54  ;;  %v5599_v55 = vpop.eup %5598  ;;  %vm4583_vm10 = vweird.f32 %v5597_v35 }
 0xa63   :  { %v4507_v39 = vsel %vm4506_vm4, %v5591_v32, %v4503_v56  ;;  %vm4584_vm13 = vmor %vm4582_vm12, %vm4583_vm10 }
 0xa64   :  { %v4512_v61 = vsel %vm4509_vm6, %v4511_v57, %v4507_v39  ;;  %v4545_v31 = vsel %vm4544_vm5, %v5593_v52, %v4541_v46  ;;  %v4579_v60 = vsub.f32 1.0, %v4578_v6 }
 0xa65   :  { %v4550_v29 = vsel %vm4547_vm7, %v4549_v33, %v4545_v31  ;;  %v4595_v62 = vmul.f32 %v5599_v55, %v4512_v61 }
 0xa66   :  { %v4593_v38 = vmul.f32 %v4550_v29, %v8524_v45  ;;  %v4580_v51 = vmul.f32 %v5597_v35, %v4579_v60  ;;  %v4570_v45 = vsel %vm4569_vm11, %v8566_v28, %v4566_v10 }
 0xa67   :  { %v5601_v13 = vpop.eup %5600  ;;  %v4575_v34 = vsel %vm4572_vm14, %v4574_v43, %v4570_v45 }
 0xa68   :  { %v4597_v44 = vadd.f32 %v4595_v62, %v4593_v38  ;;  %v4581_v36 = vadd.f32 %v5597_v35, %v4580_v51  ;;  %v4600_v26 = vmul.f32 %v5601_v13, %v4575_v34 }
 0xa6a   :  { %5602 = vtanh.f32 %v4597_v44  ;;  %v4585_v59 = vsel %vm4584_vm13, %v5597_v35, %v4581_v36  ;;  %v4602_v18 = vmax.f32 %v4600_v26, 0.0 }
 0xa6b   :  { %v4590_v14 = vsel %vm4587_vm15, %v4589_v48, %v4585_v59 }
 0xa70   :  { %v5603_v8 = vpop.eup %5602 }
 0xa71   :  { %v4601_v21 = vmul.f32 %v5603_v8, %v4590_v14 }
 0xa73   :  { %v4603_v50 = vmax.f32 %v4601_v21, 0.0 }
 0xa75   :  { %v5140_v17 = vpack.c.bf16 %v4603_v50, %v4602_v18 }
 0xa77   :  { %5146 = vst [vmem:[%s8620_s8 + $0x28] sm:$0xff] %v5140_v17  }
 0xa78   :  { %4613 = vsyncpa [#allocation5], 1 }
 0xa79   :  { %4614 = vsyncpa [#allocation7], 1 }
 0xa7a   :  { %4615 = vsyncpa [#allocation10], 1 }

</bundles_post_ra>
